<compile_context>
chip_gen: v5e
topology: v5e:2x2
jax: 0.10.0
libtpu: 0.0.40
codegen_flags: <defaults>
</compile_context>

<pallas_src>
import functools

import jax
import jax.numpy as jnp
from jax.experimental import pallas as pl
from jax.experimental.pallas import tpu as pltpu

# ------------------------- problem sizes -------------------------
N, C, H, W = 2, 32, 16, 16          # batch, channels, spatial
REDUCTION = 16
CR = C // REDUCTION                 # hidden width of CBAM channel MLP
EPS = 1e-5


# =================================================================
# Fused kernel: one grid step == one image, everything stays in VMEM
# =================================================================
def _res_cbam_fused_kernel(x_ref, w1_ref, w2_ref, bn_ref, fc1_ref, fc2_ref,
                           sw_ref, sbn_ref,                 # SMEM scalars
                           o_ref,                           # output
                           xpad_ref, cols_ref, spad_ref,    # VMEM scratch
                           *, H, W, C):
    # x_ref:   (1, H, W, C)      input image (also the identity residual)
    # w1/w2:   (9C, C)           im2col-flattened 3x3 conv weights (HWIO order)
    # bn_ref:  (4, C)            [bn1_scale, bn1_bias, bn2_scale, bn2_bias]
    # fc1/fc2: (C, CR), (CR, C)  CBAM channel MLP (transposed Linear weights)
    # sw_ref:  SMEM (98,)        7x7 spatial conv weights, idx=(kh*7+kw)*2+{0:max,1:mean}
    # sbn_ref: SMEM (2,)         folded BatchNorm2d(1) [scale, bias]
    # o_ref:   (1, H, W, C)
    # scratch:
    #   xpad_ref: (H+2, W+2, C)  zero-padded conv input (reused for conv1/conv2)
    #   cols_ref: (H*W, 9*C)     im2col column matrix
    #   spad_ref: (2, H+6, W+6)  zero-padded [channel-max, channel-mean] maps
    HW = H * W

    # Borders of the padded scratches must be zero; interiors are fully
    # overwritten below, so a single zero-fill per grid step is enough.
    xpad_ref[...] = jnp.zeros_like(xpad_ref)
    spad_ref[...] = jnp.zeros_like(spad_ref)

    x = x_ref[0]                                      # (H, W, C)

    def conv3x3_im2col(w_flat_ref):
        # Pack the 9 shifted windows into the (HW, 9C) column matrix, then do
        # one K=9C MXU matmul instead of nine K=C matmuls.
        for kh in range(3):
            for kw in range(3):
                k = kh * 3 + kw
                cols_ref[:, k * C:(k + 1) * C] = (
                    xpad_ref[kh:kh + H, kw:kw + W, :].reshape(HW, C))
        return jnp.dot(cols_ref[...], w_flat_ref[...],
                       preferred_element_type=jnp.float32)        # (HW, C)

    # ---------------- conv1 + folded BN1 + ReLU ----------------
    xpad_ref[1:H + 1, 1:W + 1, :] = x
    f1 = conv3x3_im2col(w1_ref) * bn_ref[0:1, :] + bn_ref[1:2, :]
    f1 = jnp.maximum(f1, 0.0)

    # ---------------- conv2 + folded BN2 (no ReLU) --------------
    xpad_ref[1:H + 1, 1:W + 1, :] = f1.reshape(H, W, C)
    out2 = conv3x3_im2col(w2_ref) * bn_ref[2:3, :] + bn_ref[3:4, :]   # (HW, C)

    # ---------------- CBAM channel attention --------------------
    avg = jnp.mean(out2, axis=0, keepdims=True)       # (1, C) AdaptiveAvgPool2d(1)
    mx = jnp.max(out2, axis=0, keepdims=True)         # (1, C) AdaptiveMaxPool2d(1)

    def mlp(v):
        h1 = jnp.maximum(
            jnp.dot(v, fc1_ref[...], preferred_element_type=jnp.float32), 0.0)
        return jnp.dot(h1, fc2_ref[...], preferred_element_type=jnp.float32)

    att = jax.nn.sigmoid(mlp(avg) + mlp(mx))          # (1, C)
    scaled = (out2 * att).reshape(H, W, C)            # channel-attended features

    # ---------------- CBAM spatial attention --------------------
    # Channel max / mean maps, zero-padded by 3 for the 7x7 conv (in VMEM).
    spad_ref[0, 3:3 + H, 3:3 + W] = jnp.max(scaled, axis=2)
    spad_ref[1, 3:3 + H, 3:3 + W] = jnp.mean(scaled, axis=2)

    acc = jnp.zeros((H, W), jnp.float32)
    for kh in range(7):
        for kw in range(7):
            base = (kh * 7 + kw) * 2
            acc = acc + spad_ref[0, kh:kh + H, kw:kw + W] * sw_ref[base] \
                      + spad_ref[1, kh:kh + H, kw:kw + W] * sw_ref[base + 1]
    s = acc * sbn_ref[0] + sbn_ref[1]                 # folded BatchNorm2d(1)
    s = jax.nn.sigmoid(jnp.maximum(s, 0.0))           # ReLU then Sigmoid

    # ------- spatial gate + identity residual + final ReLU -------
    o_ref[0] = jnp.maximum(scaled * s[:, :, None] + x, 0.0)


# =================================================================
# Wrapper: NCHW <-> NHWC at the boundary, one fused pallas_call
# =================================================================
def res_cbam_block(x_nchw, p):
    x = jnp.transpose(x_nchw, (0, 2, 3, 1))           # NCHW -> NHWC (C on lanes)
    n, h, w, c = x.shape
    cr = p["fc1_t"].shape[1]

    w1f = p["w1"].reshape(9 * c, c)                   # (kh,kw,ci) rows -> (9C, C)
    w2f = p["w2"].reshape(9 * c, c)
    bn = jnp.stack([p["bn1_scale"], p["bn1_bias"],
                    p["bn2_scale"], p["bn2_bias"]], axis=0)        # (4, C)

    kernel = functools.partial(_res_cbam_fused_kernel, H=h, W=w, C=c)
    out = pl.pallas_call(
        kernel,
        out_shape=jax.ShapeDtypeStruct((n, h, w, c), jnp.float32),
        grid=(n,),
        in_specs=[
            pl.BlockSpec((1, h, w, c), lambda i: (i, 0, 0, 0)),    # x (residual)
            pl.BlockSpec((9 * c, c), lambda i: (0, 0)),            # conv1 weight
            pl.BlockSpec((9 * c, c), lambda i: (0, 0)),            # conv2 weight
            pl.BlockSpec((4, c), lambda i: (0, 0)),                # folded BN1/BN2
            pl.BlockSpec((c, cr), lambda i: (0, 0)),               # fc1^T
            pl.BlockSpec((cr, c), lambda i: (0, 0)),               # fc2^T
            pl.BlockSpec(memory_space=pltpu.MemorySpace.SMEM),     # 7x7 weights (98,)
            pl.BlockSpec(memory_space=pltpu.MemorySpace.SMEM),     # spatial BN (2,)
        ],
        out_specs=pl.BlockSpec((1, h, w, c), lambda i: (i, 0, 0, 0)),
        scratch_shapes=[
            pltpu.VMEM((h + 2, w + 2, c), jnp.float32),   # padded conv input
            pltpu.VMEM((h * w, 9 * c), jnp.float32),      # im2col columns
            pltpu.VMEM((2, h + 6, w + 6), jnp.float32),   # padded [max, mean] maps
        ],
        compiler_params=pltpu.CompilerParams(
            dimension_semantics=("parallel",)),           # v7x: 2 images -> 2 TCs
    )(x, w1f, w2f, bn, p["fc1_t"], p["fc2_t"], p["w7_flat"], p["sbn"])
    return jnp.transpose(out, (0, 3, 1, 2))               # NHWC -> NCHW


# ----------------------- pure-JAX reference ----------------------
def reference(x_nchw, p):
    x = jnp.transpose(x_nchw, (0, 2, 3, 1))

    def conv3x3(v, w):
        return jax.lax.conv_general_dilated(
            v, w, (1, 1), ((1, 1), (1, 1)),
            dimension_numbers=("NHWC", "HWIO", "NHWC"))

    out = jnp.maximum(conv3x3(x, p["w1"]) * p["bn1_scale"] + p["bn1_bias"], 0.0)
    out = conv3x3(out, p["w2"]) * p["bn2_scale"] + p["bn2_bias"]
    avg = jnp.mean(out, axis=(1, 2))
    mx = jnp.max(out, axis=(1, 2))

    def mlp(v):
        return jnp.maximum(v @ p["fc1_t"], 0.0) @ p["fc2_t"]

    att = jax.nn.sigmoid(mlp(avg) + mlp(mx))
    oc = out * att[:, None, None, :]
    st = jnp.concatenate([jnp.max(oc, axis=3, keepdims=True),
                          jnp.mean(oc, axis=3, keepdims=True)], axis=3)
    w7 = p["w7_flat"].reshape(7, 7, 2, 1)
    sm = jax.lax.conv_general_dilated(
        st, w7, (1, 1), ((3, 3), (3, 3)),
        dimension_numbers=("NHWC", "HWIO", "NHWC"))
    sm = jax.nn.sigmoid(jnp.maximum(sm * p["sbn"][0] + p["sbn"][1], 0.0))
    out = jnp.maximum(oc * sm + x, 0.0)
    return jnp.transpose(out, (0, 3, 1, 2))


# ------------------------- parameter init ------------------------
def init_params(key):
    ks = jax.random.split(key, 12)

    def bn_fold(kg, kb, km, kv, ch):
        gamma = 1.0 + 0.1 * jax.random.normal(kg, (ch,), jnp.float32)
        beta = 0.1 * jax.random.normal(kb, (ch,), jnp.float32)
        mean = 0.05 * jax.random.normal(km, (ch,), jnp.float32)
        var = 1.0 + 0.1 * jnp.abs(jax.random.normal(kv, (ch,), jnp.float32))
        scale = gamma / jnp.sqrt(var + EPS)
        bias = beta - mean * scale
        return scale, bias

    bn1_scale, bn1_bias = bn_fold(ks[2], ks[3], ks[4], ks[5], C)
    bn2_scale, bn2_bias = bn_fold(ks[6], ks[7], ks[8], ks[9], C)
    # BatchNorm2d(1) of the spatial branch, folded to scalars.
    s_scale = jnp.float32(1.2) / jnp.sqrt(jnp.float32(0.9) + EPS)
    s_bias = jnp.float32(-0.05) - jnp.float32(0.1) * s_scale

    return {
        "w1": 0.1 * jax.random.normal(ks[0], (3, 3, C, C), jnp.float32),
        "w2": 0.1 * jax.random.normal(ks[1], (3, 3, C, C), jnp.float32),
        "bn1_scale": bn1_scale, "bn1_bias": bn1_bias,
        "bn2_scale": bn2_scale, "bn2_bias": bn2_bias,
        "fc1_t": 0.3 * jax.random.normal(ks[10], (C, CR), jnp.float32),
        "fc2_t": 0.3 * jax.random.normal(ks[11], (CR, C), jnp.float32),
        # (7,7,2) -> flat; index = (kh*7+kw)*2 + {0:max-channel, 1:mean-channel}
        "w7_flat": (0.2 * jax.random.normal(
            jax.random.fold_in(key, 99), (7, 7, 2), jnp.float32)).reshape(-1),
        "sbn": jnp.array([s_scale, s_bias], jnp.float32),
    }


if __name__ == "__main__":
    key = jax.random.PRNGKey(0)
    kx, kp = jax.random.split(key)
    x = jax.random.normal(kx, (N, C, H, W), jnp.float32)   # NCHW like PyTorch
    params = init_params(kp)

    out = jax.jit(lambda v: res_cbam_block(v, params))(x)
    out = jax.block_until_ready(out)

    ref = jax.block_until_ready(reference(x, params))
    if not jnp.allclose(out, ref, rtol=2e-3, atol=2e-3):
        raise AssertionError("Pallas output does not match JAX reference")
    print("KERNEL_OK")
</pallas_src>

<mosaic_0001>
module attributes {stable_mosaic.version = 11 : i64} {
  func.func @_res_cbam_fused_kernel(%arg0: i32, %arg1: memref<1x16x16x32xf32, #tpu.memory_space<vmem>>, %arg2: memref<288x32xf32, #tpu.memory_space<vmem>>, %arg3: memref<288x32xf32, #tpu.memory_space<vmem>>, %arg4: memref<4x32xf32, #tpu.memory_space<vmem>>, %arg5: memref<32x2xf32, #tpu.memory_space<vmem>>, %arg6: memref<2x32xf32, #tpu.memory_space<vmem>>, %arg7: memref<98xf32, #tpu.memory_space<smem>>, %arg8: memref<2xf32, #tpu.memory_space<smem>>, %arg9: memref<1x16x16x32xf32, #tpu.memory_space<vmem>>, %arg10: memref<18x18x32xf32, #tpu.memory_space<vmem>>, %arg11: memref<256x288xf32, #tpu.memory_space<vmem>>, %arg12: memref<2x22x22xf32, #tpu.memory_space<vmem>>) attributes {dimension_semantics = [#tpu.dimension_semantics<parallel>], iteration_bounds = array<i64: 2>, scalar_prefetch = 0 : i64, scratch_operands = 3 : i64, tpu.core_type = #tpu.core_type<tc>, window_params = [{transform_indices = @transform_0, window_bounds = array<i64: 1, 16, 16, 32>}, {pipeline_mode = #tpu.pipeline_mode<synchronous>, transform_indices = @transform_1, window_bounds = array<i64: 288, 32>}, {pipeline_mode = #tpu.pipeline_mode<synchronous>, transform_indices = @transform_2, window_bounds = array<i64: 288, 32>}, {pipeline_mode = #tpu.pipeline_mode<synchronous>, transform_indices = @transform_3, window_bounds = array<i64: 4, 32>}, {pipeline_mode = #tpu.pipeline_mode<synchronous>, transform_indices = @transform_4, window_bounds = array<i64: 32, 2>}, {pipeline_mode = #tpu.pipeline_mode<synchronous>, transform_indices = @transform_5, window_bounds = array<i64: 2, 32>}, {transform_indices = @transform_6, window_bounds = array<i64: 98>}, {transform_indices = @transform_7, window_bounds = array<i64: 2>}, {transform_indices = @transform_8, window_bounds = array<i64: 1, 16, 16, 32>}]} {
    %cst = arith.constant 0.000000e+00 : f32
    %0 = vector.broadcast %cst : f32 to vector<18x18x32xf32>
    %c0 = arith.constant 0 : index
    %c0_0 = arith.constant 0 : index
    %c0_1 = arith.constant 0 : index
    %1 = vector.load %arg10[%c0, %c0_0, %c0_1] : memref<18x18x32xf32, #tpu.memory_space<vmem>>, vector<18x18x32xf32>
    tpu.vector_store %arg10[%c0, %c0_0, %c0_1], %0 {strides = array<i32>} : memref<18x18x32xf32, #tpu.memory_space<vmem>>, vector<18x18x32xf32>,
    %cst_2 = arith.constant 0.000000e+00 : f32
    %2 = vector.broadcast %cst_2 : f32 to vector<2x22x22xf32>
    %c0_3 = arith.constant 0 : index
    %c0_4 = arith.constant 0 : index
    %c0_5 = arith.constant 0 : index
    %3 = vector.load %arg12[%c0_3, %c0_4, %c0_5] : memref<2x22x22xf32, #tpu.memory_space<vmem>>, vector<2x22x22xf32>
    tpu.vector_store %arg12[%c0_3, %c0_4, %c0_5], %2 {strides = array<i32>} : memref<2x22x22xf32, #tpu.memory_space<vmem>>, vector<2x22x22xf32>,
    %c0_6 = arith.constant 0 : index
    %c0_7 = arith.constant 0 : index
    %c0_8 = arith.constant 0 : index
    %c0_9 = arith.constant 0 : index
    %4 = vector.load %arg1[%c0_6, %c0_7, %c0_8, %c0_9] : memref<1x16x16x32xf32, #tpu.memory_space<vmem>>, vector<1x16x16x32xf32>
    %5 = vector.shape_cast %4 : vector<1x16x16x32xf32> to vector<16x16x32xf32>
    %c1 = arith.constant 1 : index
    %c1_10 = arith.constant 1 : index
    %c0_11 = arith.constant 0 : index
    %6 = vector.load %arg10[%c1, %c1_10, %c0_11] : memref<18x18x32xf32, #tpu.memory_space<vmem>>, vector<16x16x32xf32>
    tpu.vector_store %arg10[%c1, %c1_10, %c0_11], %5 {strides = array<i32>} : memref<18x18x32xf32, #tpu.memory_space<vmem>>, vector<16x16x32xf32>,
    %c0_12 = arith.constant 0 : index
    %c0_13 = arith.constant 0 : index
    %c0_14 = arith.constant 0 : index
    %7 = vector.load %arg10[%c0_12, %c0_13, %c0_14] : memref<18x18x32xf32, #tpu.memory_space<vmem>>, vector<16x16x32xf32>
    %8 = vector.shape_cast %7 : vector<16x16x32xf32> to vector<256x32xf32>
    %c0_15 = arith.constant 0 : index
    %c0_16 = arith.constant 0 : index
    %9 = vector.load %arg11[%c0_15, %c0_16] : memref<256x288xf32, #tpu.memory_space<vmem>>, vector<256x32xf32>
    tpu.vector_store %arg11[%c0_15, %c0_16], %8 {strides = array<i32>} : memref<256x288xf32, #tpu.memory_space<vmem>>, vector<256x32xf32>,
    %c0_17 = arith.constant 0 : index
    %c1_18 = arith.constant 1 : index
    %c0_19 = arith.constant 0 : index
    %10 = vector.load %arg10[%c0_17, %c1_18, %c0_19] : memref<18x18x32xf32, #tpu.memory_space<vmem>>, vector<16x16x32xf32>
    %11 = vector.shape_cast %10 : vector<16x16x32xf32> to vector<256x32xf32>
    %c0_20 = arith.constant 0 : index
    %c32 = arith.constant 32 : index
    %12 = vector.load %arg11[%c0_20, %c32] : memref<256x288xf32, #tpu.memory_space<vmem>>, vector<256x32xf32>
    tpu.vector_store %arg11[%c0_20, %c32], %11 {strides = array<i32>} : memref<256x288xf32, #tpu.memory_space<vmem>>, vector<256x32xf32>,
    %c0_21 = arith.constant 0 : index
    %c2 = arith.constant 2 : index
    %c0_22 = arith.constant 0 : index
    %13 = vector.load %arg10[%c0_21, %c2, %c0_22] : memref<18x18x32xf32, #tpu.memory_space<vmem>>, vector<16x16x32xf32>
    %14 = vector.shape_cast %13 : vector<16x16x32xf32> to vector<256x32xf32>
    %c0_23 = arith.constant 0 : index
    %c64 = arith.constant 64 : index
    %15 = vector.load %arg11[%c0_23, %c64] : memref<256x288xf32, #tpu.memory_space<vmem>>, vector<256x32xf32>
    tpu.vector_store %arg11[%c0_23, %c64], %14 {strides = array<i32>} : memref<256x288xf32, #tpu.memory_space<vmem>>, vector<256x32xf32>,
    %c1_24 = arith.constant 1 : index
    %c0_25 = arith.constant 0 : index
    %c0_26 = arith.constant 0 : index
    %16 = vector.load %arg10[%c1_24, %c0_25, %c0_26] : memref<18x18x32xf32, #tpu.memory_space<vmem>>, vector<16x16x32xf32>
    %17 = vector.shape_cast %16 : vector<16x16x32xf32> to vector<256x32xf32>
    %c0_27 = arith.constant 0 : index
    %c96 = arith.constant 96 : index
    %18 = vector.load %arg11[%c0_27, %c96] : memref<256x288xf32, #tpu.memory_space<vmem>>, vector<256x32xf32>
    tpu.vector_store %arg11[%c0_27, %c96], %17 {strides = array<i32>} : memref<256x288xf32, #tpu.memory_space<vmem>>, vector<256x32xf32>,
    %c1_28 = arith.constant 1 : index
    %c1_29 = arith.constant 1 : index
    %c0_30 = arith.constant 0 : index
    %19 = vector.load %arg10[%c1_28, %c1_29, %c0_30] : memref<18x18x32xf32, #tpu.memory_space<vmem>>, vector<16x16x32xf32>
    %20 = vector.shape_cast %19 : vector<16x16x32xf32> to vector<256x32xf32>
    %c0_31 = arith.constant 0 : index
    %c128 = arith.constant 128 : index
    %21 = vector.load %arg11[%c0_31, %c128] : memref<256x288xf32, #tpu.memory_space<vmem>>, vector<256x32xf32>
    tpu.vector_store %arg11[%c0_31, %c128], %20 {strides = array<i32>} : memref<256x288xf32, #tpu.memory_space<vmem>>, vector<256x32xf32>,
    %c1_32 = arith.constant 1 : index
    %c2_33 = arith.constant 2 : index
    %c0_34 = arith.constant 0 : index
    %22 = vector.load %arg10[%c1_32, %c2_33, %c0_34] : memref<18x18x32xf32, #tpu.memory_space<vmem>>, vector<16x16x32xf32>
    %23 = vector.shape_cast %22 : vector<16x16x32xf32> to vector<256x32xf32>
    %c0_35 = arith.constant 0 : index
    %c160 = arith.constant 160 : index
    %24 = vector.load %arg11[%c0_35, %c160] : memref<256x288xf32, #tpu.memory_space<vmem>>, vector<256x32xf32>
    tpu.vector_store %arg11[%c0_35, %c160], %23 {strides = array<i32>} : memref<256x288xf32, #tpu.memory_space<vmem>>, vector<256x32xf32>,
    %c2_36 = arith.constant 2 : index
    %c0_37 = arith.constant 0 : index
    %c0_38 = arith.constant 0 : index
    %25 = vector.load %arg10[%c2_36, %c0_37, %c0_38] : memref<18x18x32xf32, #tpu.memory_space<vmem>>, vector<16x16x32xf32>
    %26 = vector.shape_cast %25 : vector<16x16x32xf32> to vector<256x32xf32>
    %c0_39 = arith.constant 0 : index
    %c192 = arith.constant 192 : index
    %27 = vector.load %arg11[%c0_39, %c192] : memref<256x288xf32, #tpu.memory_space<vmem>>, vector<256x32xf32>
    tpu.vector_store %arg11[%c0_39, %c192], %26 {strides = array<i32>} : memref<256x288xf32, #tpu.memory_space<vmem>>, vector<256x32xf32>,
    %c2_40 = arith.constant 2 : index
    %c1_41 = arith.constant 1 : index
    %c0_42 = arith.constant 0 : index
    %28 = vector.load %arg10[%c2_40, %c1_41, %c0_42] : memref<18x18x32xf32, #tpu.memory_space<vmem>>, vector<16x16x32xf32>
    %29 = vector.shape_cast %28 : vector<16x16x32xf32> to vector<256x32xf32>
    %c0_43 = arith.constant 0 : index
    %c224 = arith.constant 224 : index
    %30 = vector.load %arg11[%c0_43, %c224] : memref<256x288xf32, #tpu.memory_space<vmem>>, vector<256x32xf32>
    tpu.vector_store %arg11[%c0_43, %c224], %29 {strides = array<i32>} : memref<256x288xf32, #tpu.memory_space<vmem>>, vector<256x32xf32>,
    %c2_44 = arith.constant 2 : index
    %c2_45 = arith.constant 2 : index
    %c0_46 = arith.constant 0 : index
    %31 = vector.load %arg10[%c2_44, %c2_45, %c0_46] : memref<18x18x32xf32, #tpu.memory_space<vmem>>, vector<16x16x32xf32>
    %32 = vector.shape_cast %31 : vector<16x16x32xf32> to vector<256x32xf32>
    %c0_47 = arith.constant 0 : index
    %c256 = arith.constant 256 : index
    %33 = vector.load %arg11[%c0_47, %c256] : memref<256x288xf32, #tpu.memory_space<vmem>>, vector<256x32xf32>
    tpu.vector_store %arg11[%c0_47, %c256], %32 {strides = array<i32>} : memref<256x288xf32, #tpu.memory_space<vmem>>, vector<256x32xf32>,
    %c0_48 = arith.constant 0 : index
    %c0_49 = arith.constant 0 : index
    %34 = vector.load %arg11[%c0_48, %c0_49] : memref<256x288xf32, #tpu.memory_space<vmem>>, vector<256x288xf32>
    %c0_50 = arith.constant 0 : index
    %c0_51 = arith.constant 0 : index
    %35 = vector.load %arg2[%c0_50, %c0_51] : memref<288x32xf32, #tpu.memory_space<vmem>>, vector<288x32xf32>
    %cst_52 = arith.constant dense<0.000000e+00> : vector<256x32xf32>
    %36 = tpu.matmul %34, %35, %cst_52 {dimension_numbers = #tpu.dot_dimension_numbers<[1], [0], [0], [1], [0, 0, 1, 1], [], []>} : vector<256x288xf32>, vector<288x32xf32>, vector<256x32xf32> -> vector<256x32xf32>
    %c0_53 = arith.constant 0 : index
    %c0_54 = arith.constant 0 : index
    %37 = vector.load %arg4[%c0_53, %c0_54] : memref<4x32xf32, #tpu.memory_space<vmem>>, vector<1x32xf32>
    %38 = vector.broadcast %37 : vector<1x32xf32> to vector<256x32xf32>
    %39 = arith.mulf %36, %38 : vector<256x32xf32>
    %c1_55 = arith.constant 1 : index
    %c0_56 = arith.constant 0 : index
    %40 = vector.load %arg4[%c1_55, %c0_56] : memref<4x32xf32, #tpu.memory_space<vmem>>, vector<1x32xf32>
    %41 = vector.broadcast %40 : vector<1x32xf32> to vector<256x32xf32>
    %42 = arith.addf %39, %41 : vector<256x32xf32>
    %cst_57 = arith.constant 0.000000e+00 : f32
    %43 = vector.broadcast %cst_57 : f32 to vector<256x32xf32>
    %44 = arith.maximumf %42, %43 : vector<256x32xf32>
    %45 = vector.shape_cast %44 : vector<256x32xf32> to vector<16x16x32xf32>
    %c1_58 = arith.constant 1 : index
    %c1_59 = arith.constant 1 : index
    %c0_60 = arith.constant 0 : index
    %46 = vector.load %arg10[%c1_58, %c1_59, %c0_60] : memref<18x18x32xf32, #tpu.memory_space<vmem>>, vector<16x16x32xf32>
    tpu.vector_store %arg10[%c1_58, %c1_59, %c0_60], %45 {strides = array<i32>} : memref<18x18x32xf32, #tpu.memory_space<vmem>>, vector<16x16x32xf32>,
    %c0_61 = arith.constant 0 : index
    %c0_62 = arith.constant 0 : index
    %c0_63 = arith.constant 0 : index
    %47 = vector.load %arg10[%c0_61, %c0_62, %c0_63] : memref<18x18x32xf32, #tpu.memory_space<vmem>>, vector<16x16x32xf32>
    %48 = vector.shape_cast %47 : vector<16x16x32xf32> to vector<256x32xf32>
    %c0_64 = arith.constant 0 : index
    %c0_65 = arith.constant 0 : index
    %49 = vector.load %arg11[%c0_64, %c0_65] : memref<256x288xf32, #tpu.memory_space<vmem>>, vector<256x32xf32>
    tpu.vector_store %arg11[%c0_64, %c0_65], %48 {strides = array<i32>} : memref<256x288xf32, #tpu.memory_space<vmem>>, vector<256x32xf32>,
    %c0_66 = arith.constant 0 : index
    %c1_67 = arith.constant 1 : index
    %c0_68 = arith.constant 0 : index
    %50 = vector.load %arg10[%c0_66, %c1_67, %c0_68] : memref<18x18x32xf32, #tpu.memory_space<vmem>>, vector<16x16x32xf32>
    %51 = vector.shape_cast %50 : vector<16x16x32xf32> to vector<256x32xf32>
    %c0_69 = arith.constant 0 : index
    %c32_70 = arith.constant 32 : index
    %52 = vector.load %arg11[%c0_69, %c32_70] : memref<256x288xf32, #tpu.memory_space<vmem>>, vector<256x32xf32>
    tpu.vector_store %arg11[%c0_69, %c32_70], %51 {strides = array<i32>} : memref<256x288xf32, #tpu.memory_space<vmem>>, vector<256x32xf32>,
    %c0_71 = arith.constant 0 : index
    %c2_72 = arith.constant 2 : index
    %c0_73 = arith.constant 0 : index
    %53 = vector.load %arg10[%c0_71, %c2_72, %c0_73] : memref<18x18x32xf32, #tpu.memory_space<vmem>>, vector<16x16x32xf32>
    %54 = vector.shape_cast %53 : vector<16x16x32xf32> to vector<256x32xf32>
    %c0_74 = arith.constant 0 : index
    %c64_75 = arith.constant 64 : index
    %55 = vector.load %arg11[%c0_74, %c64_75] : memref<256x288xf32, #tpu.memory_space<vmem>>, vector<256x32xf32>
    tpu.vector_store %arg11[%c0_74, %c64_75], %54 {strides = array<i32>} : memref<256x288xf32, #tpu.memory_space<vmem>>, vector<256x32xf32>,
    %c1_76 = arith.constant 1 : index
    %c0_77 = arith.constant 0 : index
    %c0_78 = arith.constant 0 : index
    %56 = vector.load %arg10[%c1_76, %c0_77, %c0_78] : memref<18x18x32xf32, #tpu.memory_space<vmem>>, vector<16x16x32xf32>
    %57 = vector.shape_cast %56 : vector<16x16x32xf32> to vector<256x32xf32>
    %c0_79 = arith.constant 0 : index
    %c96_80 = arith.constant 96 : index
    %58 = vector.load %arg11[%c0_79, %c96_80] : memref<256x288xf32, #tpu.memory_space<vmem>>, vector<256x32xf32>
    tpu.vector_store %arg11[%c0_79, %c96_80], %57 {strides = array<i32>} : memref<256x288xf32, #tpu.memory_space<vmem>>, vector<256x32xf32>,
    %c1_81 = arith.constant 1 : index
    %c1_82 = arith.constant 1 : index
    %c0_83 = arith.constant 0 : index
    %59 = vector.load %arg10[%c1_81, %c1_82, %c0_83] : memref<18x18x32xf32, #tpu.memory_space<vmem>>, vector<16x16x32xf32>
    %60 = vector.shape_cast %59 : vector<16x16x32xf32> to vector<256x32xf32>
    %c0_84 = arith.constant 0 : index
    %c128_85 = arith.constant 128 : index
    %61 = vector.load %arg11[%c0_84, %c128_85] : memref<256x288xf32, #tpu.memory_space<vmem>>, vector<256x32xf32>
    tpu.vector_store %arg11[%c0_84, %c128_85], %60 {strides = array<i32>} : memref<256x288xf32, #tpu.memory_space<vmem>>, vector<256x32xf32>,
    %c1_86 = arith.constant 1 : index
    %c2_87 = arith.constant 2 : index
    %c0_88 = arith.constant 0 : index
    %62 = vector.load %arg10[%c1_86, %c2_87, %c0_88] : memref<18x18x32xf32, #tpu.memory_space<vmem>>, vector<16x16x32xf32>
    %63 = vector.shape_cast %62 : vector<16x16x32xf32> to vector<256x32xf32>
    %c0_89 = arith.constant 0 : index
    %c160_90 = arith.constant 160 : index
    %64 = vector.load %arg11[%c0_89, %c160_90] : memref<256x288xf32, #tpu.memory_space<vmem>>, vector<256x32xf32>
    tpu.vector_store %arg11[%c0_89, %c160_90], %63 {strides = array<i32>} : memref<256x288xf32, #tpu.memory_space<vmem>>, vector<256x32xf32>,
    %c2_91 = arith.constant 2 : index
    %c0_92 = arith.constant 0 : index
    %c0_93 = arith.constant 0 : index
    %65 = vector.load %arg10[%c2_91, %c0_92, %c0_93] : memref<18x18x32xf32, #tpu.memory_space<vmem>>, vector<16x16x32xf32>
    %66 = vector.shape_cast %65 : vector<16x16x32xf32> to vector<256x32xf32>
    %c0_94 = arith.constant 0 : index
    %c192_95 = arith.constant 192 : index
    %67 = vector.load %arg11[%c0_94, %c192_95] : memref<256x288xf32, #tpu.memory_space<vmem>>, vector<256x32xf32>
    tpu.vector_store %arg11[%c0_94, %c192_95], %66 {strides = array<i32>} : memref<256x288xf32, #tpu.memory_space<vmem>>, vector<256x32xf32>,
    %c2_96 = arith.constant 2 : index
    %c1_97 = arith.constant 1 : index
    %c0_98 = arith.constant 0 : index
    %68 = vector.load %arg10[%c2_96, %c1_97, %c0_98] : memref<18x18x32xf32, #tpu.memory_space<vmem>>, vector<16x16x32xf32>
    %69 = vector.shape_cast %68 : vector<16x16x32xf32> to vector<256x32xf32>
    %c0_99 = arith.constant 0 : index
    %c224_100 = arith.constant 224 : index
    %70 = vector.load %arg11[%c0_99, %c224_100] : memref<256x288xf32, #tpu.memory_space<vmem>>, vector<256x32xf32>
    tpu.vector_store %arg11[%c0_99, %c224_100], %69 {strides = array<i32>} : memref<256x288xf32, #tpu.memory_space<vmem>>, vector<256x32xf32>,
    %c2_101 = arith.constant 2 : index
    %c2_102 = arith.constant 2 : index
    %c0_103 = arith.constant 0 : index
    %71 = vector.load %arg10[%c2_101, %c2_102, %c0_103] : memref<18x18x32xf32, #tpu.memory_space<vmem>>, vector<16x16x32xf32>
    %72 = vector.shape_cast %71 : vector<16x16x32xf32> to vector<256x32xf32>
    %c0_104 = arith.constant 0 : index
    %c256_105 = arith.constant 256 : index
    %73 = vector.load %arg11[%c0_104, %c256_105] : memref<256x288xf32, #tpu.memory_space<vmem>>, vector<256x32xf32>
    tpu.vector_store %arg11[%c0_104, %c256_105], %72 {strides = array<i32>} : memref<256x288xf32, #tpu.memory_space<vmem>>, vector<256x32xf32>,
    %c0_106 = arith.constant 0 : index
    %c0_107 = arith.constant 0 : index
    %74 = vector.load %arg11[%c0_106, %c0_107] : memref<256x288xf32, #tpu.memory_space<vmem>>, vector<256x288xf32>
    %c0_108 = arith.constant 0 : index
    %c0_109 = arith.constant 0 : index
    %75 = vector.load %arg3[%c0_108, %c0_109] : memref<288x32xf32, #tpu.memory_space<vmem>>, vector<288x32xf32>
    %cst_110 = arith.constant dense<0.000000e+00> : vector<256x32xf32>
    %76 = tpu.matmul %74, %75, %cst_110 {dimension_numbers = #tpu.dot_dimension_numbers<[1], [0], [0], [1], [0, 0, 1, 1], [], []>} : vector<256x288xf32>, vector<288x32xf32>, vector<256x32xf32> -> vector<256x32xf32>
    %c2_111 = arith.constant 2 : index
    %c0_112 = arith.constant 0 : index
    %77 = vector.load %arg4[%c2_111, %c0_112] : memref<4x32xf32, #tpu.memory_space<vmem>>, vector<1x32xf32>
    %78 = vector.broadcast %77 : vector<1x32xf32> to vector<256x32xf32>
    %79 = arith.mulf %76, %78 : vector<256x32xf32>
    %c3 = arith.constant 3 : index
    %c0_113 = arith.constant 0 : index
    %80 = vector.load %arg4[%c3, %c0_113] : memref<4x32xf32, #tpu.memory_space<vmem>>, vector<1x32xf32>
    %81 = vector.broadcast %80 : vector<1x32xf32> to vector<256x32xf32>
    %82 = arith.addf %79, %81 : vector<256x32xf32>
    %cst_114 = arith.constant dense<0.000000e+00> : vector<32xf32>
    %83 = vector.multi_reduction <add>, %82, %cst_114 [0] : vector<256x32xf32> to vector<32xf32>
    %84 = vector.shape_cast %83 : vector<32xf32> to vector<1x32xf32>
    %cst_115 = arith.constant 2.560000e+02 : f32
    %85 = vector.broadcast %cst_115 : f32 to vector<1x32xf32>
    %86 = arith.divf %84, %85 : vector<1x32xf32>
    %cst_116 = arith.constant dense<0xFF800000> : vector<32xf32>
    %87 = vector.multi_reduction <maximumf>, %82, %cst_116 [0] : vector<256x32xf32> to vector<32xf32>
    %88 = vector.shape_cast %87 : vector<32xf32> to vector<1x32xf32>
    %c0_117 = arith.constant 0 : index
    %c0_118 = arith.constant 0 : index
    %89 = vector.load %arg5[%c0_117, %c0_118] : memref<32x2xf32, #tpu.memory_space<vmem>>, vector<32x2xf32>
    %cst_119 = arith.constant dense<0.000000e+00> : vector<1x2xf32>
    %90 = tpu.matmul %86, %89, %cst_119 {dimension_numbers = #tpu.dot_dimension_numbers<[1], [0], [0], [1], [0, 0, 1, 1], [], []>} : vector<1x32xf32>, vector<32x2xf32>, vector<1x2xf32> -> vector<1x2xf32>
    %cst_120 = arith.constant 0.000000e+00 : f32
    %91 = vector.broadcast %cst_120 : f32 to vector<1x2xf32>
    %92 = arith.maximumf %90, %91 : vector<1x2xf32>
    %c0_121 = arith.constant 0 : index
    %c0_122 = arith.constant 0 : index
    %93 = vector.load %arg6[%c0_121, %c0_122] : memref<2x32xf32, #tpu.memory_space<vmem>>, vector<2x32xf32>
    %cst_123 = arith.constant dense<0.000000e+00> : vector<1x32xf32>
    %94 = tpu.matmul %92, %93, %cst_123 {dimension_numbers = #tpu.dot_dimension_numbers<[1], [0], [0], [1], [0, 0, 1, 1], [], []>} : vector<1x2xf32>, vector<2x32xf32>, vector<1x32xf32> -> vector<1x32xf32>
    %c0_124 = arith.constant 0 : index
    %c0_125 = arith.constant 0 : index
    %95 = vector.load %arg5[%c0_124, %c0_125] : memref<32x2xf32, #tpu.memory_space<vmem>>, vector<32x2xf32>
    %cst_126 = arith.constant dense<0.000000e+00> : vector<1x2xf32>
    %96 = tpu.matmul %88, %95, %cst_126 {dimension_numbers = #tpu.dot_dimension_numbers<[1], [0], [0], [1], [0, 0, 1, 1], [], []>} : vector<1x32xf32>, vector<32x2xf32>, vector<1x2xf32> -> vector<1x2xf32>
    %cst_127 = arith.constant 0.000000e+00 : f32
    %97 = vector.broadcast %cst_127 : f32 to vector<1x2xf32>
    %98 = arith.maximumf %96, %97 : vector<1x2xf32>
    %c0_128 = arith.constant 0 : index
    %c0_129 = arith.constant 0 : index
    %99 = vector.load %arg6[%c0_128, %c0_129] : memref<2x32xf32, #tpu.memory_space<vmem>>, vector<2x32xf32>
    %cst_130 = arith.constant dense<0.000000e+00> : vector<1x32xf32>
    %100 = tpu.matmul %98, %99, %cst_130 {dimension_numbers = #tpu.dot_dimension_numbers<[1], [0], [0], [1], [0, 0, 1, 1], [], []>} : vector<1x2xf32>, vector<2x32xf32>, vector<1x32xf32> -> vector<1x32xf32>
    %101 = arith.addf %94, %100 : vector<1x32xf32>
    %102 = arith.negf %101 : vector<1x32xf32>
    %103 = math.exp %102 : vector<1x32xf32>
    %cst_131 = arith.constant 1.000000e+00 : f32
    %104 = vector.broadcast %cst_131 : f32 to vector<1x32xf32>
    %105 = arith.addf %104, %103 : vector<1x32xf32>
    %106 = arith.divf %104, %105 : vector<1x32xf32>
    %107 = vector.broadcast %106 : vector<1x32xf32> to vector<256x32xf32>
    %108 = arith.mulf %82, %107 : vector<256x32xf32>
    %109 = vector.shape_cast %108 : vector<256x32xf32> to vector<16x16x32xf32>
    %cst_132 = arith.constant dense<0xFF800000> : vector<16x16xf32>
    %110 = vector.multi_reduction <maximumf>, %109, %cst_132 [2] : vector<16x16x32xf32> to vector<16x16xf32>
    %c0_133 = arith.constant 0 : index
    %c3_134 = arith.constant 3 : index
    %c3_135 = arith.constant 3 : index
    %111 = vector.load %arg12[%c0_133, %c3_134, %c3_135] : memref<2x22x22xf32, #tpu.memory_space<vmem>>, vector<1x16x16xf32>
    %112 = vector.shape_cast %111 : vector<1x16x16xf32> to vector<16x16xf32>
    %113 = vector.shape_cast %110 : vector<16x16xf32> to vector<1x16x16xf32>
    tpu.vector_store %arg12[%c0_133, %c3_134, %c3_135], %113 {strides = array<i32>} : memref<2x22x22xf32, #tpu.memory_space<vmem>>, vector<1x16x16xf32>,
    %cst_136 = arith.constant dense<0.000000e+00> : vector<16x16xf32>
    %114 = vector.multi_reduction <add>, %109, %cst_136 [2] : vector<16x16x32xf32> to vector<16x16xf32>
    %cst_137 = arith.constant 3.200000e+01 : f32
    %115 = vector.broadcast %cst_137 : f32 to vector<16x16xf32>
    %116 = arith.divf %114, %115 : vector<16x16xf32>
    %c1_138 = arith.constant 1 : index
    %c3_139 = arith.constant 3 : index
    %c3_140 = arith.constant 3 : index
    %117 = vector.load %arg12[%c1_138, %c3_139, %c3_140] : memref<2x22x22xf32, #tpu.memory_space<vmem>>, vector<1x16x16xf32>
    %118 = vector.shape_cast %117 : vector<1x16x16xf32> to vector<16x16xf32>
    %119 = vector.shape_cast %116 : vector<16x16xf32> to vector<1x16x16xf32>
    tpu.vector_store %arg12[%c1_138, %c3_139, %c3_140], %119 {strides = array<i32>} : memref<2x22x22xf32, #tpu.memory_space<vmem>>, vector<1x16x16xf32>,
    %cst_141 = arith.constant 0.000000e+00 : f32
    %120 = vector.broadcast %cst_141 : f32 to vector<16x16xf32>
    %c0_142 = arith.constant 0 : index
    %c0_143 = arith.constant 0 : index
    %c0_144 = arith.constant 0 : index
    %121 = vector.load %arg12[%c0_142, %c0_143, %c0_144] : memref<2x22x22xf32, #tpu.memory_space<vmem>>, vector<1x16x16xf32>
    %122 = vector.shape_cast %121 : vector<1x16x16xf32> to vector<16x16xf32>
    %c0_145 = arith.constant 0 : index
    %123 = memref.load %arg7[%c0_145] : memref<98xf32, #tpu.memory_space<smem>>
    %124 = vector.broadcast %123 : f32 to vector<16x16xf32>
    %125 = arith.mulf %122, %124 : vector<16x16xf32>
    %126 = arith.addf %120, %125 : vector<16x16xf32>
    %c1_146 = arith.constant 1 : index
    %c0_147 = arith.constant 0 : index
    %c0_148 = arith.constant 0 : index
    %127 = vector.load %arg12[%c1_146, %c0_147, %c0_148] : memref<2x22x22xf32, #tpu.memory_space<vmem>>, vector<1x16x16xf32>
    %128 = vector.shape_cast %127 : vector<1x16x16xf32> to vector<16x16xf32>
    %c1_149 = arith.constant 1 : index
    %129 = memref.load %arg7[%c1_149] : memref<98xf32, #tpu.memory_space<smem>>
    %130 = vector.broadcast %129 : f32 to vector<16x16xf32>
    %131 = arith.mulf %128, %130 : vector<16x16xf32>
    %132 = arith.addf %126, %131 : vector<16x16xf32>
    %c0_150 = arith.constant 0 : index
    %c0_151 = arith.constant 0 : index
    %c1_152 = arith.constant 1 : index
    %133 = vector.load %arg12[%c0_150, %c0_151, %c1_152] : memref<2x22x22xf32, #tpu.memory_space<vmem>>, vector<1x16x16xf32>
    %134 = vector.shape_cast %133 : vector<1x16x16xf32> to vector<16x16xf32>
    %c2_153 = arith.constant 2 : index
    %135 = memref.load %arg7[%c2_153] : memref<98xf32, #tpu.memory_space<smem>>
    %136 = vector.broadcast %135 : f32 to vector<16x16xf32>
    %137 = arith.mulf %134, %136 : vector<16x16xf32>
    %138 = arith.addf %132, %137 : vector<16x16xf32>
    %c1_154 = arith.constant 1 : index
    %c0_155 = arith.constant 0 : index
    %c1_156 = arith.constant 1 : index
    %139 = vector.load %arg12[%c1_154, %c0_155, %c1_156] : memref<2x22x22xf32, #tpu.memory_space<vmem>>, vector<1x16x16xf32>
    %140 = vector.shape_cast %139 : vector<1x16x16xf32> to vector<16x16xf32>
    %c3_157 = arith.constant 3 : index
    %141 = memref.load %arg7[%c3_157] : memref<98xf32, #tpu.memory_space<smem>>
    %142 = vector.broadcast %141 : f32 to vector<16x16xf32>
    %143 = arith.mulf %140, %142 : vector<16x16xf32>
    %144 = arith.addf %138, %143 : vector<16x16xf32>
    %c0_158 = arith.constant 0 : index
    %c0_159 = arith.constant 0 : index
    %c2_160 = arith.constant 2 : index
    %145 = vector.load %arg12[%c0_158, %c0_159, %c2_160] : memref<2x22x22xf32, #tpu.memory_space<vmem>>, vector<1x16x16xf32>
    %146 = vector.shape_cast %145 : vector<1x16x16xf32> to vector<16x16xf32>
    %c4 = arith.constant 4 : index
    %147 = memref.load %arg7[%c4] : memref<98xf32, #tpu.memory_space<smem>>
    %148 = vector.broadcast %147 : f32 to vector<16x16xf32>
    %149 = arith.mulf %146, %148 : vector<16x16xf32>
    %150 = arith.addf %144, %149 : vector<16x16xf32>
    %c1_161 = arith.constant 1 : index
    %c0_162 = arith.constant 0 : index
    %c2_163 = arith.constant 2 : index
    %151 = vector.load %arg12[%c1_161, %c0_162, %c2_163] : memref<2x22x22xf32, #tpu.memory_space<vmem>>, vector<1x16x16xf32>
    %152 = vector.shape_cast %151 : vector<1x16x16xf32> to vector<16x16xf32>
    %c5 = arith.constant 5 : index
    %153 = memref.load %arg7[%c5] : memref<98xf32, #tpu.memory_space<smem>>
    %154 = vector.broadcast %153 : f32 to vector<16x16xf32>
    %155 = arith.mulf %152, %154 : vector<16x16xf32>
    %156 = arith.addf %150, %155 : vector<16x16xf32>
    %c0_164 = arith.constant 0 : index
    %c0_165 = arith.constant 0 : index
    %c3_166 = arith.constant 3 : index
    %157 = vector.load %arg12[%c0_164, %c0_165, %c3_166] : memref<2x22x22xf32, #tpu.memory_space<vmem>>, vector<1x16x16xf32>
    %158 = vector.shape_cast %157 : vector<1x16x16xf32> to vector<16x16xf32>
    %c6 = arith.constant 6 : index
    %159 = memref.load %arg7[%c6] : memref<98xf32, #tpu.memory_space<smem>>
    %160 = vector.broadcast %159 : f32 to vector<16x16xf32>
    %161 = arith.mulf %158, %160 : vector<16x16xf32>
    %162 = arith.addf %156, %161 : vector<16x16xf32>
    %c1_167 = arith.constant 1 : index
    %c0_168 = arith.constant 0 : index
    %c3_169 = arith.constant 3 : index
    %163 = vector.load %arg12[%c1_167, %c0_168, %c3_169] : memref<2x22x22xf32, #tpu.memory_space<vmem>>, vector<1x16x16xf32>
    %164 = vector.shape_cast %163 : vector<1x16x16xf32> to vector<16x16xf32>
    %c7 = arith.constant 7 : index
    %165 = memref.load %arg7[%c7] : memref<98xf32, #tpu.memory_space<smem>>
    %166 = vector.broadcast %165 : f32 to vector<16x16xf32>
    %167 = arith.mulf %164, %166 : vector<16x16xf32>
    %168 = arith.addf %162, %167 : vector<16x16xf32>
    %c0_170 = arith.constant 0 : index
    %c0_171 = arith.constant 0 : index
    %c4_172 = arith.constant 4 : index
    %169 = vector.load %arg12[%c0_170, %c0_171, %c4_172] : memref<2x22x22xf32, #tpu.memory_space<vmem>>, vector<1x16x16xf32>
    %170 = vector.shape_cast %169 : vector<1x16x16xf32> to vector<16x16xf32>
    %c8 = arith.constant 8 : index
    %171 = memref.load %arg7[%c8] : memref<98xf32, #tpu.memory_space<smem>>
    %172 = vector.broadcast %171 : f32 to vector<16x16xf32>
    %173 = arith.mulf %170, %172 : vector<16x16xf32>
    %174 = arith.addf %168, %173 : vector<16x16xf32>
    %c1_173 = arith.constant 1 : index
    %c0_174 = arith.constant 0 : index
    %c4_175 = arith.constant 4 : index
    %175 = vector.load %arg12[%c1_173, %c0_174, %c4_175] : memref<2x22x22xf32, #tpu.memory_space<vmem>>, vector<1x16x16xf32>
    %176 = vector.shape_cast %175 : vector<1x16x16xf32> to vector<16x16xf32>
    %c9 = arith.constant 9 : index
    %177 = memref.load %arg7[%c9] : memref<98xf32, #tpu.memory_space<smem>>
    %178 = vector.broadcast %177 : f32 to vector<16x16xf32>
    %179 = arith.mulf %176, %178 : vector<16x16xf32>
    %180 = arith.addf %174, %179 : vector<16x16xf32>
    %c0_176 = arith.constant 0 : index
    %c0_177 = arith.constant 0 : index
    %c5_178 = arith.constant 5 : index
    %181 = vector.load %arg12[%c0_176, %c0_177, %c5_178] : memref<2x22x22xf32, #tpu.memory_space<vmem>>, vector<1x16x16xf32>
    %182 = vector.shape_cast %181 : vector<1x16x16xf32> to vector<16x16xf32>
    %c10 = arith.constant 10 : index
    %183 = memref.load %arg7[%c10] : memref<98xf32, #tpu.memory_space<smem>>
    %184 = vector.broadcast %183 : f32 to vector<16x16xf32>
    %185 = arith.mulf %182, %184 : vector<16x16xf32>
    %186 = arith.addf %180, %185 : vector<16x16xf32>
    %c1_179 = arith.constant 1 : index
    %c0_180 = arith.constant 0 : index
    %c5_181 = arith.constant 5 : index
    %187 = vector.load %arg12[%c1_179, %c0_180, %c5_181] : memref<2x22x22xf32, #tpu.memory_space<vmem>>, vector<1x16x16xf32>
    %188 = vector.shape_cast %187 : vector<1x16x16xf32> to vector<16x16xf32>
    %c11 = arith.constant 11 : index
    %189 = memref.load %arg7[%c11] : memref<98xf32, #tpu.memory_space<smem>>
    %190 = vector.broadcast %189 : f32 to vector<16x16xf32>
    %191 = arith.mulf %188, %190 : vector<16x16xf32>
    %192 = arith.addf %186, %191 : vector<16x16xf32>
    %c0_182 = arith.constant 0 : index
    %c0_183 = arith.constant 0 : index
    %c6_184 = arith.constant 6 : index
    %193 = vector.load %arg12[%c0_182, %c0_183, %c6_184] : memref<2x22x22xf32, #tpu.memory_space<vmem>>, vector<1x16x16xf32>
    %194 = vector.shape_cast %193 : vector<1x16x16xf32> to vector<16x16xf32>
    %c12 = arith.constant 12 : index
    %195 = memref.load %arg7[%c12] : memref<98xf32, #tpu.memory_space<smem>>
    %196 = vector.broadcast %195 : f32 to vector<16x16xf32>
    %197 = arith.mulf %194, %196 : vector<16x16xf32>
    %198 = arith.addf %192, %197 : vector<16x16xf32>
    %c1_185 = arith.constant 1 : index
    %c0_186 = arith.constant 0 : index
    %c6_187 = arith.constant 6 : index
    %199 = vector.load %arg12[%c1_185, %c0_186, %c6_187] : memref<2x22x22xf32, #tpu.memory_space<vmem>>, vector<1x16x16xf32>
    %200 = vector.shape_cast %199 : vector<1x16x16xf32> to vector<16x16xf32>
    %c13 = arith.constant 13 : index
    %201 = memref.load %arg7[%c13] : memref<98xf32, #tpu.memory_space<smem>>
    %202 = vector.broadcast %201 : f32 to vector<16x16xf32>
    %203 = arith.mulf %200, %202 : vector<16x16xf32>
    %204 = arith.addf %198, %203 : vector<16x16xf32>
    %c0_188 = arith.constant 0 : index
    %c1_189 = arith.constant 1 : index
    %c0_190 = arith.constant 0 : index
    %205 = vector.load %arg12[%c0_188, %c1_189, %c0_190] : memref<2x22x22xf32, #tpu.memory_space<vmem>>, vector<1x16x16xf32>
    %206 = vector.shape_cast %205 : vector<1x16x16xf32> to vector<16x16xf32>
    %c14 = arith.constant 14 : index
    %207 = memref.load %arg7[%c14] : memref<98xf32, #tpu.memory_space<smem>>
    %208 = vector.broadcast %207 : f32 to vector<16x16xf32>
    %209 = arith.mulf %206, %208 : vector<16x16xf32>
    %210 = arith.addf %204, %209 : vector<16x16xf32>
    %c1_191 = arith.constant 1 : index
    %c1_192 = arith.constant 1 : index
    %c0_193 = arith.constant 0 : index
    %211 = vector.load %arg12[%c1_191, %c1_192, %c0_193] : memref<2x22x22xf32, #tpu.memory_space<vmem>>, vector<1x16x16xf32>
    %212 = vector.shape_cast %211 : vector<1x16x16xf32> to vector<16x16xf32>
    %c15 = arith.constant 15 : index
    %213 = memref.load %arg7[%c15] : memref<98xf32, #tpu.memory_space<smem>>
    %214 = vector.broadcast %213 : f32 to vector<16x16xf32>
    %215 = arith.mulf %212, %214 : vector<16x16xf32>
    %216 = arith.addf %210, %215 : vector<16x16xf32>
    %c0_194 = arith.constant 0 : index
    %c1_195 = arith.constant 1 : index
    %c1_196 = arith.constant 1 : index
    %217 = vector.load %arg12[%c0_194, %c1_195, %c1_196] : memref<2x22x22xf32, #tpu.memory_space<vmem>>, vector<1x16x16xf32>
    %218 = vector.shape_cast %217 : vector<1x16x16xf32> to vector<16x16xf32>
    %c16 = arith.constant 16 : index
    %219 = memref.load %arg7[%c16] : memref<98xf32, #tpu.memory_space<smem>>
    %220 = vector.broadcast %219 : f32 to vector<16x16xf32>
    %221 = arith.mulf %218, %220 : vector<16x16xf32>
    %222 = arith.addf %216, %221 : vector<16x16xf32>
    %c1_197 = arith.constant 1 : index
    %c1_198 = arith.constant 1 : index
    %c1_199 = arith.constant 1 : index
    %223 = vector.load %arg12[%c1_197, %c1_198, %c1_199] : memref<2x22x22xf32, #tpu.memory_space<vmem>>, vector<1x16x16xf32>
    %224 = vector.shape_cast %223 : vector<1x16x16xf32> to vector<16x16xf32>
    %c17 = arith.constant 17 : index
    %225 = memref.load %arg7[%c17] : memref<98xf32, #tpu.memory_space<smem>>
    %226 = vector.broadcast %225 : f32 to vector<16x16xf32>
    %227 = arith.mulf %224, %226 : vector<16x16xf32>
    %228 = arith.addf %222, %227 : vector<16x16xf32>
    %c0_200 = arith.constant 0 : index
    %c1_201 = arith.constant 1 : index
    %c2_202 = arith.constant 2 : index
    %229 = vector.load %arg12[%c0_200, %c1_201, %c2_202] : memref<2x22x22xf32, #tpu.memory_space<vmem>>, vector<1x16x16xf32>
    %230 = vector.shape_cast %229 : vector<1x16x16xf32> to vector<16x16xf32>
    %c18 = arith.constant 18 : index
    %231 = memref.load %arg7[%c18] : memref<98xf32, #tpu.memory_space<smem>>
    %232 = vector.broadcast %231 : f32 to vector<16x16xf32>
    %233 = arith.mulf %230, %232 : vector<16x16xf32>
    %234 = arith.addf %228, %233 : vector<16x16xf32>
    %c1_203 = arith.constant 1 : index
    %c1_204 = arith.constant 1 : index
    %c2_205 = arith.constant 2 : index
    %235 = vector.load %arg12[%c1_203, %c1_204, %c2_205] : memref<2x22x22xf32, #tpu.memory_space<vmem>>, vector<1x16x16xf32>
    %236 = vector.shape_cast %235 : vector<1x16x16xf32> to vector<16x16xf32>
    %c19 = arith.constant 19 : index
    %237 = memref.load %arg7[%c19] : memref<98xf32, #tpu.memory_space<smem>>
    %238 = vector.broadcast %237 : f32 to vector<16x16xf32>
    %239 = arith.mulf %236, %238 : vector<16x16xf32>
    %240 = arith.addf %234, %239 : vector<16x16xf32>
    %c0_206 = arith.constant 0 : index
    %c1_207 = arith.constant 1 : index
    %c3_208 = arith.constant 3 : index
    %241 = vector.load %arg12[%c0_206, %c1_207, %c3_208] : memref<2x22x22xf32, #tpu.memory_space<vmem>>, vector<1x16x16xf32>
    %242 = vector.shape_cast %241 : vector<1x16x16xf32> to vector<16x16xf32>
    %c20 = arith.constant 20 : index
    %243 = memref.load %arg7[%c20] : memref<98xf32, #tpu.memory_space<smem>>
    %244 = vector.broadcast %243 : f32 to vector<16x16xf32>
    %245 = arith.mulf %242, %244 : vector<16x16xf32>
    %246 = arith.addf %240, %245 : vector<16x16xf32>
    %c1_209 = arith.constant 1 : index
    %c1_210 = arith.constant 1 : index
    %c3_211 = arith.constant 3 : index
    %247 = vector.load %arg12[%c1_209, %c1_210, %c3_211] : memref<2x22x22xf32, #tpu.memory_space<vmem>>, vector<1x16x16xf32>
    %248 = vector.shape_cast %247 : vector<1x16x16xf32> to vector<16x16xf32>
    %c21 = arith.constant 21 : index
    %249 = memref.load %arg7[%c21] : memref<98xf32, #tpu.memory_space<smem>>
    %250 = vector.broadcast %249 : f32 to vector<16x16xf32>
    %251 = arith.mulf %248, %250 : vector<16x16xf32>
    %252 = arith.addf %246, %251 : vector<16x16xf32>
    %c0_212 = arith.constant 0 : index
    %c1_213 = arith.constant 1 : index
    %c4_214 = arith.constant 4 : index
    %253 = vector.load %arg12[%c0_212, %c1_213, %c4_214] : memref<2x22x22xf32, #tpu.memory_space<vmem>>, vector<1x16x16xf32>
    %254 = vector.shape_cast %253 : vector<1x16x16xf32> to vector<16x16xf32>
    %c22 = arith.constant 22 : index
    %255 = memref.load %arg7[%c22] : memref<98xf32, #tpu.memory_space<smem>>
    %256 = vector.broadcast %255 : f32 to vector<16x16xf32>
    %257 = arith.mulf %254, %256 : vector<16x16xf32>
    %258 = arith.addf %252, %257 : vector<16x16xf32>
    %c1_215 = arith.constant 1 : index
    %c1_216 = arith.constant 1 : index
    %c4_217 = arith.constant 4 : index
    %259 = vector.load %arg12[%c1_215, %c1_216, %c4_217] : memref<2x22x22xf32, #tpu.memory_space<vmem>>, vector<1x16x16xf32>
    %260 = vector.shape_cast %259 : vector<1x16x16xf32> to vector<16x16xf32>
    %c23 = arith.constant 23 : index
    %261 = memref.load %arg7[%c23] : memref<98xf32, #tpu.memory_space<smem>>
    %262 = vector.broadcast %261 : f32 to vector<16x16xf32>
    %263 = arith.mulf %260, %262 : vector<16x16xf32>
    %264 = arith.addf %258, %263 : vector<16x16xf32>
    %c0_218 = arith.constant 0 : index
    %c1_219 = arith.constant 1 : index
    %c5_220 = arith.constant 5 : index
    %265 = vector.load %arg12[%c0_218, %c1_219, %c5_220] : memref<2x22x22xf32, #tpu.memory_space<vmem>>, vector<1x16x16xf32>
    %266 = vector.shape_cast %265 : vector<1x16x16xf32> to vector<16x16xf32>
    %c24 = arith.constant 24 : index
    %267 = memref.load %arg7[%c24] : memref<98xf32, #tpu.memory_space<smem>>
    %268 = vector.broadcast %267 : f32 to vector<16x16xf32>
    %269 = arith.mulf %266, %268 : vector<16x16xf32>
    %270 = arith.addf %264, %269 : vector<16x16xf32>
    %c1_221 = arith.constant 1 : index
    %c1_222 = arith.constant 1 : index
    %c5_223 = arith.constant 5 : index
    %271 = vector.load %arg12[%c1_221, %c1_222, %c5_223] : memref<2x22x22xf32, #tpu.memory_space<vmem>>, vector<1x16x16xf32>
    %272 = vector.shape_cast %271 : vector<1x16x16xf32> to vector<16x16xf32>
    %c25 = arith.constant 25 : index
    %273 = memref.load %arg7[%c25] : memref<98xf32, #tpu.memory_space<smem>>
    %274 = vector.broadcast %273 : f32 to vector<16x16xf32>
    %275 = arith.mulf %272, %274 : vector<16x16xf32>
    %276 = arith.addf %270, %275 : vector<16x16xf32>
    %c0_224 = arith.constant 0 : index
    %c1_225 = arith.constant 1 : index
    %c6_226 = arith.constant 6 : index
    %277 = vector.load %arg12[%c0_224, %c1_225, %c6_226] : memref<2x22x22xf32, #tpu.memory_space<vmem>>, vector<1x16x16xf32>
    %278 = vector.shape_cast %277 : vector<1x16x16xf32> to vector<16x16xf32>
    %c26 = arith.constant 26 : index
    %279 = memref.load %arg7[%c26] : memref<98xf32, #tpu.memory_space<smem>>
    %280 = vector.broadcast %279 : f32 to vector<16x16xf32>
    %281 = arith.mulf %278, %280 : vector<16x16xf32>
    %282 = arith.addf %276, %281 : vector<16x16xf32>
    %c1_227 = arith.constant 1 : index
    %c1_228 = arith.constant 1 : index
    %c6_229 = arith.constant 6 : index
    %283 = vector.load %arg12[%c1_227, %c1_228, %c6_229] : memref<2x22x22xf32, #tpu.memory_space<vmem>>, vector<1x16x16xf32>
    %284 = vector.shape_cast %283 : vector<1x16x16xf32> to vector<16x16xf32>
    %c27 = arith.constant 27 : index
    %285 = memref.load %arg7[%c27] : memref<98xf32, #tpu.memory_space<smem>>
    %286 = vector.broadcast %285 : f32 to vector<16x16xf32>
    %287 = arith.mulf %284, %286 : vector<16x16xf32>
    %288 = arith.addf %282, %287 : vector<16x16xf32>
    %c0_230 = arith.constant 0 : index
    %c2_231 = arith.constant 2 : index
    %c0_232 = arith.constant 0 : index
    %289 = vector.load %arg12[%c0_230, %c2_231, %c0_232] : memref<2x22x22xf32, #tpu.memory_space<vmem>>, vector<1x16x16xf32>
    %290 = vector.shape_cast %289 : vector<1x16x16xf32> to vector<16x16xf32>
    %c28 = arith.constant 28 : index
    %291 = memref.load %arg7[%c28] : memref<98xf32, #tpu.memory_space<smem>>
    %292 = vector.broadcast %291 : f32 to vector<16x16xf32>
    %293 = arith.mulf %290, %292 : vector<16x16xf32>
    %294 = arith.addf %288, %293 : vector<16x16xf32>
    %c1_233 = arith.constant 1 : index
    %c2_234 = arith.constant 2 : index
    %c0_235 = arith.constant 0 : index
    %295 = vector.load %arg12[%c1_233, %c2_234, %c0_235] : memref<2x22x22xf32, #tpu.memory_space<vmem>>, vector<1x16x16xf32>
    %296 = vector.shape_cast %295 : vector<1x16x16xf32> to vector<16x16xf32>
    %c29 = arith.constant 29 : index
    %297 = memref.load %arg7[%c29] : memref<98xf32, #tpu.memory_space<smem>>
    %298 = vector.broadcast %297 : f32 to vector<16x16xf32>
    %299 = arith.mulf %296, %298 : vector<16x16xf32>
    %300 = arith.addf %294, %299 : vector<16x16xf32>
    %c0_236 = arith.constant 0 : index
    %c2_237 = arith.constant 2 : index
    %c1_238 = arith.constant 1 : index
    %301 = vector.load %arg12[%c0_236, %c2_237, %c1_238] : memref<2x22x22xf32, #tpu.memory_space<vmem>>, vector<1x16x16xf32>
    %302 = vector.shape_cast %301 : vector<1x16x16xf32> to vector<16x16xf32>
    %c30 = arith.constant 30 : index
    %303 = memref.load %arg7[%c30] : memref<98xf32, #tpu.memory_space<smem>>
    %304 = vector.broadcast %303 : f32 to vector<16x16xf32>
    %305 = arith.mulf %302, %304 : vector<16x16xf32>
    %306 = arith.addf %300, %305 : vector<16x16xf32>
    %c1_239 = arith.constant 1 : index
    %c2_240 = arith.constant 2 : index
    %c1_241 = arith.constant 1 : index
    %307 = vector.load %arg12[%c1_239, %c2_240, %c1_241] : memref<2x22x22xf32, #tpu.memory_space<vmem>>, vector<1x16x16xf32>
    %308 = vector.shape_cast %307 : vector<1x16x16xf32> to vector<16x16xf32>
    %c31 = arith.constant 31 : index
    %309 = memref.load %arg7[%c31] : memref<98xf32, #tpu.memory_space<smem>>
    %310 = vector.broadcast %309 : f32 to vector<16x16xf32>
    %311 = arith.mulf %308, %310 : vector<16x16xf32>
    %312 = arith.addf %306, %311 : vector<16x16xf32>
    %c0_242 = arith.constant 0 : index
    %c2_243 = arith.constant 2 : index
    %c2_244 = arith.constant 2 : index
    %313 = vector.load %arg12[%c0_242, %c2_243, %c2_244] : memref<2x22x22xf32, #tpu.memory_space<vmem>>, vector<1x16x16xf32>
    %314 = vector.shape_cast %313 : vector<1x16x16xf32> to vector<16x16xf32>
    %c32_245 = arith.constant 32 : index
    %315 = memref.load %arg7[%c32_245] : memref<98xf32, #tpu.memory_space<smem>>
    %316 = vector.broadcast %315 : f32 to vector<16x16xf32>
    %317 = arith.mulf %314, %316 : vector<16x16xf32>
    %318 = arith.addf %312, %317 : vector<16x16xf32>
    %c1_246 = arith.constant 1 : index
    %c2_247 = arith.constant 2 : index
    %c2_248 = arith.constant 2 : index
    %319 = vector.load %arg12[%c1_246, %c2_247, %c2_248] : memref<2x22x22xf32, #tpu.memory_space<vmem>>, vector<1x16x16xf32>
    %320 = vector.shape_cast %319 : vector<1x16x16xf32> to vector<16x16xf32>
    %c33 = arith.constant 33 : index
    %321 = memref.load %arg7[%c33] : memref<98xf32, #tpu.memory_space<smem>>
    %322 = vector.broadcast %321 : f32 to vector<16x16xf32>
    %323 = arith.mulf %320, %322 : vector<16x16xf32>
    %324 = arith.addf %318, %323 : vector<16x16xf32>
    %c0_249 = arith.constant 0 : index
    %c2_250 = arith.constant 2 : index
    %c3_251 = arith.constant 3 : index
    %325 = vector.load %arg12[%c0_249, %c2_250, %c3_251] : memref<2x22x22xf32, #tpu.memory_space<vmem>>, vector<1x16x16xf32>
    %326 = vector.shape_cast %325 : vector<1x16x16xf32> to vector<16x16xf32>
    %c34 = arith.constant 34 : index
    %327 = memref.load %arg7[%c34] : memref<98xf32, #tpu.memory_space<smem>>
    %328 = vector.broadcast %327 : f32 to vector<16x16xf32>
    %329 = arith.mulf %326, %328 : vector<16x16xf32>
    %330 = arith.addf %324, %329 : vector<16x16xf32>
    %c1_252 = arith.constant 1 : index
    %c2_253 = arith.constant 2 : index
    %c3_254 = arith.constant 3 : index
    %331 = vector.load %arg12[%c1_252, %c2_253, %c3_254] : memref<2x22x22xf32, #tpu.memory_space<vmem>>, vector<1x16x16xf32>
    %332 = vector.shape_cast %331 : vector<1x16x16xf32> to vector<16x16xf32>
    %c35 = arith.constant 35 : index
    %333 = memref.load %arg7[%c35] : memref<98xf32, #tpu.memory_space<smem>>
    %334 = vector.broadcast %333 : f32 to vector<16x16xf32>
    %335 = arith.mulf %332, %334 : vector<16x16xf32>
    %336 = arith.addf %330, %335 : vector<16x16xf32>
    %c0_255 = arith.constant 0 : index
    %c2_256 = arith.constant 2 : index
    %c4_257 = arith.constant 4 : index
    %337 = vector.load %arg12[%c0_255, %c2_256, %c4_257] : memref<2x22x22xf32, #tpu.memory_space<vmem>>, vector<1x16x16xf32>
    %338 = vector.shape_cast %337 : vector<1x16x16xf32> to vector<16x16xf32>
    %c36 = arith.constant 36 : index
    %339 = memref.load %arg7[%c36] : memref<98xf32, #tpu.memory_space<smem>>
    %340 = vector.broadcast %339 : f32 to vector<16x16xf32>
    %341 = arith.mulf %338, %340 : vector<16x16xf32>
    %342 = arith.addf %336, %341 : vector<16x16xf32>
    %c1_258 = arith.constant 1 : index
    %c2_259 = arith.constant 2 : index
    %c4_260 = arith.constant 4 : index
    %343 = vector.load %arg12[%c1_258, %c2_259, %c4_260] : memref<2x22x22xf32, #tpu.memory_space<vmem>>, vector<1x16x16xf32>
    %344 = vector.shape_cast %343 : vector<1x16x16xf32> to vector<16x16xf32>
    %c37 = arith.constant 37 : index
    %345 = memref.load %arg7[%c37] : memref<98xf32, #tpu.memory_space<smem>>
    %346 = vector.broadcast %345 : f32 to vector<16x16xf32>
    %347 = arith.mulf %344, %346 : vector<16x16xf32>
    %348 = arith.addf %342, %347 : vector<16x16xf32>
    %c0_261 = arith.constant 0 : index
    %c2_262 = arith.constant 2 : index
    %c5_263 = arith.constant 5 : index
    %349 = vector.load %arg12[%c0_261, %c2_262, %c5_263] : memref<2x22x22xf32, #tpu.memory_space<vmem>>, vector<1x16x16xf32>
    %350 = vector.shape_cast %349 : vector<1x16x16xf32> to vector<16x16xf32>
    %c38 = arith.constant 38 : index
    %351 = memref.load %arg7[%c38] : memref<98xf32, #tpu.memory_space<smem>>
    %352 = vector.broadcast %351 : f32 to vector<16x16xf32>
    %353 = arith.mulf %350, %352 : vector<16x16xf32>
    %354 = arith.addf %348, %353 : vector<16x16xf32>
    %c1_264 = arith.constant 1 : index
    %c2_265 = arith.constant 2 : index
    %c5_266 = arith.constant 5 : index
    %355 = vector.load %arg12[%c1_264, %c2_265, %c5_266] : memref<2x22x22xf32, #tpu.memory_space<vmem>>, vector<1x16x16xf32>
    %356 = vector.shape_cast %355 : vector<1x16x16xf32> to vector<16x16xf32>
    %c39 = arith.constant 39 : index
    %357 = memref.load %arg7[%c39] : memref<98xf32, #tpu.memory_space<smem>>
    %358 = vector.broadcast %357 : f32 to vector<16x16xf32>
    %359 = arith.mulf %356, %358 : vector<16x16xf32>
    %360 = arith.addf %354, %359 : vector<16x16xf32>
    %c0_267 = arith.constant 0 : index
    %c2_268 = arith.constant 2 : index
    %c6_269 = arith.constant 6 : index
    %361 = vector.load %arg12[%c0_267, %c2_268, %c6_269] : memref<2x22x22xf32, #tpu.memory_space<vmem>>, vector<1x16x16xf32>
    %362 = vector.shape_cast %361 : vector<1x16x16xf32> to vector<16x16xf32>
    %c40 = arith.constant 40 : index
    %363 = memref.load %arg7[%c40] : memref<98xf32, #tpu.memory_space<smem>>
    %364 = vector.broadcast %363 : f32 to vector<16x16xf32>
    %365 = arith.mulf %362, %364 : vector<16x16xf32>
    %366 = arith.addf %360, %365 : vector<16x16xf32>
    %c1_270 = arith.constant 1 : index
    %c2_271 = arith.constant 2 : index
    %c6_272 = arith.constant 6 : index
    %367 = vector.load %arg12[%c1_270, %c2_271, %c6_272] : memref<2x22x22xf32, #tpu.memory_space<vmem>>, vector<1x16x16xf32>
    %368 = vector.shape_cast %367 : vector<1x16x16xf32> to vector<16x16xf32>
    %c41 = arith.constant 41 : index
    %369 = memref.load %arg7[%c41] : memref<98xf32, #tpu.memory_space<smem>>
    %370 = vector.broadcast %369 : f32 to vector<16x16xf32>
    %371 = arith.mulf %368, %370 : vector<16x16xf32>
    %372 = arith.addf %366, %371 : vector<16x16xf32>
    %c0_273 = arith.constant 0 : index
    %c3_274 = arith.constant 3 : index
    %c0_275 = arith.constant 0 : index
    %373 = vector.load %arg12[%c0_273, %c3_274, %c0_275] : memref<2x22x22xf32, #tpu.memory_space<vmem>>, vector<1x16x16xf32>
    %374 = vector.shape_cast %373 : vector<1x16x16xf32> to vector<16x16xf32>
    %c42 = arith.constant 42 : index
    %375 = memref.load %arg7[%c42] : memref<98xf32, #tpu.memory_space<smem>>
    %376 = vector.broadcast %375 : f32 to vector<16x16xf32>
    %377 = arith.mulf %374, %376 : vector<16x16xf32>
    %378 = arith.addf %372, %377 : vector<16x16xf32>
    %c1_276 = arith.constant 1 : index
    %c3_277 = arith.constant 3 : index
    %c0_278 = arith.constant 0 : index
    %379 = vector.load %arg12[%c1_276, %c3_277, %c0_278] : memref<2x22x22xf32, #tpu.memory_space<vmem>>, vector<1x16x16xf32>
    %380 = vector.shape_cast %379 : vector<1x16x16xf32> to vector<16x16xf32>
    %c43 = arith.constant 43 : index
    %381 = memref.load %arg7[%c43] : memref<98xf32, #tpu.memory_space<smem>>
    %382 = vector.broadcast %381 : f32 to vector<16x16xf32>
    %383 = arith.mulf %380, %382 : vector<16x16xf32>
    %384 = arith.addf %378, %383 : vector<16x16xf32>
    %c0_279 = arith.constant 0 : index
    %c3_280 = arith.constant 3 : index
    %c1_281 = arith.constant 1 : index
    %385 = vector.load %arg12[%c0_279, %c3_280, %c1_281] : memref<2x22x22xf32, #tpu.memory_space<vmem>>, vector<1x16x16xf32>
    %386 = vector.shape_cast %385 : vector<1x16x16xf32> to vector<16x16xf32>
    %c44 = arith.constant 44 : index
    %387 = memref.load %arg7[%c44] : memref<98xf32, #tpu.memory_space<smem>>
    %388 = vector.broadcast %387 : f32 to vector<16x16xf32>
    %389 = arith.mulf %386, %388 : vector<16x16xf32>
    %390 = arith.addf %384, %389 : vector<16x16xf32>
    %c1_282 = arith.constant 1 : index
    %c3_283 = arith.constant 3 : index
    %c1_284 = arith.constant 1 : index
    %391 = vector.load %arg12[%c1_282, %c3_283, %c1_284] : memref<2x22x22xf32, #tpu.memory_space<vmem>>, vector<1x16x16xf32>
    %392 = vector.shape_cast %391 : vector<1x16x16xf32> to vector<16x16xf32>
    %c45 = arith.constant 45 : index
    %393 = memref.load %arg7[%c45] : memref<98xf32, #tpu.memory_space<smem>>
    %394 = vector.broadcast %393 : f32 to vector<16x16xf32>
    %395 = arith.mulf %392, %394 : vector<16x16xf32>
    %396 = arith.addf %390, %395 : vector<16x16xf32>
    %c0_285 = arith.constant 0 : index
    %c3_286 = arith.constant 3 : index
    %c2_287 = arith.constant 2 : index
    %397 = vector.load %arg12[%c0_285, %c3_286, %c2_287] : memref<2x22x22xf32, #tpu.memory_space<vmem>>, vector<1x16x16xf32>
    %398 = vector.shape_cast %397 : vector<1x16x16xf32> to vector<16x16xf32>
    %c46 = arith.constant 46 : index
    %399 = memref.load %arg7[%c46] : memref<98xf32, #tpu.memory_space<smem>>
    %400 = vector.broadcast %399 : f32 to vector<16x16xf32>
    %401 = arith.mulf %398, %400 : vector<16x16xf32>
    %402 = arith.addf %396, %401 : vector<16x16xf32>
    %c1_288 = arith.constant 1 : index
    %c3_289 = arith.constant 3 : index
    %c2_290 = arith.constant 2 : index
    %403 = vector.load %arg12[%c1_288, %c3_289, %c2_290] : memref<2x22x22xf32, #tpu.memory_space<vmem>>, vector<1x16x16xf32>
    %404 = vector.shape_cast %403 : vector<1x16x16xf32> to vector<16x16xf32>
    %c47 = arith.constant 47 : index
    %405 = memref.load %arg7[%c47] : memref<98xf32, #tpu.memory_space<smem>>
    %406 = vector.broadcast %405 : f32 to vector<16x16xf32>
    %407 = arith.mulf %404, %406 : vector<16x16xf32>
    %408 = arith.addf %402, %407 : vector<16x16xf32>
    %c0_291 = arith.constant 0 : index
    %c3_292 = arith.constant 3 : index
    %c3_293 = arith.constant 3 : index
    %409 = vector.load %arg12[%c0_291, %c3_292, %c3_293] : memref<2x22x22xf32, #tpu.memory_space<vmem>>, vector<1x16x16xf32>
    %410 = vector.shape_cast %409 : vector<1x16x16xf32> to vector<16x16xf32>
    %c48 = arith.constant 48 : index
    %411 = memref.load %arg7[%c48] : memref<98xf32, #tpu.memory_space<smem>>
    %412 = vector.broadcast %411 : f32 to vector<16x16xf32>
    %413 = arith.mulf %410, %412 : vector<16x16xf32>
    %414 = arith.addf %408, %413 : vector<16x16xf32>
    %c1_294 = arith.constant 1 : index
    %c3_295 = arith.constant 3 : index
    %c3_296 = arith.constant 3 : index
    %415 = vector.load %arg12[%c1_294, %c3_295, %c3_296] : memref<2x22x22xf32, #tpu.memory_space<vmem>>, vector<1x16x16xf32>
    %416 = vector.shape_cast %415 : vector<1x16x16xf32> to vector<16x16xf32>
    %c49 = arith.constant 49 : index
    %417 = memref.load %arg7[%c49] : memref<98xf32, #tpu.memory_space<smem>>
    %418 = vector.broadcast %417 : f32 to vector<16x16xf32>
    %419 = arith.mulf %416, %418 : vector<16x16xf32>
    %420 = arith.addf %414, %419 : vector<16x16xf32>
    %c0_297 = arith.constant 0 : index
    %c3_298 = arith.constant 3 : index
    %c4_299 = arith.constant 4 : index
    %421 = vector.load %arg12[%c0_297, %c3_298, %c4_299] : memref<2x22x22xf32, #tpu.memory_space<vmem>>, vector<1x16x16xf32>
    %422 = vector.shape_cast %421 : vector<1x16x16xf32> to vector<16x16xf32>
    %c50 = arith.constant 50 : index
    %423 = memref.load %arg7[%c50] : memref<98xf32, #tpu.memory_space<smem>>
    %424 = vector.broadcast %423 : f32 to vector<16x16xf32>
    %425 = arith.mulf %422, %424 : vector<16x16xf32>
    %426 = arith.addf %420, %425 : vector<16x16xf32>
    %c1_300 = arith.constant 1 : index
    %c3_301 = arith.constant 3 : index
    %c4_302 = arith.constant 4 : index
    %427 = vector.load %arg12[%c1_300, %c3_301, %c4_302] : memref<2x22x22xf32, #tpu.memory_space<vmem>>, vector<1x16x16xf32>
    %428 = vector.shape_cast %427 : vector<1x16x16xf32> to vector<16x16xf32>
    %c51 = arith.constant 51 : index
    %429 = memref.load %arg7[%c51] : memref<98xf32, #tpu.memory_space<smem>>
    %430 = vector.broadcast %429 : f32 to vector<16x16xf32>
    %431 = arith.mulf %428, %430 : vector<16x16xf32>
    %432 = arith.addf %426, %431 : vector<16x16xf32>
    %c0_303 = arith.constant 0 : index
    %c3_304 = arith.constant 3 : index
    %c5_305 = arith.constant 5 : index
    %433 = vector.load %arg12[%c0_303, %c3_304, %c5_305] : memref<2x22x22xf32, #tpu.memory_space<vmem>>, vector<1x16x16xf32>
    %434 = vector.shape_cast %433 : vector<1x16x16xf32> to vector<16x16xf32>
    %c52 = arith.constant 52 : index
    %435 = memref.load %arg7[%c52] : memref<98xf32, #tpu.memory_space<smem>>
    %436 = vector.broadcast %435 : f32 to vector<16x16xf32>
    %437 = arith.mulf %434, %436 : vector<16x16xf32>
    %438 = arith.addf %432, %437 : vector<16x16xf32>
    %c1_306 = arith.constant 1 : index
    %c3_307 = arith.constant 3 : index
    %c5_308 = arith.constant 5 : index
    %439 = vector.load %arg12[%c1_306, %c3_307, %c5_308] : memref<2x22x22xf32, #tpu.memory_space<vmem>>, vector<1x16x16xf32>
    %440 = vector.shape_cast %439 : vector<1x16x16xf32> to vector<16x16xf32>
    %c53 = arith.constant 53 : index
    %441 = memref.load %arg7[%c53] : memref<98xf32, #tpu.memory_space<smem>>
    %442 = vector.broadcast %441 : f32 to vector<16x16xf32>
    %443 = arith.mulf %440, %442 : vector<16x16xf32>
    %444 = arith.addf %438, %443 : vector<16x16xf32>
    %c0_309 = arith.constant 0 : index
    %c3_310 = arith.constant 3 : index
    %c6_311 = arith.constant 6 : index
    %445 = vector.load %arg12[%c0_309, %c3_310, %c6_311] : memref<2x22x22xf32, #tpu.memory_space<vmem>>, vector<1x16x16xf32>
    %446 = vector.shape_cast %445 : vector<1x16x16xf32> to vector<16x16xf32>
    %c54 = arith.constant 54 : index
    %447 = memref.load %arg7[%c54] : memref<98xf32, #tpu.memory_space<smem>>
    %448 = vector.broadcast %447 : f32 to vector<16x16xf32>
    %449 = arith.mulf %446, %448 : vector<16x16xf32>
    %450 = arith.addf %444, %449 : vector<16x16xf32>
    %c1_312 = arith.constant 1 : index
    %c3_313 = arith.constant 3 : index
    %c6_314 = arith.constant 6 : index
    %451 = vector.load %arg12[%c1_312, %c3_313, %c6_314] : memref<2x22x22xf32, #tpu.memory_space<vmem>>, vector<1x16x16xf32>
    %452 = vector.shape_cast %451 : vector<1x16x16xf32> to vector<16x16xf32>
    %c55 = arith.constant 55 : index
    %453 = memref.load %arg7[%c55] : memref<98xf32, #tpu.memory_space<smem>>
    %454 = vector.broadcast %453 : f32 to vector<16x16xf32>
    %455 = arith.mulf %452, %454 : vector<16x16xf32>
    %456 = arith.addf %450, %455 : vector<16x16xf32>
    %c0_315 = arith.constant 0 : index
    %c4_316 = arith.constant 4 : index
    %c0_317 = arith.constant 0 : index
    %457 = vector.load %arg12[%c0_315, %c4_316, %c0_317] : memref<2x22x22xf32, #tpu.memory_space<vmem>>, vector<1x16x16xf32>
    %458 = vector.shape_cast %457 : vector<1x16x16xf32> to vector<16x16xf32>
    %c56 = arith.constant 56 : index
    %459 = memref.load %arg7[%c56] : memref<98xf32, #tpu.memory_space<smem>>
    %460 = vector.broadcast %459 : f32 to vector<16x16xf32>
    %461 = arith.mulf %458, %460 : vector<16x16xf32>
    %462 = arith.addf %456, %461 : vector<16x16xf32>
    %c1_318 = arith.constant 1 : index
    %c4_319 = arith.constant 4 : index
    %c0_320 = arith.constant 0 : index
    %463 = vector.load %arg12[%c1_318, %c4_319, %c0_320] : memref<2x22x22xf32, #tpu.memory_space<vmem>>, vector<1x16x16xf32>
    %464 = vector.shape_cast %463 : vector<1x16x16xf32> to vector<16x16xf32>
    %c57 = arith.constant 57 : index
    %465 = memref.load %arg7[%c57] : memref<98xf32, #tpu.memory_space<smem>>
    %466 = vector.broadcast %465 : f32 to vector<16x16xf32>
    %467 = arith.mulf %464, %466 : vector<16x16xf32>
    %468 = arith.addf %462, %467 : vector<16x16xf32>
    %c0_321 = arith.constant 0 : index
    %c4_322 = arith.constant 4 : index
    %c1_323 = arith.constant 1 : index
    %469 = vector.load %arg12[%c0_321, %c4_322, %c1_323] : memref<2x22x22xf32, #tpu.memory_space<vmem>>, vector<1x16x16xf32>
    %470 = vector.shape_cast %469 : vector<1x16x16xf32> to vector<16x16xf32>
    %c58 = arith.constant 58 : index
    %471 = memref.load %arg7[%c58] : memref<98xf32, #tpu.memory_space<smem>>
    %472 = vector.broadcast %471 : f32 to vector<16x16xf32>
    %473 = arith.mulf %470, %472 : vector<16x16xf32>
    %474 = arith.addf %468, %473 : vector<16x16xf32>
    %c1_324 = arith.constant 1 : index
    %c4_325 = arith.constant 4 : index
    %c1_326 = arith.constant 1 : index
    %475 = vector.load %arg12[%c1_324, %c4_325, %c1_326] : memref<2x22x22xf32, #tpu.memory_space<vmem>>, vector<1x16x16xf32>
    %476 = vector.shape_cast %475 : vector<1x16x16xf32> to vector<16x16xf32>
    %c59 = arith.constant 59 : index
    %477 = memref.load %arg7[%c59] : memref<98xf32, #tpu.memory_space<smem>>
    %478 = vector.broadcast %477 : f32 to vector<16x16xf32>
    %479 = arith.mulf %476, %478 : vector<16x16xf32>
    %480 = arith.addf %474, %479 : vector<16x16xf32>
    %c0_327 = arith.constant 0 : index
    %c4_328 = arith.constant 4 : index
    %c2_329 = arith.constant 2 : index
    %481 = vector.load %arg12[%c0_327, %c4_328, %c2_329] : memref<2x22x22xf32, #tpu.memory_space<vmem>>, vector<1x16x16xf32>
    %482 = vector.shape_cast %481 : vector<1x16x16xf32> to vector<16x16xf32>
    %c60 = arith.constant 60 : index
    %483 = memref.load %arg7[%c60] : memref<98xf32, #tpu.memory_space<smem>>
    %484 = vector.broadcast %483 : f32 to vector<16x16xf32>
    %485 = arith.mulf %482, %484 : vector<16x16xf32>
    %486 = arith.addf %480, %485 : vector<16x16xf32>
    %c1_330 = arith.constant 1 : index
    %c4_331 = arith.constant 4 : index
    %c2_332 = arith.constant 2 : index
    %487 = vector.load %arg12[%c1_330, %c4_331, %c2_332] : memref<2x22x22xf32, #tpu.memory_space<vmem>>, vector<1x16x16xf32>
    %488 = vector.shape_cast %487 : vector<1x16x16xf32> to vector<16x16xf32>
    %c61 = arith.constant 61 : index
    %489 = memref.load %arg7[%c61] : memref<98xf32, #tpu.memory_space<smem>>
    %490 = vector.broadcast %489 : f32 to vector<16x16xf32>
    %491 = arith.mulf %488, %490 : vector<16x16xf32>
    %492 = arith.addf %486, %491 : vector<16x16xf32>
    %c0_333 = arith.constant 0 : index
    %c4_334 = arith.constant 4 : index
    %c3_335 = arith.constant 3 : index
    %493 = vector.load %arg12[%c0_333, %c4_334, %c3_335] : memref<2x22x22xf32, #tpu.memory_space<vmem>>, vector<1x16x16xf32>
    %494 = vector.shape_cast %493 : vector<1x16x16xf32> to vector<16x16xf32>
    %c62 = arith.constant 62 : index
    %495 = memref.load %arg7[%c62] : memref<98xf32, #tpu.memory_space<smem>>
    %496 = vector.broadcast %495 : f32 to vector<16x16xf32>
    %497 = arith.mulf %494, %496 : vector<16x16xf32>
    %498 = arith.addf %492, %497 : vector<16x16xf32>
    %c1_336 = arith.constant 1 : index
    %c4_337 = arith.constant 4 : index
    %c3_338 = arith.constant 3 : index
    %499 = vector.load %arg12[%c1_336, %c4_337, %c3_338] : memref<2x22x22xf32, #tpu.memory_space<vmem>>, vector<1x16x16xf32>
    %500 = vector.shape_cast %499 : vector<1x16x16xf32> to vector<16x16xf32>
    %c63 = arith.constant 63 : index
    %501 = memref.load %arg7[%c63] : memref<98xf32, #tpu.memory_space<smem>>
    %502 = vector.broadcast %501 : f32 to vector<16x16xf32>
    %503 = arith.mulf %500, %502 : vector<16x16xf32>
    %504 = arith.addf %498, %503 : vector<16x16xf32>
    %c0_339 = arith.constant 0 : index
    %c4_340 = arith.constant 4 : index
    %c4_341 = arith.constant 4 : index
    %505 = vector.load %arg12[%c0_339, %c4_340, %c4_341] : memref<2x22x22xf32, #tpu.memory_space<vmem>>, vector<1x16x16xf32>
    %506 = vector.shape_cast %505 : vector<1x16x16xf32> to vector<16x16xf32>
    %c64_342 = arith.constant 64 : index
    %507 = memref.load %arg7[%c64_342] : memref<98xf32, #tpu.memory_space<smem>>
    %508 = vector.broadcast %507 : f32 to vector<16x16xf32>
    %509 = arith.mulf %506, %508 : vector<16x16xf32>
    %510 = arith.addf %504, %509 : vector<16x16xf32>
    %c1_343 = arith.constant 1 : index
    %c4_344 = arith.constant 4 : index
    %c4_345 = arith.constant 4 : index
    %511 = vector.load %arg12[%c1_343, %c4_344, %c4_345] : memref<2x22x22xf32, #tpu.memory_space<vmem>>, vector<1x16x16xf32>
    %512 = vector.shape_cast %511 : vector<1x16x16xf32> to vector<16x16xf32>
    %c65 = arith.constant 65 : index
    %513 = memref.load %arg7[%c65] : memref<98xf32, #tpu.memory_space<smem>>
    %514 = vector.broadcast %513 : f32 to vector<16x16xf32>
    %515 = arith.mulf %512, %514 : vector<16x16xf32>
    %516 = arith.addf %510, %515 : vector<16x16xf32>
    %c0_346 = arith.constant 0 : index
    %c4_347 = arith.constant 4 : index
    %c5_348 = arith.constant 5 : index
    %517 = vector.load %arg12[%c0_346, %c4_347, %c5_348] : memref<2x22x22xf32, #tpu.memory_space<vmem>>, vector<1x16x16xf32>
    %518 = vector.shape_cast %517 : vector<1x16x16xf32> to vector<16x16xf32>
    %c66 = arith.constant 66 : index
    %519 = memref.load %arg7[%c66] : memref<98xf32, #tpu.memory_space<smem>>
    %520 = vector.broadcast %519 : f32 to vector<16x16xf32>
    %521 = arith.mulf %518, %520 : vector<16x16xf32>
    %522 = arith.addf %516, %521 : vector<16x16xf32>
    %c1_349 = arith.constant 1 : index
    %c4_350 = arith.constant 4 : index
    %c5_351 = arith.constant 5 : index
    %523 = vector.load %arg12[%c1_349, %c4_350, %c5_351] : memref<2x22x22xf32, #tpu.memory_space<vmem>>, vector<1x16x16xf32>
    %524 = vector.shape_cast %523 : vector<1x16x16xf32> to vector<16x16xf32>
    %c67 = arith.constant 67 : index
    %525 = memref.load %arg7[%c67] : memref<98xf32, #tpu.memory_space<smem>>
    %526 = vector.broadcast %525 : f32 to vector<16x16xf32>
    %527 = arith.mulf %524, %526 : vector<16x16xf32>
    %528 = arith.addf %522, %527 : vector<16x16xf32>
    %c0_352 = arith.constant 0 : index
    %c4_353 = arith.constant 4 : index
    %c6_354 = arith.constant 6 : index
    %529 = vector.load %arg12[%c0_352, %c4_353, %c6_354] : memref<2x22x22xf32, #tpu.memory_space<vmem>>, vector<1x16x16xf32>
    %530 = vector.shape_cast %529 : vector<1x16x16xf32> to vector<16x16xf32>
    %c68 = arith.constant 68 : index
    %531 = memref.load %arg7[%c68] : memref<98xf32, #tpu.memory_space<smem>>
    %532 = vector.broadcast %531 : f32 to vector<16x16xf32>
    %533 = arith.mulf %530, %532 : vector<16x16xf32>
    %534 = arith.addf %528, %533 : vector<16x16xf32>
    %c1_355 = arith.constant 1 : index
    %c4_356 = arith.constant 4 : index
    %c6_357 = arith.constant 6 : index
    %535 = vector.load %arg12[%c1_355, %c4_356, %c6_357] : memref<2x22x22xf32, #tpu.memory_space<vmem>>, vector<1x16x16xf32>
    %536 = vector.shape_cast %535 : vector<1x16x16xf32> to vector<16x16xf32>
    %c69 = arith.constant 69 : index
    %537 = memref.load %arg7[%c69] : memref<98xf32, #tpu.memory_space<smem>>
    %538 = vector.broadcast %537 : f32 to vector<16x16xf32>
    %539 = arith.mulf %536, %538 : vector<16x16xf32>
    %540 = arith.addf %534, %539 : vector<16x16xf32>
    %c0_358 = arith.constant 0 : index
    %c5_359 = arith.constant 5 : index
    %c0_360 = arith.constant 0 : index
    %541 = vector.load %arg12[%c0_358, %c5_359, %c0_360] : memref<2x22x22xf32, #tpu.memory_space<vmem>>, vector<1x16x16xf32>
    %542 = vector.shape_cast %541 : vector<1x16x16xf32> to vector<16x16xf32>
    %c70 = arith.constant 70 : index
    %543 = memref.load %arg7[%c70] : memref<98xf32, #tpu.memory_space<smem>>
    %544 = vector.broadcast %543 : f32 to vector<16x16xf32>
    %545 = arith.mulf %542, %544 : vector<16x16xf32>
    %546 = arith.addf %540, %545 : vector<16x16xf32>
    %c1_361 = arith.constant 1 : index
    %c5_362 = arith.constant 5 : index
    %c0_363 = arith.constant 0 : index
    %547 = vector.load %arg12[%c1_361, %c5_362, %c0_363] : memref<2x22x22xf32, #tpu.memory_space<vmem>>, vector<1x16x16xf32>
    %548 = vector.shape_cast %547 : vector<1x16x16xf32> to vector<16x16xf32>
    %c71 = arith.constant 71 : index
    %549 = memref.load %arg7[%c71] : memref<98xf32, #tpu.memory_space<smem>>
    %550 = vector.broadcast %549 : f32 to vector<16x16xf32>
    %551 = arith.mulf %548, %550 : vector<16x16xf32>
    %552 = arith.addf %546, %551 : vector<16x16xf32>
    %c0_364 = arith.constant 0 : index
    %c5_365 = arith.constant 5 : index
    %c1_366 = arith.constant 1 : index
    %553 = vector.load %arg12[%c0_364, %c5_365, %c1_366] : memref<2x22x22xf32, #tpu.memory_space<vmem>>, vector<1x16x16xf32>
    %554 = vector.shape_cast %553 : vector<1x16x16xf32> to vector<16x16xf32>
    %c72 = arith.constant 72 : index
    %555 = memref.load %arg7[%c72] : memref<98xf32, #tpu.memory_space<smem>>
    %556 = vector.broadcast %555 : f32 to vector<16x16xf32>
    %557 = arith.mulf %554, %556 : vector<16x16xf32>
    %558 = arith.addf %552, %557 : vector<16x16xf32>
    %c1_367 = arith.constant 1 : index
    %c5_368 = arith.constant 5 : index
    %c1_369 = arith.constant 1 : index
    %559 = vector.load %arg12[%c1_367, %c5_368, %c1_369] : memref<2x22x22xf32, #tpu.memory_space<vmem>>, vector<1x16x16xf32>
    %560 = vector.shape_cast %559 : vector<1x16x16xf32> to vector<16x16xf32>
    %c73 = arith.constant 73 : index
    %561 = memref.load %arg7[%c73] : memref<98xf32, #tpu.memory_space<smem>>
    %562 = vector.broadcast %561 : f32 to vector<16x16xf32>
    %563 = arith.mulf %560, %562 : vector<16x16xf32>
    %564 = arith.addf %558, %563 : vector<16x16xf32>
    %c0_370 = arith.constant 0 : index
    %c5_371 = arith.constant 5 : index
    %c2_372 = arith.constant 2 : index
    %565 = vector.load %arg12[%c0_370, %c5_371, %c2_372] : memref<2x22x22xf32, #tpu.memory_space<vmem>>, vector<1x16x16xf32>
    %566 = vector.shape_cast %565 : vector<1x16x16xf32> to vector<16x16xf32>
    %c74 = arith.constant 74 : index
    %567 = memref.load %arg7[%c74] : memref<98xf32, #tpu.memory_space<smem>>
    %568 = vector.broadcast %567 : f32 to vector<16x16xf32>
    %569 = arith.mulf %566, %568 : vector<16x16xf32>
    %570 = arith.addf %564, %569 : vector<16x16xf32>
    %c1_373 = arith.constant 1 : index
    %c5_374 = arith.constant 5 : index
    %c2_375 = arith.constant 2 : index
    %571 = vector.load %arg12[%c1_373, %c5_374, %c2_375] : memref<2x22x22xf32, #tpu.memory_space<vmem>>, vector<1x16x16xf32>
    %572 = vector.shape_cast %571 : vector<1x16x16xf32> to vector<16x16xf32>
    %c75 = arith.constant 75 : index
    %573 = memref.load %arg7[%c75] : memref<98xf32, #tpu.memory_space<smem>>
    %574 = vector.broadcast %573 : f32 to vector<16x16xf32>
    %575 = arith.mulf %572, %574 : vector<16x16xf32>
    %576 = arith.addf %570, %575 : vector<16x16xf32>
    %c0_376 = arith.constant 0 : index
    %c5_377 = arith.constant 5 : index
    %c3_378 = arith.constant 3 : index
    %577 = vector.load %arg12[%c0_376, %c5_377, %c3_378] : memref<2x22x22xf32, #tpu.memory_space<vmem>>, vector<1x16x16xf32>
    %578 = vector.shape_cast %577 : vector<1x16x16xf32> to vector<16x16xf32>
    %c76 = arith.constant 76 : index
    %579 = memref.load %arg7[%c76] : memref<98xf32, #tpu.memory_space<smem>>
    %580 = vector.broadcast %579 : f32 to vector<16x16xf32>
    %581 = arith.mulf %578, %580 : vector<16x16xf32>
    %582 = arith.addf %576, %581 : vector<16x16xf32>
    %c1_379 = arith.constant 1 : index
    %c5_380 = arith.constant 5 : index
    %c3_381 = arith.constant 3 : index
    %583 = vector.load %arg12[%c1_379, %c5_380, %c3_381] : memref<2x22x22xf32, #tpu.memory_space<vmem>>, vector<1x16x16xf32>
    %584 = vector.shape_cast %583 : vector<1x16x16xf32> to vector<16x16xf32>
    %c77 = arith.constant 77 : index
    %585 = memref.load %arg7[%c77] : memref<98xf32, #tpu.memory_space<smem>>
    %586 = vector.broadcast %585 : f32 to vector<16x16xf32>
    %587 = arith.mulf %584, %586 : vector<16x16xf32>
    %588 = arith.addf %582, %587 : vector<16x16xf32>
    %c0_382 = arith.constant 0 : index
    %c5_383 = arith.constant 5 : index
    %c4_384 = arith.constant 4 : index
    %589 = vector.load %arg12[%c0_382, %c5_383, %c4_384] : memref<2x22x22xf32, #tpu.memory_space<vmem>>, vector<1x16x16xf32>
    %590 = vector.shape_cast %589 : vector<1x16x16xf32> to vector<16x16xf32>
    %c78 = arith.constant 78 : index
    %591 = memref.load %arg7[%c78] : memref<98xf32, #tpu.memory_space<smem>>
    %592 = vector.broadcast %591 : f32 to vector<16x16xf32>
    %593 = arith.mulf %590, %592 : vector<16x16xf32>
    %594 = arith.addf %588, %593 : vector<16x16xf32>
    %c1_385 = arith.constant 1 : index
    %c5_386 = arith.constant 5 : index
    %c4_387 = arith.constant 4 : index
    %595 = vector.load %arg12[%c1_385, %c5_386, %c4_387] : memref<2x22x22xf32, #tpu.memory_space<vmem>>, vector<1x16x16xf32>
    %596 = vector.shape_cast %595 : vector<1x16x16xf32> to vector<16x16xf32>
    %c79 = arith.constant 79 : index
    %597 = memref.load %arg7[%c79] : memref<98xf32, #tpu.memory_space<smem>>
    %598 = vector.broadcast %597 : f32 to vector<16x16xf32>
    %599 = arith.mulf %596, %598 : vector<16x16xf32>
    %600 = arith.addf %594, %599 : vector<16x16xf32>
    %c0_388 = arith.constant 0 : index
    %c5_389 = arith.constant 5 : index
    %c5_390 = arith.constant 5 : index
    %601 = vector.load %arg12[%c0_388, %c5_389, %c5_390] : memref<2x22x22xf32, #tpu.memory_space<vmem>>, vector<1x16x16xf32>
    %602 = vector.shape_cast %601 : vector<1x16x16xf32> to vector<16x16xf32>
    %c80 = arith.constant 80 : index
    %603 = memref.load %arg7[%c80] : memref<98xf32, #tpu.memory_space<smem>>
    %604 = vector.broadcast %603 : f32 to vector<16x16xf32>
    %605 = arith.mulf %602, %604 : vector<16x16xf32>
    %606 = arith.addf %600, %605 : vector<16x16xf32>
    %c1_391 = arith.constant 1 : index
    %c5_392 = arith.constant 5 : index
    %c5_393 = arith.constant 5 : index
    %607 = vector.load %arg12[%c1_391, %c5_392, %c5_393] : memref<2x22x22xf32, #tpu.memory_space<vmem>>, vector<1x16x16xf32>
    %608 = vector.shape_cast %607 : vector<1x16x16xf32> to vector<16x16xf32>
    %c81 = arith.constant 81 : index
    %609 = memref.load %arg7[%c81] : memref<98xf32, #tpu.memory_space<smem>>
    %610 = vector.broadcast %609 : f32 to vector<16x16xf32>
    %611 = arith.mulf %608, %610 : vector<16x16xf32>
    %612 = arith.addf %606, %611 : vector<16x16xf32>
    %c0_394 = arith.constant 0 : index
    %c5_395 = arith.constant 5 : index
    %c6_396 = arith.constant 6 : index
    %613 = vector.load %arg12[%c0_394, %c5_395, %c6_396] : memref<2x22x22xf32, #tpu.memory_space<vmem>>, vector<1x16x16xf32>
    %614 = vector.shape_cast %613 : vector<1x16x16xf32> to vector<16x16xf32>
    %c82 = arith.constant 82 : index
    %615 = memref.load %arg7[%c82] : memref<98xf32, #tpu.memory_space<smem>>
    %616 = vector.broadcast %615 : f32 to vector<16x16xf32>
    %617 = arith.mulf %614, %616 : vector<16x16xf32>
    %618 = arith.addf %612, %617 : vector<16x16xf32>
    %c1_397 = arith.constant 1 : index
    %c5_398 = arith.constant 5 : index
    %c6_399 = arith.constant 6 : index
    %619 = vector.load %arg12[%c1_397, %c5_398, %c6_399] : memref<2x22x22xf32, #tpu.memory_space<vmem>>, vector<1x16x16xf32>
    %620 = vector.shape_cast %619 : vector<1x16x16xf32> to vector<16x16xf32>
    %c83 = arith.constant 83 : index
    %621 = memref.load %arg7[%c83] : memref<98xf32, #tpu.memory_space<smem>>
    %622 = vector.broadcast %621 : f32 to vector<16x16xf32>
    %623 = arith.mulf %620, %622 : vector<16x16xf32>
    %624 = arith.addf %618, %623 : vector<16x16xf32>
    %c0_400 = arith.constant 0 : index
    %c6_401 = arith.constant 6 : index
    %c0_402 = arith.constant 0 : index
    %625 = vector.load %arg12[%c0_400, %c6_401, %c0_402] : memref<2x22x22xf32, #tpu.memory_space<vmem>>, vector<1x16x16xf32>
    %626 = vector.shape_cast %625 : vector<1x16x16xf32> to vector<16x16xf32>
    %c84 = arith.constant 84 : index
    %627 = memref.load %arg7[%c84] : memref<98xf32, #tpu.memory_space<smem>>
    %628 = vector.broadcast %627 : f32 to vector<16x16xf32>
    %629 = arith.mulf %626, %628 : vector<16x16xf32>
    %630 = arith.addf %624, %629 : vector<16x16xf32>
    %c1_403 = arith.constant 1 : index
    %c6_404 = arith.constant 6 : index
    %c0_405 = arith.constant 0 : index
    %631 = vector.load %arg12[%c1_403, %c6_404, %c0_405] : memref<2x22x22xf32, #tpu.memory_space<vmem>>, vector<1x16x16xf32>
    %632 = vector.shape_cast %631 : vector<1x16x16xf32> to vector<16x16xf32>
    %c85 = arith.constant 85 : index
    %633 = memref.load %arg7[%c85] : memref<98xf32, #tpu.memory_space<smem>>
    %634 = vector.broadcast %633 : f32 to vector<16x16xf32>
    %635 = arith.mulf %632, %634 : vector<16x16xf32>
    %636 = arith.addf %630, %635 : vector<16x16xf32>
    %c0_406 = arith.constant 0 : index
    %c6_407 = arith.constant 6 : index
    %c1_408 = arith.constant 1 : index
    %637 = vector.load %arg12[%c0_406, %c6_407, %c1_408] : memref<2x22x22xf32, #tpu.memory_space<vmem>>, vector<1x16x16xf32>
    %638 = vector.shape_cast %637 : vector<1x16x16xf32> to vector<16x16xf32>
    %c86 = arith.constant 86 : index
    %639 = memref.load %arg7[%c86] : memref<98xf32, #tpu.memory_space<smem>>
    %640 = vector.broadcast %639 : f32 to vector<16x16xf32>
    %641 = arith.mulf %638, %640 : vector<16x16xf32>
    %642 = arith.addf %636, %641 : vector<16x16xf32>
    %c1_409 = arith.constant 1 : index
    %c6_410 = arith.constant 6 : index
    %c1_411 = arith.constant 1 : index
    %643 = vector.load %arg12[%c1_409, %c6_410, %c1_411] : memref<2x22x22xf32, #tpu.memory_space<vmem>>, vector<1x16x16xf32>
    %644 = vector.shape_cast %643 : vector<1x16x16xf32> to vector<16x16xf32>
    %c87 = arith.constant 87 : index
    %645 = memref.load %arg7[%c87] : memref<98xf32, #tpu.memory_space<smem>>
    %646 = vector.broadcast %645 : f32 to vector<16x16xf32>
    %647 = arith.mulf %644, %646 : vector<16x16xf32>
    %648 = arith.addf %642, %647 : vector<16x16xf32>
    %c0_412 = arith.constant 0 : index
    %c6_413 = arith.constant 6 : index
    %c2_414 = arith.constant 2 : index
    %649 = vector.load %arg12[%c0_412, %c6_413, %c2_414] : memref<2x22x22xf32, #tpu.memory_space<vmem>>, vector<1x16x16xf32>
    %650 = vector.shape_cast %649 : vector<1x16x16xf32> to vector<16x16xf32>
    %c88 = arith.constant 88 : index
    %651 = memref.load %arg7[%c88] : memref<98xf32, #tpu.memory_space<smem>>
    %652 = vector.broadcast %651 : f32 to vector<16x16xf32>
    %653 = arith.mulf %650, %652 : vector<16x16xf32>
    %654 = arith.addf %648, %653 : vector<16x16xf32>
    %c1_415 = arith.constant 1 : index
    %c6_416 = arith.constant 6 : index
    %c2_417 = arith.constant 2 : index
    %655 = vector.load %arg12[%c1_415, %c6_416, %c2_417] : memref<2x22x22xf32, #tpu.memory_space<vmem>>, vector<1x16x16xf32>
    %656 = vector.shape_cast %655 : vector<1x16x16xf32> to vector<16x16xf32>
    %c89 = arith.constant 89 : index
    %657 = memref.load %arg7[%c89] : memref<98xf32, #tpu.memory_space<smem>>
    %658 = vector.broadcast %657 : f32 to vector<16x16xf32>
    %659 = arith.mulf %656, %658 : vector<16x16xf32>
    %660 = arith.addf %654, %659 : vector<16x16xf32>
    %c0_418 = arith.constant 0 : index
    %c6_419 = arith.constant 6 : index
    %c3_420 = arith.constant 3 : index
    %661 = vector.load %arg12[%c0_418, %c6_419, %c3_420] : memref<2x22x22xf32, #tpu.memory_space<vmem>>, vector<1x16x16xf32>
    %662 = vector.shape_cast %661 : vector<1x16x16xf32> to vector<16x16xf32>
    %c90 = arith.constant 90 : index
    %663 = memref.load %arg7[%c90] : memref<98xf32, #tpu.memory_space<smem>>
    %664 = vector.broadcast %663 : f32 to vector<16x16xf32>
    %665 = arith.mulf %662, %664 : vector<16x16xf32>
    %666 = arith.addf %660, %665 : vector<16x16xf32>
    %c1_421 = arith.constant 1 : index
    %c6_422 = arith.constant 6 : index
    %c3_423 = arith.constant 3 : index
    %667 = vector.load %arg12[%c1_421, %c6_422, %c3_423] : memref<2x22x22xf32, #tpu.memory_space<vmem>>, vector<1x16x16xf32>
    %668 = vector.shape_cast %667 : vector<1x16x16xf32> to vector<16x16xf32>
    %c91 = arith.constant 91 : index
    %669 = memref.load %arg7[%c91] : memref<98xf32, #tpu.memory_space<smem>>
    %670 = vector.broadcast %669 : f32 to vector<16x16xf32>
    %671 = arith.mulf %668, %670 : vector<16x16xf32>
    %672 = arith.addf %666, %671 : vector<16x16xf32>
    %c0_424 = arith.constant 0 : index
    %c6_425 = arith.constant 6 : index
    %c4_426 = arith.constant 4 : index
    %673 = vector.load %arg12[%c0_424, %c6_425, %c4_426] : memref<2x22x22xf32, #tpu.memory_space<vmem>>, vector<1x16x16xf32>
    %674 = vector.shape_cast %673 : vector<1x16x16xf32> to vector<16x16xf32>
    %c92 = arith.constant 92 : index
    %675 = memref.load %arg7[%c92] : memref<98xf32, #tpu.memory_space<smem>>
    %676 = vector.broadcast %675 : f32 to vector<16x16xf32>
    %677 = arith.mulf %674, %676 : vector<16x16xf32>
    %678 = arith.addf %672, %677 : vector<16x16xf32>
    %c1_427 = arith.constant 1 : index
    %c6_428 = arith.constant 6 : index
    %c4_429 = arith.constant 4 : index
    %679 = vector.load %arg12[%c1_427, %c6_428, %c4_429] : memref<2x22x22xf32, #tpu.memory_space<vmem>>, vector<1x16x16xf32>
    %680 = vector.shape_cast %679 : vector<1x16x16xf32> to vector<16x16xf32>
    %c93 = arith.constant 93 : index
    %681 = memref.load %arg7[%c93] : memref<98xf32, #tpu.memory_space<smem>>
    %682 = vector.broadcast %681 : f32 to vector<16x16xf32>
    %683 = arith.mulf %680, %682 : vector<16x16xf32>
    %684 = arith.addf %678, %683 : vector<16x16xf32>
    %c0_430 = arith.constant 0 : index
    %c6_431 = arith.constant 6 : index
    %c5_432 = arith.constant 5 : index
    %685 = vector.load %arg12[%c0_430, %c6_431, %c5_432] : memref<2x22x22xf32, #tpu.memory_space<vmem>>, vector<1x16x16xf32>
    %686 = vector.shape_cast %685 : vector<1x16x16xf32> to vector<16x16xf32>
    %c94 = arith.constant 94 : index
    %687 = memref.load %arg7[%c94] : memref<98xf32, #tpu.memory_space<smem>>
    %688 = vector.broadcast %687 : f32 to vector<16x16xf32>
    %689 = arith.mulf %686, %688 : vector<16x16xf32>
    %690 = arith.addf %684, %689 : vector<16x16xf32>
    %c1_433 = arith.constant 1 : index
    %c6_434 = arith.constant 6 : index
    %c5_435 = arith.constant 5 : index
    %691 = vector.load %arg12[%c1_433, %c6_434, %c5_435] : memref<2x22x22xf32, #tpu.memory_space<vmem>>, vector<1x16x16xf32>
    %692 = vector.shape_cast %691 : vector<1x16x16xf32> to vector<16x16xf32>
    %c95 = arith.constant 95 : index
    %693 = memref.load %arg7[%c95] : memref<98xf32, #tpu.memory_space<smem>>
    %694 = vector.broadcast %693 : f32 to vector<16x16xf32>
    %695 = arith.mulf %692, %694 : vector<16x16xf32>
    %696 = arith.addf %690, %695 : vector<16x16xf32>
    %c0_436 = arith.constant 0 : index
    %c6_437 = arith.constant 6 : index
    %c6_438 = arith.constant 6 : index
    %697 = vector.load %arg12[%c0_436, %c6_437, %c6_438] : memref<2x22x22xf32, #tpu.memory_space<vmem>>, vector<1x16x16xf32>
    %698 = vector.shape_cast %697 : vector<1x16x16xf32> to vector<16x16xf32>
    %c96_439 = arith.constant 96 : index
    %699 = memref.load %arg7[%c96_439] : memref<98xf32, #tpu.memory_space<smem>>
    %700 = vector.broadcast %699 : f32 to vector<16x16xf32>
    %701 = arith.mulf %698, %700 : vector<16x16xf32>
    %702 = arith.addf %696, %701 : vector<16x16xf32>
    %c1_440 = arith.constant 1 : index
    %c6_441 = arith.constant 6 : index
    %c6_442 = arith.constant 6 : index
    %703 = vector.load %arg12[%c1_440, %c6_441, %c6_442] : memref<2x22x22xf32, #tpu.memory_space<vmem>>, vector<1x16x16xf32>
    %704 = vector.shape_cast %703 : vector<1x16x16xf32> to vector<16x16xf32>
    %c97 = arith.constant 97 : index
    %705 = memref.load %arg7[%c97] : memref<98xf32, #tpu.memory_space<smem>>
    %706 = vector.broadcast %705 : f32 to vector<16x16xf32>
    %707 = arith.mulf %704, %706 : vector<16x16xf32>
    %708 = arith.addf %702, %707 : vector<16x16xf32>
    %c0_443 = arith.constant 0 : index
    %709 = memref.load %arg8[%c0_443] : memref<2xf32, #tpu.memory_space<smem>>
    %710 = vector.broadcast %709 : f32 to vector<16x16xf32>
    %711 = arith.mulf %708, %710 : vector<16x16xf32>
    %c1_444 = arith.constant 1 : index
    %712 = memref.load %arg8[%c1_444] : memref<2xf32, #tpu.memory_space<smem>>
    %713 = vector.broadcast %712 : f32 to vector<16x16xf32>
    %714 = arith.addf %711, %713 : vector<16x16xf32>
    %cst_445 = arith.constant 0.000000e+00 : f32
    %715 = vector.broadcast %cst_445 : f32 to vector<16x16xf32>
    %716 = arith.maximumf %714, %715 : vector<16x16xf32>
    %717 = arith.negf %716 : vector<16x16xf32>
    %718 = math.exp %717 : vector<16x16xf32>
    %cst_446 = arith.constant 1.000000e+00 : f32
    %719 = vector.broadcast %cst_446 : f32 to vector<16x16xf32>
    %720 = arith.addf %719, %718 : vector<16x16xf32>
    %721 = arith.divf %719, %720 : vector<16x16xf32>
    %722 = vector.shape_cast %721 : vector<16x16xf32> to vector<16x16x1xf32>
    %723 = vector.broadcast %722 : vector<16x16x1xf32> to vector<16x16x32xf32>
    %724 = arith.mulf %109, %723 : vector<16x16x32xf32>
    %725 = arith.addf %724, %5 : vector<16x16x32xf32>
    %cst_447 = arith.constant 0.000000e+00 : f32
    %726 = vector.broadcast %cst_447 : f32 to vector<16x16x32xf32>
    %727 = arith.maximumf %725, %726 : vector<16x16x32xf32>
    %c0_448 = arith.constant 0 : index
    %c0_449 = arith.constant 0 : index
    %c0_450 = arith.constant 0 : index
    %c0_451 = arith.constant 0 : index
    %728 = vector.load %arg9[%c0_448, %c0_449, %c0_450, %c0_451] : memref<1x16x16x32xf32, #tpu.memory_space<vmem>>, vector<1x16x16x32xf32>
    %729 = vector.shape_cast %728 : vector<1x16x16x32xf32> to vector<16x16x32xf32>
    %730 = vector.shape_cast %727 : vector<16x16x32xf32> to vector<1x16x16x32xf32>
    tpu.vector_store %arg9[%c0_448, %c0_449, %c0_450, %c0_451], %730 {strides = array<i32>} : memref<1x16x16x32xf32, #tpu.memory_space<vmem>>, vector<1x16x16x32xf32>,
    return
  }
  func.func @transform_0(%arg0: i32) -> (i32, i32, i32, i32) {
    %c0_i32 = arith.constant 0 : i32
    %c0_i32_0 = arith.constant 0 : i32
    %c0_i32_1 = arith.constant 0 : i32
    %c0_i32_2 = arith.constant 0 : i32
    return %arg0, %c0_i32, %c0_i32_0, %c0_i32_1 : i32, i32, i32, i32
  }
  func.func @transform_1(%arg0: i32) -> (i32, i32) {
    %c0_i32 = arith.constant 0 : i32
    %c0_i32_0 = arith.constant 0 : i32
    %c0_i32_1 = arith.constant 0 : i32
    return %c0_i32, %c0_i32_0 : i32, i32
  }
  func.func @transform_2(%arg0: i32) -> (i32, i32) {
    %c0_i32 = arith.constant 0 : i32
    %c0_i32_0 = arith.constant 0 : i32
    %c0_i32_1 = arith.constant 0 : i32
    return %c0_i32, %c0_i32_0 : i32, i32
  }
  func.func @transform_3(%arg0: i32) -> (i32, i32) {
    %c0_i32 = arith.constant 0 : i32
    %c0_i32_0 = arith.constant 0 : i32
    %c0_i32_1 = arith.constant 0 : i32
    return %c0_i32, %c0_i32_0 : i32, i32
  }
  func.func @transform_4(%arg0: i32) -> (i32, i32) {
    %c0_i32 = arith.constant 0 : i32
    %c0_i32_0 = arith.constant 0 : i32
    %c0_i32_1 = arith.constant 0 : i32
    return %c0_i32, %c0_i32_0 : i32, i32
  }
  func.func @transform_5(%arg0: i32) -> (i32, i32) {
    %c0_i32 = arith.constant 0 : i32
    %c0_i32_0 = arith.constant 0 : i32
    %c0_i32_1 = arith.constant 0 : i32
    return %c0_i32, %c0_i32_0 : i32, i32
  }
  func.func @transform_6(%arg0: i32) -> i32 {
    %c0_i32 = arith.constant 0 : i32
    %c0_i32_0 = arith.constant 0 : i32
    return %c0_i32 : i32
  }
  func.func @transform_7(%arg0: i32) -> i32 {
    %c0_i32 = arith.constant 0 : i32
    %c0_i32_0 = arith.constant 0 : i32
    return %c0_i32 : i32
  }
  func.func @transform_8(%arg0: i32) -> (i32, i32, i32, i32) {
    %c0_i32 = arith.constant 0 : i32
    %c0_i32_0 = arith.constant 0 : i32
    %c0_i32_1 = arith.constant 0 : i32
    %c0_i32_2 = arith.constant 0 : i32
    return %arg0, %c0_i32, %c0_i32_0, %c0_i32_1 : i32, i32, i32, i32
  }
}

</mosaic_0001>

<bundles_post_ra>
// kernel: _lambda_.1
= control target key start
LH: loop header
LB: loop body
LE: loop exit
PB: predicated region body
PF: predicated region fallthrough
CT: control target
= control target key end

     0   :  { %s12261_s0 = inlined_call_operand.hbm [shape: f32[2,16,16,32], index: 0, kind: input, shape index: {}]   ;;  %s12262_s1 = inlined_call_operand.hbm [shape: f32[288,32], index: 1, kind: input, shape index: {}]   ;;  %s12263_s2 = inlined_call_operand.hbm [shape: f32[288,32], index: 2, kind: input, shape index: {}]   ;;  %s12264_s3 = inlined_call_operand.hbm [shape: f32[4,32], index: 3, kind: input, shape index: {}]   ;;  %s12265_s4 = inlined_call_operand.hbm [shape: f32[32,2], index: 4, kind: input, shape index: {}]   ;;  %s12266_s5 = inlined_call_operand.vmem [shape: f32[2,32], index: 5, kind: input, shape index: {}]   ;;  %s12267_s6 = inlined_call_operand.vmem [shape: f32[98], index: 6, kind: input, shape index: {}]   ;;  %s12268_s7 = inlined_call_operand.vmem [shape: f32[2], index: 7, kind: input, shape index: {}]   ;;  %s12269_s8 = inlined_call_operand.hbm [shape: f32[2,16,16,32], index: 8, kind: output, shape index: {}]  }
   0x1   :  { %12366 = sst [smem:[#allocation86_spill]] %s12262_s1 }
   0x2   :  { %12367 = sst [smem:[#allocation87_spill]] %s12263_s2 }
   0x3   :  { %12368 = sst [smem:[#allocation88_spill]] %s12264_s3 }
   0x4   :  { %13 = vsyncpa [#allocation6], 0 }
   0x5   :  { %15 = vsyncpa [#allocation6 + $0x1], 0 }
   0x6   :  { %16 = vsyncpa [#allocation10], 0 }
   0x7   :  { %17 = vsyncpa [#allocation13], 0 }
   0x8   :  { %18 = vsyncpa [#allocation8], 0 }
   0x9   :  { %19 = vsyncpa [#allocation17], 0 }
   0xa   :  { %20 = vsyncpa [#allocation7], 0 }
   0xb   :  { %22 = vsyncpa [#allocation7 + $0x1], 0  ;;  %s7855_s27 = smov 0   ;;  %s7857_s28 = smov 0  }
   0xc   :  { %s7859_s29 = smov 0   ;;  %s7861_s30 = smov 0  }
   0xd LB: > { %s12369_s1 = sld [smem:[#allocation86_spill]]  ;;  %s7879_s12 = sadd.s32 4294967295, %s7786_s30   ;;  %s7786_s30 = sphi %s7861_s30, %s12598_s30   ;;  %s7782_s29 = sphi %s7859_s29, %s12597_s29   ;;  %s7778_s28 = sphi %s7857_s28, %s12596_s28   ;;  %s7774_s27 = sphi %s7855_s27, %s12595_s27  }
   0xe   : > { %p7137_p0 = scmp.ge.s32.totalorder %s7786_s30, 1  ;;  %p49_p1 = scmp.eq.s32.totalorder %s7879_s12, 0 }
   0xf   : > { %p232_p2 = scmp.lt.s32.totalorder %s7786_s30, 3  ;;  %s7788_s14 = smov [#allocation9]  }
  0x10   : > { %s245_s15 = sshll.u32 %s7788_s14, 4  ;;  %s12371_s3 = sld [smem:[#allocation88_spill]]  ;;  %s246_s15 = int_to_ptr.vmem [resolvable:$true] %s245_s15 }
  0x11   : > { %p7884_p3 = pnand %p7137_p0, %p232_p2  ;;  %s12373_s2 = sld [smem:[#allocation87_spill]] }
  0x12   : > { %s7789_s23 = smov [#allocation12]   ;;  %s12270_s25 = smov 128  }
  0x13   : > { %s243_s11 = sshll.u32 %s12369_s1, 4  ;;  %p7387_p4 = pneg %p7884_p3  ;;  %s244_s11 = int_to_ptr.hbm [resolvable:$true] %s243_s11 }
  0x14   : > { %s274_s24 = sshll.u32 %s7789_s23, 4  ;;  %s12271_s26 = smov 8   ;;  %s275_s24 = int_to_ptr.vmem [resolvable:$true] %s274_s24 }
  0x15   : > { %p7896_p6 = pnand %p7387_p4, %p49_p1  ;;  %s283_s14 = sshll.u32 %s12265_s4, 4  ;;  %s284_s14 = int_to_ptr.hbm [resolvable:$true] %s283_s14 }
  0x16   : > { %s272_s18 = sshll.u32 %s12371_s3, 4  ;;  %s7792_s16 = smov [#allocation11]   ;;  %s273_s18 = int_to_ptr.hbm [resolvable:$true] %s272_s18 }
  0x17   : > { %s257_s22 = sshll.u32 %s12373_s2, 4  ;;  %s259_s17 = sshll.u32 %s7792_s16, 4  ;;  %s258_s22 = int_to_ptr.hbm [resolvable:$true] %s257_s22  ;;  %s260_s17 = int_to_ptr.vmem [resolvable:$true] %s259_s17 }
  0x18   : > { %7390 = dma.hbm_to_vmem [thread:$0]  (!%p7896_p6), %s244_s11, 4608, %s246_s15, [#allocation10], %s12270_s25, %s12270_s25, %s12271_s26  }
  0x19   : > { %7396 = dma.hbm_to_vmem [thread:$0]  (!%p7896_p6), %s273_s18, 64, %s275_s24, [#allocation13]  }
  0x1a   : > { %7393 = dma.hbm_to_vmem [thread:$0]  (!%p7896_p6), %s258_s22, 4608, %s260_s17, [#allocation10], %s12270_s25, %s12270_s25, %s12271_s26  }
  0x1b   : > { %s7793_s11 = smov [#allocation14]   ;;  %s301_s21 = sshll.u32 %s12267_s6, 4  ;;  %s302_s21 = int_to_ptr.vmem [resolvable:$true] %s301_s21 }
  0x1c   : > { %s285_s15 = sshll.u32 %s7793_s11, 4  ;;  %s311_s24 = sshll.u32 %s12268_s7, 4  ;;  %s286_s15 = int_to_ptr.vmem [resolvable:$true] %s285_s15  ;;  %s312_s24 = int_to_ptr.vmem [resolvable:$true] %s311_s24 }
  0x1d   : > { %7399 = dma.hbm_to_vmem [thread:$0]  (!%p7896_p6), %s284_s14, 512, %s286_s15, [#allocation13], %s12270_s25, %s12270_s25, %s12271_s26  }
  0x1e   : > { %s7794_s9 = smov [#allocation15]   ;;  %s7795_s10 = smov [#allocation16]  }
  0x1f   : > { %7402 = dma.vmem_to_smem (!%p7896_p6), %s302_s21, 16, %s7794_s9, [#allocation8]  }
  0x20   : > { %7405 = dma.vmem_to_smem (!%p7896_p6), %s312_s24, 16, %s7795_s10, [#allocation17]  }
  0x21   : > { %s7136_s16 = sadd.s32 4294967294, %s7786_s30   ;;  %s7935_s17 = sadd.s32 1, %s7786_s30  }
  0x22   : > { %s32_s14 = ssub.s32 %s7786_s30, %s7935_s17  ;;  %s35_s11 = sadd.s32 1, %s7782_s29 }
  0x23   : > { %p33_p7 = scmp.eq.s32.totalorder %s32_s14, 0  ;;  %p42_p8 = scmp.ne.s32.totalorder %s7782_s29, %s7778_s28 }
  0x24   : > { %p43_p9 = scmp.eq.s32.totalorder %s7786_s30, 0  ;;  %p48_p10 = scmp.ne.s32.totalorder %s7778_s28, %s7774_s27 }
  0x25   : > { %s7946_s15 = scalar_select %p33_p7, %s7782_s29, %s35_s11  }
  0x26   : > { %p7948_p11 = por %p43_p9, %p42_p8  ;;  %p7954_p12 = por %p49_p1, %p48_p10 }
  0x27   : > { %p219_p13 = scmp.eq.s32.totalorder %s7879_s12, 1  ;;  %p225_p0 = scmp.eq.s32.totalorder %s7136_s16, 1 }
  0x28   : > { %p7420_p2 = scmp.lt.s32.totalorder %s7786_s30, 2  ;;  %s322_s20 = sand.u32 1, %s7782_s29  }
  0x29   : > { %p7961_p4 = por %p219_p13, %p42_p8  ;;  %p7965_p6 = por %p225_p0, %p48_p10 }
  0x2a   : > { %s7145_s23 = sshll.u32 %s322_s20, 8  ;;  %s7333_s24 = sshll.u32 %s7786_s30, 8 }
  0x2b   : > { %s331_s14 = scalar_lea.hbm %s12261_s0, %s7333_s24  ;;  %s326_s11 = scalar_lea.vmem [#allocation5], %s7145_s23 }
  0x2c   : > { %s334_s25 = sshll.u32 %s326_s11, 4  ;;  %s332_s26 = sshll.u32 %s331_s14, 4  ;;  %s335_s25 = int_to_ptr.vmem [resolvable:$true] %s334_s25  ;;  %s333_s26 = int_to_ptr.hbm [resolvable:$true] %s332_s26 }
  0x2d   : > { %p7975_p7 = pnand %p7420_p2, %p7948_p11  ;;  %s323_s1 = scalar_lea.sflag [#allocation6], %s322_s20 }
  0x2e   : > { %s7674_s2 = sshra.s32 %s333_s26, 4  ;;  %s7681_s9 = scalar_lea.hbm %s12261_s0, 512  ;;  %s7675_s2 = int_to_ptr.hbm [resolvable:$true] %s7674_s2 }
  0x2f   : > { %s7676_s3 = scalar_lea.hbm %s7675_s2, 256  ;;  %p7678_p9 = pneg %p7975_p7 }
  0x30   : > { %p7677_p8 = scmp.ne.s32.totalorder %s7675_s2, %s7676_s3  ;;  %p7682_p11 = scmp.lt.s32.totalorder %s7675_s2, %s12261_s0 }
  0x31   : > { %p7683_p0 = scmp.lt.s32.totalorder %s7681_s9, %s7676_s3 }
  0x32   : > { %p7679_p10 = pnand %p7678_p9, %p7677_p8 }
  0x33   : > { %p7684_p2 = por %p7683_p0, %p7682_p11 }
  0x34   : > { %p7680_p13 = pneg %p7679_p10 }
  0x36   : > { %p7685_p5 = pnand %p7684_p2, %p7680_p13 }
  0x38   : > { %7688 = shalt.err (!%p7685_p5)
}
  0x39   : > { %s12379_s20 = smov 8   ;;  %s12380_s14 = smov 128  }
  0x3a   : > { %7409 = dma.hbm_to_vmem [thread:$0]  (!%p7975_p7), %s333_s26, 4096, %s335_s25, %s323_s1, %s12380_s14, %s12380_s14, %s12379_s20  }
  0x3b   : > { %346 = sbr.rel (%p7884_p3) target bundleno = 3180 (0xc6c), region = 52 }
  0x40   : > { %s7995_s11 = sand.u32 1, %s7778_s28  }
  0x41   : > { %s7149_s2 = sshll.u32 %s7995_s11, 8  ;;  %s349_s3 = scalar_lea.sflag [#allocation6], %s7995_s11 }
  0x42   : > { %s8001_s23 = scalar_lea.vmem [#allocation5], %s7149_s2 }
  0x43   : > { %7749 = dma.done.wait (%p7954_p12), %s349_s3, 4096  }
  0x44   : > { %7751 = vsyncadd (%p7954_p12), %s349_s3, 4294963200 }
  0x45   : > { %7753 = dma.done.wait (%p49_p1), [#allocation10], 9216  }
  0x46   : > { %7755 = vsyncadd (%p49_p1), [#allocation10], 4294958080 }
  0x47   : > { %7757 = dma.done.wait (%p49_p1), [#allocation13], 576  }
  0x48   : > { %7759 = vsyncadd (%p49_p1), [#allocation13], 4294966720 }
  0x49   : > { %7761 = dma.done.wait (%p49_p1), [#allocation8], 16  }
  0x4a   : > { %7763 = vsyncadd (%p49_p1), [#allocation8], 4294967280 }
  0x4b   : > { %7765 = dma.done.wait (%p49_p1), [#allocation17], 16  }
  0x4c   : > { %7767 = vsyncadd (%p49_p1), [#allocation17], 4294967280 }
  0x4d   : > { %388 = sfence }
  0x4e   : > { %vm417_vm0 = vcmask 261120   ;;  %v12272_v0 = vmov 0.0   ;;  %s7797_s1 = smov 32   ;;  %v8093_v2 = vld [vmem:[%s8001_s23] sm:$0xff]  ;;  %vm420_vm1 = vcmask 254976   ;;  %v8136_v5 = vld [vmem:[%s8001_s23 + $0x8] sm:$0xff] }
  0x4f   : > { %418 = vst.msk [vmem:[#allocation2] sm:$0xff] %vm417_vm0, %v12272_v0  ;;  %v8141_v6 = vld [vmem:[%s8001_s23 + $0x20] sm:$0xff]  ;;  %v8146_v7 = vld [vmem:[%s8001_s23 + $0x28] sm:$0xff]  ;;  %v8151_v8 = vld [vmem:[%s8001_s23 + $0x38] sm:$0xff]  ;;  %s7798_s13 = smov 64   ;;  %vm770_vm2 = vcmask 523520  }
  0x50   : > { %419 = vst.msk [vmem:[#allocation2 + $0x8] sm:$0xff] %vm417_vm0, %v12272_v0  ;;  %v8156_v9 = vld [vmem:[%s8001_s23 + $0x40] sm:$0xff]  ;;  %v8161_v10 = vld [vmem:[%s8001_s23 + $0x50] sm:$0xff]  ;;  %v8171_v12 = vld [vmem:[%s8001_s23 + $0x58] sm:$0xff]  ;;  %s7799_s25 = smov 96   ;;  %vm963_vm3 = vcmask 785920  }
  0x51   : > { %422 = vst.msk [vmem:[#allocation2 + $0x18] sm:$0xff] %vm417_vm0, %v12272_v0  ;;  %v8166_v11 = vld [vmem:[%s8001_s23 + $0x10] sm:$0xff]  ;;  %v8176_v13 = vld [vmem:[%s8001_s23 + $0x68] sm:$0xff]  ;;  %v8181_v14 = vld [vmem:[%s8001_s23 + $0x18] sm:$0xff]  ;;  %vm1156_vm4 = vcmask 1048320   ;;  %vm4775_vm5 = vcmask 1041408  }
  0x52   : > { %423 = vst.msk [vmem:[#allocation2 + $0x20] sm:$0xff] %vm417_vm0, %v12272_v0  ;;  %v8186_v16 = vld [vmem:[%s8001_s23 + $0x70] sm:$0xff]  ;;  %v8192_v18 = vld [vmem:[%s8001_s23 + $0x80] sm:$0xff]  ;;  %v8203_v20 = vld [vmem:[%s8001_s23 + $0x88] sm:$0xff]  ;;  %vm4771_vm7 = vcmask 15360   ;;  %vm473_vm12 = vcmask 179200  }
  0x53   : > { %425 = vst.msk [vmem:[#allocation2 + $0x30] sm:$0xff] %vm417_vm0, %v12272_v0  ;;  %v8198_v19 = vld [vmem:[%s8001_s23 + $0x30] sm:$0xff]  ;;  %v8213_v24 = vld [vmem:[%s8001_s23 + $0x98] sm:$0xff]  ;;  %v8218_v25 = vld [vmem:[%s8001_s23 + $0x48] sm:$0xff]  ;;  %vm5008_vm13 = vcmask 154712   ;;  %vm5055_vm14 = vcmask 1041409  }
  0x54   : > { %426 = vst.msk [vmem:[#allocation2 + $0x38] sm:$0xff] %vm417_vm0, %v12272_v0  ;;  %v8221_v26 = vld [vmem:[%s8001_s23 + $0xa0] sm:$0xff]  ;;  %v8231_v30 = vld [vmem:[%s8001_s23 + $0xb0] sm:$0xff]  ;;  %v8239_v32 = vld [vmem:[%s8001_s23 + $0xb8] sm:$0xff]  ;;  %vm5057_vm15 = vcmask 1042434   ;;  %s11098_s16 = sld [smem:[#allocation15 + $0x2]] }
  0x55   : > { %428 = vst.msk [vmem:[#allocation2 + $0x48] sm:$0xff] %vm417_vm0, %v12272_v0  ;;  %v8236_v31 = vld [vmem:[%s8001_s23 + $0x60] sm:$0xff]  ;;  %v8249_v36 = vld [vmem:[%s8001_s23 + $0xc8] sm:$0xff]  ;;  %v8254_v37 = vld [vmem:[%s8001_s23 + $0x78] sm:$0xff]  ;;  %s7801_s24 = smov 127   ;;  %s11136_s9 = sld [smem:[#allocation15 + $0x6]] }
  0x56   : > { %429 = vst.msk [vmem:[#allocation2 + $0x50] sm:$0xff] %vm417_vm0, %v12272_v0  ;;  %v8257_v38 = vld [vmem:[%s8001_s23 + $0xd0] sm:$0xff]  ;;  %v8267_v42 = vld [vmem:[%s8001_s23 + $0xe0] sm:$0xff]  ;;  %v8275_v44 = vld [vmem:[%s8001_s23 + $0xe8] sm:$0xff]  ;;  %s11139_s10 = sld [smem:[#allocation15 + $0x4]]  ;;  %s7803_s20 = smov 125  }
  0x57   : > { %v610_v1 = vld [vmem:[#allocation2 + $0x1] sm:$0xff]  ;;  %431 = vst.msk [vmem:[#allocation2 + $0x60] sm:$0xff] %vm417_vm0, %v12272_v0  ;;  %v8272_v43 = vld [vmem:[%s8001_s23 + $0x90] sm:$0xff]  ;;  %v8301_v56 = vld [vmem:[%s8001_s23 + $0xd8] sm:$0xff]  ;;  %s11142_s18 = sld [smem:[#allocation15 + $0x8]]  ;;  %s7804_s14 = smov 126  }
  0x58   : > { %674 = vrot.lane.b32.xlu0 %v610_v1, %s7797_s1  ;;  %432 = vst.msk [vmem:[#allocation2 + $0x68] sm:$0xff] %vm417_vm0, %v12272_v0  ;;  %v8285_v48 = vld [vmem:[%s8001_s23 + $0xa8] sm:$0xff]  ;;  %v8293_v52 = vld [vmem:[%s8001_s23 + $0xc0] sm:$0xff]  ;;  %s11155_s3 = sld [smem:[#allocation15 + $0xc]]  ;;  %s7807_s26 = smov 123  }
  0x59   : > { %434 = vst.msk [vmem:[#allocation2 + $0x78] sm:$0xff] %vm417_vm0, %v12272_v0  ;;  %v546_v63 = vld [vmem:[#allocation2] sm:$0xff]  ;;  %s11202_s19 = sld [smem:[#allocation15 + $0x14]] }
  0x5a   : > { %435 = vst.msk [vmem:[#allocation2 + $0x80] sm:$0xff] %vm417_vm0, %v12272_v0 }
  0x5b   : > { %437 = vst.msk [vmem:[#allocation2 + $0x90] sm:$0xff] %vm417_vm0, %v12272_v0 }
  0x5c   : > { %438 = vst.msk [vmem:[#allocation2 + $0x98] sm:$0xff] %vm417_vm0, %v12272_v0 }
  0x5d   : > { %440 = vst.msk [vmem:[#allocation2 + $0xa8] sm:$0xff] %vm417_vm0, %v12272_v0 }
  0x5e   : > { %441 = vst.msk [vmem:[#allocation2 + $0xb0] sm:$0xff] %vm417_vm0, %v12272_v0 }
  0x5f   : > { %443 = vst.msk [vmem:[#allocation2 + $0xc0] sm:$0xff] %vm417_vm0, %v12272_v0 }
  0x60   : > { %444 = vst.msk [vmem:[#allocation2 + $0xc8] sm:$0xff] %vm417_vm0, %v12272_v0 }
  0x61   : > { %446 = vst.msk [vmem:[#allocation2 + $0xd8] sm:$0xff] %vm417_vm0, %v12272_v0 }
  0x62   : > { %447 = vst.msk [vmem:[#allocation2 + $0xe0] sm:$0xff] %vm417_vm0, %v12272_v0 }
  0x63   : > { %449 = vst.msk [vmem:[#allocation2 + $0xf0] sm:$0xff] %vm417_vm0, %v12272_v0 }
  0x64   : > { %450 = vst.msk [vmem:[#allocation2 + $0xf8] sm:$0xff] %vm417_vm0, %v12272_v0 }
  0x65   : > { %452 = vst.msk [vmem:[#allocation2 + $0x108] sm:$0xff] %vm417_vm0, %v12272_v0 }
  0x66   : > { %453 = vst.msk [vmem:[#allocation2 + $0x110] sm:$0xff] %vm417_vm0, %v12272_v0 }
  0x67   : > { %455 = vst.msk [vmem:[#allocation2 + $0x120] sm:$0xff] %vm417_vm0, %v12272_v0 }
  0x68   : > { %456 = vst.msk [vmem:[#allocation2 + $0x128] sm:$0xff] %vm417_vm0, %v12272_v0 }
  0x69   : > { %458 = vst.msk [vmem:[#allocation2 + $0x138] sm:$0xff] %vm417_vm0, %v12272_v0 }
  0x6a   : > { %459 = vst.msk [vmem:[#allocation2 + $0x140] sm:$0xff] %vm417_vm0, %v12272_v0 }
  0x6b   : > { %461 = vst.msk [vmem:[#allocation2 + $0x150] sm:$0xff] %vm417_vm0, %v12272_v0 }
  0x6c   : > { %462 = vst.msk [vmem:[#allocation2 + $0x158] sm:$0xff] %vm417_vm0, %v12272_v0 }
  0x6d   : > { %464 = vst.msk [vmem:[#allocation2 + $0x168] sm:$0xff] %vm417_vm0, %v12272_v0 }
  0x6e   : > { %465 = vst.msk [vmem:[#allocation2 + $0x170] sm:$0xff] %vm417_vm0, %v12272_v0 }
  0x6f   : > { %467 = vst.msk [vmem:[#allocation2 + $0x180] sm:$0xff] %vm417_vm0, %v12272_v0 }
  0x70   : > { %468 = vst.msk [vmem:[#allocation2 + $0x188] sm:$0xff] %vm417_vm0, %v12272_v0 }
  0x71   : > { %12381 = vst [vmem:[#allocation25_spill] sm:$0xff] %v8093_v2 }
  0x72   : > { %470 = vst.msk [vmem:[#allocation2 + $0x198] sm:$0xff] %vm417_vm0, %v12272_v0 }
  0x73   : > { %471 = vst.msk [vmem:[#allocation2 + $0x1a0] sm:$0xff] %vm417_vm0, %v12272_v0 }
  0x74   : > { %514 = vst.msk [vmem:[#allocation2 + $0x19] sm:$0xff] %vm417_vm0, %v8093_v2 }
  0x75   : > { %421 = vst.msk [vmem:[#allocation2 + $0x10] sm:$0x3] %vm420_vm1, %v12272_v0 }
  0x76   : > { %424 = vst.msk [vmem:[#allocation2 + $0x28] sm:$0x3] %vm420_vm1, %v12272_v0 }
  0x77   : > { %427 = vst.msk [vmem:[#allocation2 + $0x40] sm:$0x3] %vm420_vm1, %v12272_v0 }
  0x78   : > { %430 = vst.msk [vmem:[#allocation2 + $0x58] sm:$0x3] %vm420_vm1, %v12272_v0 }
  0x79   : > { %433 = vst.msk [vmem:[#allocation2 + $0x70] sm:$0x3] %vm420_vm1, %v12272_v0 }
  0x7a   : > { %436 = vst.msk [vmem:[#allocation2 + $0x88] sm:$0x3] %vm420_vm1, %v12272_v0 }
  0x7b   : > { %v612_v3 = vld [vmem:[#allocation2 + $0x19] sm:$0xff]  ;;  %439 = vst.msk [vmem:[#allocation2 + $0xa0] sm:$0x3] %vm420_vm1, %v12272_v0 }
  0x7c   : > { %678 = vrot.lane.b32.xlu1 %v612_v3, %s7797_s1  ;;  %v611_v4 = vld [vmem:[#allocation2 + $0x9] sm:$0xff]  ;;  %442 = vst.msk [vmem:[#allocation2 + $0xb8] sm:$0x3] %vm420_vm1, %v12272_v0  ;;  %v8312_v1 = vld [vmem:[#allocation2 + $0x18] sm:$0xff] }
  0x7d   : > { %676 = vrot.lane.b32.xlu0 %v611_v4, %s7797_s1  ;;  %445 = vst.msk [vmem:[#allocation2 + $0xd0] sm:$0x3] %vm420_vm1, %v12272_v0  ;;  %v804_v62 = vld [vmem:[#allocation2 + $0xa] sm:$0xff] }
  0x7e   : > { %448 = vst.msk [vmem:[#allocation2 + $0xe8] sm:$0x3] %vm420_vm1, %v12272_v0 }
  0x7f   : > { %451 = vst.msk [vmem:[#allocation2 + $0x100] sm:$0x3] %vm420_vm1, %v12272_v0 }
  0x80   : > { %454 = vst.msk [vmem:[#allocation2 + $0x118] sm:$0x3] %vm420_vm1, %v12272_v0 }
  0x81   : > { %457 = vst.msk [vmem:[#allocation2 + $0x130] sm:$0x3] %vm420_vm1, %v12272_v0 }
  0x82   : > { %460 = vst.msk [vmem:[#allocation2 + $0x148] sm:$0x3] %vm420_vm1, %v12272_v0 }
  0x83   : > { %463 = vst.msk [vmem:[#allocation2 + $0x160] sm:$0x3] %vm420_vm1, %v12272_v0 }
  0x84   : > { %466 = vst.msk [vmem:[#allocation2 + $0x178] sm:$0x3] %vm420_vm1, %v12272_v0 }
  0x85   : > { %12382 = vst [vmem:[#allocation26_spill] sm:$0xff] %v8136_v5 }
  0x86   : > { %469 = vst.msk [vmem:[#allocation2 + $0x190] sm:$0x3] %vm420_vm1, %v12272_v0 }
  0x87   : > { %12383 = vst [vmem:[#allocation27_spill] sm:$0xff] %v8141_v6 }
  0x88   : > { %472 = vst.msk [vmem:[#allocation2 + $0x1a8] sm:$0x3] %vm420_vm1, %v12272_v0  ;;  %vm5059_vm1 = vcmask 1043459  }
  0x89   : > { %12384 = vst [vmem:[#allocation28_spill] sm:$0xff] %v8146_v7 }
  0x8a   : > { %515 = vst.msk [vmem:[#allocation2 + $0x21] sm:$0xff] %vm417_vm0, %v8136_v5 }
  0x8b   : > { %12385 = vst [vmem:[#allocation29_spill] sm:$0xff] %v8151_v8 }
  0x8c   : > { %518 = vst.msk [vmem:[#allocation2 + $0x49] sm:$0xff] %vm417_vm0, %v8141_v6 }
  0x8d   : > { %12386 = vst [vmem:[#allocation30_spill] sm:$0xff] %v8156_v9 }
  0x8e   : > { %519 = vst.msk [vmem:[#allocation2 + $0x51] sm:$0xff] %vm417_vm0, %v8146_v7 }
  0x8f   : > { %12387 = vst [vmem:[#allocation31_spill] sm:$0xff] %v8161_v10 }
  0x90   : > { %521 = vst.msk [vmem:[#allocation2 + $0x69] sm:$0xff] %vm417_vm0, %v8151_v8 }
  0x91   : > { %12388 = vst [vmem:[#allocation32_spill] sm:$0xff] %v8166_v11  ;;  %v613_v15 = vld [vmem:[#allocation2 + $0x21] sm:$0xff] }
  0x92   : > { %522 = vst.msk [vmem:[#allocation2 + $0x79] sm:$0xff] %vm417_vm0, %v8156_v9  ;;  %680 = vrot.lane.b32.xlu1 %v613_v15, %s7797_s1  ;;  %v8319_v15 = vld [vmem:[#allocation2 + $0x1a] sm:$0xff] }
  0x93   : > { %12389 = vst [vmem:[#allocation33_spill] sm:$0xff] %v8171_v12  ;;  %v616_v17 = vld [vmem:[#allocation2 + $0x49] sm:$0xff] }
  0x94   : > { %524 = vst.msk [vmem:[#allocation2 + $0x91] sm:$0xff] %vm417_vm0, %v8161_v10  ;;  %686 = vrot.lane.b32.xlu0 %v616_v17, %s7797_s1 }
  0x95   : > { %12390 = vst [vmem:[#allocation34_spill] sm:$0xff] %v8176_v13  ;;  %v617_v21 = vld [vmem:[#allocation2 + $0x51] sm:$0xff] }
  0x96   : > { %516 = vst.msk [vmem:[#allocation2 + $0x31] sm:$0xff] %vm417_vm0, %v8166_v11 }
  0x97   : > { %12391 = vst [vmem:[#allocation35_spill] sm:$0xff] %v8181_v14  ;;  %v619_v23 = vld [vmem:[#allocation2 + $0x69] sm:$0xff] }
  0x98   : > { %525 = vst.msk [vmem:[#allocation2 + $0x99] sm:$0xff] %vm417_vm0, %v8171_v12 }
  0x99   : > { %12392 = vst [vmem:[#allocation36_spill] sm:$0xff] %v8186_v16  ;;  %v620_v28 = vld [vmem:[#allocation2 + $0x79] sm:$0xff] }
  0x9a   : > { %527 = vst.msk [vmem:[#allocation2 + $0xb1] sm:$0xff] %vm417_vm0, %v8176_v13  ;;  %688 = vrot.lane.b32.xlu1 %v617_v21, %s7797_s1  ;;  %v547_v21 = vld [vmem:[#allocation2 + $0x8] sm:$0xff] }
  0x9b   : > { %12393 = vst [vmem:[#allocation37_spill] sm:$0xff] %v8192_v18  ;;  %v622_v29 = vld [vmem:[#allocation2 + $0x91] sm:$0xff] }
  0x9c   : > { %517 = vst.msk [vmem:[#allocation2 + $0x39] sm:$0xff] %vm417_vm0, %v8181_v14  ;;  %692 = vrot.lane.b32.xlu0 %v619_v23, %s7797_s1  ;;  %v8331_v23 = vld [vmem:[#allocation2 + $0x20] sm:$0xff] }
  0x9d   : > { %12394 = vst [vmem:[#allocation38_spill] sm:$0xff] %v8198_v19  ;;  %v614_v22 = vld [vmem:[#allocation2 + $0x31] sm:$0xff] }
  0x9e   : > { %528 = vst.msk [vmem:[#allocation2 + $0xc1] sm:$0xff] %vm417_vm0, %v8186_v16  ;;  %682 = vrot.lane.b32.xlu2 %v614_v22, %s7797_s1  ;;  %v8326_v22 = vld [vmem:[#allocation2 + $0x30] sm:$0xff] }
  0x9f   : > { %12395 = vst [vmem:[#allocation39_spill] sm:$0xff] %v8203_v20  ;;  %v623_v34 = vld [vmem:[#allocation2 + $0x99] sm:$0xff] }
  0xa0   : > { %530 = vst.msk [vmem:[#allocation2 + $0xd9] sm:$0xff] %vm417_vm0, %v8192_v18 }
  0xa1   : > { %520 = vst.msk [vmem:[#allocation2 + $0x61] sm:$0xff] %vm417_vm0, %v8198_v19  ;;  %v625_v35 = vld [vmem:[#allocation2 + $0xb1] sm:$0xff] }
  0xa2   : > { %531 = vst.msk [vmem:[#allocation2 + $0xe1] sm:$0xff] %vm417_vm0, %v8203_v20  ;;  %694 = vrot.lane.b32.xlu1 %v620_v28, %s7797_s1 }
  0xa3   : > { %12396 = vst [vmem:[#allocation40_spill] sm:$0xff] %v8213_v24  ;;  %v615_v27 = vld [vmem:[#allocation2 + $0x39] sm:$0xff] }
  0xa4   : > { %533 = vst.msk [vmem:[#allocation2 + $0xf9] sm:$0xff] %vm417_vm0, %v8213_v24  ;;  %698 = vrot.lane.b32.xlu0 %v622_v29, %s7797_s1  ;;  %v8321_v17 = vld [vmem:[#allocation2 + $0x32] sm:$0xff]  ;;  %v8337_v28 = vld [vmem:[#allocation2 + $0x3a] sm:$0xff] }
  0xa5   : > { %12397 = vst [vmem:[#allocation41_spill] sm:$0xff] %v8218_v25  ;;  %v626_v40 = vld [vmem:[#allocation2 + $0xc1] sm:$0xff]  ;;  %v8339_v29 = vld [vmem:[#allocation2 + $0x52] sm:$0xff] }
  0xa6   : > { %12398 = vst [vmem:[#allocation42_spill] sm:$0xff] %v8221_v26  ;;  %684 = vrot.lane.b32.xlu2 %v615_v27, %s7797_s1  ;;  %v803_v27 = vld [vmem:[#allocation2 + $0x2] sm:$0xff] }
  0xa7   : > { %523 = vst.msk [vmem:[#allocation2 + $0x81] sm:$0xff] %vm417_vm0, %v8218_v25  ;;  %v628_v41 = vld [vmem:[#allocation2 + $0xd9] sm:$0xff] }
  0xa8   : > { %534 = vst.msk [vmem:[#allocation2 + $0x109] sm:$0xff] %vm417_vm0, %v8221_v26  ;;  %v618_v33 = vld [vmem:[#allocation2 + $0x61] sm:$0xff]  ;;  %v8447_v0 = vld [vmem:[#allocation2 + $0xd8] sm:$0xff] }
  0xa9   : > { %12399 = vst [vmem:[#allocation43_spill] sm:$0xff] %v8231_v30  ;;  %v629_v46 = vld [vmem:[#allocation2 + $0xe1] sm:$0xff] }
  0xaa   : > { %536 = vst.msk [vmem:[#allocation2 + $0x121] sm:$0xff] %vm417_vm0, %v8231_v30  ;;  %700 = vrot.lane.b32.xlu1 %v623_v34, %s7797_s1  ;;  %v8346_v34 = vld [vmem:[#allocation2 + $0x38] sm:$0xff] }
  0xab   : > { %12400 = vst [vmem:[#allocation44_spill] sm:$0xff] %v8236_v31  ;;  %v631_v47 = vld [vmem:[#allocation2 + $0xf9] sm:$0xff] }
  0xac   : > { %12401 = vst [vmem:[#allocation45_spill] sm:$0xff] %v8239_v32  ;;  %704 = vrot.lane.b32.xlu0 %v625_v35, %s7797_s1  ;;  %v8348_v35 = vld [vmem:[#allocation2 + $0x50] sm:$0xff]  ;;  %v8484_v26 = vld [vmem:[#allocation2 + $0xda] sm:$0xff] }
  0xad   : > { %526 = vst.msk [vmem:[#allocation2 + $0xa9] sm:$0xff] %vm417_vm0, %v8236_v31  ;;  %v8511_v12 = vld [vmem:[#allocation2 + $0xfa] sm:$0xff] }
  0xae   : > { %537 = vst.msk [vmem:[#allocation2 + $0x129] sm:$0xff] %vm417_vm0, %v8239_v32  ;;  %690 = vrot.lane.b32.xlu2 %v618_v33, %s7797_s1  ;;  %v621_v39 = vld [vmem:[#allocation2 + $0x81] sm:$0xff] }
  0xaf   : > { %12402 = vst [vmem:[#allocation46_spill] sm:$0xff] %v8249_v36  ;;  %v632_v50 = vld [vmem:[#allocation2 + $0x109] sm:$0xff] }
  0xb0   : > { %539 = vst.msk [vmem:[#allocation2 + $0x141] sm:$0xff] %vm417_vm0, %v8249_v36  ;;  %v8344_v33 = vld [vmem:[#allocation2 + $0x48] sm:$0xff] }
  0xb1   : > { %12403 = vst [vmem:[#allocation47_spill] sm:$0xff] %v8254_v37  ;;  %v634_v51 = vld [vmem:[#allocation2 + $0x121] sm:$0xff] }
  0xb2   : > { %12404 = vst [vmem:[#allocation48_spill] sm:$0xff] %v8257_v38  ;;  %706 = vrot.lane.b32.xlu1 %v626_v40, %s7797_s1  ;;  %v8360_v40 = vld [vmem:[#allocation2 + $0x62] sm:$0xff] }
  0xb3   : > { %529 = vst.msk [vmem:[#allocation2 + $0xc9] sm:$0xff] %vm417_vm0, %v8254_v37  ;;  %v8486_v18 = vld [vmem:[#allocation2 + $0x108] sm:$0xff]  ;;  %v8501_v16 = vld [vmem:[#allocation2 + $0x120] sm:$0xff] }
  0xb4   : > { %540 = vst.msk [vmem:[#allocation2 + $0x151] sm:$0xff] %vm417_vm0, %v8257_v38  ;;  %710 = vrot.lane.b32.xlu0 %v628_v41, %s7797_s1  ;;  %v624_v45 = vld [vmem:[#allocation2 + $0xa9] sm:$0xff]  ;;  %v8362_v41 = vld [vmem:[#allocation2 + $0x7a] sm:$0xff] }
  0xb5   : > { %12405 = vst [vmem:[#allocation49_spill] sm:$0xff] %v8267_v42  ;;  %v635_v54 = vld [vmem:[#allocation2 + $0x129] sm:$0xff] }
  0xb6   : > { %696 = vrot.lane.b32.xlu2 %v621_v39, %s7797_s1  ;;  %542 = vst.msk [vmem:[#allocation2 + $0x169] sm:$0xff] %vm417_vm0, %v8267_v42  ;;  %v8356_v39 = vld [vmem:[#allocation2 + $0x22] sm:$0xff]  ;;  %v8457_v42 = vld [vmem:[#allocation2 + $0xb2] sm:$0xff] }
  0xb7   : > { %12406 = vst [vmem:[#allocation50_spill] sm:$0xff] %v8272_v43  ;;  %v637_v55 = vld [vmem:[#allocation2 + $0x141] sm:$0xff] }
  0xb8   : > { %12407 = vst [vmem:[#allocation51_spill] sm:$0xff] %v8275_v44  ;;  %v8513_v13 = vld [vmem:[#allocation2 + $0x128] sm:$0xff] }
  0xb9   : > { %532 = vst.msk [vmem:[#allocation2 + $0xf1] sm:$0xff] %vm417_vm0, %v8272_v43  ;;  %v8538_v19 = vld [vmem:[#allocation2 + $0x122] sm:$0xff] }
  0xba   : > { %543 = vst.msk [vmem:[#allocation2 + $0x171] sm:$0xff] %vm417_vm0, %v8275_v44  ;;  %712 = vrot.lane.b32.xlu1 %v629_v46, %s7797_s1  ;;  %v627_v49 = vld [vmem:[#allocation2 + $0xc9] sm:$0xff] }
  0xbb   : > { %12408 = vst [vmem:[#allocation52_spill] sm:$0xff] %v8285_v48  ;;  %v638_v58 = vld [vmem:[#allocation2 + $0x151] sm:$0xff]  ;;  %v8454_v44 = vld [vmem:[#allocation2 + $0xc8] sm:$0xff] }
  0xbc   : > { %535 = vst.msk [vmem:[#allocation2 + $0x111] sm:$0xff] %vm417_vm0, %v8285_v48  ;;  %716 = vrot.lane.b32.xlu0 %v631_v47, %s7797_s1  ;;  %v8540_v9 = vld [vmem:[#allocation2 + $0x150] sm:$0xff]  ;;  %v8565_v11 = vld [vmem:[#allocation2 + $0x142] sm:$0xff] }
  0xbd   : > { %12409 = vst [vmem:[#allocation53_spill] sm:$0xff] %v8293_v52  ;;  %v640_v59 = vld [vmem:[#allocation2 + $0x169] sm:$0xff] }
  0xbe   : > { %702 = vrot.lane.b32.xlu2 %v624_v45, %s7797_s1  ;;  %538 = vst.msk [vmem:[#allocation2 + $0x139] sm:$0xff] %vm417_vm0, %v8293_v52  ;;  %v8459_v52 = vld [vmem:[#allocation2 + $0xe0] sm:$0xff]  ;;  %v8555_v6 = vld [vmem:[#allocation2 + $0x168] sm:$0xff] }
  0xbf   : > { %12410 = vst [vmem:[#allocation54_spill] sm:$0xff] %v8301_v56 }
  0xc0   : > { %v630_v53 = vld [vmem:[#allocation2 + $0xf1] sm:$0xff]  ;;  %541 = vst.msk [vmem:[#allocation2 + $0x159] sm:$0xff] %vm417_vm0, %v8301_v56 }
  0xc1   : > { %v641_v61 = vld [vmem:[#allocation2 + $0x171] sm:$0xff]  ;;  %578 = vst.msk [vmem:[#allocation3] sm:$0xff] %vm417_vm0, %v546_v63  ;;  %v8414_v63 = vld [vmem:[#allocation2 + $0xc2] sm:$0xff] }
  0xc2   : > { %718 = vrot.lane.b32.xlu1 %v632_v50, %s7797_s1  ;;  %580 = vst.msk [vmem:[#allocation3 + $0x30] sm:$0xff] %vm417_vm0, %v8312_v1  ;;  %v8374_v50 = vld [vmem:[#allocation2 + $0x60] sm:$0xff]  ;;  %v8462_v36 = vld [vmem:[#allocation2 + $0xf2] sm:$0xff]  ;;  %v8582_v14 = vld [vmem:[#allocation2 + $0x16a] sm:$0xff] }
  0xc3   : > { %v633_v57 = vld [vmem:[#allocation2 + $0x111] sm:$0xff]  ;;  %579 = vst.msk [vmem:[#allocation3 + $0x18] sm:$0xff] %vm417_vm0, %v547_v21 }
  0xc4   : > { %722 = vrot.lane.b32.xlu0 %v634_v51, %s7797_s1  ;;  %582 = vst.msk [vmem:[#allocation3 + $0x60] sm:$0xff] %vm417_vm0, %v8326_v22  ;;  %v8377_v51 = vld [vmem:[#allocation2 + $0x78] sm:$0xff]  ;;  %v8481_v32 = vld [vmem:[#allocation2 + $0xf0] sm:$0xff] }
  0xc5   : > { %v636_v60 = vld [vmem:[#allocation2 + $0x139] sm:$0xff]  ;;  %581 = vst.msk [vmem:[#allocation3 + $0x48] sm:$0xff] %vm417_vm0, %v8331_v23  ;;  %v8508_v37 = vld [vmem:[#allocation2 + $0x110] sm:$0xff] }
  0xc6   : > { %708 = vrot.lane.b32.xlu2 %v627_v49, %s7797_s1  ;;  %584 = vst.msk [vmem:[#allocation3 + $0x90] sm:$0xff] %vm417_vm0, %v8344_v33  ;;  %v8369_v49 = vld [vmem:[#allocation2 + $0x68] sm:$0xff]  ;;  %v8474_v48 = vld [vmem:[#allocation2 + $0xf8] sm:$0xff]  ;;  %v8528_v25 = vld [vmem:[#allocation2 + $0x140] sm:$0xff] }
  0xc7   : > { %v639_v4 = vld [vmem:[#allocation2 + $0x159] sm:$0xff]  ;;  %583 = vst.msk [vmem:[#allocation3 + $0x78] sm:$0xff] %vm417_vm0, %v8346_v34  ;;  %v8567_v5 = vld [vmem:[#allocation2 + $0x170] sm:$0xff] }
  0xc8   : > { %585 = vst.msk [vmem:[#allocation3 + $0xa8] sm:$0xff] %vm417_vm0, %v8348_v35  ;;  %v8489_v43 = vld [vmem:[#allocation2 + $0x112] sm:$0xff]  ;;  %v8516_v20 = vld [vmem:[#allocation2 + $0x13a] sm:$0xff] }
  0xc9   : > { %587 = vst.msk [vmem:[#allocation3 + $0xd8] sm:$0xff] %vm417_vm0, %v8369_v49  ;;  %v8535_v8 = vld [vmem:[#allocation2 + $0x138] sm:$0xff] }
  0xca   : > { %724 = vrot.lane.b32.xlu1 %v635_v54, %s7797_s1  ;;  %v675_v3 = vpop.permute.xlu0 %674  ;;  %586 = vst.msk [vmem:[#allocation3 + $0xc0] sm:$0xff] %vm417_vm0, %v8374_v50  ;;  %v8385_v54 = vld [vmem:[#allocation2 + $0x82] sm:$0xff]  ;;  %v8543_v30 = vld [vmem:[#allocation2 + $0x15a] sm:$0xff] }
  0xcb   : > { %771 = vst.msk [vmem:[#allocation3] sm:$0xff] %vm770_vm2, %v675_v3  ;;  %v8562_v31 = vld [vmem:[#allocation2 + $0x158] sm:$0xff] }
  0xcc   : > { %728 = vrot.lane.b32.xlu0 %v637_v55, %s7797_s1  ;;  %588 = vst.msk [vmem:[#allocation3 + $0xf0] sm:$0xff] %vm417_vm0, %v8377_v51  ;;  %v8389_v55 = vld [vmem:[#allocation2 + $0x9a] sm:$0xff] }
  0xcd   : > { %596 = vst.msk [vmem:[#allocation3 + $0x1b0] sm:$0xff] %vm417_vm0, %v8447_v0 }
  0xce   : > { %714 = vrot.lane.b32.xlu2 %v630_v53, %s7797_s1  ;;  %v8379_v53 = vld [vmem:[#allocation2 + $0x4a] sm:$0xff]  ;;  %595 = vst.msk [vmem:[#allocation3 + $0x198] sm:$0xff] %vm417_vm0, %v8454_v44 }
  0xcf   : > { %597 = vst.msk [vmem:[#allocation3 + $0x1c8] sm:$0xff] %vm417_vm0, %v8459_v52 }
  0xd0   : > { %599 = vst.msk [vmem:[#allocation3 + $0x1f8] sm:$0xff] %vm417_vm0, %v8474_v48 }
  0xd1   : > { %598 = vst.msk [vmem:[#allocation3 + $0x1e0] sm:$0xff] %vm417_vm0, %v8481_v32 }
  0xd2   : > { %730 = vrot.lane.b32.xlu1 %v638_v58, %s7797_s1  ;;  %v8395_v58 = vld [vmem:[#allocation2 + $0x90] sm:$0xff]  ;;  %600 = vst.msk [vmem:[#allocation3 + $0x210] sm:$0xff] %vm417_vm0, %v8486_v18 }
  0xd3   : > { %590 = vst.msk [vmem:[#allocation3 + $0x120] sm:$0xff] %vm417_vm0, %v8395_v58 }
  0xd4   : > { %734 = vrot.lane.b32.xlu0 %v640_v59, %s7797_s1  ;;  %v8397_v59 = vld [vmem:[#allocation2 + $0x80] sm:$0xff]  ;;  %602 = vst.msk [vmem:[#allocation3 + $0x240] sm:$0xff] %vm417_vm0, %v8501_v16 }
  0xd5   : > { %589 = vst.msk [vmem:[#allocation3 + $0x108] sm:$0xff] %vm417_vm0, %v8397_v59 }
  0xd6   : > { %720 = vrot.lane.b32.xlu2 %v633_v57, %s7797_s1  ;;  %601 = vst.msk [vmem:[#allocation3 + $0x228] sm:$0xff] %vm417_vm0, %v8508_v37 }
  0xd7   : > { %603 = vst.msk [vmem:[#allocation3 + $0x258] sm:$0xff] %vm417_vm0, %v8513_v13 }
  0xd8   : > { %605 = vst.msk [vmem:[#allocation3 + $0x288] sm:$0xff] %vm417_vm0, %v8528_v25 }
  0xd9   : > { %604 = vst.msk [vmem:[#allocation3 + $0x270] sm:$0xff] %vm417_vm0, %v8535_v8 }
  0xda   : > { %736 = vrot.lane.b32.xlu1 %v641_v61, %s7797_s1  ;;  %v8406_v61 = vld [vmem:[#allocation2 + $0x6a] sm:$0xff]  ;;  %606 = vst.msk [vmem:[#allocation3 + $0x2a0] sm:$0xff] %vm417_vm0, %v8540_v9 }
  0xdb   : > { %608 = vst.msk [vmem:[#allocation3 + $0x2d0] sm:$0xff] %vm417_vm0, %v8555_v6 }
  0xdc   : > { %869 = vrot.lane.b32.xlu0 %v804_v62, %s7798_s13  ;;  %v8412_v62 = vld [vmem:[#allocation2 + $0xaa] sm:$0xff]  ;;  %607 = vst.msk [vmem:[#allocation3 + $0x2b8] sm:$0xff] %vm417_vm0, %v8562_v31 }
  0xdd   : > { %609 = vst.msk [vmem:[#allocation3 + $0x2e8] sm:$0xff] %vm417_vm0, %v8567_v5 }
  0xde   : > { %726 = vrot.lane.b32.xlu2 %v636_v60, %s7797_s1  ;;  %v8402_v60 = vld [vmem:[#allocation2 + $0x98] sm:$0xff] }
  0xdf   : > { %591 = vst.msk [vmem:[#allocation3 + $0x138] sm:$0xff] %vm417_vm0, %v8402_v60 }
  0xe2   : > { %871 = vrot.lane.b32.xlu1 %v8319_v15, %s7798_s13 }
  0xe4   : > { %875 = vrot.lane.b32.xlu0 %v8321_v17, %s7798_s13 }
  0xe6   : > { %732 = vrot.lane.b32.xlu2 %v639_v4, %s7797_s1  ;;  %v8420_v4 = vld [vmem:[#allocation2 + $0xb0] sm:$0xff] }
  0xe7   : > { %593 = vst.msk [vmem:[#allocation3 + $0x168] sm:$0xff] %vm417_vm0, %v8420_v4 }
  0xea   : > { %877 = vrot.lane.b32.xlu1 %v8337_v28, %s7798_s13 }
  0xec   : > { %881 = vrot.lane.b32.xlu0 %v8339_v29, %s7798_s13 }
  0xee   : > { %867 = vrot.lane.b32.xlu2 %v803_v27, %s7798_s13  ;;  %v679_v45 = vpop.permute.xlu1 %678  ;;  %v8427_v27 = vld [vmem:[#allocation2 + $0xa8] sm:$0xff] }
  0xef   : > { %773 = vst.msk [vmem:[#allocation3 + $0x30] sm:$0xff] %vm770_vm2, %v679_v45  ;;  %v677_v46 = vpop.permute.xlu0 %676 }
  0xf0   : > { %772 = vst.msk [vmem:[#allocation3 + $0x18] sm:$0xff] %vm770_vm2, %v677_v46  ;;  %v8430_v46 = vld [vmem:[#allocation2 + $0x92] sm:$0xff] }
  0xf1   : > { %592 = vst.msk [vmem:[#allocation3 + $0x150] sm:$0xff] %vm417_vm0, %v8427_v27 }
  0xf2   : > { %883 = vrot.lane.b32.xlu1 %v8360_v40, %s7798_s13 }
  0xf4   : > { %887 = vrot.lane.b32.xlu0 %v8362_v41, %s7798_s13 }
  0xf6   : > { %873 = vrot.lane.b32.xlu2 %v8356_v39, %s7798_s13 }
  0xf8   : > { %v683_v47 = vpop.permute.xlu2 %682 }
  0xf9   : > { %775 = vst.msk [vmem:[#allocation3 + $0x60] sm:$0xff] %vm770_vm2, %v683_v47  ;;  %v8432_v47 = vld [vmem:[#allocation2 + $0xc0] sm:$0xff] }
  0xfa   : > { %889 = vrot.lane.b32.xlu1 %v8385_v54, %s7798_s13  ;;  %594 = vst.msk [vmem:[#allocation3 + $0x180] sm:$0xff] %vm417_vm0, %v8432_v47 }
  0xfc   : > { %893 = vrot.lane.b32.xlu0 %v8389_v55, %s7798_s13 }
  0xfe   : > { %879 = vrot.lane.b32.xlu2 %v8379_v53, %s7798_s13 }
 0x100   : > { %v685_v57 = vpop.permute.xlu2 %684 }
 0x101   : > { %776 = vst.msk [vmem:[#allocation3 + $0x78] sm:$0xff] %vm770_vm2, %v685_v57  ;;  %v8435_v57 = vld [vmem:[#allocation2 + $0xca] sm:$0xff] }
 0x102   : > { %895 = vrot.lane.b32.xlu1 %v8412_v62, %s7798_s13 }
 0x104   : > { %899 = vrot.lane.b32.xlu0 %v8414_v63, %s7798_s13  ;;  %v681_v21 = vpop.permute.xlu1 %680 }
 0x105   : > { %774 = vst.msk [vmem:[#allocation3 + $0x48] sm:$0xff] %vm770_vm2, %v681_v21 }
 0x106   : > { %885 = vrot.lane.b32.xlu2 %v8406_v61, %s7798_s13  ;;  %v687_v45 = vpop.permute.xlu0 %686 }
 0x107   : > { %777 = vst.msk [vmem:[#allocation3 + $0x90] sm:$0xff] %vm770_vm2, %v687_v45 }
 0x108   : > { %v691_v3 = vpop.permute.xlu2 %690 }
 0x109   : > { %779 = vst.msk [vmem:[#allocation3 + $0xc0] sm:$0xff] %vm770_vm2, %v691_v3  ;;  %v8439_v3 = vld [vmem:[#allocation2 + $0xe2] sm:$0xff] }
 0x10a   : > { %901 = vrot.lane.b32.xlu1 %v8435_v57, %s7798_s13 }
 0x10c   : > { %905 = vrot.lane.b32.xlu0 %v8439_v3, %s7798_s13  ;;  %v689_v45 = vpop.permute.xlu1 %688 }
 0x10d   : > { %778 = vst.msk [vmem:[#allocation3 + $0xa8] sm:$0xff] %vm770_vm2, %v689_v45 }
 0x10e   : > { %891 = vrot.lane.b32.xlu2 %v8430_v46, %s7798_s13  ;;  %v693_v38 = vpop.permute.xlu0 %692 }
 0x10f   : > { %780 = vst.msk [vmem:[#allocation3 + $0xd8] sm:$0xff] %vm770_vm2, %v693_v38 }
 0x110   : > { %v697_v21 = vpop.permute.xlu2 %696 }
 0x111   : > { %782 = vst.msk [vmem:[#allocation3 + $0x108] sm:$0xff] %vm770_vm2, %v697_v21  ;;  %v8466_v21 = vld [vmem:[#allocation2 + $0x10a] sm:$0xff] }
 0x112   : > { %907 = vrot.lane.b32.xlu1 %v8462_v36, %s7798_s13 }
 0x114   : > { %911 = vrot.lane.b32.xlu0 %v8466_v21, %s7798_s13  ;;  %v695_v38 = vpop.permute.xlu1 %694 }
 0x115   : > { %781 = vst.msk [vmem:[#allocation3 + $0xf0] sm:$0xff] %vm770_vm2, %v695_v38 }
 0x116   : > { %897 = vrot.lane.b32.xlu2 %v8457_v42, %s7798_s13  ;;  %v699_v24 = vpop.permute.xlu0 %698 }
 0x117   : > { %783 = vst.msk [vmem:[#allocation3 + $0x120] sm:$0xff] %vm770_vm2, %v699_v24 }
 0x118   : > { %v703_v45 = vpop.permute.xlu2 %702 }
 0x119   : > { %785 = vst.msk [vmem:[#allocation3 + $0x150] sm:$0xff] %vm770_vm2, %v703_v45  ;;  %v8493_v45 = vld [vmem:[#allocation2 + $0x12a] sm:$0xff] }
 0x11a   : > { %913 = vrot.lane.b32.xlu1 %v8489_v43, %s7798_s13 }
 0x11c   : > { %917 = vrot.lane.b32.xlu0 %v8493_v45, %s7798_s13  ;;  %v701_v24 = vpop.permute.xlu1 %700 }
 0x11d   : > { %784 = vst.msk [vmem:[#allocation3 + $0x138] sm:$0xff] %vm770_vm2, %v701_v24 }
 0x11e   : > { %903 = vrot.lane.b32.xlu2 %v8484_v26, %s7798_s13  ;;  %v705_v56 = vpop.permute.xlu0 %704 }
 0x11f   : > { %786 = vst.msk [vmem:[#allocation3 + $0x168] sm:$0xff] %vm770_vm2, %v705_v56 }
 0x120   : > { %v709_v38 = vpop.permute.xlu2 %708 }
 0x121   : > { %788 = vst.msk [vmem:[#allocation3 + $0x198] sm:$0xff] %vm770_vm2, %v709_v38  ;;  %v8520_v38 = vld [vmem:[#allocation2 + $0x152] sm:$0xff] }
 0x122   : > { %919 = vrot.lane.b32.xlu1 %v8516_v20, %s7798_s13 }
 0x124   : > { %923 = vrot.lane.b32.xlu0 %v8520_v38, %s7798_s13  ;;  %v707_v56 = vpop.permute.xlu1 %706 }
 0x125   : > { %787 = vst.msk [vmem:[#allocation3 + $0x180] sm:$0xff] %vm770_vm2, %v707_v56 }
 0x126   : > { %909 = vrot.lane.b32.xlu2 %v8511_v12, %s7798_s13  ;;  %v711_v10 = vpop.permute.xlu0 %710 }
 0x127   : > { %789 = vst.msk [vmem:[#allocation3 + $0x1b0] sm:$0xff] %vm770_vm2, %v711_v10 }
 0x128   : > { %v715_v24 = vpop.permute.xlu2 %714 }
 0x129   : > { %791 = vst.msk [vmem:[#allocation3 + $0x1e0] sm:$0xff] %vm770_vm2, %v715_v24  ;;  %v8547_v24 = vld [vmem:[#allocation2 + $0x172] sm:$0xff] }
 0x12a   : > { %925 = vrot.lane.b32.xlu1 %v8543_v30, %s7798_s13 }
 0x12c   : > { %929 = vrot.lane.b32.xlu0 %v8547_v24, %s7798_s13  ;;  %v713_v10 = vpop.permute.xlu1 %712 }
 0x12d   : > { %790 = vst.msk [vmem:[#allocation3 + $0x1c8] sm:$0xff] %vm770_vm2, %v713_v10 }
 0x12e   : > { %915 = vrot.lane.b32.xlu2 %v8538_v19, %s7798_s13  ;;  %v717_v7 = vpop.permute.xlu0 %716 }
 0x12f   : > { %792 = vst.msk [vmem:[#allocation3 + $0x1f8] sm:$0xff] %vm770_vm2, %v717_v7 }
 0x130   : > { %v721_v56 = vpop.permute.xlu2 %720 }
 0x131   : > { %794 = vst.msk [vmem:[#allocation3 + $0x228] sm:$0xff] %vm770_vm2, %v721_v56 }
 0x132   : > { %1060 = vrot.lane.b32.xlu1 %v8312_v1, %s7799_s25 }
 0x134   : > { %1064 = vrot.lane.b32.xlu0 %v8326_v22, %s7799_s25  ;;  %v719_v7 = vpop.permute.xlu1 %718 }
 0x135   : > { %793 = vst.msk [vmem:[#allocation3 + $0x210] sm:$0xff] %vm770_vm2, %v719_v7 }
 0x136   : > { %921 = vrot.lane.b32.xlu2 %v8565_v11, %s7798_s13  ;;  %v723_v10 = vpop.permute.xlu0 %722 }
 0x137   : > { %795 = vst.msk [vmem:[#allocation3 + $0x240] sm:$0xff] %vm770_vm2, %v723_v10 }
 0x138   : > { %v727_v56 = vpop.permute.xlu2 %726 }
 0x139   : > { %797 = vst.msk [vmem:[#allocation3 + $0x270] sm:$0xff] %vm770_vm2, %v727_v56 }
 0x13a   : > { %1066 = vrot.lane.b32.xlu1 %v8346_v34, %s7799_s25 }
 0x13c   : > { %1070 = vrot.lane.b32.xlu0 %v8348_v35, %s7799_s25  ;;  %v725_v56 = vpop.permute.xlu1 %724 }
 0x13d   : > { %796 = vst.msk [vmem:[#allocation3 + $0x258] sm:$0xff] %vm770_vm2, %v725_v56 }
 0x13e   : > { %927 = vrot.lane.b32.xlu2 %v8582_v14, %s7798_s13  ;;  %v729_v7 = vpop.permute.xlu0 %728 }
 0x13f   : > { %798 = vst.msk [vmem:[#allocation3 + $0x288] sm:$0xff] %vm770_vm2, %v729_v7 }
 0x140   : > { %v733_v1 = vpop.permute.xlu2 %732 }
 0x141   : > { %800 = vst.msk [vmem:[#allocation3 + $0x2b8] sm:$0xff] %vm770_vm2, %v733_v1 }
 0x142   : > { %1072 = vrot.lane.b32.xlu1 %v8374_v50, %s7799_s25 }
 0x144   : > { %1076 = vrot.lane.b32.xlu0 %v8377_v51, %s7799_s25  ;;  %v731_v1 = vpop.permute.xlu1 %730 }
 0x145   : > { %799 = vst.msk [vmem:[#allocation3 + $0x2a0] sm:$0xff] %vm770_vm2, %v731_v1 }
 0x146   : > { %1062 = vrot.lane.b32.xlu2 %v8331_v23, %s7799_s25  ;;  %v735_v56 = vpop.permute.xlu0 %734 }
 0x147   : > { %801 = vst.msk [vmem:[#allocation3 + $0x2d0] sm:$0xff] %vm770_vm2, %v735_v56 }
 0x148   : > { %v868_v10 = vpop.permute.xlu2 %867 }
 0x149   : > { %964 = vst.msk [vmem:[#allocation3] sm:$0xff] %vm963_vm3, %v868_v10 }
 0x14a   : > { %1078 = vrot.lane.b32.xlu1 %v8397_v59, %s7799_s25 }
 0x14c   : > { %1082 = vrot.lane.b32.xlu0 %v8402_v60, %s7799_s25  ;;  %v737_v7 = vpop.permute.xlu1 %736 }
 0x14d   : > { %802 = vst.msk [vmem:[#allocation3 + $0x2e8] sm:$0xff] %vm770_vm2, %v737_v7  ;;  %v8624_v7 = vld [vmem:[%s8001_s23 + $0xf0] sm:$0xff] }
 0x14e   : > { %1068 = vrot.lane.b32.xlu2 %v8344_v33, %s7799_s25  ;;  %v870_v10 = vpop.permute.xlu0 %869  ;;  %12411 = vst [vmem:[#allocation55_spill] sm:$0xff] %v8624_v7 }
 0x14f   : > { %965 = vst.msk [vmem:[#allocation3 + $0x18] sm:$0xff] %vm963_vm3, %v870_v10 }
 0x150   : > { %v874_v23 = vpop.permute.xlu2 %873  ;;  %544 = vst.msk [vmem:[#allocation2 + $0x181] sm:$0xff] %vm417_vm0, %v8624_v7  ;;  %v1999_v7 = vld [vmem:[#allocation9 + $0x48] sm:$0xff] }
 0x151   : > { %967 = vst.msk [vmem:[#allocation3 + $0x48] sm:$0xff] %vm963_vm3, %v874_v23 }
 0x152   : > { %1084 = vrot.lane.b32.xlu1 %v8427_v27, %s7799_s25 }
 0x154   : > { %1088 = vrot.lane.b32.xlu0 %v8432_v47, %s7799_s25  ;;  %v872_v56 = vpop.permute.xlu1 %871 }
 0x155   : > { %966 = vst.msk [vmem:[#allocation3 + $0x30] sm:$0xff] %vm963_vm3, %v872_v56 }
 0x156   : > { %1074 = vrot.lane.b32.xlu2 %v8369_v49, %s7799_s25  ;;  %v876_v23 = vpop.permute.xlu0 %875 }
 0x157   : > { %968 = vst.msk [vmem:[#allocation3 + $0x60] sm:$0xff] %vm963_vm3, %v876_v23 }
 0x158   : > { %v880_v1 = vpop.permute.xlu2 %879 }
 0x159   : > { %970 = vst.msk [vmem:[#allocation3 + $0x90] sm:$0xff] %vm963_vm3, %v880_v1 }
 0x15a   : > { %1090 = vrot.lane.b32.xlu1 %v8454_v44, %s7799_s25 }
 0x15c   : > { %1094 = vrot.lane.b32.xlu0 %v8459_v52, %s7799_s25  ;;  %v878_v1 = vpop.permute.xlu1 %877 }
 0x15d   : > { %969 = vst.msk [vmem:[#allocation3 + $0x78] sm:$0xff] %vm963_vm3, %v878_v1 }
 0x15e   : > { %1080 = vrot.lane.b32.xlu2 %v8395_v58, %s7799_s25  ;;  %v882_v56 = vpop.permute.xlu0 %881 }
 0x15f   : > { %971 = vst.msk [vmem:[#allocation3 + $0xa8] sm:$0xff] %vm963_vm3, %v882_v56 }
 0x160   : > { %v886_v10 = vpop.permute.xlu2 %885 }
 0x161   : > { %973 = vst.msk [vmem:[#allocation3 + $0xd8] sm:$0xff] %vm963_vm3, %v886_v10 }
 0x162   : > { %1096 = vrot.lane.b32.xlu1 %v8481_v32, %s7799_s25 }
 0x164   : > { %1100 = vrot.lane.b32.xlu0 %v8486_v18, %s7799_s25  ;;  %v884_v52 = vpop.permute.xlu1 %883 }
 0x165   : > { %972 = vst.msk [vmem:[#allocation3 + $0xc0] sm:$0xff] %vm963_vm3, %v884_v52  ;;  %v2004_v52 = vld [vmem:[#allocation9 + $0x70] sm:$0xff] }
 0x166   : > { %1086 = vrot.lane.b32.xlu2 %v8420_v4, %s7799_s25  ;;  %v888_v10 = vpop.permute.xlu0 %887 }
 0x167   : > { %974 = vst.msk [vmem:[#allocation3 + $0xf0] sm:$0xff] %vm963_vm3, %v888_v10  ;;  %v2003_v10 = vld [vmem:[#allocation9 + $0x68] sm:$0xff] }
 0x168   : > { %v892_v23 = vpop.permute.xlu2 %891 }
 0x169   : > { %976 = vst.msk [vmem:[#allocation3 + $0x120] sm:$0xff] %vm963_vm3, %v892_v23  ;;  %v2005_v23 = vld [vmem:[#allocation9 + $0x78] sm:$0xff] }
 0x16a   : > { %1102 = vrot.lane.b32.xlu1 %v8508_v37, %s7799_s25  ;;  %2122 = vmatpush.msra.mxu0 %v2005_v23 }
 0x16b   : > { %7335 = vmatpush.msra.mxu1 %v2005_v23  ;;  %v2001_v23 = vld [vmem:[#allocation9 + $0x58] sm:$0xff] }
 0x16c   : > { %1106 = vrot.lane.b32.xlu0 %v8513_v13, %s7799_s25  ;;  %v890_v18 = vpop.permute.xlu1 %889  ;;  %2123 = vmatpush.msra.mxu0 %v2004_v52 }
 0x16d   : > { %975 = vst.msk [vmem:[#allocation3 + $0x108] sm:$0xff] %vm963_vm3, %v890_v18  ;;  %7336 = vmatpush.msra.mxu1 %v2004_v52  ;;  %v2000_v52 = vld [vmem:[#allocation9 + $0x50] sm:$0xff] }
 0x16e   : > { %1092 = vrot.lane.b32.xlu2 %v8447_v0, %s7799_s25  ;;  %v894_v56 = vpop.permute.xlu0 %893  ;;  %2124 = vmatpush.msra.mxu0 %v2003_v10 }
 0x16f   : > { %977 = vst.msk [vmem:[#allocation3 + $0x138] sm:$0xff] %vm963_vm3, %v894_v56  ;;  %7337 = vmatpush.msra.mxu1 %v2003_v10 }
 0x170   : > { %v898_v1 = vpop.permute.xlu2 %897 }
 0x171   : > { %979 = vst.msk [vmem:[#allocation3 + $0x168] sm:$0xff] %vm963_vm3, %v898_v1  ;;  %v2002_v1 = vld [vmem:[#allocation9 + $0x60] sm:$0xff] }
 0x172   : > { %1108 = vrot.lane.b32.xlu1 %v8535_v8, %s7799_s25  ;;  %2125 = vmatpush.msra.mxu0 %v2002_v1 }
 0x173   : > { %7338 = vmatpush.msra.mxu1 %v2002_v1 }
 0x174   : > { %1112 = vrot.lane.b32.xlu0 %v8540_v9, %s7799_s25  ;;  %v896_v18 = vpop.permute.xlu1 %895  ;;  %2126 = vmatpush.msra.mxu0 %v2001_v23  ;;  %v8665_v9 = vld [vmem:[%s8001_s23 + $0xf8] sm:$0xff]  ;;  %s11157_s23 = sld [smem:[#allocation15 + $0xa]] }
 0x175   : > { %978 = vst.msk [vmem:[#allocation3 + $0x150] sm:$0xff] %vm963_vm3, %v896_v18  ;;  %7339 = vmatpush.msra.mxu1 %v2001_v23  ;;  %v1996_v23 = vld [vmem:[#allocation9 + $0x30] sm:$0xff] }
 0x176   : > { %1098 = vrot.lane.b32.xlu2 %v8474_v48, %s7799_s25  ;;  %v900_v56 = vpop.permute.xlu0 %899  ;;  %2127 = vmatpush.msra.mxu0 %v2000_v52  ;;  %12412 = vst [vmem:[#allocation56_spill] sm:$0xff] %v8665_v9 }
 0x177   : > { %980 = vst.msk [vmem:[#allocation3 + $0x180] sm:$0xff] %vm963_vm3, %v900_v56  ;;  %7340 = vmatpush.msra.mxu1 %v2000_v52  ;;  %v1997_v56 = vld [vmem:[#allocation9 + $0x38] sm:$0xff]  ;;  %v8676_v52 = vld [vmem:[#allocation2 + $0x180] sm:$0xff] }
 0x178   : > { %v904_v13 = vpop.permute.xlu2 %903  ;;  %2128 = vmatpush.msra.mxu0 %v1999_v7  ;;  %545 = vst.msk [vmem:[#allocation2 + $0x189] sm:$0xff] %vm417_vm0, %v8665_v9  ;;  %v1995_v9 = vld [vmem:[#allocation9 + $0x28] sm:$0xff] }
 0x179   : > { %982 = vst.msk [vmem:[#allocation3 + $0x1b0] sm:$0xff] %vm963_vm3, %v904_v13  ;;  %v1998_v13 = vld [vmem:[#allocation9 + $0x40] sm:$0xff]  ;;  %7341 = vmatpush.msra.mxu1 %v1999_v7 }
 0x17a   : > { %1114 = vrot.lane.b32.xlu1 %v8562_v31, %s7799_s25  ;;  %2129 = vmatpush.msra.mxu0 %v1998_v13  ;;  %v1994_v7 = vld [vmem:[#allocation9 + $0x20] sm:$0xff] }
 0x17b   : > { %7342 = vmatpush.msra.mxu1 %v1998_v13 }
 0x17c   : > { %1118 = vrot.lane.b32.xlu0 %v8567_v5, %s7799_s25  ;;  %v902_v1 = vpop.permute.xlu1 %901  ;;  %2130 = vmatpush.msra.mxu0 %v1997_v56 }
 0x17d   : > { %981 = vst.msk [vmem:[#allocation3 + $0x198] sm:$0xff] %vm963_vm3, %v902_v1  ;;  %7343 = vmatpush.msra.mxu1 %v1997_v56  ;;  %v1993_v1 = vld [vmem:[#allocation9 + $0x18] sm:$0xff]  ;;  %v1991_v56 = vld [vmem:[#allocation9 + $0x8] sm:$0xff] }
 0x17e   : > { %1104 = vrot.lane.b32.xlu2 %v8501_v16, %s7799_s25  ;;  %v906_v18 = vpop.permute.xlu0 %905  ;;  %2131 = vmatpush.msra.mxu0 %v1996_v23 }
 0x17f   : > { %983 = vst.msk [vmem:[#allocation3 + $0x1c8] sm:$0xff] %vm963_vm3, %v906_v18  ;;  %7344 = vmatpush.msra.mxu1 %v1996_v23  ;;  %v1992_v18 = vld [vmem:[#allocation9 + $0x10] sm:$0xff] }
 0x180   : > { %v910_v10 = vpop.permute.xlu2 %909  ;;  %2132 = vmatpush.msra.mxu0 %v1995_v9 }
 0x181   : > { %985 = vst.msk [vmem:[#allocation3 + $0x1f8] sm:$0xff] %vm963_vm3, %v910_v10  ;;  %7345 = vmatpush.msra.mxu1 %v1995_v9  ;;  %v1990_v9 = vld [vmem:[#allocation9] sm:$0xff] }
 0x182   : > { %1120 = vrot.lane.b32.xlu1 %v8676_v52, %s7799_s25  ;;  %2133 = vmatpush.msra.mxu0 %v1994_v7 }
 0x183   : > { %7346 = vmatpush.msra.mxu1 %v1994_v7  ;;  %v8695_v7 = vld [vmem:[#allocation2 + $0x188] sm:$0xff] }
 0x184   : > { %1317 = vrot.lane.b32.xlu0 %v8319_v15, %s7797_s1  ;;  %v908_v10 = vpop.permute.xlu1 %907  ;;  %2134 = vmatpush.msra.mxu0 %v1993_v1 }
 0x185   : > { %984 = vst.msk [vmem:[#allocation3 + $0x1e0] sm:$0xff] %vm963_vm3, %v908_v10  ;;  %7347 = vmatpush.msra.mxu1 %v1993_v1 }
 0x186   : > { %1110 = vrot.lane.b32.xlu2 %v8528_v25, %s7799_s25  ;;  %v912_v13 = vpop.permute.xlu0 %911  ;;  %2135 = vmatpush.msra.mxu0 %v1992_v18 }
 0x187   : > { %986 = vst.msk [vmem:[#allocation3 + $0x210] sm:$0xff] %vm963_vm3, %v912_v13  ;;  %7348 = vmatpush.msra.mxu1 %v1992_v18 }
 0x188   : > { %v916_v5 = vpop.permute.xlu2 %915  ;;  %2136 = vmatpush.msra.mxu0 %v1991_v56 }
 0x189   : > { %988 = vst.msk [vmem:[#allocation3 + $0x240] sm:$0xff] %vm963_vm3, %v916_v5  ;;  %7349 = vmatpush.msra.mxu1 %v1991_v56 }
 0x18a   : > { %1319 = vrot.lane.b32.xlu1 %v8356_v39, %s7797_s1  ;;  %2137 = vmatpush.msra.mxu0 %v1990_v9 }
 0x18b   : > { %7350 = vmatpush.msra.mxu1 %v1990_v9 }
 0x18c   : > { %1323 = vrot.lane.b32.xlu0 %v8337_v28, %s7797_s1  ;;  %v914_v23 = vpop.permute.xlu1 %913 }
 0x18d   : > { %987 = vst.msk [vmem:[#allocation3 + $0x228] sm:$0xff] %vm963_vm3, %v914_v23 }
 0x18e   : > { %1116 = vrot.lane.b32.xlu2 %v8555_v6, %s7799_s25  ;;  %v918_v5 = vpop.permute.xlu0 %917 }
 0x18f   : > { %989 = vst.msk [vmem:[#allocation3 + $0x258] sm:$0xff] %vm963_vm3, %v918_v5 }
 0x190   : > { %v922_v15 = vpop.permute.xlu2 %921 }
 0x191   : > { %991 = vst.msk [vmem:[#allocation3 + $0x288] sm:$0xff] %vm963_vm3, %v922_v15 }
 0x192   : > { %1325 = vrot.lane.b32.xlu1 %v8379_v53, %s7797_s1 }
 0x194   : > { %1329 = vrot.lane.b32.xlu0 %v8360_v40, %s7797_s1  ;;  %v920_v39 = vpop.permute.xlu1 %919 }
 0x195   : > { %990 = vst.msk [vmem:[#allocation3 + $0x270] sm:$0xff] %vm963_vm3, %v920_v39  ;;  %v1190_v39 = vld [vmem:[#allocation2 + $0x21] sm:$0xff] }
 0x196   : > { %1122 = vrot.lane.b32.xlu2 %v8695_v7, %s7799_s25  ;;  %v924_v10 = vpop.permute.xlu0 %923  ;;  %1222 = vst.msk [vmem:[#allocation3 + $0x20] sm:$0xff] %vm417_vm0, %v1190_v39 }
 0x197   : > { %992 = vst.msk [vmem:[#allocation3 + $0x2a0] sm:$0xff] %vm963_vm3, %v924_v10 }
 0x198   : > { %v928_v28 = vpop.permute.xlu2 %927 }
 0x199   : > { %994 = vst.msk [vmem:[#allocation3 + $0x2d0] sm:$0xff] %vm963_vm3, %v928_v28 }
 0x19a   : > { %1331 = vrot.lane.b32.xlu1 %v8406_v61, %s7797_s1 }
 0x19c   : > { %1335 = vrot.lane.b32.xlu0 %v8385_v54, %s7797_s1  ;;  %v926_v40 = vpop.permute.xlu1 %925 }
 0x19d   : > { %993 = vst.msk [vmem:[#allocation3 + $0x2b8] sm:$0xff] %vm963_vm3, %v926_v40 }
 0x19e   : > { %1321 = vrot.lane.b32.xlu2 %v8321_v17, %s7797_s1  ;;  %v930_v13 = vpop.permute.xlu0 %929 }
 0x19f   : > { %995 = vst.msk [vmem:[#allocation3 + $0x2e8] sm:$0xff] %vm963_vm3, %v930_v13 }
 0x1a0   : > { %v1063_v53 = vpop.permute.xlu2 %1062 }
 0x1a1   : > { %1158 = vst.msk [vmem:[#allocation3 + $0x18] sm:$0xff] %vm1156_vm4, %v1063_v53 }
 0x1a2   : > { %1337 = vrot.lane.b32.xlu1 %v8430_v46, %s7797_s1 }
 0x1a4   : > { %1341 = vrot.lane.b32.xlu0 %v8412_v62, %s7797_s1  ;;  %v1061_v54 = vpop.permute.xlu1 %1060 }
 0x1a5   : > { %1157 = vst.msk [vmem:[#allocation3] sm:$0xff] %vm1156_vm4, %v1061_v54 }
 0x1a6   : > { %1327 = vrot.lane.b32.xlu2 %v8339_v29, %s7797_s1  ;;  %v1065_v61 = vpop.permute.xlu0 %1064 }
 0x1a7   : > { %1159 = vst.msk [vmem:[#allocation3 + $0x30] sm:$0xff] %vm1156_vm4, %v1065_v61  ;;  %v8798_v61 = vld [vmem:[#allocation2 + $0x31] sm:$0xff] }
 0x1a8   : > { %v1069_v17 = vpop.permute.xlu2 %1068  ;;  %1223 = vst.msk [vmem:[#allocation3 + $0x38] sm:$0xff] %vm417_vm0, %v8798_v61 }
 0x1a9   : > { %1161 = vst.msk [vmem:[#allocation3 + $0x60] sm:$0xff] %vm1156_vm4, %v1069_v17 }
 0x1aa   : > { %1343 = vrot.lane.b32.xlu1 %v8457_v42, %s7797_s1  ;;  %v1897_v42 = vld [vmem:[#allocation3 + $0x18] sm:$0xff] }
 0x1ac   : > { %1347 = vrot.lane.b32.xlu0 %v8435_v57, %s7797_s1  ;;  %v1067_v62 = vpop.permute.xlu1 %1066  ;;  %v1894_v46 = vld [vmem:[#allocation3] sm:$0xff] }
 0x1ad   : > { %1160 = vst.msk [vmem:[#allocation3 + $0x48] sm:$0xff] %vm1156_vm4, %v1067_v62  ;;  %2138 = vmatmul.f32.vlgmr.msra.gmra.mxu0 %v1894_v46  ;;  %v8809_v62 = vld [vmem:[#allocation2 + $0x69] sm:$0xff] }
 0x1ae   : > { %1333 = vrot.lane.b32.xlu2 %v8362_v41, %s7797_s1  ;;  %v1071_v1 = vpop.permute.xlu0 %1070  ;;  %1228 = vst.msk [vmem:[#allocation3 + $0xb0] sm:$0xff] %vm417_vm0, %v8809_v62 }
 0x1af   : > { %1162 = vst.msk [vmem:[#allocation3 + $0x78] sm:$0xff] %vm1156_vm4, %v1071_v1 }
 0x1b0   : > { %v1075_v29 = vpop.permute.xlu2 %1074 }
 0x1b1   : > { %1164 = vst.msk [vmem:[#allocation3 + $0xa8] sm:$0xff] %vm1156_vm4, %v1075_v29  ;;  %v1189_v29 = vld [vmem:[#allocation2 + $0x19] sm:$0xff] }
 0x1b2   : > { %1349 = vrot.lane.b32.xlu1 %v8484_v26, %s7797_s1  ;;  %v1900_v26 = vld [vmem:[#allocation3 + $0x30] sm:$0xff]  ;;  %1221 = vst.msk [vmem:[#allocation3 + $0x8] sm:$0xff] %vm417_vm0, %v1189_v29 }
 0x1b4   : > { %1353 = vrot.lane.b32.xlu0 %v8462_v36, %s7797_s1  ;;  %v1073_v57 = vpop.permute.xlu1 %1072 }
 0x1b5   : > { %1163 = vst.msk [vmem:[#allocation3 + $0x90] sm:$0xff] %vm1156_vm4, %v1073_v57  ;;  %2141 = vmatmul.f32.gmra.mxu0 %v1897_v42  ;;  %v8816_v42 = vld [vmem:[#allocation2 + $0x51] sm:$0xff] }
 0x1b6   : > { %1339 = vrot.lane.b32.xlu2 %v8389_v55, %s7797_s1  ;;  %v1077_v18 = vpop.permute.xlu0 %1076  ;;  %v1909_v23 = vld [vmem:[#allocation3 + $0x78] sm:$0xff]  ;;  %1226 = vst.msk [vmem:[#allocation3 + $0x80] sm:$0xff] %vm417_vm0, %v8816_v42  ;;  %v8830_v57 = vld [vmem:[#allocation2 + $0x91] sm:$0xff] }
 0x1b7   : > { %1165 = vst.msk [vmem:[#allocation3 + $0xc0] sm:$0xff] %vm1156_vm4, %v1077_v18 }
 0x1b8   : > { %v1081_v41 = vpop.permute.xlu2 %1080  ;;  %v1915_v54 = vld [vmem:[#allocation3 + $0xa8] sm:$0xff]  ;;  %1231 = vst.msk [vmem:[#allocation3 + $0xf8] sm:$0xff] %vm417_vm0, %v8830_v57 }
 0x1b9   : > { %1167 = vst.msk [vmem:[#allocation3 + $0xf0] sm:$0xff] %vm1156_vm4, %v1081_v41  ;;  %v8819_v41 = vld [vmem:[#allocation2 + $0x39] sm:$0xff] }
 0x1ba   : > { %1355 = vrot.lane.b32.xlu1 %v8511_v12, %s7797_s1  ;;  %1224 = vst.msk [vmem:[#allocation3 + $0x50] sm:$0xff] %vm417_vm0, %v8819_v41 }
 0x1bc   : > { %1359 = vrot.lane.b32.xlu0 %v8489_v43, %s7797_s1  ;;  %v1079_v36 = vpop.permute.xlu1 %1078  ;;  %v1912_v53 = vld [vmem:[#allocation3 + $0x90] sm:$0xff] }
 0x1bd   : > { %1166 = vst.msk [vmem:[#allocation3 + $0xd8] sm:$0xff] %vm1156_vm4, %v1079_v36  ;;  %2144 = vmatmul.f32.gmra.mxu0 %v1900_v26  ;;  %v8840_v36 = vld [vmem:[#allocation2 + $0x61] sm:$0xff] }
 0x1be   : > { %1345 = vrot.lane.b32.xlu2 %v8414_v63, %s7797_s1  ;;  %v1083_v56 = vpop.permute.xlu0 %1082  ;;  %v1903_v63 = vld [vmem:[#allocation3 + $0x48] sm:$0xff]  ;;  %v1918_v1 = vld [vmem:[#allocation3 + $0xc0] sm:$0xff]  ;;  %1227 = vst.msk [vmem:[#allocation3 + $0x98] sm:$0xff] %vm417_vm0, %v8840_v36 }
 0x1bf   : > { %1168 = vst.msk [vmem:[#allocation3 + $0x108] sm:$0xff] %vm1156_vm4, %v1083_v56  ;;  %v8851_v56 = vld [vmem:[#allocation2 + $0xb1] sm:$0xff] }
 0x1c0   : > { %v1087_v55 = vpop.permute.xlu2 %1086  ;;  %1234 = vst.msk [vmem:[#allocation3 + $0x140] sm:$0xff] %vm417_vm0, %v8851_v56 }
 0x1c1   : > { %1170 = vst.msk [vmem:[#allocation3 + $0x138] sm:$0xff] %vm1156_vm4, %v1087_v55 }
 0x1c2   : > { %1361 = vrot.lane.b32.xlu1 %v8538_v19, %s7797_s1 }
 0x1c4   : > { %1365 = vrot.lane.b32.xlu0 %v8516_v20, %s7797_s1  ;;  %v1085_v43 = vpop.permute.xlu1 %1084  ;;  %v1921_v26 = vld [vmem:[#allocation3 + $0xd8] sm:$0xff] }
 0x1c5   : > { %1169 = vst.msk [vmem:[#allocation3 + $0x120] sm:$0xff] %vm1156_vm4, %v1085_v43  ;;  %2147 = vmatmul.f32.gmra.mxu0 %v1903_v63  ;;  %v1924_v43 = vld [vmem:[#allocation3 + $0xf0] sm:$0xff] }
 0x1c6   : > { %1351 = vrot.lane.b32.xlu2 %v8439_v3, %s7797_s1  ;;  %v1089_v15 = vpop.permute.xlu0 %1088  ;;  %v1906_v3 = vld [vmem:[#allocation3 + $0x60] sm:$0xff] }
 0x1c7   : > { %1171 = vst.msk [vmem:[#allocation3 + $0x150] sm:$0xff] %vm1156_vm4, %v1089_v15  ;;  %v8861_v15 = vld [vmem:[#allocation2 + $0x81] sm:$0xff] }
 0x1c8   : > { %v1093_v12 = vpop.permute.xlu2 %1092  ;;  %1230 = vst.msk [vmem:[#allocation3 + $0xe0] sm:$0xff] %vm417_vm0, %v8861_v15 }
 0x1c9   : > { %1173 = vst.msk [vmem:[#allocation3 + $0x180] sm:$0xff] %vm1156_vm4, %v1093_v12 }
 0x1ca   : > { %1367 = vrot.lane.b32.xlu1 %v8565_v11, %s7797_s1 }
 0x1cc   : > { %1371 = vrot.lane.b32.xlu0 %v8543_v30, %s7797_s1  ;;  %v1091_v20 = vpop.permute.xlu1 %1090 }
 0x1cd   : > { %1172 = vst.msk [vmem:[#allocation3 + $0x168] sm:$0xff] %vm1156_vm4, %v1091_v20  ;;  %2150 = vmatmul.f32.gmra.mxu0 %v1906_v3  ;;  %v1927_v3 = vld [vmem:[#allocation3 + $0x108] sm:$0xff] }
 0x1ce   : > { %1357 = vrot.lane.b32.xlu2 %v8466_v21, %s7797_s1  ;;  %v1095_v9 = vpop.permute.xlu0 %1094  ;;  %v1283_v21 = vld [vmem:[#allocation2 + $0x182] sm:$0xff] }
 0x1cf   : > { %1174 = vst.msk [vmem:[#allocation3 + $0x198] sm:$0xff] %vm1156_vm4, %v1095_v9 }
 0x1d0   : > { %v1099_v19 = vpop.permute.xlu2 %1098 }
 0x1d1   : > { %1176 = vst.msk [vmem:[#allocation3 + $0x1c8] sm:$0xff] %vm1156_vm4, %v1099_v19  ;;  %v8872_v19 = vld [vmem:[#allocation2 + $0xd9] sm:$0xff] }
 0x1d2   : > { %1373 = vrot.lane.b32.xlu1 %v8582_v14, %s7797_s1  ;;  %1237 = vst.msk [vmem:[#allocation3 + $0x188] sm:$0xff] %vm417_vm0, %v8872_v19 }
 0x1d4   : > { %1377 = vrot.lane.b32.xlu0 %v1283_v21, %s7797_s1  ;;  %v1097_v30 = vpop.permute.xlu1 %1096  ;;  %v8882_v21 = vld [vmem:[#allocation2 + $0xa9] sm:$0xff] }
 0x1d5   : > { %1175 = vst.msk [vmem:[#allocation3 + $0x1b0] sm:$0xff] %vm1156_vm4, %v1097_v30  ;;  %2153 = vmatmul.f32.gmra.mxu0 %v1909_v23  ;;  %v1930_v23 = vld [vmem:[#allocation3 + $0x120] sm:$0xff] }
 0x1d6   : > { %1363 = vrot.lane.b32.xlu2 %v8493_v45, %s7797_s1  ;;  %v1945_v5 = vld [vmem:[#allocation3 + $0x198] sm:$0xff]  ;;  %v1101_v28 = vpop.permute.xlu0 %1100  ;;  %1233 = vst.msk [vmem:[#allocation3 + $0x128] sm:$0xff] %vm417_vm0, %v8882_v21 }
 0x1d7   : > { %2189 = vmatmul.f32.vlgmr.msra.gmra.mxu1 %v1945_v5  ;;  %1177 = vst.msk [vmem:[#allocation3 + $0x1e0] sm:$0xff] %vm1156_vm4, %v1101_v28  ;;  %v1284_v45 = vld [vmem:[#allocation2 + $0x18a] sm:$0xff]  ;;  %v1461_v28 = vld [vmem:[#allocation2 + $0xe0] sm:$0xff] }
 0x1d8   : > { %v1105_v11 = vpop.permute.xlu2 %1104 }
 0x1d9   : > { %1179 = vst.msk [vmem:[#allocation3 + $0x210] sm:$0xff] %vm1156_vm4, %v1105_v11  ;;  %v8893_v11 = vld [vmem:[#allocation2 + $0xf9] sm:$0xff] }
 0x1da   : > { %1379 = vrot.lane.b32.xlu1 %v1284_v45, %s7797_s1  ;;  %1240 = vst.msk [vmem:[#allocation3 + $0x1d0] sm:$0xff] %vm417_vm0, %v8893_v11  ;;  %v8903_v45 = vld [vmem:[#allocation2 + $0xc9] sm:$0xff] }
 0x1db   : > { %1236 = vst.msk [vmem:[#allocation3 + $0x170] sm:$0xff] %vm417_vm0, %v8903_v45 }
 0x1dc   : > { %1512 = vrot.lane.b32.xlu0 %v8346_v34, %s7798_s13  ;;  %v1103_v10 = vpop.permute.xlu1 %1102  ;;  %v1948_v40 = vld [vmem:[#allocation3 + $0x1b0] sm:$0xff] }
 0x1dd   : > { %1178 = vst.msk [vmem:[#allocation3 + $0x1f8] sm:$0xff] %vm1156_vm4, %v1103_v10  ;;  %2156 = vmatmul.f32.gmra.mxu0 %v1912_v53  ;;  %v1933_v10 = vld [vmem:[#allocation3 + $0x138] sm:$0xff] }
 0x1de   : > { %1369 = vrot.lane.b32.xlu2 %v8520_v38, %s7797_s1  ;;  %v1107_v13 = vpop.permute.xlu0 %1106  ;;  %v8791_v38 = vld [vmem:[#allocation2 + $0x49] sm:$0xff] }
 0x1df   : > { %2192 = vmatmul.f32.gmra.mxu1 %v1948_v40  ;;  %1180 = vst.msk [vmem:[#allocation3 + $0x228] sm:$0xff] %vm1156_vm4, %v1107_v13  ;;  %v8920_v40 = vld [vmem:[#allocation2 + $0x109] sm:$0xff] }
 0x1e0   : > { %v1111_v14 = vpop.permute.xlu2 %1110  ;;  %1225 = vst.msk [vmem:[#allocation3 + $0x68] sm:$0xff] %vm417_vm0, %v8791_v38  ;;  %v1960_v63 = vld [vmem:[#allocation3 + $0x210] sm:$0xff]  ;;  %v1464_v13 = vld [vmem:[#allocation2 + $0x108] sm:$0xff] }
 0x1e1   : > { %1182 = vst.msk [vmem:[#allocation3 + $0x258] sm:$0xff] %vm1156_vm4, %v1111_v14  ;;  %v8913_v14 = vld [vmem:[#allocation2 + $0x121] sm:$0xff] }
 0x1e2   : > { %1514 = vrot.lane.b32.xlu1 %v8344_v33, %s7798_s13  ;;  %1243 = vst.msk [vmem:[#allocation3 + $0x218] sm:$0xff] %vm417_vm0, %v8913_v14 }
 0x1e3   : > { %1241 = vst.msk [vmem:[#allocation3 + $0x1e8] sm:$0xff] %vm417_vm0, %v8920_v40 }
 0x1e4   : > { %1518 = vrot.lane.b32.xlu0 %v8374_v50, %s7798_s13  ;;  %v1109_v17 = vpop.permute.xlu1 %1108  ;;  %v1957_v55 = vld [vmem:[#allocation3 + $0x1f8] sm:$0xff] }
 0x1e5   : > { %1181 = vst.msk [vmem:[#allocation3 + $0x240] sm:$0xff] %vm1156_vm4, %v1109_v17  ;;  %2159 = vmatmul.f32.gmra.mxu0 %v1915_v54  ;;  %v2021_v17 = vld [vmem:[#allocation9 + $0xf8] sm:$0xff]  ;;  %v8933_v54 = vld [vmem:[#allocation2 + $0x141] sm:$0xff] }
 0x1e6   : > { %1375 = vrot.lane.b32.xlu2 %v8547_v24, %s7797_s1  ;;  %v1951_v24 = vld [vmem:[#allocation3 + $0x1c8] sm:$0xff]  ;;  %v1113_v33 = vpop.permute.xlu0 %1112  ;;  %2235 = vmatpush.msrb.mxu1 %v2021_v17  ;;  %1246 = vst.msk [vmem:[#allocation3 + $0x260] sm:$0xff] %vm417_vm0, %v8933_v54 }
 0x1e7   : > { %2195 = vmatmul.f32.gmra.mxu1 %v1951_v24  ;;  %1183 = vst.msk [vmem:[#allocation3 + $0x270] sm:$0xff] %vm1156_vm4, %v1113_v33  ;;  %v1963_v9 = vld [vmem:[#allocation3 + $0x228] sm:$0xff]  ;;  %v1936_v33 = vld [vmem:[#allocation3 + $0x150] sm:$0xff] }
 0x1e8   : > { %v1117_v34 = vpop.permute.xlu2 %1116  ;;  %v1969_v53 = vld [vmem:[#allocation3 + $0x258] sm:$0xff] }
 0x1e9   : > { %1185 = vst.msk [vmem:[#allocation3 + $0x2a0] sm:$0xff] %vm1156_vm4, %v1117_v34  ;;  %v8923_v34 = vld [vmem:[#allocation2 + $0xf1] sm:$0xff] }
 0x1ea   : > { %1520 = vrot.lane.b32.xlu1 %v8369_v49, %s7798_s13  ;;  %1239 = vst.msk [vmem:[#allocation3 + $0x1b8] sm:$0xff] %vm417_vm0, %v8923_v34 }
 0x1ec   : > { %1524 = vrot.lane.b32.xlu0 %v8397_v59, %s7798_s13  ;;  %v1115_v46 = vpop.permute.xlu1 %1114  ;;  %v1966_v5 = vld [vmem:[#allocation3 + $0x240] sm:$0xff] }
 0x1ed   : > { %1184 = vst.msk [vmem:[#allocation3 + $0x288] sm:$0xff] %vm1156_vm4, %v1115_v46  ;;  %2162 = vmatmul.f32.gmra.mxu0 %v1918_v1  ;;  %v1467_v46 = vld [vmem:[#allocation2 + $0x128] sm:$0xff]  ;;  %v8943_v1 = vld [vmem:[#allocation2 + $0x111] sm:$0xff] }
 0x1ee   : > { %1510 = vrot.lane.b32.xlu2 %v8326_v22, %s7798_s13  ;;  %v1954_v22 = vld [vmem:[#allocation3 + $0x1e0] sm:$0xff]  ;;  %v1119_v49 = vpop.permute.xlu0 %1118  ;;  %v1972_v29 = vld [vmem:[#allocation3 + $0x270] sm:$0xff]  ;;  %1242 = vst.msk [vmem:[#allocation3 + $0x200] sm:$0xff] %vm417_vm0, %v8943_v1 }
 0x1ef   : > { %2198 = vmatmul.f32.gmra.mxu1 %v1954_v22  ;;  %1186 = vst.msk [vmem:[#allocation3 + $0x2b8] sm:$0xff] %vm1156_vm4, %v1119_v49  ;;  %v2020_v22 = vld [vmem:[#allocation9 + $0xf0] sm:$0xff]  ;;  %v2019_v49 = vld [vmem:[#allocation9 + $0xe8] sm:$0xff] }
 0x1f0   : > { %v1123_v50 = vpop.permute.xlu2 %1122  ;;  %2236 = vmatpush.msrb.mxu1 %v2020_v22  ;;  %v2009_v22 = vld [vmem:[#allocation9 + $0x98] sm:$0xff] }
 0x1f1   : > { %1188 = vst.msk [vmem:[#allocation3 + $0x2e8] sm:$0xff] %vm1156_vm4, %v1123_v50  ;;  %v8940_v50 = vld [vmem:[#allocation2 + $0x129] sm:$0xff] }
 0x1f2   : > { %1526 = vrot.lane.b32.xlu1 %v8395_v58, %s7798_s13  ;;  %1244 = vst.msk [vmem:[#allocation3 + $0x230] sm:$0xff] %vm417_vm0, %v8940_v50  ;;  %2237 = vmatpush.msrb.mxu1 %v2019_v49 }
 0x1f4   : > { %1530 = vrot.lane.b32.xlu0 %v8427_v27, %s7798_s13  ;;  %v1121_v18 = vpop.permute.xlu1 %1120 }
 0x1f5   : > { %1187 = vst.msk [vmem:[#allocation3 + $0x2d0] sm:$0xff] %vm1156_vm4, %v1121_v18  ;;  %2165 = vmatmul.f32.gmra.mxu0 %v1921_v26  ;;  %v1939_v26 = vld [vmem:[#allocation3 + $0x168] sm:$0xff] }
 0x1f6   : > { %1516 = vrot.lane.b32.xlu2 %v8348_v35, %s7798_s13  ;;  %v8837_v35 = vld [vmem:[#allocation2 + $0x79] sm:$0xff]  ;;  %v1318_v58 = vpop.permute.xlu0 %1317 }
 0x1f7   : > { %2201 = vmatmul.f32.gmra.mxu1 %v1957_v55  ;;  %1413 = vst.msk [vmem:[#allocation3 + $0x8] sm:$0xff] %vm770_vm2, %v1318_v58  ;;  %v8960_v55 = vld [vmem:[#allocation2 + $0x151] sm:$0xff] }
 0x1f8   : > { %v1322_v59 = vpop.permute.xlu2 %1321  ;;  %1229 = vst.msk [vmem:[#allocation3 + $0xc8] sm:$0xff] %vm417_vm0, %v8837_v35  ;;  %v1987_v17 = vld [vmem:[#allocation3 + $0x2e8] sm:$0xff] }
 0x1f9   : > { %1415 = vst.msk [vmem:[#allocation3 + $0x38] sm:$0xff] %vm770_vm2, %v1322_v59  ;;  %v8953_v59 = vld [vmem:[#allocation2 + $0x169] sm:$0xff] }
 0x1fa   : > { %1532 = vrot.lane.b32.xlu1 %v8420_v4, %s7798_s13  ;;  %1249 = vst.msk [vmem:[#allocation3 + $0x2a8] sm:$0xff] %vm417_vm0, %v8953_v59 }
 0x1fb   : > { %1247 = vst.msk [vmem:[#allocation3 + $0x278] sm:$0xff] %vm417_vm0, %v8960_v55 }
 0x1fc   : > { %1536 = vrot.lane.b32.xlu0 %v8454_v44, %s7798_s13  ;;  %v1320_v12 = vpop.permute.xlu1 %1319 }
 0x1fd   : > { %1414 = vst.msk [vmem:[#allocation3 + $0x20] sm:$0xff] %vm770_vm2, %v1320_v12  ;;  %2168 = vmatmul.f32.gmra.mxu0 %v1924_v43  ;;  %v8963_v12 = vld [vmem:[#allocation2 + $0x139] sm:$0xff] }
 0x1fe   : > { %1522 = vrot.lane.b32.xlu2 %v8377_v51, %s7798_s13  ;;  %v8858_v51 = vld [vmem:[#allocation2 + $0x99] sm:$0xff]  ;;  %v1324_v4 = vpop.permute.xlu0 %1323  ;;  %1245 = vst.msk [vmem:[#allocation3 + $0x248] sm:$0xff] %vm417_vm0, %v8963_v12 }
 0x1ff   : > { %2204 = vmatmul.f32.gmra.mxu1 %v1960_v63  ;;  %1416 = vst.msk [vmem:[#allocation3 + $0x50] sm:$0xff] %vm770_vm2, %v1324_v4  ;;  %v2018_v63 = vld [vmem:[#allocation9 + $0xe0] sm:$0xff]  ;;  %v8973_v4 = vld [vmem:[#allocation2 + $0x189] sm:$0xff] }
 0x200   : > { %v1328_v27 = vpop.permute.xlu2 %1327  ;;  %1232 = vst.msk [vmem:[#allocation3 + $0x110] sm:$0xff] %vm417_vm0, %v8858_v51  ;;  %2238 = vmatpush.msrb.mxu1 %v2018_v63  ;;  %v2022_v63 = vld [vmem:[#allocation9 + $0x100] sm:$0xff] }
 0x201   : > { %1418 = vst.msk [vmem:[#allocation3 + $0x80] sm:$0xff] %vm770_vm2, %v1328_v27  ;;  %v1470_v27 = vld [vmem:[#allocation2 + $0x150] sm:$0xff] }
 0x202   : > { %1538 = vrot.lane.b32.xlu1 %v8447_v0, %s7798_s13  ;;  %1252 = vst.msk [vmem:[#allocation3 + $0x2f0] sm:$0xff] %vm417_vm0, %v8973_v4 }
 0x204   : > { %1542 = vrot.lane.b32.xlu0 %v8481_v32, %s7798_s13  ;;  %v1326_v20 = vpop.permute.xlu1 %1325 }
 0x205   : > { %1417 = vst.msk [vmem:[#allocation3 + $0x68] sm:$0xff] %vm770_vm2, %v1326_v20  ;;  %2171 = vmatmul.f32.gmra.mxu0 %v1927_v3  ;;  %v1942_v20 = vld [vmem:[#allocation3 + $0x180] sm:$0xff] }
 0x206   : > { %1528 = vrot.lane.b32.xlu2 %v8402_v60, %s7798_s13  ;;  %v8879_v60 = vld [vmem:[#allocation2 + $0xc1] sm:$0xff]  ;;  %v1330_v0 = vpop.permute.xlu0 %1329  ;;  %v8979_v3 = vld [vmem:[#allocation2 + $0x171] sm:$0xff] }
 0x207   : > { %2207 = vmatmul.f32.gmra.mxu1 %v1963_v9  ;;  %1419 = vst.msk [vmem:[#allocation3 + $0x98] sm:$0xff] %vm770_vm2, %v1330_v0  ;;  %v1473_v0 = vld [vmem:[#allocation2 + $0x170] sm:$0xff] }
 0x208   : > { %v1334_v44 = vpop.permute.xlu2 %1333  ;;  %1235 = vst.msk [vmem:[#allocation3 + $0x158] sm:$0xff] %vm417_vm0, %v8879_v60 }
 0x209   : > { %1421 = vst.msk [vmem:[#allocation3 + $0xc8] sm:$0xff] %vm770_vm2, %v1334_v44 }
 0x20a   : > { %1544 = vrot.lane.b32.xlu1 %v8474_v48, %s7798_s13  ;;  %1250 = vst.msk [vmem:[#allocation3 + $0x2c0] sm:$0xff] %vm417_vm0, %v8979_v3 }
 0x20c   : > { %1548 = vrot.lane.b32.xlu0 %v8508_v37, %s7798_s13  ;;  %v1332_v30 = vpop.permute.xlu1 %1331 }
 0x20d   : > { %1420 = vst.msk [vmem:[#allocation3 + $0xb0] sm:$0xff] %vm770_vm2, %v1332_v30  ;;  %2174 = vmatmul.f32.gmra.mxu0 %v1930_v23  ;;  %v2017_v23 = vld [vmem:[#allocation9 + $0xd8] sm:$0xff] }
 0x20e   : > { %1534 = vrot.lane.b32.xlu2 %v8432_v47, %s7798_s13  ;;  %v8900_v47 = vld [vmem:[#allocation2 + $0xe1] sm:$0xff]  ;;  %v1336_v48 = vpop.permute.xlu0 %1335  ;;  %2239 = vmatpush.msrb.mxu1 %v2017_v23 }
 0x20f   : > { %2210 = vmatmul.f32.gmra.mxu1 %v1966_v5  ;;  %1422 = vst.msk [vmem:[#allocation3 + $0xe0] sm:$0xff] %vm770_vm2, %v1336_v48  ;;  %v8995_v5 = vld [vmem:[#allocation2 + $0x181] sm:$0xff] }
 0x210   : > { %v1340_v32 = vpop.permute.xlu2 %1339  ;;  %1238 = vst.msk [vmem:[#allocation3 + $0x1a0] sm:$0xff] %vm417_vm0, %v8900_v47 }
 0x211   : > { %1424 = vst.msk [vmem:[#allocation3 + $0x110] sm:$0xff] %vm770_vm2, %v1340_v32  ;;  %v8982_v32 = vld [vmem:[#allocation2 + $0x159] sm:$0xff] }
 0x212   : > { %1550 = vrot.lane.b32.xlu1 %v8501_v16, %s7798_s13  ;;  %1248 = vst.msk [vmem:[#allocation3 + $0x290] sm:$0xff] %vm417_vm0, %v8982_v32 }
 0x213   : > { %1251 = vst.msk [vmem:[#allocation3 + $0x2d8] sm:$0xff] %vm417_vm0, %v8995_v5 }
 0x214   : > { %1554 = vrot.lane.b32.xlu0 %v8535_v8, %s7798_s13  ;;  %v1338_v39 = vpop.permute.xlu1 %1337 }
 0x215   : > { %1423 = vst.msk [vmem:[#allocation3 + $0xf8] sm:$0xff] %vm770_vm2, %v1338_v39  ;;  %2177 = vmatmul.f32.gmra.mxu0 %v1933_v10  ;;  %v1476_v39 = vld [vmem:[#allocation2 + $0x198] sm:$0xff] }
 0x216   : > { %1540 = vrot.lane.b32.xlu2 %v1461_v28, %s7798_s13  ;;  %v1342_v16 = vpop.permute.xlu0 %1341  ;;  %v1981_v28 = vld [vmem:[#allocation3 + $0x2b8] sm:$0xff] }
 0x217   : > { %2213 = vmatmul.f32.gmra.mxu1 %v1969_v53  ;;  %1425 = vst.msk [vmem:[#allocation3 + $0x128] sm:$0xff] %vm770_vm2, %v1342_v16  ;;  %v1984_v53 = vld [vmem:[#allocation3 + $0x2d0] sm:$0xff] }
 0x218   : > { %v1346_v37 = vpop.permute.xlu2 %1345 }
 0x219   : > { %1427 = vst.msk [vmem:[#allocation3 + $0x158] sm:$0xff] %vm770_vm2, %v1346_v37 }
 0x21a   : > { %1556 = vrot.lane.b32.xlu1 %v8528_v25, %s7798_s13 }
 0x21c   : > { %1560 = vrot.lane.b32.xlu0 %v8562_v31, %s7798_s13  ;;  %v1344_v24 = vpop.permute.xlu1 %1343 }
 0x21d   : > { %1426 = vst.msk [vmem:[#allocation3 + $0x140] sm:$0xff] %vm770_vm2, %v1344_v24  ;;  %2180 = vmatmul.f32.gmra.mxu0 %v1936_v33  ;;  %v2014_v24 = vld [vmem:[#allocation9 + $0xc0] sm:$0xff]  ;;  %v2013_v33 = vld [vmem:[#allocation9 + $0xb8] sm:$0xff] }
 0x21e   : > { %1546 = vrot.lane.b32.xlu2 %v1464_v13, %s7798_s13  ;;  %v1348_v25 = vpop.permute.xlu0 %1347  ;;  %v2015_v13 = vld [vmem:[#allocation9 + $0xc8] sm:$0xff] }
 0x21f   : > { %2216 = vmatmul.f32.gmra.mxu1 %v1972_v29  ;;  %1428 = vst.msk [vmem:[#allocation3 + $0x170] sm:$0xff] %vm770_vm2, %v1348_v25  ;;  %v2012_v29 = vld [vmem:[#allocation9 + $0xb0] sm:$0xff]  ;;  %v2011_v25 = vld [vmem:[#allocation9 + $0xa8] sm:$0xff] }
 0x220   : > { %v1352_v8 = vpop.permute.xlu2 %1351 }
 0x221   : > { %1430 = vst.msk [vmem:[#allocation3 + $0x1a0] sm:$0xff] %vm770_vm2, %v1352_v8 }
 0x222   : > { %1562 = vrot.lane.b32.xlu1 %v8555_v6, %s7798_s13  ;;  %v1975_v6 = vld [vmem:[#allocation3 + $0x288] sm:$0xff] }
 0x224   : > { %1566 = vrot.lane.b32.xlu0 %v8676_v52, %s7798_s13  ;;  %v1350_v18 = vpop.permute.xlu1 %1349  ;;  %v1477_v52 = vld [vmem:[#allocation2 + $0x1a0] sm:$0xff] }
 0x225   : > { %1429 = vst.msk [vmem:[#allocation3 + $0x188] sm:$0xff] %vm770_vm2, %v1350_v18  ;;  %2183 = vmatmul.f32.gmra.mxu0 %v1939_v26  ;;  %v2007_v18 = vld [vmem:[#allocation9 + $0x88] sm:$0xff]  ;;  %v2025_v26 = vld [vmem:[#allocation9 + $0x118] sm:$0xff] }
 0x226   : > { %1552 = vrot.lane.b32.xlu2 %v1467_v46, %s7798_s13  ;;  %v1354_v58 = vpop.permute.xlu0 %1353  ;;  %v2010_v46 = vld [vmem:[#allocation9 + $0xa0] sm:$0xff]  ;;  %2360 = vmatpush.msra.mxu2 %v2025_v26 }
 0x227   : > { %2219 = vmatmul.f32.gmra.mxu1 %v1975_v6  ;;  %1431 = vst.msk [vmem:[#allocation3 + $0x1b8] sm:$0xff] %vm770_vm2, %v1354_v58  ;;  %7351 = vmatpush.msra.mxu3 %v2025_v26  ;;  %v2024_v58 = vld [vmem:[#allocation9 + $0x110] sm:$0xff] }
 0x228   : > { %v1358_v31 = vpop.permute.xlu2 %1357  ;;  %2361 = vmatpush.msra.mxu2 %v2024_v58  ;;  %v1841_v26 = vld [vmem:[#allocation2 + $0xb2] sm:$0xff] }
 0x229   : > { %1433 = vst.msk [vmem:[#allocation3 + $0x1e8] sm:$0xff] %vm770_vm2, %v1358_v31  ;;  %v2008_v31 = vld [vmem:[#allocation9 + $0x90] sm:$0xff]  ;;  %7352 = vmatpush.msra.mxu3 %v2024_v58 }
 0x22a   : > { %1568 = vrot.lane.b32.xlu1 %v8695_v7, %s7798_s13  ;;  %v1978_v7 = vld [vmem:[#allocation3 + $0x2a0] sm:$0xff]  ;;  %1873 = vst.msk [vmem:[#allocation3 + $0x118] sm:$0xff] %vm417_vm0, %v1841_v26 }
 0x22b   : > { %v2658_v26 = vld [vmem:[#allocation2 + $0x9] sm:$0xff] }
 0x22c   : > { %1572 = vrot.lane.b32.xlu0 %v1477_v52, %s7798_s13  ;;  %v1356_v44 = vpop.permute.xlu1 %1355  ;;  %v2006_v52 = vld [vmem:[#allocation9 + $0x80] sm:$0xff] }
 0x22d   : > { %1432 = vst.msk [vmem:[#allocation3 + $0x1d0] sm:$0xff] %vm770_vm2, %v1356_v44  ;;  %2186 = vmatmul.f32.gmra.mxu0 %v1942_v20  ;;  %v1831_v44 = vld [vmem:[#allocation2 + $0x3a] sm:$0xff] }
 0x22e   : > { %1558 = vrot.lane.b32.xlu2 %v1470_v27, %s7798_s13  ;;  %v1360_v9 = vpop.permute.xlu0 %1359  ;;  %1863 = vst.msk [vmem:[#allocation3 + $0x28] sm:$0xff] %vm417_vm0, %v1831_v44  ;;  %v1843_v44 = vld [vmem:[#allocation2 + $0xca] sm:$0xff] }
 0x22f   : > { %2222 = vmatmul.f32.gmra.mxu1 %v1978_v7  ;;  %1434 = vst.msk [vmem:[#allocation3 + $0x200] sm:$0xff] %vm770_vm2, %v1360_v9 }
 0x230   : > { %v1364_v43 = vpop.permute.xlu2 %1363  ;;  %1875 = vst.msk [vmem:[#allocation3 + $0x148] sm:$0xff] %vm417_vm0, %v1843_v44 }
 0x231   : > { %1436 = vst.msk [vmem:[#allocation3 + $0x230] sm:$0xff] %vm770_vm2, %v1364_v43  ;;  %v2023_v43 = vld [vmem:[#allocation9 + $0x108] sm:$0xff] }
 0x232   : > { %1702 = vrot.lane.b32.xlu1 %v8798_v61, %s7799_s25  ;;  %v2016_v61 = vld [vmem:[#allocation9 + $0xd0] sm:$0xff]  ;;  %2362 = vmatpush.msra.mxu2 %v2023_v43 }
 0x233   : > { %2240 = vmatpush.msrb.mxu1 %v2016_v61  ;;  %7353 = vmatpush.msra.mxu3 %v2023_v43 }
 0x234   : > { %1706 = vrot.lane.b32.xlu0 %v8791_v38, %s7799_s25  ;;  %v1362_v48 = vpop.permute.xlu1 %1361  ;;  %2363 = vmatpush.msra.mxu2 %v2022_v63 }
 0x235   : > { %1435 = vst.msk [vmem:[#allocation3 + $0x218] sm:$0xff] %vm770_vm2, %v1362_v48  ;;  %2241 = vmatpush.msrb.mxu1 %v2015_v13  ;;  %7354 = vmatpush.msra.mxu3 %v2022_v63  ;;  %v1899_v9 = vld [vmem:[#allocation3 + $0x28] sm:$0xff] }
 0x236   : > { %1564 = vrot.lane.b32.xlu2 %v1473_v0, %s7798_s13  ;;  %v1366_v37 = vpop.permute.xlu0 %1365  ;;  %v1832_v0 = vld [vmem:[#allocation2 + $0x4a] sm:$0xff] }
 0x237   : > { %2225 = vmatmul.f32.gmra.mxu1 %v1981_v28  ;;  %1437 = vst.msk [vmem:[#allocation3 + $0x248] sm:$0xff] %vm770_vm2, %v1366_v37  ;;  %v1833_v28 = vld [vmem:[#allocation2 + $0x52] sm:$0xff] }
 0x238   : > { %v1370_v30 = vpop.permute.xlu2 %1369  ;;  %2242 = vmatpush.msrb.mxu1 %v2014_v24  ;;  %1864 = vst.msk [vmem:[#allocation3 + $0x40] sm:$0xff] %vm417_vm0, %v1832_v0  ;;  %v1844_v0 = vld [vmem:[#allocation2 + $0xda] sm:$0xff] }
 0x239   : > { %1439 = vst.msk [vmem:[#allocation3 + $0x278] sm:$0xff] %vm770_vm2, %v1370_v30 }
 0x23a   : > { %1708 = vrot.lane.b32.xlu1 %v8816_v42, %s7799_s25  ;;  %2243 = vmatpush.msrb.mxu1 %v2013_v33  ;;  %1865 = vst.msk [vmem:[#allocation3 + $0x58] sm:$0xff] %vm417_vm0, %v1833_v28  ;;  %v1836_v33 = vld [vmem:[#allocation2 + $0x7a] sm:$0xff] }
 0x23b   : > { %1868 = vst.msk [vmem:[#allocation3 + $0xa0] sm:$0xff] %vm417_vm0, %v1836_v33 }
 0x23c   : > { %1712 = vrot.lane.b32.xlu0 %v8809_v62, %s7799_s25  ;;  %v1368_v10 = vpop.permute.xlu1 %1367  ;;  %2244 = vmatpush.msrb.mxu1 %v2012_v29  ;;  %1876 = vst.msk [vmem:[#allocation3 + $0x160] sm:$0xff] %vm417_vm0, %v1844_v0 }
 0x23d   : > { %1438 = vst.msk [vmem:[#allocation3 + $0x260] sm:$0xff] %vm770_vm2, %v1368_v10 }
 0x23e   : > { %1570 = vrot.lane.b32.xlu2 %v1476_v39, %s7798_s13  ;;  %v1372_v16 = vpop.permute.xlu0 %1371  ;;  %2245 = vmatpush.msrb.mxu1 %v2011_v25 }
 0x23f   : > { %2228 = vmatmul.f32.gmra.mxu1 %v1984_v53  ;;  %1440 = vst.msk [vmem:[#allocation3 + $0x290] sm:$0xff] %vm770_vm2, %v1372_v16  ;;  %v1902_v48 = vld [vmem:[#allocation3 + $0x40] sm:$0xff]  ;;  %v1834_v53 = vld [vmem:[#allocation2 + $0x62] sm:$0xff] }
 0x240   : > { %v1376_v38 = vpop.permute.xlu2 %1375  ;;  %2246 = vmatpush.msrb.mxu1 %v2010_v46  ;;  %1866 = vst.msk [vmem:[#allocation3 + $0x70] sm:$0xff] %vm417_vm0, %v1834_v53  ;;  %v1846_v53 = vld [vmem:[#allocation2 + $0xf2] sm:$0xff] }
 0x241   : > { %1442 = vst.msk [vmem:[#allocation3 + $0x2c0] sm:$0xff] %vm770_vm2, %v1376_v38  ;;  %v1905_v10 = vld [vmem:[#allocation3 + $0x58] sm:$0xff] }
 0x242   : > { %1714 = vrot.lane.b32.xlu1 %v8837_v35, %s7799_s25  ;;  %2247 = vmatpush.msrb.mxu1 %v2009_v22  ;;  %v1839_v22 = vld [vmem:[#allocation2 + $0x9a] sm:$0xff]  ;;  %1878 = vst.msk [vmem:[#allocation3 + $0x190] sm:$0xff] %vm417_vm0, %v1846_v53 }
 0x243   : > { %1871 = vst.msk [vmem:[#allocation3 + $0xe8] sm:$0xff] %vm417_vm0, %v1839_v22  ;;  %v2657_v22 = vld [vmem:[#allocation2 + $0x1] sm:$0xff] }
 0x244   : > { %1718 = vrot.lane.b32.xlu0 %v8830_v57, %s7799_s25  ;;  %v1374_v62 = vpop.permute.xlu1 %1373  ;;  %2248 = vmatpush.msrb.mxu1 %v2008_v31  ;;  %v1840_v31 = vld [vmem:[#allocation2 + $0xaa] sm:$0xff] }
 0x245   : > { %1441 = vst.msk [vmem:[#allocation3 + $0x2a8] sm:$0xff] %vm770_vm2, %v1374_v62 }
 0x246   : > { %1704 = vrot.lane.b32.xlu2 %v8819_v41, %s7799_s25  ;;  %v1378_v8 = vpop.permute.xlu0 %1377  ;;  %2249 = vmatpush.msrb.mxu1 %v2007_v18  ;;  %1872 = vst.msk [vmem:[#allocation3 + $0x100] sm:$0xff] %vm417_vm0, %v1840_v31 }
 0x247   : > { %2231 = vmatmul.f32.gmra.mxu1 %v1987_v17  ;;  %1443 = vst.msk [vmem:[#allocation3 + $0x2d8] sm:$0xff] %vm770_vm2, %v1378_v8  ;;  %v1908_v62 = vld [vmem:[#allocation3 + $0x70] sm:$0xff]  ;;  %v1835_v17 = vld [vmem:[#allocation2 + $0x6a] sm:$0xff] }
 0x248   : > { %v1511_v42 = vpop.permute.xlu2 %1510  ;;  %2250 = vmatpush.msrb.mxu1 %v2006_v52  ;;  %1867 = vst.msk [vmem:[#allocation3 + $0x88] sm:$0xff] %vm417_vm0, %v1835_v17  ;;  %v2139_v17 = vpop.f32.mrf.mxu0 }
 0x249   : > { %1606 = vst.msk [vmem:[#allocation3 + $0x8] sm:$0xff] %vm963_vm3, %v1511_v42 }
 0x24a   : > { %1720 = vrot.lane.b32.xlu1 %v8858_v51, %s7799_s25 }
 0x24c   : > { %1724 = vrot.lane.b32.xlu0 %v8851_v56, %s7799_s25  ;;  %v1380_v57 = vpop.permute.xlu1 %1379 }
 0x24d   : > { %1444 = vst.msk [vmem:[#allocation3 + $0x2f0] sm:$0xff] %vm770_vm2, %v1380_v57  ;;  %v1926_v18 = vld [vmem:[#allocation3 + $0x100] sm:$0xff] }
 0x24e   : > { %1710 = vrot.lane.b32.xlu2 %v8840_v36, %s7799_s25  ;;  %v1513_v35 = vpop.permute.xlu0 %1512 }
 0x24f   : > { %1607 = vst.msk [vmem:[#allocation3 + $0x20] sm:$0xff] %vm963_vm3, %v1513_v35  ;;  %v1911_v35 = vld [vmem:[#allocation3 + $0x88] sm:$0xff] }
 0x250   : > { %v1517_v41 = vpop.permute.xlu2 %1516 }
 0x251   : > { %1609 = vst.msk [vmem:[#allocation3 + $0x50] sm:$0xff] %vm963_vm3, %v1517_v41 }
 0x252   : > { %1726 = vrot.lane.b32.xlu1 %v8879_v60, %s7799_s25 }
 0x254   : > { %1730 = vrot.lane.b32.xlu0 %v8872_v19, %s7799_s25  ;;  %v1515_v56 = vpop.permute.xlu1 %1514 }
 0x255   : > { %1608 = vst.msk [vmem:[#allocation3 + $0x38] sm:$0xff] %vm963_vm3, %v1515_v56 }
 0x256   : > { %1716 = vrot.lane.b32.xlu2 %v8861_v15, %s7799_s25  ;;  %v1519_v51 = vpop.permute.xlu0 %1518 }
 0x257   : > { %1610 = vst.msk [vmem:[#allocation3 + $0x68] sm:$0xff] %vm963_vm3, %v1519_v51 }
 0x258   : > { %v1523_v36 = vpop.permute.xlu2 %1522 }
 0x259   : > { %1612 = vst.msk [vmem:[#allocation3 + $0x98] sm:$0xff] %vm963_vm3, %v1523_v36 }
 0x25a   : > { %1732 = vrot.lane.b32.xlu1 %v8900_v47, %s7799_s25 }
 0x25c   : > { %1736 = vrot.lane.b32.xlu0 %v8893_v11, %s7799_s25  ;;  %v1521_v19 = vpop.permute.xlu1 %1520 }
 0x25d   : > { %1611 = vst.msk [vmem:[#allocation3 + $0x80] sm:$0xff] %vm963_vm3, %v1521_v19  ;;  %v1837_v19 = vld [vmem:[#allocation2 + $0x82] sm:$0xff] }
 0x25e   : > { %1722 = vrot.lane.b32.xlu2 %v8882_v21, %s7799_s25  ;;  %v1525_v60 = vpop.permute.xlu0 %1524  ;;  %1869 = vst.msk [vmem:[#allocation3 + $0xb8] sm:$0xff] %vm417_vm0, %v1837_v19 }
 0x25f   : > { %1613 = vst.msk [vmem:[#allocation3 + $0xb0] sm:$0xff] %vm963_vm3, %v1525_v60 }
 0x260   : > { %v1529_v15 = vpop.permute.xlu2 %1528 }
 0x261   : > { %1615 = vst.msk [vmem:[#allocation3 + $0xe0] sm:$0xff] %vm963_vm3, %v1529_v15  ;;  %v1914_v15 = vld [vmem:[#allocation3 + $0xa0] sm:$0xff] }
 0x262   : > { %1738 = vrot.lane.b32.xlu1 %v8920_v40, %s7799_s25 }
 0x264   : > { %1742 = vrot.lane.b32.xlu0 %v8913_v14, %s7799_s25  ;;  %v1527_v11 = vpop.permute.xlu1 %1526 }
 0x265   : > { %1614 = vst.msk [vmem:[#allocation3 + $0xc8] sm:$0xff] %vm963_vm3, %v1527_v11  ;;  %v1917_v11 = vld [vmem:[#allocation3 + $0xb8] sm:$0xff] }
 0x266   : > { %1728 = vrot.lane.b32.xlu2 %v8903_v45, %s7799_s25  ;;  %v1531_v47 = vpop.permute.xlu0 %1530 }
 0x267   : > { %1616 = vst.msk [vmem:[#allocation3 + $0xf8] sm:$0xff] %vm963_vm3, %v1531_v47  ;;  %v1838_v47 = vld [vmem:[#allocation2 + $0x92] sm:$0xff] }
 0x268   : > { %v1535_v21 = vpop.permute.xlu2 %1534  ;;  %1870 = vst.msk [vmem:[#allocation3 + $0xd0] sm:$0xff] %vm417_vm0, %v1838_v47  ;;  %v1849_v47 = vld [vmem:[#allocation2 + $0x112] sm:$0xff] }
 0x269   : > { %1618 = vst.msk [vmem:[#allocation3 + $0x128] sm:$0xff] %vm963_vm3, %v1535_v21 }
 0x26a   : > { %1744 = vrot.lane.b32.xlu1 %v8940_v50, %s7799_s25  ;;  %1881 = vst.msk [vmem:[#allocation3 + $0x1d8] sm:$0xff] %vm417_vm0, %v1849_v47 }
 0x26c   : > { %1748 = vrot.lane.b32.xlu0 %v8933_v54, %s7799_s25  ;;  %v1533_v14 = vpop.permute.xlu1 %1532 }
 0x26d   : > { %1617 = vst.msk [vmem:[#allocation3 + $0x110] sm:$0xff] %vm963_vm3, %v1533_v14 }
 0x26e   : > { %1734 = vrot.lane.b32.xlu2 %v8923_v34, %s7799_s25  ;;  %v1537_v40 = vpop.permute.xlu0 %1536 }
 0x26f   : > { %1619 = vst.msk [vmem:[#allocation3 + $0x140] sm:$0xff] %vm963_vm3, %v1537_v40  ;;  %v1920_v40 = vld [vmem:[#allocation3 + $0xd0] sm:$0xff] }
 0x270   : > { %v1541_v45 = vpop.permute.xlu2 %1540 }
 0x271   : > { %1621 = vst.msk [vmem:[#allocation3 + $0x170] sm:$0xff] %vm963_vm3, %v1541_v45 }
 0x272   : > { %1750 = vrot.lane.b32.xlu1 %v8960_v55, %s7799_s25  ;;  %v1830_v55 = vld [vmem:[#allocation2 + $0x32] sm:$0xff] }
 0x273   : > { %1862 = vst.msk [vmem:[#allocation3 + $0x10] sm:$0xff] %vm417_vm0, %v1830_v55 }
 0x274   : > { %1754 = vrot.lane.b32.xlu0 %v8953_v59, %s7799_s25  ;;  %v1539_v54 = vpop.permute.xlu1 %1538 }
 0x275   : > { %1620 = vst.msk [vmem:[#allocation3 + $0x158] sm:$0xff] %vm963_vm3, %v1539_v54 }
 0x276   : > { %1740 = vrot.lane.b32.xlu2 %v8943_v1, %s7799_s25  ;;  %v1543_v50 = vpop.permute.xlu0 %1542 }
 0x277   : > { %1622 = vst.msk [vmem:[#allocation3 + $0x188] sm:$0xff] %vm963_vm3, %v1543_v50  ;;  %v1923_v50 = vld [vmem:[#allocation3 + $0xe8] sm:$0xff] }
 0x278   : > { %v1547_v34 = vpop.permute.xlu2 %1546 }
 0x279   : > { %1624 = vst.msk [vmem:[#allocation3 + $0x1b8] sm:$0xff] %vm963_vm3, %v1547_v34 }
 0x27a   : > { %1756 = vrot.lane.b32.xlu1 %v8979_v3, %s7799_s25 }
 0x27c   : > { %1760 = vrot.lane.b32.xlu0 %v8973_v4, %s7799_s25  ;;  %v1545_v49 = vpop.permute.xlu1 %1544  ;;  %v1896_v4 = vld [vmem:[#allocation3 + $0x10] sm:$0xff] }
 0x27d   : > { %1623 = vst.msk [vmem:[#allocation3 + $0x1a0] sm:$0xff] %vm963_vm3, %v1545_v49  ;;  %7157 = vmatmul.msk.f32.vlgmr.msra.gmra.mxu2 %vm417_vm0, %v1896_v4 }
 0x27e   : > { %1746 = vrot.lane.b32.xlu2 %v8963_v12, %s7799_s25  ;;  %v1549_v59 = vpop.permute.xlu0 %1548 }
 0x27f   : > { %1625 = vst.msk [vmem:[#allocation3 + $0x1d0] sm:$0xff] %vm963_vm3, %v1549_v59 }
 0x280   : > { %v1553_v1 = vpop.permute.xlu2 %1552 }
 0x281   : > { %1627 = vst.msk [vmem:[#allocation3 + $0x200] sm:$0xff] %vm963_vm3, %v1553_v1 }
 0x284   : > { %v1551_v27 = vpop.permute.xlu1 %1550  ;;  %2721 = vrot.lane.b32.xlu0 %v2657_v22, %s7797_s1 }
 0x285   : > { %1626 = vst.msk [vmem:[#allocation3 + $0x1e8] sm:$0xff] %vm963_vm3, %v1551_v27  ;;  %7158 = vmatmul.msk.f32.gmra.mxu2 %vm417_vm0, %v1899_v9  ;;  %v1929_v27 = vld [vmem:[#allocation3 + $0x118] sm:$0xff]  ;;  %v1935_v9 = vld [vmem:[#allocation3 + $0x148] sm:$0xff] }
 0x286   : > { %1752 = vrot.lane.b32.xlu2 %v8982_v32, %s7799_s25  ;;  %v1555_v12 = vpop.permute.xlu0 %1554 }
 0x287   : > { %1628 = vst.msk [vmem:[#allocation3 + $0x218] sm:$0xff] %vm963_vm3, %v1555_v12  ;;  %v1842_v12 = vld [vmem:[#allocation2 + $0xc2] sm:$0xff] }
 0x288   : > { %v1559_v6 = vpop.permute.xlu2 %1558  ;;  %1874 = vst.msk [vmem:[#allocation3 + $0x130] sm:$0xff] %vm417_vm0, %v1842_v12 }
 0x289   : > { %1630 = vst.msk [vmem:[#allocation3 + $0x248] sm:$0xff] %vm963_vm3, %v1559_v6 }
 0x28c   : > { %v1557_v3 = vpop.permute.xlu1 %1556 }
 0x28d   : > { %1629 = vst.msk [vmem:[#allocation3 + $0x230] sm:$0xff] %vm963_vm3, %v1557_v3  ;;  %7159 = vmatmul.msk.f32.gmra.mxu2 %vm417_vm0, %v1902_v48  ;;  %v1845_v48 = vld [vmem:[#allocation2 + $0xe2] sm:$0xff] }
 0x28e   : > { %1758 = vrot.lane.b32.xlu2 %v8995_v5, %s7799_s25  ;;  %v1561_v7 = vpop.permute.xlu0 %1560  ;;  %v9098_v5 = vpop.f32.mrf.mxu1  ;;  %1877 = vst.msk [vmem:[#allocation3 + $0x178] sm:$0xff] %vm417_vm0, %v1845_v48 }
 0x28f   : > { %1631 = vst.msk [vmem:[#allocation3 + $0x260] sm:$0xff] %vm963_vm3, %v1561_v7  ;;  %v1932_v4 = vld [vmem:[#allocation3 + $0x130] sm:$0xff] }
 0x290   : > { %v1565_v20 = vpop.permute.xlu2 %1564 }
 0x291   : > { %1633 = vst.msk [vmem:[#allocation3 + $0x290] sm:$0xff] %vm963_vm3, %v1565_v20 }
 0x294   : > { %v1563_v30 = vpop.permute.xlu1 %1562 }
 0x295   : > { %1632 = vst.msk [vmem:[#allocation3 + $0x278] sm:$0xff] %vm963_vm3, %v1563_v30  ;;  %7160 = vmatmul.msk.f32.gmra.mxu2 %vm417_vm0, %v1905_v10  ;;  %v1941_v10 = vld [vmem:[#allocation3 + $0x178] sm:$0xff] }
 0x296   : > { %v1567_v23 = vpop.permute.xlu0 %1566  ;;  %v9106_v61 = vpop.f32.mrf.mxu1 }
 0x297   : > { %1634 = vst.msk [vmem:[#allocation3 + $0x2a8] sm:$0xff] %vm963_vm3, %v1567_v23  ;;  %v1938_v23 = vld [vmem:[#allocation3 + $0x160] sm:$0xff] }
 0x298   : > { %v1571_v32 = vpop.permute.xlu2 %1570 }
 0x299   : > { %1636 = vst.msk [vmem:[#allocation3 + $0x2d8] sm:$0xff] %vm963_vm3, %v1571_v32 }
 0x29c   : > { %v1569_v39 = vpop.permute.xlu1 %1568 }
 0x29d   : > { %1635 = vst.msk [vmem:[#allocation3 + $0x2c0] sm:$0xff] %vm963_vm3, %v1569_v39  ;;  %7161 = vmatmul.msk.f32.gmra.mxu2 %vm417_vm0, %v1908_v62  ;;  %v1668_v39 = vld [vmem:[#allocation2 + $0x199] sm:$0xff] }
 0x29e   : > { %v1573_v38 = vpop.permute.xlu0 %1572  ;;  %v9115_v8 = vpop.f32.mrf.mxu1  ;;  %1762 = vrot.lane.b32.xlu1 %v1668_v39, %s7799_s25  ;;  %v1847_v62 = vld [vmem:[#allocation2 + $0xfa] sm:$0xff] }
 0x29f   : > { %1637 = vst.msk [vmem:[#allocation3 + $0x2f0] sm:$0xff] %vm963_vm3, %v1573_v38 }
 0x2a0   : > { %v1705_v37 = vpop.permute.xlu2 %1704  ;;  %1879 = vst.msk [vmem:[#allocation3 + $0x1a8] sm:$0xff] %vm417_vm0, %v1847_v62 }
 0x2a1   : > { %1799 = vst.msk [vmem:[#allocation3 + $0x20] sm:$0xff] %vm1156_vm4, %v1705_v37 }
 0x2a4   : > { %v1703_v13 = vpop.permute.xlu1 %1702 }
 0x2a5   : > { %1798 = vst.msk [vmem:[#allocation3 + $0x8] sm:$0xff] %vm1156_vm4, %v1703_v13  ;;  %7162 = vmatmul.msk.f32.gmra.mxu2 %vm417_vm0, %v1911_v35 }
 0x2a6   : > { %v1707_v42 = vpop.permute.xlu0 %1706  ;;  %v9121_v56 = vpop.f32.mrf.mxu1  ;;  %2723 = vrot.lane.b32.xlu1 %v2658_v26, %s7797_s1 }
 0x2a7   : > { %1800 = vst.msk [vmem:[#allocation3 + $0x38] sm:$0xff] %vm1156_vm4, %v1707_v42  ;;  %v1944_v42 = vld [vmem:[#allocation3 + $0x190] sm:$0xff]  ;;  %v1947_v33 = vld [vmem:[#allocation3 + $0x1a8] sm:$0xff] }
 0x2a8   : > { %v1711_v16 = vpop.permute.xlu2 %1710  ;;  %v1898_v36 = vld [vmem:[#allocation3 + $0x20] sm:$0xff] }
 0x2a9   : > { %1802 = vst.msk [vmem:[#allocation3 + $0x68] sm:$0xff] %vm1156_vm4, %v1711_v16 }
 0x2ac   : > { %v1895_v24 = vld [vmem:[#allocation3 + $0x8] sm:$0xff]  ;;  %v1709_v41 = vpop.permute.xlu1 %1708 }
 0x2ad   : > { %2251 = vmatmul.f32.vlgmr.msrb.gmra.mxu1 %v1895_v24  ;;  %1801 = vst.msk [vmem:[#allocation3 + $0x50] sm:$0xff] %vm1156_vm4, %v1709_v41  ;;  %7163 = vmatmul.msk.f32.gmra.mxu2 %vm417_vm0, %v1914_v15 }
 0x2ae   : > { %v1713_v57 = vpop.permute.xlu0 %1712  ;;  %v1901_v60 = vld [vmem:[#allocation3 + $0x38] sm:$0xff]  ;;  %v9127_v21 = vpop.f32.mrf.mxu1 }
 0x2af   : > { %1803 = vst.msk [vmem:[#allocation3 + $0x80] sm:$0xff] %vm1156_vm4, %v1713_v57 }
 0x2b0   : > { %v1717_v29 = vpop.permute.xlu2 %1716  ;;  %v1907_v34 = vld [vmem:[#allocation3 + $0x68] sm:$0xff] }
 0x2b1   : > { %1805 = vst.msk [vmem:[#allocation3 + $0xb0] sm:$0xff] %vm1156_vm4, %v1717_v29  ;;  %v2142_v29 = vpop.f32.mrf.mxu0 }
 0x2b4   : > { %v1715_v51 = vpop.permute.xlu1 %1714  ;;  %v1904_v46 = vld [vmem:[#allocation3 + $0x50] sm:$0xff] }
 0x2b5   : > { %2254 = vmatmul.f32.gmra.mxu1 %v1898_v36  ;;  %1804 = vst.msk [vmem:[#allocation3 + $0x98] sm:$0xff] %vm1156_vm4, %v1715_v51  ;;  %7164 = vmatmul.msk.f32.gmra.mxu2 %vm417_vm0, %v1917_v11  ;;  %v1848_v36 = vld [vmem:[#allocation2 + $0x10a] sm:$0xff] }
 0x2b6   : > { %v1719_v25 = vpop.permute.xlu0 %1718  ;;  %v9133_v14 = vpop.f32.mrf.mxu1  ;;  %v1910_v49 = vld [vmem:[#allocation3 + $0x80] sm:$0xff]  ;;  %1880 = vst.msk [vmem:[#allocation3 + $0x1c0] sm:$0xff] %vm417_vm0, %v1848_v36  ;;  %v1853_v36 = vld [vmem:[#allocation2 + $0x142] sm:$0xff] }
 0x2b7   : > { %1806 = vst.msk [vmem:[#allocation3 + $0xc8] sm:$0xff] %vm1156_vm4, %v1719_v25 }
 0x2b8   : > { %v1723_v54 = vpop.permute.xlu2 %1722  ;;  %v1916_v52 = vld [vmem:[#allocation3 + $0xb0] sm:$0xff]  ;;  %1885 = vst.msk [vmem:[#allocation3 + $0x238] sm:$0xff] %vm417_vm0, %v1853_v36 }
 0x2b9   : > { %1808 = vst.msk [vmem:[#allocation3 + $0xf8] sm:$0xff] %vm1156_vm4, %v1723_v54  ;;  %v1953_v54 = vld [vmem:[#allocation3 + $0x1d8] sm:$0xff] }
 0x2ba   : > { %7176 = vmatmul.msk.f32.vlgmr.msra.gmra.mxu3 %vm417_vm0, %v1953_v54 }
 0x2bc   : > { %v1721_v45 = vpop.permute.xlu1 %1720  ;;  %v1913_v55 = vld [vmem:[#allocation3 + $0x98] sm:$0xff] }
 0x2bd   : > { %2257 = vmatmul.f32.gmra.mxu1 %v1901_v60  ;;  %1807 = vst.msk [vmem:[#allocation3 + $0xe0] sm:$0xff] %vm1156_vm4, %v1721_v45  ;;  %7165 = vmatmul.msk.f32.gmra.mxu2 %vm417_vm0, %v1920_v40  ;;  %v1669_v60 = vld [vmem:[#allocation2 + $0x1a1] sm:$0xff]  ;;  %v1950_v11 = vld [vmem:[#allocation3 + $0x1c0] sm:$0xff] }
 0x2be   : > { %v9140_v1 = vpop.f32.mrf.mxu1  ;;  %v1725_v59 = vpop.permute.xlu0 %1724  ;;  %v1919_v20 = vld [vmem:[#allocation3 + $0xc8] sm:$0xff]  ;;  %1764 = vrot.lane.b32.xlu2 %v1669_v60, %s7799_s25 }
 0x2bf   : > { %1809 = vst.msk [vmem:[#allocation3 + $0x110] sm:$0xff] %vm1156_vm4, %v1725_v59 }
 0x2c0   : > { %v1729_v43 = vpop.permute.xlu2 %1728  ;;  %v1925_v37 = vld [vmem:[#allocation3 + $0xf8] sm:$0xff] }
 0x2c1   : > { %1811 = vst.msk [vmem:[#allocation3 + $0x140] sm:$0xff] %vm1156_vm4, %v1729_v43 }
 0x2c4   : > { %v1727_v58 = vpop.permute.xlu1 %1726  ;;  %v1922_v32 = vld [vmem:[#allocation3 + $0xe0] sm:$0xff] }
 0x2c5   : > { %2260 = vmatmul.f32.gmra.mxu1 %v1904_v46  ;;  %7166 = vmatmul.msk.f32.gmra.mxu2 %vm417_vm0, %v1923_v50  ;;  %1810 = vst.msk [vmem:[#allocation3 + $0x128] sm:$0xff] %vm1156_vm4, %v1727_v58  ;;  %v1850_v50 = vld [vmem:[#allocation2 + $0x122] sm:$0xff] }
 0x2c6   : > { %v9145_v6 = vpop.f32.mrf.mxu1  ;;  %v1731_v3 = vpop.permute.xlu0 %1730  ;;  %v1928_v16 = vld [vmem:[#allocation3 + $0x110] sm:$0xff]  ;;  %1882 = vst.msk [vmem:[#allocation3 + $0x1f0] sm:$0xff] %vm417_vm0, %v1850_v50 }
 0x2c7   : > { %1812 = vst.msk [vmem:[#allocation3 + $0x158] sm:$0xff] %vm1156_vm4, %v1731_v3  ;;  %v9204_v3 = vld [vmem:[#allocation12 + $0x1] ss:$0 sm:$0xff] }
 0x2c8   : > { %v1735_v38 = vpop.permute.xlu2 %1734  ;;  %v1934_v51 = vld [vmem:[#allocation3 + $0x140] sm:$0xff] }
 0x2c9   : > { %1814 = vst.msk [vmem:[#allocation3 + $0x188] sm:$0xff] %vm1156_vm4, %v1735_v38 }
 0x2cc   : > { %v1733_v30 = vpop.permute.xlu1 %1732  ;;  %v1931_v24 = vld [vmem:[#allocation3 + $0x128] sm:$0xff] }
 0x2cd   : > { %2263 = vmatmul.f32.gmra.mxu1 %v1907_v34  ;;  %7167 = vmatmul.msk.f32.gmra.mxu2 %vm417_vm0, %v1926_v18  ;;  %1813 = vst.msk [vmem:[#allocation3 + $0x170] sm:$0xff] %vm1156_vm4, %v1733_v30  ;;  %v9186_v34 = vpop.f32.mrf.mxu0  ;;  %v1956_v58 = vld [vmem:[#allocation3 + $0x1f0] sm:$0xff] }
 0x2ce   : > { %v9150_v63 = vpop.f32.mrf.mxu1  ;;  %v1737_v57 = vpop.permute.xlu0 %1736  ;;  %v1937_v46 = vld [vmem:[#allocation3 + $0x158] sm:$0xff]  ;;  %7177 = vmatmul.msk.f32.gmra.mxu3 %vm417_vm0, %v1956_v58  ;;  %v1852_v30 = vld [vmem:[#allocation2 + $0x13a] sm:$0xff] }
 0x2cf   : > { %1815 = vst.msk [vmem:[#allocation3 + $0x1a0] sm:$0xff] %vm1156_vm4, %v1737_v57 }
 0x2d0   : > { %v1741_v40 = vpop.permute.xlu2 %1740  ;;  %1884 = vst.msk [vmem:[#allocation3 + $0x220] sm:$0xff] %vm417_vm0, %v1852_v30 }
 0x2d1   : > { %1817 = vst.msk [vmem:[#allocation3 + $0x1d0] sm:$0xff] %vm1156_vm4, %v1741_v40 }
 0x2d4   : > { %v1739_v19 = vpop.permute.xlu1 %1738 }
 0x2d5   : > { %2266 = vmatmul.f32.gmra.mxu1 %v1910_v49  ;;  %7168 = vmatmul.msk.f32.gmra.mxu2 %vm417_vm0, %v1929_v27  ;;  %1816 = vst.msk [vmem:[#allocation3 + $0x1b8] sm:$0xff] %vm1156_vm4, %v1739_v19  ;;  %v1940_v49 = vld [vmem:[#allocation3 + $0x170] sm:$0xff]  ;;  %v1851_v27 = vld [vmem:[#allocation2 + $0x12a] sm:$0xff] }
 0x2d6   : > { %v9156_v7 = vpop.f32.mrf.mxu1  ;;  %v1743_v18 = vpop.permute.xlu0 %1742  ;;  %1883 = vst.msk [vmem:[#allocation3 + $0x208] sm:$0xff] %vm417_vm0, %v1851_v27  ;;  %v1946_v39 = vld [vmem:[#allocation3 + $0x1a0] sm:$0xff] }
 0x2d7   : > { %1818 = vst.msk [vmem:[#allocation3 + $0x1e8] sm:$0xff] %vm1156_vm4, %v1743_v18 }
 0x2d8   : > { %v1747_v53 = vpop.permute.xlu2 %1746  ;;  %v1952_v26 = vld [vmem:[#allocation3 + $0x1d0] sm:$0xff] }
 0x2d9   : > { %1820 = vst.msk [vmem:[#allocation3 + $0x218] sm:$0xff] %vm1156_vm4, %v1747_v53 }
 0x2dc   : > { %v1745_v44 = vpop.permute.xlu1 %1744 }
 0x2dd   : > { %2269 = vmatmul.f32.gmra.mxu1 %v1913_v55  ;;  %7169 = vmatmul.msk.f32.gmra.mxu2 %vm417_vm0, %v1932_v4  ;;  %v9198_v55 = vpop.f32.mrf.mxu0  ;;  %v9202_v4 = vld [vmem:[#allocation12] ss:$0 sm:$0xff]  ;;  %1819 = vst.msk [vmem:[#allocation3 + $0x200] sm:$0xff] %vm1156_vm4, %v1745_v44 }
 0x2de   : > { %v9163_v28 = vpop.f32.mrf.mxu1 }
 0x2e4   : > { %v1958_v36 = vld [vmem:[#allocation3 + $0x200] sm:$0xff] }
 0x2e5   : > { %2272 = vmatmul.f32.gmra.mxu1 %v1916_v52  ;;  %7170 = vmatmul.msk.f32.gmra.mxu2 %vm417_vm0, %v1935_v9  ;;  %v1943_v52 = vld [vmem:[#allocation3 + $0x188] sm:$0xff] }
 0x2e6   : > { %v9169_v13 = vpop.f32.mrf.mxu1 }
 0x2ed   : > { %2275 = vmatmul.f32.gmra.mxu1 %v1919_v20  ;;  %7171 = vmatmul.msk.f32.gmra.mxu2 %vm417_vm0, %v1938_v23  ;;  %v9210_v23 = vpop.f32.mrf.mxu0 }
 0x2ee   : > { %v9174_v35 = vpop.f32.mrf.mxu1 }
 0x2f5   : > { %2278 = vmatmul.f32.gmra.mxu1 %v1922_v32  ;;  %7172 = vmatmul.msk.f32.gmra.mxu2 %vm417_vm0, %v1941_v10  ;;  %v1959_v32 = vld [vmem:[#allocation3 + $0x208] sm:$0xff] }
 0x2f6   : > { %v9180_v25 = vpop.f32.mrf.mxu1  ;;  %7178 = vmatmul.msk.f32.gmra.mxu3 %vm417_vm0, %v1959_v32 }
 0x2fd   : > { %2281 = vmatmul.f32.gmra.mxu1 %v1925_v37  ;;  %7173 = vmatmul.msk.f32.gmra.mxu2 %vm417_vm0, %v1944_v42  ;;  %v4068_v42 = vld [vmem:[#allocation11 + $0x118] sm:$0xff] }
 0x2fe   : > { %v9192_v31 = vpop.f32.mrf.mxu1  ;;  %4403 = vmatpush.msrb.mxu0 %v4068_v42 }
 0x300   : > { %v2365_v41 = vpop.f32.mrf.mxu2 }
 0x305   : > { %2284 = vmatmul.f32.gmra.mxu1 %v1928_v16  ;;  %7174 = vmatmul.msk.f32.gmra.mxu2 %vm417_vm0, %v1947_v33  ;;  %v4066_v33 = vld [vmem:[#allocation11 + $0x108] sm:$0xff] }
 0x308   : > { %v2368_v15 = vpop.f32.mrf.mxu2 }
 0x30d   : > { %2287 = vmatmul.f32.gmra.mxu1 %v1931_v24  ;;  %7175 = vmatmul.msk.f32.gmra.mxu2 %vm417_vm0, %v1950_v11  ;;  %v4065_v11 = vld [vmem:[#allocation11 + $0x100] sm:$0xff] }
 0x310   : > { %v9184_v45 = vpop.f32.mrf.mxu2 }
 0x315   : > { %2290 = vmatmul.f32.gmra.mxu1 %v1934_v51 }
 0x318   : > { %v9194_v59 = vpop.f32.mrf.mxu2 }
 0x31d   : > { %2293 = vmatmul.f32.gmra.mxu1 %v1937_v46  ;;  %v1749_v46 = vpop.permute.xlu0 %1748 }
 0x31e   : > { %1821 = vst.msk [vmem:[#allocation3 + $0x230] sm:$0xff] %vm1156_vm4, %v1749_v46 }
 0x320   : > { %v9207_v9 = vpop.f32.mrf.mxu2 }
 0x325   : > { %2296 = vmatmul.f32.gmra.mxu1 %v1940_v49  ;;  %v1965_v49 = vld [vmem:[#allocation3 + $0x238] sm:$0xff] }
 0x328   : > { %v9218_v24 = vpop.f32.mrf.mxu2 }
 0x32a   : > { %v2252_v12 = vpop.f32.mrf.mxu1 }
 0x32b   : > { %v2253_v43 = vadd.f32 %v2252_v12, %v2139_v17  ;;  %v4067_v17 = vld [vmem:[#allocation11 + $0x110] sm:$0xff] }
 0x32c   : > { %4404 = vmatpush.msrb.mxu0 %v4067_v17 }
 0x32d   : > { %v2366_v20 = vadd.f32 %v2365_v41, %v2253_v43  ;;  %2299 = vmatmul.f32.gmra.mxu1 %v1943_v52  ;;  %v1962_v41 = vld [vmem:[#allocation3 + $0x220] sm:$0xff] }
 0x32e   : > { %7179 = vmatmul.msk.f32.gmra.mxu3 %vm417_vm0, %v1962_v41  ;;  %4405 = vmatpush.msrb.mxu0 %v4066_v33  ;;  %v1753_v41 = vpop.permute.xlu2 %1752 }
 0x32f   : > { %v2463_v0 = vmul.f32 %v9202_v4, %v2366_v20  ;;  %1823 = vst.msk [vmem:[#allocation3 + $0x260] sm:$0xff] %vm1156_vm4, %v1753_v41 }
 0x330   : > { %4406 = vmatpush.msrb.mxu0 %v4065_v11  ;;  %v9237_v58 = vpop.f32.mrf.mxu2 }
 0x331   : > { %v2497_v48 = vadd.f32 %v9204_v3, %v2463_v0  ;;  %v1751_v0 = vpop.permute.xlu1 %1750 }
 0x332   : > { %v2255_v37 = vpop.f32.mrf.mxu1  ;;  %1822 = vst.msk [vmem:[#allocation3 + $0x248] sm:$0xff] %vm1156_vm4, %v1751_v0 }
 0x333   : > { %v2529_v38 = vmax.f32 %v2497_v48, 0.0  ;;  %v2256_v10 = vadd.f32 %v2255_v37, %v2142_v29  ;;  %v1949_v29 = vld [vmem:[#allocation3 + $0x1b8] sm:$0xff]  ;;  %v1955_v37 = vld [vmem:[#allocation3 + $0x1e8] sm:$0xff] }
 0x335   : > { %2561 = vst.msk [vmem:[#allocation2 + $0x19] sm:$0xff] %vm417_vm0, %v2529_v38  ;;  %v2369_v16 = vadd.f32 %v2368_v15, %v2256_v10  ;;  %2302 = vmatmul.f32.gmra.mxu1 %v1946_v39  ;;  %v9223_v15 = vpop.f32.mrf.mxu0 }
 0x336   : > { %7180 = vmatmul.msk.f32.gmra.mxu3 %vm417_vm0, %v1965_v49 }
 0x337   : > { %v2464_v62 = vmul.f32 %v9202_v4, %v2369_v16 }
 0x338   : > { %v9258_v16 = vpop.f32.mrf.mxu2 }
 0x339   : > { %v2498_v57 = vadd.f32 %v9204_v3, %v2464_v62 }
 0x33a   : > { %v2258_v51 = vpop.f32.mrf.mxu1 }
 0x33b   : > { %v2530_v19 = vmax.f32 %v2498_v57, 0.0  ;;  %v2259_v60 = vadd.f32 %v2258_v51, %v9186_v34 }
 0x33c   : > { %v2659_v47 = vld [vmem:[#allocation2 + $0x19] sm:$0xff] }
 0x33d   : > { %v9226_v40 = vld [vmem:[#allocation2 + $0x18] sm:$0xff]  ;;  %2562 = vst.msk [vmem:[#allocation2 + $0x21] sm:$0xff] %vm417_vm0, %v2530_v19  ;;  %v2372_v22 = vadd.f32 %v9184_v45, %v2259_v60  ;;  %2305 = vmatmul.f32.gmra.mxu1 %v1949_v29  ;;  %2725 = vrot.lane.b32.xlu2 %v2659_v47, %s7797_s1  ;;  %v9244_v44 = vpop.f32.mrf.mxu0  ;;  %v1856_v29 = vld [vmem:[#allocation2 + $0x16a] sm:$0xff] }
 0x33e   : > { %v3233_v54 = vld [vmem:[#allocation2 + $0x19] sm:$0xff]  ;;  %2627 = vst.msk [vmem:[#allocation3 + $0x30] sm:$0xff] %vm417_vm0, %v9226_v40 }
 0x33f   : > { %v2465_v50 = vmul.f32 %v9202_v4, %v2372_v22  ;;  %3265 = vst.msk [vmem:[#allocation3 + $0x8] sm:$0xff] %vm417_vm0, %v3233_v54  ;;  %v1854_v45 = vld [vmem:[#allocation2 + $0x152] sm:$0xff]  ;;  %v1755_v54 = vpop.permute.xlu0 %1754 }
 0x340   : > { %1886 = vst.msk [vmem:[#allocation3 + $0x250] sm:$0xff] %vm417_vm0, %v1854_v45  ;;  %v1961_v45 = vld [vmem:[#allocation3 + $0x218] sm:$0xff] }
 0x341   : > { %v2499_v34 = vadd.f32 %v9204_v3, %v2465_v50  ;;  %1888 = vst.msk [vmem:[#allocation3 + $0x280] sm:$0xff] %vm417_vm0, %v1856_v29 }
 0x342   : > { %v2261_v18 = vpop.f32.mrf.mxu1  ;;  %1824 = vst.msk [vmem:[#allocation3 + $0x278] sm:$0xff] %vm1156_vm4, %v1755_v54  ;;  %v1967_v54 = vld [vmem:[#allocation3 + $0x248] sm:$0xff] }
 0x343   : > { %v2531_v27 = vmax.f32 %v2499_v34, 0.0  ;;  %v2262_v12 = vadd.f32 %v2261_v18, %v9198_v55 }
 0x344   : > { %v2660_v52 = vld [vmem:[#allocation2 + $0x21] sm:$0xff] }
 0x345   : > { %v9242_v43 = vld [vmem:[#allocation2 + $0x20] sm:$0xff]  ;;  %2563 = vst.msk [vmem:[#allocation2 + $0x31] sm:$0xff] %vm417_vm0, %v2531_v27  ;;  %v2375_v20 = vadd.f32 %v9194_v59, %v2262_v12  ;;  %2308 = vmatmul.f32.gmra.mxu1 %v1952_v26  ;;  %2727 = vrot.lane.b32.xlu0 %v2660_v52, %s7797_s1  ;;  %v1857_v12 = vld [vmem:[#allocation2 + $0x172] sm:$0xff] }
 0x346   : > { %v3234_v32 = vld [vmem:[#allocation2 + $0x21] sm:$0xff]  ;;  %2628 = vst.msk [vmem:[#allocation3 + $0x48] sm:$0xff] %vm417_vm0, %v9242_v43 }
 0x347   : > { %v2466_v55 = vmul.f32 %v9202_v4, %v2375_v20  ;;  %3266 = vst.msk [vmem:[#allocation3 + $0x20] sm:$0xff] %vm417_vm0, %v3234_v32  ;;  %v1968_v39 = vld [vmem:[#allocation3 + $0x250] sm:$0xff] }
 0x348   : > { %v1855_v59 = vld [vmem:[#allocation2 + $0x15a] sm:$0xff]  ;;  %7181 = vmatmul.msk.f32.gmra.mxu3 %vm417_vm0, %v1968_v39  ;;  %v1974_v27 = vld [vmem:[#allocation3 + $0x280] sm:$0xff]  ;;  %1889 = vst.msk [vmem:[#allocation3 + $0x298] sm:$0xff] %vm417_vm0, %v1857_v12 }
 0x349   : > { %v2500_v30 = vadd.f32 %v9204_v3, %v2466_v55  ;;  %1887 = vst.msk [vmem:[#allocation3 + $0x268] sm:$0xff] %vm417_vm0, %v1855_v59 }
 0x34a   : > { %v2264_v48 = vpop.f32.mrf.mxu1 }
 0x34b   : > { %v2532_v38 = vmax.f32 %v2500_v30, 0.0  ;;  %v2265_v10 = vadd.f32 %v2264_v48, %v9210_v23  ;;  %v2160_v23 = vpop.f32.mrf.mxu0 }
 0x34c   : > { %v2661_v53 = vld [vmem:[#allocation2 + $0x31] sm:$0xff] }
 0x34d   : > { %v9260_v42 = vld [vmem:[#allocation2 + $0x30] sm:$0xff]  ;;  %2564 = vst.msk [vmem:[#allocation2 + $0x39] sm:$0xff] %vm417_vm0, %v2532_v38  ;;  %v2378_v62 = vadd.f32 %v9207_v9, %v2265_v10  ;;  %2311 = vmatmul.f32.gmra.mxu1 %v1955_v37  ;;  %2729 = vrot.lane.b32.xlu1 %v2661_v53, %s7797_s1  ;;  %v1964_v38 = vld [vmem:[#allocation3 + $0x230] sm:$0xff] }
 0x34e   : > { %v9265_v17 = vld [vmem:[#allocation2 + $0x31] sm:$0xff]  ;;  %2629 = vst.msk [vmem:[#allocation3 + $0x60] sm:$0xff] %vm417_vm0, %v9260_v42  ;;  %v1858_v53 = vld [vmem:[#allocation2 + $0x182] sm:$0xff] }
 0x34f   : > { %12413 = vst [vmem:[#allocation57_spill] sm:$0xff] %v9265_v17  ;;  %v2467_v57 = vmul.f32 %v9202_v4, %v2378_v62  ;;  %v1977_v10 = vld [vmem:[#allocation3 + $0x298] sm:$0xff] }
 0x350   : > { %3267 = vst.msk [vmem:[#allocation3 + $0x38] sm:$0xff] %vm417_vm0, %v9265_v17  ;;  %v1971_v51 = vld [vmem:[#allocation3 + $0x268] sm:$0xff] }
 0x351   : > { %v2501_v33 = vadd.f32 %v9204_v3, %v2467_v57  ;;  %7182 = vmatmul.msk.f32.gmra.mxu3 %vm417_vm0, %v1971_v51  ;;  %1890 = vst.msk [vmem:[#allocation3 + $0x2b0] sm:$0xff] %vm417_vm0, %v1858_v53 }
 0x352   : > { %v2267_v9 = vpop.f32.mrf.mxu1 }
 0x353   : > { %v2533_v19 = vmax.f32 %v2501_v33, 0.0  ;;  %v2268_v60 = vadd.f32 %v2267_v9, %v9223_v15  ;;  %v9286_v15 = vpop.f32.mrf.mxu2 }
 0x354   : > { %v2662_v11 = vld [vmem:[#allocation2 + $0x39] sm:$0xff] }
 0x355   : > { %v9277_v47 = vld [vmem:[#allocation2 + $0x32] sm:$0xff]  ;;  %v9279_v46 = vld [vmem:[#allocation2 + $0x3a] sm:$0xff]  ;;  %2565 = vst.msk [vmem:[#allocation2 + $0x49] sm:$0xff] %vm417_vm0, %v2533_v19  ;;  %v2381_v22 = vadd.f32 %v9218_v24, %v2268_v60  ;;  %2314 = vmatmul.f32.gmra.mxu1 %v1958_v36  ;;  %2731 = vrot.lane.b32.xlu2 %v2662_v11, %s7797_s1  ;;  %v2163_v24 = vpop.f32.mrf.mxu0 }
 0x356   : > { %3905 = vst.msk [vmem:[#allocation3 + $0x10] sm:$0xff] %vm417_vm0, %v9277_v47  ;;  %v9288_v50 = vld [vmem:[#allocation2 + $0x38] sm:$0xff] }
 0x357   : > { %v2468_v34 = vmul.f32 %v9202_v4, %v2381_v22  ;;  %3906 = vst.msk [vmem:[#allocation3 + $0x28] sm:$0xff] %vm417_vm0, %v9279_v46  ;;  %v9293_v49 = vld [vmem:[#allocation2 + $0x39] sm:$0xff] }
 0x358   : > { %12414 = vst [vmem:[#allocation58_spill] sm:$0xff] %v9293_v49 }
 0x359   : > { %v2502_v18 = vadd.f32 %v9204_v3, %v2468_v34  ;;  %2630 = vst.msk [vmem:[#allocation3 + $0x78] sm:$0xff] %vm417_vm0, %v9288_v50  ;;  %7183 = vmatmul.msk.f32.gmra.mxu3 %vm417_vm0, %v1974_v27 }
 0x35a   : > { %v2270_v26 = vpop.f32.mrf.mxu1  ;;  %3268 = vst.msk [vmem:[#allocation3 + $0x50] sm:$0xff] %vm417_vm0, %v9293_v49 }
 0x35b   : > { %v2534_v52 = vmax.f32 %v2502_v18, 0.0  ;;  %v2271_v20 = vadd.f32 %v2270_v26, %v9244_v44  ;;  %v1757_v44 = vpop.permute.xlu1 %1756  ;;  %v9316_v39 = vpop.f32.mrf.mxu2  ;;  %v1980_v18 = vld [vmem:[#allocation3 + $0x2b0] sm:$0xff]  ;;  %v1859_v26 = vld [vmem:[#allocation2 + $0x18a] sm:$0xff] }
 0x35c   : > { %v2663_v0 = vld [vmem:[#allocation2 + $0x49] sm:$0xff]  ;;  %1825 = vst.msk [vmem:[#allocation3 + $0x290] sm:$0xff] %vm1156_vm4, %v1757_v44 }
 0x35d   : > { %v9304_v32 = vld [vmem:[#allocation2 + $0x48] sm:$0xff]  ;;  %2566 = vst.msk [vmem:[#allocation2 + $0x51] sm:$0xff] %vm417_vm0, %v2534_v52  ;;  %v2384_v55 = vadd.f32 %v9237_v58, %v2271_v20  ;;  %2317 = vmatmul.f32.gmra.mxu1 %v1961_v45  ;;  %v3939_v30 = vld [vmem:[#allocation3 + $0x10] sm:$0xff]  ;;  %2733 = vrot.lane.b32.xlu0 %v2663_v0, %s7797_s1  ;;  %v2166_v62 = vpop.f32.mrf.mxu0 }
 0x35e   : > { %v9309_v48 = vld [vmem:[#allocation2 + $0x49] sm:$0xff]  ;;  %7189 = vmatmul.msk.f32.vlgmr.msrb.gmra.mxu0 %vm417_vm0, %v3939_v30  ;;  %2631 = vst.msk [vmem:[#allocation3 + $0x90] sm:$0xff] %vm417_vm0, %v9304_v32  ;;  %v3942_v29 = vld [vmem:[#allocation3 + $0x28] sm:$0xff] }
 0x35f   : > { %12415 = vst [vmem:[#allocation59_spill] sm:$0xff] %v9309_v48  ;;  %v2469_v37 = vmul.f32 %v9202_v4, %v2384_v55 }
 0x360   : > { %3269 = vst.msk [vmem:[#allocation3 + $0x68] sm:$0xff] %vm417_vm0, %v9309_v48 }
 0x361   : > { %v2503_v58 = vadd.f32 %v9204_v3, %v2469_v37  ;;  %7184 = vmatmul.msk.f32.gmra.mxu3 %vm417_vm0, %v1977_v10  ;;  %1891 = vst.msk [vmem:[#allocation3 + $0x2c8] sm:$0xff] %vm417_vm0, %v1859_v26  ;;  %v1860_v10 = vld [vmem:[#allocation2 + $0x19a] sm:$0xff] }
 0x362   : > { %v2273_v59 = vpop.f32.mrf.mxu1  ;;  %1892 = vst.msk [vmem:[#allocation3 + $0x2e0] sm:$0xff] %vm417_vm0, %v1860_v10 }
 0x363   : > { %v2535_v41 = vmax.f32 %v2503_v58, 0.0  ;;  %v2274_v57 = vadd.f32 %v2273_v59, %v2160_v23  ;;  %v1759_v23 = vpop.permute.xlu2 %1758  ;;  %v9344_v34 = vpop.f32.mrf.mxu2  ;;  %v1970_v59 = vld [vmem:[#allocation3 + $0x260] sm:$0xff] }
 0x364   : > { %v2664_v33 = vld [vmem:[#allocation2 + $0x51] sm:$0xff]  ;;  %1826 = vst.msk [vmem:[#allocation3 + $0x2a8] sm:$0xff] %vm1156_vm4, %v1759_v23 }
 0x365   : > { %v9323_v9 = vld [vmem:[#allocation2 + $0x4a] sm:$0xff]  ;;  %v9325_v36 = vld [vmem:[#allocation2 + $0x52] sm:$0xff]  ;;  %2567 = vst.msk [vmem:[#allocation2 + $0x61] sm:$0xff] %vm417_vm0, %v2535_v41  ;;  %v2387_v51 = vadd.f32 %v9258_v16, %v2274_v57  ;;  %2320 = vmatmul.f32.gmra.mxu1 %v1964_v38  ;;  %2735 = vrot.lane.b32.xlu1 %v2664_v33, %s7797_s1  ;;  %v2169_v20 = vpop.f32.mrf.mxu0 }
 0x366   : > { %7190 = vmatmul.msk.f32.gmra.mxu0 %vm417_vm0, %v3942_v29  ;;  %3907 = vst.msk [vmem:[#allocation3 + $0x40] sm:$0xff] %vm417_vm0, %v9323_v9  ;;  %v9333_v19 = vld [vmem:[#allocation2 + $0x50] sm:$0xff] }
 0x367   : > { %v2470_v60 = vmul.f32 %v9202_v4, %v2387_v51  ;;  %3908 = vst.msk [vmem:[#allocation3 + $0x58] sm:$0xff] %vm417_vm0, %v9325_v36  ;;  %v9338_v11 = vld [vmem:[#allocation2 + $0x51] sm:$0xff] }
 0x368   : > { %12416 = vst [vmem:[#allocation60_spill] sm:$0xff] %v9338_v11  ;;  %v1983_v38 = vld [vmem:[#allocation3 + $0x2c8] sm:$0xff] }
 0x369   : > { %v2504_v16 = vadd.f32 %v9204_v3, %v2470_v60  ;;  %2632 = vst.msk [vmem:[#allocation3 + $0xa8] sm:$0xff] %vm417_vm0, %v9333_v19  ;;  %7185 = vmatmul.msk.f32.gmra.mxu3 %vm417_vm0, %v1980_v18 }
 0x36a   : > { %v2276_v22 = vpop.f32.mrf.mxu1  ;;  %3270 = vst.msk [vmem:[#allocation3 + $0x80] sm:$0xff] %vm417_vm0, %v9338_v11 }
 0x36b   : > { %v2536_v45 = vmax.f32 %v2504_v16, 0.0  ;;  %v2277_v27 = vadd.f32 %v2276_v22, %v2163_v24  ;;  %v1761_v24 = vpop.permute.xlu0 %1760  ;;  %v1765_v37 = vpop.permute.xlu2 %1764 }
 0x36c   : > { %v2665_v12 = vld [vmem:[#allocation2 + $0x61] sm:$0xff]  ;;  %1827 = vst.msk [vmem:[#allocation3 + $0x2c0] sm:$0xff] %vm1156_vm4, %v1761_v24  ;;  %v2398_v51 = vpop.f32.mrf.mxu2 }
 0x36d   : > { %v9350_v52 = vld [vmem:[#allocation2 + $0x60] sm:$0xff]  ;;  %2568 = vst.msk [vmem:[#allocation2 + $0x69] sm:$0xff] %vm417_vm0, %v2536_v45  ;;  %v2390_v0 = vadd.f32 %v9286_v15, %v2277_v27  ;;  %2323 = vmatmul.f32.gmra.mxu1 %v1967_v54  ;;  %v3945_v55 = vld [vmem:[#allocation3 + $0x40] sm:$0xff]  ;;  %2737 = vrot.lane.b32.xlu2 %v2665_v12, %s7797_s1  ;;  %v2172_v22 = vpop.f32.mrf.mxu0  ;;  %v1973_v45 = vld [vmem:[#allocation3 + $0x278] sm:$0xff] }
 0x36e   : > { %v9355_v30 = vld [vmem:[#allocation2 + $0x61] sm:$0xff]  ;;  %7191 = vmatmul.msk.f32.gmra.mxu0 %vm417_vm0, %v3945_v55  ;;  %2633 = vst.msk [vmem:[#allocation3 + $0xc0] sm:$0xff] %vm417_vm0, %v9350_v52  ;;  %v1986_v27 = vld [vmem:[#allocation3 + $0x2e0] sm:$0xff] }
 0x36f   : > { %12417 = vst [vmem:[#allocation61_spill] sm:$0xff] %v9355_v30  ;;  %v2471_v44 = vmul.f32 %v9202_v4, %v2390_v0  ;;  %v3948_v60 = vld [vmem:[#allocation3 + $0x58] sm:$0xff] }
 0x370   : > { %3271 = vst.msk [vmem:[#allocation3 + $0x98] sm:$0xff] %vm417_vm0, %v9355_v30  ;;  %v1861_v12 = vld [vmem:[#allocation2 + $0x1a2] sm:$0xff] }
 0x371   : > { %v2505_v15 = vadd.f32 %v9204_v3, %v2471_v44  ;;  %1829 = vst.msk [vmem:[#allocation3 + $0x2f0] sm:$0xff] %vm1156_vm4, %v1765_v37  ;;  %7186 = vmatmul.msk.f32.gmra.mxu3 %vm417_vm0, %v1983_v38 }
 0x372   : > { %v2279_v58 = vpop.f32.mrf.mxu1  ;;  %3935 = vst.msk [vmem:[#allocation3 + $0x2e0] sm:$0xff] %vm417_vm0, %v1860_v10 }
 0x373   : > { %v2537_v53 = vmax.f32 %v2505_v15, 0.0  ;;  %v2280_v41 = vadd.f32 %v2279_v58, %v2166_v62  ;;  %v1763_v62 = vpop.permute.xlu1 %1762  ;;  %1893 = vst.msk [vmem:[#allocation3 + $0x2f8] sm:$0xff] %vm417_vm0, %v1861_v12 }
 0x374   : > { %v2666_v57 = vld [vmem:[#allocation2 + $0x69] sm:$0xff]  ;;  %1828 = vst.msk [vmem:[#allocation3 + $0x2d8] sm:$0xff] %vm1156_vm4, %v1763_v62 }
 0x375   : > { %v9368_v33 = vld [vmem:[#allocation2 + $0x62] sm:$0xff]  ;;  %v9370_v29 = vld [vmem:[#allocation2 + $0x6a] sm:$0xff]  ;;  %2569 = vst.msk [vmem:[#allocation2 + $0x79] sm:$0xff] %vm417_vm0, %v2537_v53  ;;  %v2393_v23 = vadd.f32 %v9316_v39, %v2280_v41  ;;  %2326 = vmatmul.f32.gmra.mxu1 %v1970_v59  ;;  %2739 = vrot.lane.b32.xlu0 %v2666_v57, %s7797_s1  ;;  %v2175_v38 = vpop.f32.mrf.mxu0 }
 0x376   : > { %7192 = vmatmul.msk.f32.gmra.mxu0 %vm417_vm0, %v3948_v60  ;;  %3909 = vst.msk [vmem:[#allocation3 + $0x70] sm:$0xff] %vm417_vm0, %v9368_v33  ;;  %v9378_v16 = vld [vmem:[#allocation2 + $0x68] sm:$0xff]  ;;  %v1976_v53 = vld [vmem:[#allocation3 + $0x290] sm:$0xff] }
 0x377   : > { %v2472_v54 = vmul.f32 %v9202_v4, %v2393_v23  ;;  %3910 = vst.msk [vmem:[#allocation3 + $0x88] sm:$0xff] %vm417_vm0, %v9370_v29  ;;  %v9383_v18 = vld [vmem:[#allocation2 + $0x69] sm:$0xff] }
 0x378   : > { %12418 = vst [vmem:[#allocation62_spill] sm:$0xff] %v9383_v18 }
 0x379   : > { %v2506_v39 = vadd.f32 %v9204_v3, %v2472_v54  ;;  %2634 = vst.msk [vmem:[#allocation3 + $0xd8] sm:$0xff] %vm417_vm0, %v9378_v16  ;;  %7187 = vmatmul.msk.f32.gmra.mxu3 %vm417_vm0, %v1986_v27 }
 0x37a   : > { %v2282_v26 = vpop.f32.mrf.mxu1  ;;  %3272 = vst.msk [vmem:[#allocation3 + $0xb0] sm:$0xff] %vm417_vm0, %v9383_v18  ;;  %v1989_v23 = vld [vmem:[#allocation3 + $0x2f8] sm:$0xff] }
 0x37b   : > { %v2538_v0 = vmax.f32 %v2506_v39, 0.0  ;;  %v2283_v55 = vadd.f32 %v2282_v26, %v2169_v20  ;;  %v2401_v20 = vpop.f32.mrf.mxu2  ;;  %3936 = vst.msk [vmem:[#allocation3 + $0x2f8] sm:$0xff] %vm417_vm0, %v1861_v12 }
 0x37c   : > { %v2667_v24 = vld [vmem:[#allocation2 + $0x79] sm:$0xff] }
 0x37d   : > { %v9394_v44 = vld [vmem:[#allocation2 + $0x78] sm:$0xff]  ;;  %2570 = vst.msk [vmem:[#allocation2 + $0x81] sm:$0xff] %vm417_vm0, %v2538_v0  ;;  %v2396_v15 = vadd.f32 %v9344_v34, %v2283_v55  ;;  %2329 = vmatmul.f32.gmra.mxu1 %v1973_v45  ;;  %v3951_v37 = vld [vmem:[#allocation3 + $0x70] sm:$0xff]  ;;  %2741 = vrot.lane.b32.xlu1 %v2667_v24, %s7797_s1  ;;  %v2178_v24 = vpop.f32.mrf.mxu0 }
 0x37e   : > { %v9399_v58 = vld [vmem:[#allocation2 + $0x79] sm:$0xff]  ;;  %7193 = vmatmul.msk.f32.gmra.mxu0 %vm417_vm0, %v3951_v37  ;;  %2635 = vst.msk [vmem:[#allocation3 + $0xf0] sm:$0xff] %vm417_vm0, %v9394_v44 }
 0x37f   : > { %12419 = vst [vmem:[#allocation63_spill] sm:$0xff] %v9399_v58  ;;  %v2473_v59 = vmul.f32 %v9202_v4, %v2396_v15  ;;  %v3954_v26 = vld [vmem:[#allocation3 + $0x88] sm:$0xff] }
 0x380   : > { %3273 = vst.msk [vmem:[#allocation3 + $0xc8] sm:$0xff] %vm417_vm0, %v9399_v58  ;;  %v1979_v55 = vld [vmem:[#allocation3 + $0x2a8] sm:$0xff] }
 0x381   : > { %v2507_v34 = vadd.f32 %v9204_v3, %v2473_v59  ;;  %7188 = vmatmul.msk.f32.gmra.mxu3 %vm417_vm0, %v1989_v23 }
 0x382   : > { %v2285_v10 = vpop.f32.mrf.mxu1 }
 0x383   : > { %v2539_v41 = vmax.f32 %v2507_v34, 0.0  ;;  %v2286_v57 = vadd.f32 %v2285_v10, %v2172_v22  ;;  %v2404_v12 = vpop.f32.mrf.mxu2 }
 0x384   : > { %v2668_v60 = vld [vmem:[#allocation2 + $0x81] sm:$0xff] }
 0x385   : > { %v9408_v62 = vld [vmem:[#allocation2 + $0x7a] sm:$0xff]  ;;  %v9410_v54 = vld [vmem:[#allocation2 + $0x82] sm:$0xff]  ;;  %2571 = vst.msk [vmem:[#allocation2 + $0x91] sm:$0xff] %vm417_vm0, %v2539_v41  ;;  %v2399_v39 = vadd.f32 %v2398_v51, %v2286_v57  ;;  %2332 = vmatmul.f32.gmra.mxu1 %v1976_v53  ;;  %2743 = vrot.lane.b32.xlu2 %v2668_v60, %s7797_s1  ;;  %v1982_v60 = vld [vmem:[#allocation3 + $0x2c0] sm:$0xff] }
 0x386   : > { %v9416_v45 = vld [vmem:[#allocation2 + $0x80] sm:$0xff]  ;;  %7194 = vmatmul.msk.f32.gmra.mxu0 %vm417_vm0, %v3954_v26  ;;  %3911 = vst.msk [vmem:[#allocation3 + $0xa0] sm:$0xff] %vm417_vm0, %v9408_v62 }
 0x387   : > { %v9421_v22 = vld [vmem:[#allocation2 + $0x81] sm:$0xff]  ;;  %v2474_v27 = vmul.f32 %v9202_v4, %v2399_v39  ;;  %3912 = vst.msk [vmem:[#allocation3 + $0xb8] sm:$0xff] %vm417_vm0, %v9410_v54 }
 0x388   : > { %12420 = vst [vmem:[#allocation64_spill] sm:$0xff] %v9421_v22 }
 0x389   : > { %2636 = vst.msk [vmem:[#allocation3 + $0x108] sm:$0xff] %vm417_vm0, %v9416_v45  ;;  %v2508_v51 = vadd.f32 %v9204_v3, %v2474_v27 }
 0x38a   : > { %3274 = vst.msk [vmem:[#allocation3 + $0xe0] sm:$0xff] %vm417_vm0, %v9421_v22  ;;  %v2288_v0 = vpop.f32.mrf.mxu1 }
 0x38b   : > { %v2540_v15 = vmax.f32 %v2508_v51, 0.0  ;;  %v2289_v37 = vadd.f32 %v2288_v0, %v2175_v38  ;;  %v2407_v39 = vpop.f32.mrf.mxu2 }
 0x38c   : > { %v2669_v59 = vld [vmem:[#allocation2 + $0x91] sm:$0xff] }
 0x38d   : > { %v9431_v34 = vld [vmem:[#allocation2 + $0x90] sm:$0xff]  ;;  %2572 = vst.msk [vmem:[#allocation2 + $0x99] sm:$0xff] %vm417_vm0, %v2540_v15  ;;  %v2402_v53 = vadd.f32 %v2401_v20, %v2289_v37  ;;  %2335 = vmatmul.f32.gmra.mxu1 %v1979_v55  ;;  %2745 = vrot.lane.b32.xlu0 %v2669_v59, %s7797_s1  ;;  %v2181_v55 = vpop.f32.mrf.mxu0  ;;  %v2593_v59 = vld [vmem:[#allocation2] sm:$0xff] }
 0x38e   : > { %v9433_v10 = vld [vmem:[#allocation2 + $0x91] sm:$0xff]  ;;  %2637 = vst.msk [vmem:[#allocation3 + $0x120] sm:$0xff] %vm417_vm0, %v9431_v34  ;;  %v3960_v37 = vld [vmem:[#allocation3 + $0xb8] sm:$0xff] }
 0x38f   : > { %12421 = vst [vmem:[#allocation65_spill] sm:$0xff] %v9433_v10  ;;  %v3957_v41 = vld [vmem:[#allocation3 + $0xa0] sm:$0xff]  ;;  %v2475_v57 = vmul.f32 %v9202_v4, %v2402_v53 }
 0x390   : > { %7195 = vmatmul.msk.f32.gmra.mxu0 %vm417_vm0, %v3957_v41  ;;  %3275 = vst.msk [vmem:[#allocation3 + $0xf8] sm:$0xff] %vm417_vm0, %v9433_v10 }
 0x391   : > { %v2509_v38 = vadd.f32 %v9204_v3, %v2475_v57  ;;  %v2722_v57 = vpop.permute.xlu0 %2721  ;;  %2625 = vst.msk [vmem:[#allocation3] sm:$0xff] %vm417_vm0, %v2593_v59 }
 0x392   : > { %v2291_v23 = vpop.f32.mrf.mxu1  ;;  %2817 = vst.msk [vmem:[#allocation3] sm:$0xff] %vm770_vm2, %v2722_v57 }
 0x393   : > { %v2541_v20 = vmax.f32 %v2509_v38, 0.0  ;;  %v2292_v26 = vadd.f32 %v2291_v23, %v2178_v24 }
 0x394   : > { %v2670_v27 = vld [vmem:[#allocation2 + $0x99] sm:$0xff] }
 0x395   : > { %v9444_v51 = vld [vmem:[#allocation2 + $0x92] sm:$0xff]  ;;  %v9446_v0 = vld [vmem:[#allocation2 + $0x9a] sm:$0xff]  ;;  %2573 = vst.msk [vmem:[#allocation2 + $0xa9] sm:$0xff] %vm417_vm0, %v2541_v20  ;;  %v2405_v15 = vadd.f32 %v2404_v12, %v2292_v26  ;;  %2338 = vmatmul.f32.gmra.mxu1 %v1982_v60  ;;  %2747 = vrot.lane.b32.xlu1 %v2670_v27, %s7797_s1  ;;  %v1985_v60 = vld [vmem:[#allocation3 + $0x2d8] sm:$0xff]  ;;  %v2184_v57 = vpop.f32.mrf.mxu0 }
 0x396   : > { %3913 = vst.msk [vmem:[#allocation3 + $0xd0] sm:$0xff] %vm417_vm0, %v9444_v51  ;;  %v9457_v41 = vld [vmem:[#allocation2 + $0x98] sm:$0xff] }
 0x397   : > { %v2476_v24 = vmul.f32 %v9202_v4, %v2405_v15  ;;  %v2726_v53 = vpop.permute.xlu2 %2725  ;;  %3914 = vst.msk [vmem:[#allocation3 + $0xe8] sm:$0xff] %vm417_vm0, %v9446_v0  ;;  %v9461_v38 = vld [vmem:[#allocation2 + $0x99] sm:$0xff]  ;;  %v2410_v15 = vpop.f32.mrf.mxu2 }
 0x398   : > { %7196 = vmatmul.msk.f32.gmra.mxu0 %vm417_vm0, %v3960_v37  ;;  %2819 = vst.msk [vmem:[#allocation3 + $0x30] sm:$0xff] %vm770_vm2, %v2726_v53 }
 0x399   : > { %v2510_v12 = vadd.f32 %v9204_v3, %v2476_v24  ;;  %12422 = vst [vmem:[#allocation66_spill] sm:$0xff] %v9461_v38  ;;  %v2594_v24 = vld [vmem:[#allocation2 + $0x8] sm:$0xff] }
 0x39a   : > { %v2294_v23 = vpop.f32.mrf.mxu1  ;;  %2638 = vst.msk [vmem:[#allocation3 + $0x138] sm:$0xff] %vm417_vm0, %v9457_v41 }
 0x39b   : > { %v2542_v20 = vmax.f32 %v2510_v12, 0.0  ;;  %v2295_v26 = vadd.f32 %v2294_v23, %v2181_v55  ;;  %3276 = vst.msk [vmem:[#allocation3 + $0x110] sm:$0xff] %vm417_vm0, %v9461_v38  ;;  %v2724_v55 = vpop.permute.xlu1 %2723 }
 0x39c   : > { %v2671_v27 = vld [vmem:[#allocation2 + $0xa9] sm:$0xff]  ;;  %2626 = vst.msk [vmem:[#allocation3 + $0x18] sm:$0xff] %vm417_vm0, %v2594_v24 }
 0x39d   : > { %2574 = vst.msk [vmem:[#allocation2 + $0xb1] sm:$0xff] %vm417_vm0, %v2542_v20  ;;  %v2408_v37 = vadd.f32 %v2407_v39, %v2295_v26  ;;  %2341 = vmatmul.f32.gmra.mxu1 %v1985_v60  ;;  %v3963_v59 = vld [vmem:[#allocation3 + $0xd0] sm:$0xff]  ;;  %2749 = vrot.lane.b32.xlu2 %v2671_v27, %s7797_s1  ;;  %v9470_v53 = vld [vmem:[#allocation2 + $0xa8] sm:$0xff] }
 0x39e   : > { %v9474_v12 = vld [vmem:[#allocation2 + $0xa9] sm:$0xff]  ;;  %2818 = vst.msk [vmem:[#allocation3 + $0x18] sm:$0xff] %vm770_vm2, %v2724_v55  ;;  %v1988_v20 = vld [vmem:[#allocation3 + $0x2f0] sm:$0xff]  ;;  %v3966_v55 = vld [vmem:[#allocation3 + $0xe8] sm:$0xff] }
 0x39f   : > { %12423 = vst [vmem:[#allocation67_spill] sm:$0xff] %v9474_v12  ;;  %v2477_v23 = vmul.f32 %v9202_v4, %v2408_v37 }
 0x3a0   : > { %7197 = vmatmul.msk.f32.gmra.mxu0 %vm417_vm0, %v3963_v59  ;;  %2639 = vst.msk [vmem:[#allocation3 + $0x150] sm:$0xff] %vm417_vm0, %v9470_v53 }
 0x3a1   : > { %v2511_v39 = vadd.f32 %v9204_v3, %v2477_v23  ;;  %3277 = vst.msk [vmem:[#allocation3 + $0x128] sm:$0xff] %vm417_vm0, %v9474_v12  ;;  %v2413_v12 = vpop.f32.mrf.mxu2 }
 0x3a2   : > { %v2297_v60 = vpop.f32.mrf.mxu1 }
 0x3a3   : > { %v2543_v26 = vmax.f32 %v2511_v39, 0.0  ;;  %v2298_v27 = vadd.f32 %v2297_v60, %v2184_v57 }
 0x3a4   : > { %v2672_v59 = vld [vmem:[#allocation2 + $0xb1] sm:$0xff] }
 0x3a5   : > { %v9483_v24 = vld [vmem:[#allocation2 + $0xaa] sm:$0xff]  ;;  %v9485_v2 = vld [vmem:[#allocation2 + $0xb2] sm:$0xff]  ;;  %2575 = vst.msk [vmem:[#allocation2 + $0xc1] sm:$0xff] %vm417_vm0, %v2543_v26  ;;  %v2411_v37 = vadd.f32 %v2410_v15, %v2298_v27  ;;  %2344 = vmatmul.f32.gmra.mxu1 %v1988_v20  ;;  %2751 = vrot.lane.b32.xlu0 %v2672_v59, %s7797_s1  ;;  %v2187_v15 = vpop.f32.mrf.mxu0  ;;  %v9504_v26 = vpop.f32.mrf.mxu3 }
 0x3a6   : > { %v9489_v23 = vld [vmem:[#allocation2 + $0xb0] sm:$0xff]  ;;  %3915 = vst.msk [vmem:[#allocation3 + $0x100] sm:$0xff] %vm417_vm0, %v9483_v24 }
 0x3a7   : > { %v9494_v57 = vld [vmem:[#allocation2 + $0xb1] sm:$0xff]  ;;  %v2478_v39 = vmul.f32 %v9202_v4, %v2411_v37  ;;  %3916 = vst.msk [vmem:[#allocation3 + $0x118] sm:$0xff] %vm417_vm0, %v9485_v2 }
 0x3a8   : > { %7198 = vmatmul.msk.f32.gmra.mxu0 %vm417_vm0, %v3966_v55  ;;  %12424 = vst [vmem:[#allocation68_spill] sm:$0xff] %v9494_v57 }
 0x3a9   : > { %2640 = vst.msk [vmem:[#allocation3 + $0x168] sm:$0xff] %vm417_vm0, %v9489_v23  ;;  %v2512_v60 = vadd.f32 %v9204_v3, %v2478_v39 }
 0x3aa   : > { %3278 = vst.msk [vmem:[#allocation3 + $0x140] sm:$0xff] %vm417_vm0, %v9494_v57  ;;  %v2300_v20 = vpop.f32.mrf.mxu1 }
 0x3ab   : > { %v2544_v27 = vmax.f32 %v2512_v60, 0.0  ;;  %v2301_v59 = vadd.f32 %v2300_v20, %v2187_v15  ;;  %v2416_v15 = vpop.f32.mrf.mxu2 }
 0x3ac   : > { %v2673_v55 = vld [vmem:[#allocation2 + $0xc1] sm:$0xff] }
 0x3ad   : > { %v9506_v38 = vld [vmem:[#allocation2 + $0xc0] sm:$0xff]  ;;  %2576 = vst.msk [vmem:[#allocation2 + $0xc9] sm:$0xff] %vm417_vm0, %v2544_v27  ;;  %v2414_v10 = vadd.f32 %v2413_v12, %v2301_v59  ;;  %v3969_v22 = vld [vmem:[#allocation3 + $0x100] sm:$0xff]  ;;  %2753 = vrot.lane.b32.xlu1 %v2673_v55, %s7797_s1  ;;  %v9525_v58 = vpop.f32.mrf.mxu3 }
 0x3ae   : > { %v9508_v37 = vld [vmem:[#allocation2 + $0xc1] sm:$0xff]  ;;  %2641 = vst.msk [vmem:[#allocation3 + $0x180] sm:$0xff] %vm417_vm0, %v9506_v38 }
 0x3af   : > { %12425 = vst [vmem:[#allocation69_spill] sm:$0xff] %v9508_v37  ;;  %v2479_v39 = vmul.f32 %v9202_v4, %v2414_v10  ;;  %v2732_v60 = vpop.permute.xlu2 %2731 }
 0x3b0   : > { %7199 = vmatmul.msk.f32.gmra.mxu0 %vm417_vm0, %v3969_v22  ;;  %3279 = vst.msk [vmem:[#allocation3 + $0x158] sm:$0xff] %vm417_vm0, %v9508_v37  ;;  %v3972_v37 = vld [vmem:[#allocation3 + $0x118] sm:$0xff] }
 0x3b1   : > { %2822 = vst.msk [vmem:[#allocation3 + $0x78] sm:$0xff] %vm770_vm2, %v2732_v60  ;;  %v2513_v20 = vadd.f32 %v9204_v3, %v2479_v39 }
 0x3b2   : > { %v2303_v12 = vpop.f32.mrf.mxu1 }
 0x3b3   : > { %v2545_v27 = vmax.f32 %v2513_v20, 0.0  ;;  %v2304_v59 = vadd.f32 %v2303_v12, %v9098_v5  ;;  %v2419_v12 = vpop.f32.mrf.mxu2 }
 0x3b4   : > { %v2674_v55 = vld [vmem:[#allocation2 + $0xc9] sm:$0xff] }
 0x3b5   : > { %v9521_v22 = vld [vmem:[#allocation2 + $0xc2] sm:$0xff]  ;;  %v9523_v57 = vld [vmem:[#allocation2 + $0xca] sm:$0xff]  ;;  %2577 = vst.msk [vmem:[#allocation2 + $0xd9] sm:$0xff] %vm417_vm0, %v2545_v27  ;;  %v2417_v10 = vadd.f32 %v2416_v15, %v2304_v59  ;;  %2755 = vrot.lane.b32.xlu2 %v2674_v55, %s7797_s1  ;;  %v2428_v18 = vpop.f32.mrf.mxu3 }
 0x3b6   : > { %3917 = vst.msk [vmem:[#allocation3 + $0x130] sm:$0xff] %vm417_vm0, %v9521_v22  ;;  %v9532_v39 = vld [vmem:[#allocation2 + $0xc8] sm:$0xff] }
 0x3b7   : > { %v2480_v5 = vmul.f32 %v9202_v4, %v2417_v10  ;;  %v2728_v60 = vpop.permute.xlu0 %2727  ;;  %3918 = vst.msk [vmem:[#allocation3 + $0x148] sm:$0xff] %vm417_vm0, %v9523_v57  ;;  %v9537_v20 = vld [vmem:[#allocation2 + $0xc9] sm:$0xff] }
 0x3b8   : > { %7200 = vmatmul.msk.f32.gmra.mxu0 %vm417_vm0, %v3972_v37  ;;  %12426 = vst [vmem:[#allocation70_spill] sm:$0xff] %v9537_v20 }
 0x3b9   : > { %2820 = vst.msk [vmem:[#allocation3 + $0x48] sm:$0xff] %vm770_vm2, %v2728_v60  ;;  %v2514_v15 = vadd.f32 %v9204_v3, %v2480_v5 }
 0x3ba   : > { %2642 = vst.msk [vmem:[#allocation3 + $0x198] sm:$0xff] %vm417_vm0, %v9532_v39  ;;  %v2306_v37 = vpop.f32.mrf.mxu1 }
 0x3bb   : > { %3280 = vst.msk [vmem:[#allocation3 + $0x170] sm:$0xff] %vm417_vm0, %v9537_v20  ;;  %v2546_v27 = vmax.f32 %v2514_v15, 0.0  ;;  %v2307_v59 = vadd.f32 %v2306_v37, %v9106_v61 }
 0x3bc   : > { %v2675_v55 = vld [vmem:[#allocation2 + $0xd9] sm:$0xff] }
 0x3bd   : > { %v9546_v10 = vld [vmem:[#allocation2 + $0xd8] sm:$0xff]  ;;  %2578 = vst.msk [vmem:[#allocation2 + $0xe1] sm:$0xff] %vm417_vm0, %v2546_v27  ;;  %v2420_v30 = vadd.f32 %v2419_v12, %v2307_v59  ;;  %v3975_v60 = vld [vmem:[#allocation3 + $0x130] sm:$0xff]  ;;  %2757 = vrot.lane.b32.xlu0 %v2675_v55, %s7797_s1 }
 0x3be   : > { %v9550_v5 = vld [vmem:[#allocation2 + $0xd9] sm:$0xff]  ;;  %2643 = vst.msk [vmem:[#allocation3 + $0x1b0] sm:$0xff] %vm417_vm0, %v9546_v10 }
 0x3bf   : > { %12427 = vst [vmem:[#allocation71_spill] sm:$0xff] %v9550_v5  ;;  %v2481_v15 = vmul.f32 %v9202_v4, %v2420_v30  ;;  %v2730_v61 = vpop.permute.xlu1 %2729 }
 0x3c0   : > { %7201 = vmatmul.msk.f32.gmra.mxu0 %vm417_vm0, %v3975_v60  ;;  %3281 = vst.msk [vmem:[#allocation3 + $0x188] sm:$0xff] %vm417_vm0, %v9550_v5  ;;  %v3978_v5 = vld [vmem:[#allocation3 + $0x148] sm:$0xff] }
 0x3c1   : > { %2821 = vst.msk [vmem:[#allocation3 + $0x60] sm:$0xff] %vm770_vm2, %v2730_v61  ;;  %v2515_v37 = vadd.f32 %v9204_v3, %v2481_v15 }
 0x3c2   : > { %v2309_v12 = vpop.f32.mrf.mxu1 }
 0x3c3   : > { %v2547_v27 = vmax.f32 %v2515_v37, 0.0  ;;  %v2310_v59 = vadd.f32 %v2309_v12, %v9115_v8 }
 0x3c4   : > { %v2676_v55 = vld [vmem:[#allocation2 + $0xe1] sm:$0xff] }
 0x3c5   : > { %v9561_v60 = vld [vmem:[#allocation2 + $0xda] sm:$0xff]  ;;  %v9563_v20 = vld [vmem:[#allocation2 + $0xe2] sm:$0xff]  ;;  %2579 = vst.msk [vmem:[#allocation2 + $0xf1] sm:$0xff] %vm417_vm0, %v2547_v27  ;;  %v2423_v30 = vadd.f32 %v9504_v26, %v2310_v59  ;;  %2759 = vrot.lane.b32.xlu1 %v2676_v55, %s7797_s1  ;;  %v2431_v26 = vpop.f32.mrf.mxu3 }
 0x3c6   : > { %3919 = vst.msk [vmem:[#allocation3 + $0x160] sm:$0xff] %vm417_vm0, %v9561_v60  ;;  %v9571_v15 = vld [vmem:[#allocation2 + $0xe0] sm:$0xff] }
 0x3c7   : > { %v2482_v8 = vmul.f32 %v9202_v4, %v2423_v30  ;;  %v2738_v61 = vpop.permute.xlu2 %2737  ;;  %3920 = vst.msk [vmem:[#allocation3 + $0x178] sm:$0xff] %vm417_vm0, %v9563_v20  ;;  %v9576_v37 = vld [vmem:[#allocation2 + $0xe1] sm:$0xff] }
 0x3c8   : > { %7202 = vmatmul.msk.f32.gmra.mxu0 %vm417_vm0, %v3978_v5  ;;  %12428 = vst [vmem:[#allocation72_spill] sm:$0xff] %v9576_v37 }
 0x3c9   : > { %2825 = vst.msk [vmem:[#allocation3 + $0xc0] sm:$0xff] %vm770_vm2, %v2738_v61  ;;  %v2516_v12 = vadd.f32 %v9204_v3, %v2482_v8 }
 0x3ca   : > { %2644 = vst.msk [vmem:[#allocation3 + $0x1c8] sm:$0xff] %vm417_vm0, %v9571_v15  ;;  %v2312_v5 = vpop.f32.mrf.mxu1 }
 0x3cb   : > { %3282 = vst.msk [vmem:[#allocation3 + $0x1a0] sm:$0xff] %vm417_vm0, %v9576_v37  ;;  %v2548_v27 = vmax.f32 %v2516_v12, 0.0  ;;  %v2313_v59 = vadd.f32 %v2312_v5, %v9121_v56 }
 0x3cc   : > { %v2677_v55 = vld [vmem:[#allocation2 + $0xf1] sm:$0xff] }
 0x3cd   : > { %v9585_v30 = vld [vmem:[#allocation2 + $0xf0] sm:$0xff]  ;;  %2580 = vst.msk [vmem:[#allocation2 + $0xf9] sm:$0xff] %vm417_vm0, %v2548_v27  ;;  %v2426_v61 = vadd.f32 %v9525_v58, %v2313_v59  ;;  %2761 = vrot.lane.b32.xlu2 %v2677_v55, %s7797_s1  ;;  %v2434_v58 = vpop.f32.mrf.mxu3 }
 0x3ce   : > { %v9587_v11 = vld [vmem:[#allocation2 + $0xf1] sm:$0xff]  ;;  %2645 = vst.msk [vmem:[#allocation3 + $0x1e0] sm:$0xff] %vm417_vm0, %v9585_v30  ;;  %v3984_v49 = vld [vmem:[#allocation3 + $0x178] sm:$0xff] }
 0x3cf   : > { %12429 = vst [vmem:[#allocation73_spill] sm:$0xff] %v9587_v11  ;;  %v3981_v8 = vld [vmem:[#allocation3 + $0x160] sm:$0xff]  ;;  %v2483_v12 = vmul.f32 %v9202_v4, %v2426_v61  ;;  %v2734_v56 = vpop.permute.xlu0 %2733 }
 0x3d0   : > { %7203 = vmatmul.msk.f32.gmra.mxu0 %vm417_vm0, %v3981_v8  ;;  %3283 = vst.msk [vmem:[#allocation3 + $0x1b8] sm:$0xff] %vm417_vm0, %v9587_v11 }
 0x3d1   : > { %2823 = vst.msk [vmem:[#allocation3 + $0x90] sm:$0xff] %vm770_vm2, %v2734_v56  ;;  %v2517_v5 = vadd.f32 %v9204_v3, %v2483_v12 }
 0x3d2   : > { %v2315_v27 = vpop.f32.mrf.mxu1 }
 0x3d3   : > { %v2549_v59 = vmax.f32 %v2517_v5, 0.0  ;;  %v2316_v55 = vadd.f32 %v2315_v27, %v9127_v21 }
 0x3d4   : > { %v2678_v37 = vld [vmem:[#allocation2 + $0xf9] sm:$0xff] }
 0x3d5   : > { %v9601_v8 = vld [vmem:[#allocation2 + $0xf2] sm:$0xff]  ;;  %v9603_v48 = vld [vmem:[#allocation2 + $0xfa] sm:$0xff]  ;;  %2581 = vst.msk [vmem:[#allocation2 + $0x109] sm:$0xff] %vm417_vm0, %v2549_v59  ;;  %v2429_v61 = vadd.f32 %v2428_v18, %v2316_v55  ;;  %2763 = vrot.lane.b32.xlu0 %v2678_v37, %s7797_s1  ;;  %v2437_v59 = vpop.f32.mrf.mxu3 }
 0x3d6   : > { %3921 = vst.msk [vmem:[#allocation3 + $0x190] sm:$0xff] %vm417_vm0, %v9601_v8  ;;  %v9610_v12 = vld [vmem:[#allocation2 + $0xf8] sm:$0xff] }
 0x3d7   : > { %v2484_v21 = vmul.f32 %v9202_v4, %v2429_v61  ;;  %v2736_v56 = vpop.permute.xlu1 %2735  ;;  %3922 = vst.msk [vmem:[#allocation3 + $0x1a8] sm:$0xff] %vm417_vm0, %v9603_v48  ;;  %v9615_v5 = vld [vmem:[#allocation2 + $0xf9] sm:$0xff] }
 0x3d8   : > { %7204 = vmatmul.msk.f32.gmra.mxu0 %vm417_vm0, %v3984_v49  ;;  %12430 = vst [vmem:[#allocation74_spill] sm:$0xff] %v9615_v5 }
 0x3d9   : > { %2824 = vst.msk [vmem:[#allocation3 + $0xa8] sm:$0xff] %vm770_vm2, %v2736_v56  ;;  %v2518_v18 = vadd.f32 %v9204_v3, %v2484_v21  ;;  %v9633_v21 = vld [vmem:[#allocation12] ss:$0 sm:$0xff] }
 0x3da   : > { %2646 = vst.msk [vmem:[#allocation3 + $0x1f8] sm:$0xff] %vm417_vm0, %v9610_v12  ;;  %v2318_v49 = vpop.f32.mrf.mxu1 }
 0x3db   : > { %3284 = vst.msk [vmem:[#allocation3 + $0x1d0] sm:$0xff] %vm417_vm0, %v9615_v5  ;;  %v2550_v37 = vmax.f32 %v2518_v18, 0.0  ;;  %v2319_v4 = vadd.f32 %v2318_v49, %v9133_v14  ;;  %v9639_v49 = vld [vmem:[#allocation12 + $0x1] ss:$0 sm:$0xff] }
 0x3dc   : > { %v2679_v27 = vld [vmem:[#allocation2 + $0x109] sm:$0xff] }
 0x3dd   : > { %v9624_v55 = vld [vmem:[#allocation2 + $0x108] sm:$0xff]  ;;  %2582 = vst.msk [vmem:[#allocation2 + $0x111] sm:$0xff] %vm417_vm0, %v2550_v37  ;;  %v2432_v56 = vadd.f32 %v2431_v26, %v2319_v4  ;;  %2765 = vrot.lane.b32.xlu1 %v2679_v27, %s7797_s1  ;;  %v3987_v3 = vld [vmem:[#allocation3 + $0x190] sm:$0xff] }
 0x3de   : > { %12431 = vst [vmem:[#allocation75_spill] sm:$0xff] %v9624_v55  ;;  %v9626_v61 = vld [vmem:[#allocation2 + $0x109] sm:$0xff] }
 0x3df   : > { %12432 = vst [vmem:[#allocation76_spill] sm:$0xff] %v9626_v61  ;;  %v2485_v14 = vmul.f32 %v9633_v21, %v2432_v56  ;;  %v2744_v18 = vpop.permute.xlu2 %2743 }
 0x3e0   : > { %7205 = vmatmul.msk.f32.gmra.mxu0 %vm417_vm0, %v3987_v3  ;;  %2647 = vst.msk [vmem:[#allocation3 + $0x210] sm:$0xff] %vm417_vm0, %v9624_v55 }
 0x3e1   : > { %3285 = vst.msk [vmem:[#allocation3 + $0x1e8] sm:$0xff] %vm417_vm0, %v9626_v61  ;;  %v2519_v26 = vadd.f32 %v9639_v49, %v2485_v14  ;;  %v3990_v61 = vld [vmem:[#allocation3 + $0x1a8] sm:$0xff]  ;;  %v2440_v14 = vpop.f32.mrf.mxu3 }
 0x3e2   : > { %2828 = vst.msk [vmem:[#allocation3 + $0x108] sm:$0xff] %vm770_vm2, %v2744_v18  ;;  %v2321_v37 = vpop.f32.mrf.mxu1 }
 0x3e3   : > { %v2551_v4 = vmax.f32 %v2519_v26, 0.0  ;;  %v2322_v27 = vadd.f32 %v2321_v37, %v9140_v1 }
 0x3e4   : > { %v2680_v3 = vld [vmem:[#allocation2 + $0x111] sm:$0xff] }
 0x3e5   : > { %v9643_v5 = vld [vmem:[#allocation2 + $0x10a] sm:$0xff]  ;;  %v9645_v11 = vld [vmem:[#allocation2 + $0x112] sm:$0xff]  ;;  %2583 = vst.msk [vmem:[#allocation2 + $0x121] sm:$0xff] %vm417_vm0, %v2551_v4  ;;  %v2435_v56 = vadd.f32 %v2434_v58, %v2322_v27  ;;  %2767 = vrot.lane.b32.xlu2 %v2680_v3, %s7797_s1  ;;  %v2849_v4 = vld [vmem:[#allocation2 + $0x2] sm:$0xff] }
 0x3e6   : > { %3923 = vst.msk [vmem:[#allocation3 + $0x1c0] sm:$0xff] %vm417_vm0, %v9643_v5  ;;  %v9652_v18 = vld [vmem:[#allocation2 + $0x110] sm:$0xff] }
 0x3e7   : > { %v2486_v1 = vmul.f32 %v9633_v21, %v2435_v56  ;;  %v2740_v26 = vpop.permute.xlu0 %2739  ;;  %3924 = vst.msk [vmem:[#allocation3 + $0x1d8] sm:$0xff] %vm417_vm0, %v9645_v11  ;;  %v9657_v37 = vld [vmem:[#allocation2 + $0x111] sm:$0xff] }
 0x3e8   : > { %7206 = vmatmul.msk.f32.gmra.mxu0 %vm417_vm0, %v3990_v61  ;;  %12433 = vst [vmem:[#allocation77_spill] sm:$0xff] %v9657_v37 }
 0x3e9   : > { %2826 = vst.msk [vmem:[#allocation3 + $0xd8] sm:$0xff] %vm770_vm2, %v2740_v26  ;;  %v2520_v58 = vadd.f32 %v9639_v49, %v2486_v1 }
 0x3ea   : > { %2648 = vst.msk [vmem:[#allocation3 + $0x228] sm:$0xff] %vm417_vm0, %v9652_v18  ;;  %v2324_v61 = vpop.f32.mrf.mxu1 }
 0x3eb   : > { %3286 = vst.msk [vmem:[#allocation3 + $0x200] sm:$0xff] %vm417_vm0, %v9657_v37  ;;  %v2552_v27 = vmax.f32 %v2520_v58, 0.0  ;;  %v2325_v3 = vadd.f32 %v2324_v61, %v9145_v6 }
 0x3ec   : > { %v2681_v56 = vld [vmem:[#allocation2 + $0x121] sm:$0xff] }
 0x3ed   : > { %v9666_v17 = vld [vmem:[#allocation2 + $0x120] sm:$0xff]  ;;  %2584 = vst.msk [vmem:[#allocation2 + $0x129] sm:$0xff] %vm417_vm0, %v2552_v27  ;;  %v2438_v55 = vadd.f32 %v2437_v59, %v2325_v3  ;;  %v3993_v26 = vld [vmem:[#allocation3 + $0x1c0] sm:$0xff]  ;;  %2769 = vrot.lane.b32.xlu0 %v2681_v56, %s7797_s1  ;;  %2913 = vrot.lane.b32.xlu2 %v2849_v4, %s7798_s13  ;;  %v2443_v59 = vpop.f32.mrf.mxu3 }
 0x3ee   : > { %12434 = vst [vmem:[#allocation78_spill] sm:$0xff] %v9666_v17  ;;  %v9671_v1 = vld [vmem:[#allocation2 + $0x121] sm:$0xff]  ;;  %v2850_v4 = vld [vmem:[#allocation2 + $0xa] sm:$0xff] }
 0x3ef   : > { %12435 = vst [vmem:[#allocation79_spill] sm:$0xff] %v9671_v1  ;;  %v2487_v6 = vmul.f32 %v9633_v21, %v2438_v55  ;;  %v2742_v58 = vpop.permute.xlu1 %2741 }
 0x3f0   : > { %7207 = vmatmul.msk.f32.gmra.mxu0 %vm417_vm0, %v3993_v26  ;;  %2649 = vst.msk [vmem:[#allocation3 + $0x240] sm:$0xff] %vm417_vm0, %v9666_v17 }
 0x3f1   : > { %3287 = vst.msk [vmem:[#allocation3 + $0x218] sm:$0xff] %vm417_vm0, %v9671_v1  ;;  %v2521_v61 = vadd.f32 %v9639_v49, %v2487_v6  ;;  %v3996_v1 = vld [vmem:[#allocation3 + $0x1d8] sm:$0xff] }
 0x3f2   : > { %2827 = vst.msk [vmem:[#allocation3 + $0xf0] sm:$0xff] %vm770_vm2, %v2742_v58  ;;  %v2327_v27 = vpop.f32.mrf.mxu1 }
 0x3f3   : > { %v2553_v3 = vmax.f32 %v2521_v61, 0.0  ;;  %v2328_v56 = vadd.f32 %v2327_v27, %v9150_v63 }
 0x3f4   : > { %v2682_v26 = vld [vmem:[#allocation2 + $0x129] sm:$0xff] }
 0x3f5   : > { %v9682_v37 = vld [vmem:[#allocation2 + $0x122] sm:$0xff]  ;;  %v9684_v17 = vld [vmem:[#allocation2 + $0x12a] sm:$0xff]  ;;  %2585 = vst.msk [vmem:[#allocation2 + $0x139] sm:$0xff] %vm417_vm0, %v2553_v3  ;;  %v2441_v55 = vadd.f32 %v2440_v14, %v2328_v56  ;;  %2771 = vrot.lane.b32.xlu1 %v2682_v26, %s7797_s1  ;;  %2915 = vrot.lane.b32.xlu0 %v2850_v4, %s7798_s13  ;;  %v2446_v27 = vpop.f32.mrf.mxu3  ;;  %v9706_v56 = vld [vmem:[#allocation2 + $0x1a] sm:$0xff] }
 0x3f6   : > { %3925 = vst.msk [vmem:[#allocation3 + $0x1f0] sm:$0xff] %vm417_vm0, %v9682_v37  ;;  %v9692_v6 = vld [vmem:[#allocation2 + $0x128] sm:$0xff] }
 0x3f7   : > { %12436 = vst [vmem:[#allocation80_spill] sm:$0xff] %v9692_v6  ;;  %v2488_v63 = vmul.f32 %v9633_v21, %v2441_v55  ;;  %v2750_v58 = vpop.permute.xlu2 %2749  ;;  %v9697_v61 = vld [vmem:[#allocation2 + $0x129] sm:$0xff] }
 0x3f8   : > { %7208 = vmatmul.msk.f32.gmra.mxu0 %vm417_vm0, %v3996_v1  ;;  %3926 = vst.msk [vmem:[#allocation3 + $0x208] sm:$0xff] %vm417_vm0, %v9684_v17 }
 0x3f9   : > { %12437 = vst [vmem:[#allocation81_spill] sm:$0xff] %v9697_v61  ;;  %v2522_v14 = vadd.f32 %v9639_v49, %v2488_v63 }
 0x3fa   : > { %2831 = vst.msk [vmem:[#allocation3 + $0x150] sm:$0xff] %vm770_vm2, %v2750_v58  ;;  %v2330_v1 = vpop.f32.mrf.mxu1 }
 0x3fb   : > { %2650 = vst.msk [vmem:[#allocation3 + $0x258] sm:$0xff] %vm417_vm0, %v9692_v6  ;;  %v2554_v4 = vmax.f32 %v2522_v14, 0.0  ;;  %v2331_v3 = vadd.f32 %v2330_v1, %v9156_v7 }
 0x3fc   : > { %3288 = vst.msk [vmem:[#allocation3 + $0x230] sm:$0xff] %vm417_vm0, %v9697_v61  ;;  %v2683_v26 = vld [vmem:[#allocation2 + $0x139] sm:$0xff] }
 0x3fd   : > { %12438 = vst [vmem:[#allocation82_spill] sm:$0xff] %v9706_v56  ;;  %v9708_v55 = vld [vmem:[#allocation2 + $0x138] sm:$0xff]  ;;  %v2444_v58 = vadd.f32 %v2443_v59, %v2331_v3  ;;  %2917 = vrot.lane.b32.xlu1 %v9706_v56, %s7798_s13  ;;  %2773 = vrot.lane.b32.xlu2 %v2683_v26, %s7797_s1  ;;  %v3999_v63 = vld [vmem:[#allocation3 + $0x1f0] sm:$0xff]  ;;  %v2449_v61 = vpop.f32.mrf.mxu3 }
 0x3fe   : > { %12439 = vst [vmem:[#allocation83_spill] sm:$0xff] %v9708_v55  ;;  %v9714_v6 = vld [vmem:[#allocation2 + $0x139] sm:$0xff]  ;;  %v9725_v26 = vld [vmem:[#allocation2 + $0x22] sm:$0xff] }
 0x3ff   : > { %2586 = vst.msk [vmem:[#allocation2 + $0x141] sm:$0xff] %vm417_vm0, %v2554_v4  ;;  %v2489_v7 = vmul.f32 %v9633_v21, %v2444_v58  ;;  %v2746_v14 = vpop.permute.xlu0 %2745 }
 0x400   : > { %7209 = vmatmul.msk.f32.gmra.mxu0 %vm417_vm0, %v3999_v63  ;;  %2651 = vst.msk [vmem:[#allocation3 + $0x270] sm:$0xff] %vm417_vm0, %v9708_v55 }
 0x401   : > { %3289 = vst.msk [vmem:[#allocation3 + $0x248] sm:$0xff] %vm417_vm0, %v9714_v6  ;;  %v2523_v59 = vadd.f32 %v9639_v49, %v2489_v7  ;;  %v4002_v7 = vld [vmem:[#allocation3 + $0x208] sm:$0xff] }
 0x402   : > { %2829 = vst.msk [vmem:[#allocation3 + $0x120] sm:$0xff] %vm770_vm2, %v2746_v14  ;;  %v2333_v1 = vpop.f32.mrf.mxu1 }
 0x403   : > { %v2555_v4 = vmax.f32 %v2523_v59, 0.0  ;;  %v2334_v3 = vadd.f32 %v2333_v1, %v9163_v28 }
 0x405   : > { %2587 = vst.msk [vmem:[#allocation2 + $0x151] sm:$0xff] %vm417_vm0, %v2555_v4  ;;  %v2447_v58 = vadd.f32 %v2446_v27, %v2334_v3  ;;  %2923 = vrot.lane.b32.xlu1 %v9279_v46, %s7798_s13  ;;  %2919 = vrot.lane.b32.xlu2 %v9725_v26, %s7798_s13 }
 0x406   : > { %v2684_v63 = vld [vmem:[#allocation2 + $0x141] sm:$0xff] }
 0x407   : > { %v9727_v56 = vld [vmem:[#allocation2 + $0x13a] sm:$0xff]  ;;  %v9729_v55 = vld [vmem:[#allocation2 + $0x142] sm:$0xff]  ;;  %2775 = vrot.lane.b32.xlu0 %v2684_v63, %s7797_s1  ;;  %v2490_v14 = vmul.f32 %v9633_v21, %v2447_v58  ;;  %v2748_v59 = vpop.permute.xlu1 %2747 }
 0x408   : > { %7210 = vmatmul.msk.f32.gmra.mxu0 %vm417_vm0, %v4002_v7  ;;  %3927 = vst.msk [vmem:[#allocation3 + $0x220] sm:$0xff] %vm417_vm0, %v9727_v56  ;;  %v9740_v28 = vld [vmem:[#allocation2 + $0x140] sm:$0xff] }
 0x409   : > { %3928 = vst.msk [vmem:[#allocation3 + $0x238] sm:$0xff] %vm417_vm0, %v9729_v55  ;;  %v9745_v46 = vld [vmem:[#allocation2 + $0x141] sm:$0xff]  ;;  %v2524_v27 = vadd.f32 %v9639_v49, %v2490_v14 }
 0x40a   : > { %12440 = vst [vmem:[#allocation84_spill] sm:$0xff] %v9745_v46  ;;  %v2336_v1 = vpop.f32.mrf.mxu1 }
 0x40b   : > { %2830 = vst.msk [vmem:[#allocation3 + $0x138] sm:$0xff] %vm770_vm2, %v2748_v59  ;;  %v2556_v4 = vmax.f32 %v2524_v27, 0.0  ;;  %v2337_v3 = vadd.f32 %v2336_v1, %v9169_v13  ;;  %v2452_v13 = vpop.f32.mrf.mxu3 }
 0x40c   : > { %2652 = vst.msk [vmem:[#allocation3 + $0x288] sm:$0xff] %vm417_vm0, %v9740_v28  ;;  %v2685_v63 = vld [vmem:[#allocation2 + $0x151] sm:$0xff] }
 0x40d   : > { %3290 = vst.msk [vmem:[#allocation3 + $0x260] sm:$0xff] %vm417_vm0, %v9745_v46  ;;  %v9754_v58 = vld [vmem:[#allocation2 + $0x150] sm:$0xff]  ;;  %v2450_v59 = vadd.f32 %v2449_v61, %v2337_v3  ;;  %2777 = vrot.lane.b32.xlu1 %v2685_v63, %s7797_s1  ;;  %2925 = vrot.lane.b32.xlu2 %v9323_v9, %s7798_s13  ;;  %v9773_v63 = vpop.f32.mrf.mxu0 }
 0x40e   : > { %v9756_v7 = vld [vmem:[#allocation2 + $0x151] sm:$0xff]  ;;  %2588 = vst.msk [vmem:[#allocation2 + $0x159] sm:$0xff] %vm417_vm0, %v2556_v4 }
 0x40f   : > { %v4005_v14 = vld [vmem:[#allocation3 + $0x220] sm:$0xff]  ;;  %2921 = vrot.lane.b32.xlu0 %v9277_v47, %s7798_s13  ;;  %2653 = vst.msk [vmem:[#allocation3 + $0x2a0] sm:$0xff] %vm417_vm0, %v9754_v58  ;;  %v2491_v27 = vmul.f32 %v9633_v21, %v2450_v59  ;;  %v2756_v1 = vpop.permute.xlu2 %2755 }
 0x410   : > { %7211 = vmatmul.msk.f32.gmra.mxu0 %vm417_vm0, %v4005_v14  ;;  %3291 = vst.msk [vmem:[#allocation3 + $0x278] sm:$0xff] %vm417_vm0, %v9756_v7 }
 0x411   : > { %2834 = vst.msk [vmem:[#allocation3 + $0x198] sm:$0xff] %vm770_vm2, %v2756_v1  ;;  %v2525_v9 = vadd.f32 %v9639_v49, %v2491_v27  ;;  %v4008_v27 = vld [vmem:[#allocation3 + $0x238] sm:$0xff] }
 0x412   : > { %v2339_v61 = vpop.f32.mrf.mxu1  ;;  %12441 = vst [vmem:[#allocation85_spill] sm:$0xff] %v9773_v63 }
 0x413   : > { %v2557_v4 = vmax.f32 %v2525_v9, 0.0  ;;  %v2340_v3 = vadd.f32 %v2339_v61, %v9174_v35 }
 0x415   : > { %v2686_v47 = vld [vmem:[#allocation2 + $0x159] sm:$0xff]  ;;  %2589 = vst.msk [vmem:[#allocation2 + $0x169] sm:$0xff] %vm417_vm0, %v2557_v4  ;;  %v2453_v59 = vadd.f32 %v2452_v13, %v2340_v3  ;;  %2929 = vrot.lane.b32.xlu1 %v9368_v33, %s7798_s13  ;;  %v2455_v13 = vpop.f32.mrf.mxu3  ;;  %v9811_v63 = vpop.f32.mrf.mxu0 }
 0x416   : > { %v9775_v14 = vld [vmem:[#allocation2 + $0x152] sm:$0xff]  ;;  %v9777_v46 = vld [vmem:[#allocation2 + $0x15a] sm:$0xff]  ;;  %2779 = vrot.lane.b32.xlu2 %v2686_v47, %s7797_s1 }
 0x417   : > { %2927 = vrot.lane.b32.xlu0 %v9325_v36, %s7798_s13  ;;  %3929 = vst.msk [vmem:[#allocation3 + $0x250] sm:$0xff] %vm417_vm0, %v9775_v14  ;;  %v9788_v35 = vld [vmem:[#allocation2 + $0x158] sm:$0xff]  ;;  %v2492_v1 = vmul.f32 %v9633_v21, %v2453_v59  ;;  %v2752_v9 = vpop.permute.xlu0 %2751 }
 0x418   : > { %7212 = vmatmul.msk.f32.gmra.mxu0 %vm417_vm0, %v4008_v27  ;;  %3930 = vst.msk [vmem:[#allocation3 + $0x268] sm:$0xff] %vm417_vm0, %v9777_v46  ;;  %v9793_v33 = vld [vmem:[#allocation2 + $0x159] sm:$0xff] }
 0x419   : > { %2832 = vst.msk [vmem:[#allocation3 + $0x168] sm:$0xff] %vm770_vm2, %v2752_v9  ;;  %v2526_v61 = vadd.f32 %v9639_v49, %v2492_v1 }
 0x41a   : > { %2654 = vst.msk [vmem:[#allocation3 + $0x2b8] sm:$0xff] %vm417_vm0, %v9788_v35  ;;  %v2342_v36 = vpop.f32.mrf.mxu1 }
 0x41b   : > { %3292 = vst.msk [vmem:[#allocation3 + $0x290] sm:$0xff] %vm417_vm0, %v9793_v33  ;;  %v2558_v4 = vmax.f32 %v2526_v61, 0.0  ;;  %v2343_v3 = vadd.f32 %v2342_v36, %v9180_v25 }
 0x41c   : > { %v2687_v47 = vld [vmem:[#allocation2 + $0x169] sm:$0xff] }
 0x41d   : > { %v9802_v59 = vld [vmem:[#allocation2 + $0x168] sm:$0xff]  ;;  %2590 = vst.msk [vmem:[#allocation2 + $0x171] sm:$0xff] %vm417_vm0, %v2558_v4  ;;  %v2456_v27 = vadd.f32 %v2455_v13, %v2343_v3  ;;  %2935 = vrot.lane.b32.xlu1 %v9410_v54, %s7798_s13  ;;  %v2458_v61 = vpop.f32.mrf.mxu3 }
 0x41e   : > { %2931 = vrot.lane.b32.xlu2 %v9370_v29, %s7798_s13  ;;  %v4011_v1 = vld [vmem:[#allocation3 + $0x250] sm:$0xff]  ;;  %v9809_v9 = vld [vmem:[#allocation2 + $0x169] sm:$0xff]  ;;  %2655 = vst.msk [vmem:[#allocation3 + $0x2d0] sm:$0xff] %vm417_vm0, %v9802_v59 }
 0x41f   : > { %2781 = vrot.lane.b32.xlu0 %v2687_v47, %s7797_s1  ;;  %v2493_v25 = vmul.f32 %v9633_v21, %v2456_v27  ;;  %v2754_v13 = vpop.permute.xlu1 %2753  ;;  %3293 = vst.msk [vmem:[#allocation3 + $0x2a8] sm:$0xff] %vm417_vm0, %v9809_v9 }
 0x420   : > { %7213 = vmatmul.msk.f32.gmra.mxu0 %vm417_vm0, %v4011_v1  ;;  %2833 = vst.msk [vmem:[#allocation3 + $0x180] sm:$0xff] %vm770_vm2, %v2754_v13  ;;  %v4014_v13 = vld [vmem:[#allocation3 + $0x268] sm:$0xff] }
 0x421   : > { %v2527_v29 = vadd.f32 %v9639_v49, %v2493_v25 }
 0x422   : > { %v2345_v54 = vpop.f32.mrf.mxu1 }
 0x423   : > { %v2559_v36 = vmax.f32 %v2527_v29, 0.0  ;;  %v2346_v4 = vadd.f32 %v2345_v54, %v9192_v31 }
 0x424   : > { %v2688_v3 = vld [vmem:[#allocation2 + $0x171] sm:$0xff] }
 0x425   : > { %v9823_v47 = vld [vmem:[#allocation2 + $0x16a] sm:$0xff]  ;;  %v9825_v1 = vld [vmem:[#allocation2 + $0x172] sm:$0xff]  ;;  %2591 = vst.msk [vmem:[#allocation2 + $0x181] sm:$0xff] %vm417_vm0, %v2559_v36  ;;  %v2459_v27 = vadd.f32 %v2458_v61, %v2346_v4  ;;  %2783 = vrot.lane.b32.xlu1 %v2688_v3, %s7797_s1 }
 0x426   : > { %2937 = vrot.lane.b32.xlu2 %v9444_v51, %s7798_s13  ;;  %3931 = vst.msk [vmem:[#allocation3 + $0x280] sm:$0xff] %vm417_vm0, %v9823_v47  ;;  %v9836_v31 = vld [vmem:[#allocation2 + $0x170] sm:$0xff]  ;;  %v9843_v51 = vpop.f32.mrf.mxu0 }
 0x427   : > { %2933 = vrot.lane.b32.xlu0 %v9408_v62, %s7798_s13  ;;  %v2494_v25 = vmul.f32 %v9633_v21, %v2459_v27  ;;  %v2762_v29 = vpop.permute.xlu2 %2761  ;;  %3932 = vst.msk [vmem:[#allocation3 + $0x298] sm:$0xff] %vm417_vm0, %v9825_v1  ;;  %v9841_v54 = vld [vmem:[#allocation2 + $0x171] sm:$0xff] }
 0x428   : > { %7214 = vmatmul.msk.f32.gmra.mxu0 %vm417_vm0, %v4014_v13  ;;  %2837 = vst.msk [vmem:[#allocation3 + $0x1e0] sm:$0xff] %vm770_vm2, %v2762_v29 }
 0x429   : > { %v2528_v61 = vadd.f32 %v9639_v49, %v2494_v25  ;;  %2656 = vst.msk [vmem:[#allocation3 + $0x2e8] sm:$0xff] %vm417_vm0, %v9836_v31 }
 0x42a   : > { %3294 = vst.msk [vmem:[#allocation3 + $0x2c0] sm:$0xff] %vm417_vm0, %v9841_v54 }
 0x42b   : > { %v2560_v62 = vmax.f32 %v2528_v61, 0.0  ;;  %v4045_v61 = vld [vmem:[#allocation11 + $0x60] sm:$0xff] }
 0x42c   : > { %v9851_v21 = vld [vmem:[#allocation2 + $0x181] sm:$0xff] }
 0x42d   : > { %2592 = vst.msk [vmem:[#allocation2 + $0x189] sm:$0xff] %vm417_vm0, %v2560_v62  ;;  %2941 = vrot.lane.b32.xlu1 %v9483_v24, %s7798_s13  ;;  %v4017_v36 = vld [vmem:[#allocation3 + $0x280] sm:$0xff] }
 0x42e   : > { %2943 = vrot.lane.b32.xlu2 %v9485_v2, %s7798_s13  ;;  %3295 = vst.msk [vmem:[#allocation3 + $0x2d8] sm:$0xff] %vm417_vm0, %v9851_v21  ;;  %v9864_v4 = vpop.f32.mrf.mxu0  ;;  %v4020_v2 = vld [vmem:[#allocation3 + $0x298] sm:$0xff] }
 0x42f   : > { %2939 = vrot.lane.b32.xlu0 %v9446_v0, %s7798_s13  ;;  %v2758_v49 = vpop.permute.xlu0 %2757 }
 0x430   : > { %7215 = vmatmul.msk.f32.gmra.mxu0 %vm417_vm0, %v4017_v36  ;;  %2835 = vst.msk [vmem:[#allocation3 + $0x1b0] sm:$0xff] %vm770_vm2, %v2758_v49  ;;  %v4044_v36 = vld [vmem:[#allocation11 + $0x58] sm:$0xff]  ;;  %v4043_v49 = vld [vmem:[#allocation11 + $0x50] sm:$0xff] }
 0x434   : > { %v3901_v3 = vld [vmem:[#allocation2 + $0x182] sm:$0xff]  ;;  %v3902_v27 = vld [vmem:[#allocation2 + $0x18a] sm:$0xff] }
 0x435   : > { %2947 = vrot.lane.b32.xlu1 %v9523_v57, %s7798_s13  ;;  %3933 = vst.msk [vmem:[#allocation3 + $0x2b0] sm:$0xff] %vm417_vm0, %v3901_v3  ;;  %v9875_v0 = vld [vmem:[#allocation2 + $0x189] sm:$0xff] }
 0x436   : > { %2949 = vrot.lane.b32.xlu2 %v9561_v60, %s7798_s13  ;;  %3934 = vst.msk [vmem:[#allocation3 + $0x2c8] sm:$0xff] %vm417_vm0, %v3902_v27  ;;  %v9880_v57 = vpop.f32.mrf.mxu0 }
 0x437   : > { %2945 = vrot.lane.b32.xlu0 %v9521_v22, %s7798_s13  ;;  %v2760_v24 = vpop.permute.xlu1 %2759  ;;  %3296 = vst.msk [vmem:[#allocation3 + $0x2f0] sm:$0xff] %vm417_vm0, %v9875_v0 }
 0x438   : > { %7216 = vmatmul.msk.f32.gmra.mxu0 %vm417_vm0, %v4020_v2  ;;  %2836 = vst.msk [vmem:[#allocation3 + $0x1c8] sm:$0xff] %vm770_vm2, %v2760_v24  ;;  %v4041_v2 = vld [vmem:[#allocation11 + $0x40] sm:$0xff] }
 0x43c   : > { %v4023_v60 = vld [vmem:[#allocation3 + $0x2b0] sm:$0xff] }
 0x43d   : > { %2953 = vrot.lane.b32.xlu1 %v9601_v8, %s7798_s13  ;;  %v4026_v13 = vld [vmem:[#allocation3 + $0x2c8] sm:$0xff] }
 0x43e   : > { %2955 = vrot.lane.b32.xlu2 %v9603_v48, %s7798_s13  ;;  %v9894_v25 = vpop.f32.mrf.mxu0 }
 0x43f   : > { %2951 = vrot.lane.b32.xlu0 %v9563_v20, %s7798_s13  ;;  %v2768_v22 = vpop.permute.xlu2 %2767 }
 0x440   : > { %7217 = vmatmul.msk.f32.gmra.mxu0 %vm417_vm0, %v4023_v60  ;;  %2840 = vst.msk [vmem:[#allocation3 + $0x228] sm:$0xff] %vm770_vm2, %v2768_v22  ;;  %v4039_v60 = vld [vmem:[#allocation11 + $0x30] sm:$0xff]  ;;  %v3072_v22 = vld [vmem:[#allocation2 + $0x188] sm:$0xff] }
 0x445   : > { %2959 = vrot.lane.b32.xlu1 %v9645_v11, %s7798_s13 }
 0x446   : > { %2961 = vrot.lane.b32.xlu2 %v9682_v37, %s7798_s13 }
 0x447   : > { %2957 = vrot.lane.b32.xlu0 %v9643_v5, %s7798_s13  ;;  %v2764_v48 = vpop.permute.xlu0 %2763  ;;  %v2914_v20 = vpop.permute.xlu2 %2913 }
 0x448   : > { %7218 = vmatmul.msk.f32.gmra.mxu0 %vm417_vm0, %v4026_v13  ;;  %2838 = vst.msk [vmem:[#allocation3 + $0x1f8] sm:$0xff] %vm770_vm2, %v2764_v48 }
 0x449   : > { %3009 = vst.msk [vmem:[#allocation3] sm:$0xff] %vm963_vm3, %v2914_v20  ;;  %v4037_v20 = vld [vmem:[#allocation11 + $0x20] sm:$0xff] }
 0x44d   : > { %2965 = vrot.lane.b32.xlu1 %v9727_v56, %s7798_s13 }
 0x44e   : > { %2967 = vrot.lane.b32.xlu2 %v9729_v55, %s7798_s13  ;;  %v4048_v55 = vld [vmem:[#allocation11 + $0x78] sm:$0xff] }
 0x44f   : > { %2963 = vrot.lane.b32.xlu0 %v9684_v17, %s7798_s13  ;;  %v2766_v11 = vpop.permute.xlu1 %2765  ;;  %4165 = vmatpush.msrb.mxu3 %v4048_v55 }
 0x450   : > { %2839 = vst.msk [vmem:[#allocation3 + $0x210] sm:$0xff] %vm770_vm2, %v2766_v11 }
 0x455   : > { %2971 = vrot.lane.b32.xlu1 %v9777_v46, %s7798_s13  ;;  %v4047_v46 = vld [vmem:[#allocation11 + $0x70] sm:$0xff] }
 0x456   : > { %2973 = vrot.lane.b32.xlu2 %v9823_v47, %s7798_s13  ;;  %v12445_v47 = vld [vmem:[#allocation80_spill] sm:$0xff]  ;;  %4166 = vmatpush.msrb.mxu3 %v4047_v46  ;;  %v3307_v46 = vld [vmem:[#allocation2 + $0x92] sm:$0xff] }
 0x457   : > { %2969 = vrot.lane.b32.xlu0 %v9775_v14, %s7798_s13  ;;  %v2774_v8 = vpop.permute.xlu2 %2773  ;;  %v4046_v14 = vld [vmem:[#allocation11 + $0x68] sm:$0xff] }
 0x458   : > { %2843 = vst.msk [vmem:[#allocation3 + $0x270] sm:$0xff] %vm770_vm2, %v2774_v8  ;;  %4167 = vmatpush.msrb.mxu3 %v4046_v14  ;;  %v4036_v8 = vld [vmem:[#allocation11 + $0x18] sm:$0xff]  ;;  %v3306_v14 = vld [vmem:[#allocation2 + $0x82] sm:$0xff] }
 0x45a   : > { %4168 = vmatpush.msrb.mxu3 %v4045_v61 }
 0x45c   : > { %4169 = vmatpush.msrb.mxu3 %v4044_v36  ;;  %v3311_v36 = vld [vmem:[#allocation2 + $0xc2] sm:$0xff] }
 0x45d   : > { %3105 = vrot.lane.b32.xlu1 %v9226_v40, %s7799_s25 }
 0x45e   : > { %3107 = vrot.lane.b32.xlu2 %v9242_v43, %s7799_s25  ;;  %4170 = vmatpush.msrb.mxu3 %v4043_v49  ;;  %v3309_v49 = vld [vmem:[#allocation2 + $0xaa] sm:$0xff] }
 0x45f   : > { %2975 = vrot.lane.b32.xlu0 %v9825_v1, %s7798_s13  ;;  %v2920_v17 = vpop.permute.xlu2 %2919  ;;  %v2770_v5 = vpop.permute.xlu0 %2769 }
 0x460   : > { %3012 = vst.msk [vmem:[#allocation3 + $0x48] sm:$0xff] %vm963_vm3, %v2920_v17  ;;  %v4064_v17 = vld [vmem:[#allocation11 + $0xf8] sm:$0xff] }
 0x461   : > { %2841 = vst.msk [vmem:[#allocation3 + $0x240] sm:$0xff] %vm770_vm2, %v2770_v5  ;;  %4278 = vmatpush.msrb.mxu2 %v4064_v17  ;;  %v4035_v5 = vld [vmem:[#allocation11 + $0x10] sm:$0xff] }
 0x462   : > { %v3315_v17 = vld [vmem:[#allocation2 + $0xf2] sm:$0xff] }
 0x465   : > { %3111 = vrot.lane.b32.xlu1 %v9288_v50, %s7799_s25 }
 0x466   : > { %3113 = vrot.lane.b32.xlu2 %v9304_v32, %s7799_s25 }
 0x467   : > { %3109 = vrot.lane.b32.xlu0 %v9260_v42, %s7799_s25  ;;  %v2772_v40 = vpop.permute.xlu1 %2771  ;;  %v2926_v43 = vpop.permute.xlu2 %2925 }
 0x468   : > { %2842 = vst.msk [vmem:[#allocation3 + $0x258] sm:$0xff] %vm770_vm2, %v2772_v40  ;;  %v2916_v37 = vpop.permute.xlu0 %2915  ;;  %v3299_v40 = vld [vmem:[#allocation2 + $0x32] sm:$0xff] }
 0x469   : > { %3015 = vst.msk [vmem:[#allocation3 + $0x90] sm:$0xff] %vm963_vm3, %v2926_v43  ;;  %v12446_v43 = vld [vmem:[#allocation82_spill] sm:$0xff] }
 0x46a   : > { %3010 = vst.msk [vmem:[#allocation3 + $0x18] sm:$0xff] %vm963_vm3, %v2916_v37 }
 0x46d   : > { %3117 = vrot.lane.b32.xlu1 %v9350_v52, %s7799_s25 }
 0x46e   : > { %3119 = vrot.lane.b32.xlu2 %v9378_v16, %s7799_s25 }
 0x46f   : > { %3115 = vrot.lane.b32.xlu0 %v9333_v19, %s7799_s25  ;;  %v2918_v50 = vpop.permute.xlu1 %2917 }
 0x470   : > { %v2780_v42 = vpop.permute.xlu2 %2779  ;;  %3011 = vst.msk [vmem:[#allocation3 + $0x30] sm:$0xff] %vm963_vm3, %v2918_v50 }
 0x471   : > { %2846 = vst.msk [vmem:[#allocation3 + $0x2b8] sm:$0xff] %vm770_vm2, %v2780_v42  ;;  %v4033_v42 = vld [vmem:[#allocation11] sm:$0xff] }
 0x475   : > { %3123 = vrot.lane.b32.xlu1 %v9416_v45, %s7799_s25 }
 0x476   : > { %3125 = vrot.lane.b32.xlu2 %v9431_v34, %s7799_s25 }
 0x477   : > { %3121 = vrot.lane.b32.xlu0 %v9394_v44, %s7799_s25  ;;  %v2924_v32 = vpop.permute.xlu1 %2923 }
 0x478   : > { %v2932_v52 = vpop.permute.xlu2 %2931  ;;  %3014 = vst.msk [vmem:[#allocation3 + $0x78] sm:$0xff] %vm963_vm3, %v2924_v32 }
 0x479   : > { %v2776_v19 = vpop.permute.xlu0 %2775  ;;  %3018 = vst.msk [vmem:[#allocation3 + $0xd8] sm:$0xff] %vm963_vm3, %v2932_v52  ;;  %v7520_v52 = vld [vmem:[#allocation11 + $0x118] sm:$0xff] }
 0x47a   : > { %2844 = vst.msk [vmem:[#allocation3 + $0x288] sm:$0xff] %vm770_vm2, %v2776_v19  ;;  %v3301_v19 = vld [vmem:[#allocation2 + $0x4a] sm:$0xff] }
 0x47d   : > { %3129 = vrot.lane.b32.xlu1 %v9470_v53, %s7799_s25 }
 0x47e   : > { %3131 = vrot.lane.b32.xlu2 %v9489_v23, %s7799_s25 }
 0x47f   : > { %3127 = vrot.lane.b32.xlu0 %v9457_v41, %s7799_s25  ;;  %v2778_v16 = vpop.permute.xlu1 %2777 }
 0x480   : > { %v2938_v44 = vpop.permute.xlu2 %2937  ;;  %2845 = vst.msk [vmem:[#allocation3 + $0x2a0] sm:$0xff] %vm770_vm2, %v2778_v16  ;;  %v3302_v16 = vld [vmem:[#allocation2 + $0x52] sm:$0xff] }
 0x481   : > { %v2922_v45 = vpop.permute.xlu0 %2921  ;;  %3021 = vst.msk [vmem:[#allocation3 + $0x120] sm:$0xff] %vm963_vm3, %v2938_v44  ;;  %v3300_v44 = vld [vmem:[#allocation2 + $0x3a] sm:$0xff] }
 0x482   : > { %3013 = vst.msk [vmem:[#allocation3 + $0x60] sm:$0xff] %vm963_vm3, %v2922_v45  ;;  %v7521_v45 = vld [vmem:[#allocation11 + $0x110] sm:$0xff] }
 0x485   : > { %3135 = vrot.lane.b32.xlu1 %v9532_v39, %s7799_s25 }
 0x486   : > { %3137 = vrot.lane.b32.xlu2 %v9546_v10, %s7799_s25  ;;  %v12442_v10 = vld [vmem:[#allocation78_spill] sm:$0xff] }
 0x487   : > { %3133 = vrot.lane.b32.xlu0 %v9506_v38, %s7799_s25  ;;  %v2930_v34 = vpop.permute.xlu1 %2929 }
 0x488   : > { %v2944_v41 = vpop.permute.xlu2 %2943  ;;  %3017 = vst.msk [vmem:[#allocation3 + $0xc0] sm:$0xff] %vm963_vm3, %v2930_v34 }
 0x489   : > { %v2928_v53 = vpop.permute.xlu0 %2927  ;;  %3024 = vst.msk [vmem:[#allocation3 + $0x168] sm:$0xff] %vm963_vm3, %v2944_v41 }
 0x48a   : > { %3016 = vst.msk [vmem:[#allocation3 + $0xa8] sm:$0xff] %vm963_vm3, %v2928_v53 }
 0x48d   : > { %3141 = vrot.lane.b32.xlu1 %v9585_v30, %s7799_s25  ;;  %v12443_v30 = vld [vmem:[#allocation75_spill] sm:$0xff] }
 0x48e   : > { %3143 = vrot.lane.b32.xlu2 %v9610_v12, %s7799_s25 }
 0x48f   : > { %3139 = vrot.lane.b32.xlu0 %v9571_v15, %s7799_s25  ;;  %v2936_v23 = vpop.permute.xlu1 %2935 }
 0x490   : > { %v2950_v38 = vpop.permute.xlu2 %2949  ;;  %3020 = vst.msk [vmem:[#allocation3 + $0x108] sm:$0xff] %vm963_vm3, %v2936_v23  ;;  %v7522_v23 = vld [vmem:[#allocation11 + $0x108] sm:$0xff] }
 0x491   : > { %v2782_v39 = vpop.permute.xlu0 %2781  ;;  %3027 = vst.msk [vmem:[#allocation3 + $0x1b0] sm:$0xff] %vm963_vm3, %v2950_v38  ;;  %v4062_v38 = vld [vmem:[#allocation11 + $0xe8] sm:$0xff] }
 0x492   : > { %2847 = vst.msk [vmem:[#allocation3 + $0x2d0] sm:$0xff] %vm770_vm2, %v2782_v39  ;;  %v7523_v39 = vld [vmem:[#allocation11 + $0x100] sm:$0xff] }
 0x495   : > { %3147 = vrot.lane.b32.xlu1 %v9652_v18, %s7799_s25  ;;  %v12444_v18 = vld [vmem:[#allocation83_spill] sm:$0xff] }
 0x496   : > { %3149 = vrot.lane.b32.xlu2 %v12442_v10, %s7799_s25  ;;  %v3304_v10 = vld [vmem:[#allocation2 + $0x6a] sm:$0xff] }
 0x497   : > { %3145 = vrot.lane.b32.xlu0 %v12443_v30, %s7799_s25  ;;  %v2784_v12 = vpop.permute.xlu1 %2783  ;;  %v3305_v30 = vld [vmem:[#allocation2 + $0x7a] sm:$0xff] }
 0x498   : > { %v2956_v15 = vpop.permute.xlu2 %2955  ;;  %2848 = vst.msk [vmem:[#allocation3 + $0x2e8] sm:$0xff] %vm770_vm2, %v2784_v12  ;;  %v3303_v12 = vld [vmem:[#allocation2 + $0x62] sm:$0xff] }
 0x499   : > { %v2934_v56 = vpop.permute.xlu0 %2933  ;;  %3030 = vst.msk [vmem:[#allocation3 + $0x1f8] sm:$0xff] %vm963_vm3, %v2956_v15 }
 0x49a   : > { %3019 = vst.msk [vmem:[#allocation3 + $0xf0] sm:$0xff] %vm963_vm3, %v2934_v56 }
 0x49d   : > { %3153 = vrot.lane.b32.xlu1 %v12444_v18, %s7799_s25  ;;  %v3308_v18 = vld [vmem:[#allocation2 + $0x9a] sm:$0xff] }
 0x49e   : > { %3155 = vrot.lane.b32.xlu2 %v9740_v28, %s7799_s25  ;;  %v4042_v28 = vld [vmem:[#allocation11 + $0x48] sm:$0xff] }
 0x49f   : > { %3151 = vrot.lane.b32.xlu0 %v12445_v47, %s7799_s25  ;;  %v2942_v1 = vpop.permute.xlu1 %2941  ;;  %4171 = vmatpush.msrb.mxu3 %v4042_v28  ;;  %v4061_v47 = vld [vmem:[#allocation11 + $0xe0] sm:$0xff]  ;;  %v4060_v28 = vld [vmem:[#allocation11 + $0xd8] sm:$0xff] }
 0x4a0   : > { %v2962_v29 = vpop.permute.xlu2 %2961  ;;  %3023 = vst.msk [vmem:[#allocation3 + $0x150] sm:$0xff] %vm963_vm3, %v2942_v1 }
 0x4a1   : > { %v2940_v62 = vpop.permute.xlu0 %2939  ;;  %3033 = vst.msk [vmem:[#allocation3 + $0x240] sm:$0xff] %vm963_vm3, %v2962_v29  ;;  %4172 = vmatpush.msrb.mxu3 %v4041_v2 }
 0x4a2   : > { %3022 = vst.msk [vmem:[#allocation3 + $0x138] sm:$0xff] %vm963_vm3, %v2940_v62  ;;  %v3310_v62 = vld [vmem:[#allocation2 + $0xb2] sm:$0xff] }
 0x4a5   : > { %3159 = vrot.lane.b32.xlu1 %v9788_v35, %s7799_s25  ;;  %v4040_v35 = vld [vmem:[#allocation11 + $0x38] sm:$0xff] }
 0x4a6   : > { %3161 = vrot.lane.b32.xlu2 %v9802_v59, %s7799_s25  ;;  %v3071_v59 = vld [vmem:[#allocation2 + $0x180] sm:$0xff]  ;;  %4173 = vmatpush.msrb.mxu3 %v4040_v35 }
 0x4a7   : > { %3157 = vrot.lane.b32.xlu0 %v9754_v58, %s7799_s25  ;;  %v2948_v3 = vpop.permute.xlu1 %2947  ;;  %v4038_v58 = vld [vmem:[#allocation11 + $0x28] sm:$0xff]  ;;  %v3313_v35 = vld [vmem:[#allocation2 + $0xda] sm:$0xff] }
 0x4a8   : > { %v2968_v27 = vpop.permute.xlu2 %2967  ;;  %3026 = vst.msk [vmem:[#allocation3 + $0x198] sm:$0xff] %vm963_vm3, %v2948_v3  ;;  %4174 = vmatpush.msrb.mxu3 %v4039_v60  ;;  %v3314_v60 = vld [vmem:[#allocation2 + $0xe2] sm:$0xff] }
 0x4a9   : > { %v2946_v24 = vpop.permute.xlu0 %2945  ;;  %3036 = vst.msk [vmem:[#allocation3 + $0x288] sm:$0xff] %vm963_vm3, %v2968_v27 }
 0x4aa   : > { %3025 = vst.msk [vmem:[#allocation3 + $0x180] sm:$0xff] %vm963_vm3, %v2946_v24  ;;  %4175 = vmatpush.msrb.mxu3 %v4038_v58 }
 0x4ac   : > { %4176 = vmatpush.msrb.mxu3 %v4037_v20  ;;  %v4059_v20 = vld [vmem:[#allocation11 + $0xd0] sm:$0xff] }
 0x4ad   : > { %3165 = vrot.lane.b32.xlu1 %v3071_v59, %s7799_s25  ;;  %v3312_v59 = vld [vmem:[#allocation2 + $0xca] sm:$0xff] }
 0x4ae   : > { %3167 = vrot.lane.b32.xlu2 %v3072_v22, %s7799_s25  ;;  %4177 = vmatpush.msrb.mxu3 %v4036_v8  ;;  %v3317_v8 = vld [vmem:[#allocation2 + $0x10a] sm:$0xff] }
 0x4af   : > { %3163 = vrot.lane.b32.xlu0 %v9836_v31, %s7799_s25  ;;  %v2954_v13 = vpop.permute.xlu1 %2953  ;;  %v4034_v31 = vld [vmem:[#allocation11 + $0x8] sm:$0xff] }
 0x4b0   : > { %v2974_v48 = vpop.permute.xlu2 %2973  ;;  %3029 = vst.msk [vmem:[#allocation3 + $0x1e0] sm:$0xff] %vm963_vm3, %v2954_v13  ;;  %4178 = vmatpush.msrb.mxu3 %v4035_v5 }
 0x4b1   : > { %v2952_v11 = vpop.permute.xlu0 %2951  ;;  %3039 = vst.msk [vmem:[#allocation3 + $0x2d0] sm:$0xff] %vm963_vm3, %v2974_v48 }
 0x4b2   : > { %3028 = vst.msk [vmem:[#allocation3 + $0x1c8] sm:$0xff] %vm963_vm3, %v2952_v11  ;;  %4179 = vmatpush.msrb.mxu3 %v4034_v31  ;;  %v3316_v11 = vld [vmem:[#allocation2 + $0xfa] sm:$0xff] }
 0x4b4   : > { %4180 = vmatpush.msrb.mxu3 %v4033_v42  ;;  %v12447_v42 = vld [vmem:[#allocation57_spill] sm:$0xff] }
 0x4b5   : > { %3363 = vrot.lane.b32.xlu1 %v9725_v26, %s7797_s1  ;;  %v4063_v26 = vld [vmem:[#allocation11 + $0xf0] sm:$0xff] }
 0x4b6   : > { %3365 = vrot.lane.b32.xlu2 %v3299_v40, %s7797_s1  ;;  %4279 = vmatpush.msrb.mxu2 %v4063_v26 }
 0x4b7   : > { %3361 = vrot.lane.b32.xlu0 %v12446_v43, %s7797_s1  ;;  %v2960_v37 = vpop.permute.xlu1 %2959  ;;  %7355 = vmatpush.msra.mxu3 %v7520_v52 }
 0x4b8   : > { %v3108_v50 = vpop.permute.xlu2 %3107  ;;  %3032 = vst.msk [vmem:[#allocation3 + $0x228] sm:$0xff] %vm963_vm3, %v2960_v37  ;;  %4280 = vmatpush.msrb.mxu2 %v4062_v38  ;;  %v4058_v37 = vld [vmem:[#allocation11 + $0xc8] sm:$0xff] }
 0x4b9   : > { %v2958_v32 = vpop.permute.xlu0 %2957  ;;  %3202 = vst.msk [vmem:[#allocation3 + $0x18] sm:$0xff] %vm1156_vm4, %v3108_v50  ;;  %7356 = vmatpush.msra.mxu3 %v7521_v45  ;;  %v3318_v50 = vld [vmem:[#allocation2 + $0x112] sm:$0xff]  ;;  %v3491_v45 = vld [vmem:[#allocation2 + $0x48] sm:$0xff] }
 0x4ba   : > { %3031 = vst.msk [vmem:[#allocation3 + $0x210] sm:$0xff] %vm963_vm3, %v2958_v32  ;;  %4281 = vmatpush.msrb.mxu2 %v4061_v47  ;;  %v3489_v32 = vld [vmem:[#allocation2 + $0x30] sm:$0xff]  ;;  %v3493_v47 = vld [vmem:[#allocation2 + $0x60] sm:$0xff] }
 0x4bb   : > { %7357 = vmatpush.msra.mxu3 %v7522_v23 }
 0x4bc   : > { %4282 = vmatpush.msrb.mxu2 %v4060_v28  ;;  %v3494_v28 = vld [vmem:[#allocation2 + $0x68] sm:$0xff] }
 0x4bd   : > { %3369 = vrot.lane.b32.xlu1 %v3301_v19, %s7797_s1  ;;  %7358 = vmatpush.msra.mxu3 %v7523_v39 }
 0x4be   : > { %3371 = vrot.lane.b32.xlu2 %v3302_v16, %s7797_s1  ;;  %4283 = vmatpush.msrb.mxu2 %v4059_v20 }
 0x4bf   : > { %3367 = vrot.lane.b32.xlu0 %v3300_v44, %s7797_s1  ;;  %v2966_v34 = vpop.permute.xlu1 %2965  ;;  %v4057_v44 = vld [vmem:[#allocation11 + $0xc0] sm:$0xff] }
 0x4c0   : > { %v3114_v41 = vpop.permute.xlu2 %3113  ;;  %3035 = vst.msk [vmem:[#allocation3 + $0x270] sm:$0xff] %vm963_vm3, %v2966_v34  ;;  %v3940_v13 = vld [vmem:[#allocation3 + $0x18] sm:$0xff]  ;;  %4284 = vmatpush.msrb.mxu2 %v4058_v37 }
 0x4c1   : > { %v2964_v53 = vpop.permute.xlu0 %2963  ;;  %3205 = vst.msk [vmem:[#allocation3 + $0x60] sm:$0xff] %vm1156_vm4, %v3114_v41  ;;  %v12448_v34 = vld [vmem:[#allocation58_spill] sm:$0xff]  ;;  %v3490_v41 = vld [vmem:[#allocation2 + $0x38] sm:$0xff] }
 0x4c2   : > { %3034 = vst.msk [vmem:[#allocation3 + $0x258] sm:$0xff] %vm963_vm3, %v2964_v53  ;;  %4285 = vmatpush.msrb.mxu2 %v4057_v44 }
 0x4c5   : > { %3375 = vrot.lane.b32.xlu1 %v3304_v10, %s7797_s1  ;;  %v4056_v10 = vld [vmem:[#allocation11 + $0xb8] sm:$0xff] }
 0x4c6   : > { %3377 = vrot.lane.b32.xlu2 %v3305_v30, %s7797_s1  ;;  %4286 = vmatpush.msrb.mxu2 %v4056_v10  ;;  %v3319_v30 = vld [vmem:[#allocation2 + $0x122] sm:$0xff] }
 0x4c7   : > { %3373 = vrot.lane.b32.xlu0 %v3303_v12, %s7797_s1  ;;  %v2972_v15 = vpop.permute.xlu1 %2971  ;;  %v3492_v12 = vld [vmem:[#allocation2 + $0x50] sm:$0xff] }
 0x4c8   : > { %v3120_v56 = vpop.permute.xlu2 %3119  ;;  %3038 = vst.msk [vmem:[#allocation3 + $0x2b8] sm:$0xff] %vm963_vm3, %v2972_v15  ;;  %v3949_v38 = vld [vmem:[#allocation3 + $0x60] sm:$0xff] }
 0x4c9   : > { %v2970_v55 = vpop.permute.xlu0 %2969  ;;  %3208 = vst.msk [vmem:[#allocation3 + $0xa8] sm:$0xff] %vm1156_vm4, %v3120_v56  ;;  %v12449_v15 = vld [vmem:[#allocation59_spill] sm:$0xff] }
 0x4ca   : > { %3037 = vst.msk [vmem:[#allocation3 + $0x2a0] sm:$0xff] %vm963_vm3, %v2970_v55 }
 0x4cd   : > { %3381 = vrot.lane.b32.xlu1 %v3307_v46, %s7797_s1 }
 0x4ce   : > { %3383 = vrot.lane.b32.xlu2 %v3308_v18, %s7797_s1 }
 0x4cf   : > { %3379 = vrot.lane.b32.xlu0 %v3306_v14, %s7797_s1  ;;  %v3106_v1 = vpop.permute.xlu1 %3105  ;;  %v3320_v14 = vld [vmem:[#allocation2 + $0x12a] sm:$0xff] }
 0x4d0   : > { %v3126_v29 = vpop.permute.xlu2 %3125  ;;  %3201 = vst.msk [vmem:[#allocation3] sm:$0xff] %vm1156_vm4, %v3106_v1  ;;  %v12450_v1 = vld [vmem:[#allocation60_spill] sm:$0xff] }
 0x4d1   : > { %v2976_v61 = vpop.permute.xlu0 %2975  ;;  %3211 = vst.msk [vmem:[#allocation3 + $0xf0] sm:$0xff] %vm1156_vm4, %v3126_v29  ;;  %v4055_v29 = vld [vmem:[#allocation11 + $0xb0] sm:$0xff] }
 0x4d2   : > { %3040 = vst.msk [vmem:[#allocation3 + $0x2e8] sm:$0xff] %vm963_vm3, %v2976_v61  ;;  %4287 = vmatpush.msrb.mxu2 %v4055_v29  ;;  %v3325_v29 = vld [vmem:[#allocation2 + $0x16a] sm:$0xff] }
 0x4d5   : > { %3387 = vrot.lane.b32.xlu1 %v3310_v62, %s7797_s1 }
 0x4d6   : > { %3389 = vrot.lane.b32.xlu2 %v3311_v36, %s7797_s1 }
 0x4d7   : > { %3385 = vrot.lane.b32.xlu0 %v3309_v49, %s7797_s1  ;;  %v3112_v3 = vpop.permute.xlu1 %3111  ;;  %v3937_v2 = vld [vmem:[#allocation3] sm:$0xff] }
 0x4d8   : > { %v3132_v27 = vpop.permute.xlu2 %3131  ;;  %3204 = vst.msk [vmem:[#allocation3 + $0x48] sm:$0xff] %vm1156_vm4, %v3112_v3  ;;  %4181 = vmatmul.f32.vlgmr.msrb.gmra.mxu3 %v3937_v2  ;;  %v12451_v3 = vld [vmem:[#allocation62_spill] sm:$0xff] }
 0x4d9   : > { %v3110_v24 = vpop.permute.xlu0 %3109  ;;  %3214 = vst.msk [vmem:[#allocation3 + $0x138] sm:$0xff] %vm1156_vm4, %v3132_v27  ;;  %v12452_v27 = vld [vmem:[#allocation61_spill] sm:$0xff] }
 0x4da   : > { %3203 = vst.msk [vmem:[#allocation3 + $0x30] sm:$0xff] %vm1156_vm4, %v3110_v24 }
 0x4dd   : > { %3393 = vrot.lane.b32.xlu1 %v3313_v35, %s7797_s1  ;;  %v3958_v35 = vld [vmem:[#allocation3 + $0xa8] sm:$0xff] }
 0x4de   : > { %3395 = vrot.lane.b32.xlu2 %v3314_v60, %s7797_s1 }
 0x4df   : > { %3391 = vrot.lane.b32.xlu0 %v3312_v59, %s7797_s1  ;;  %v3118_v22 = vpop.permute.xlu1 %3117  ;;  %v3946_v19 = vld [vmem:[#allocation3 + $0x48] sm:$0xff]  ;;  %v4054_v59 = vld [vmem:[#allocation11 + $0xa8] sm:$0xff] }
 0x4e0   : > { %v3138_v58 = vpop.permute.xlu2 %3137  ;;  %3207 = vst.msk [vmem:[#allocation3 + $0x90] sm:$0xff] %vm1156_vm4, %v3118_v22  ;;  %4184 = vmatmul.f32.gmra.mxu3 %v3940_v13  ;;  %4288 = vmatpush.msrb.mxu2 %v4054_v59  ;;  %v3495_v22 = vld [vmem:[#allocation2 + $0x78] sm:$0xff] }
 0x4e1   : > { %v3116_v48 = vpop.permute.xlu0 %3115  ;;  %3217 = vst.msk [vmem:[#allocation3 + $0x180] sm:$0xff] %vm1156_vm4, %v3138_v58  ;;  %v3943_v31 = vld [vmem:[#allocation3 + $0x30] sm:$0xff]  ;;  %v12453_v58 = vld [vmem:[#allocation63_spill] sm:$0xff] }
 0x4e2   : > { %3206 = vst.msk [vmem:[#allocation3 + $0x78] sm:$0xff] %vm1156_vm4, %v3116_v48  ;;  %v3321_v13 = vld [vmem:[#allocation2 + $0x13a] sm:$0xff] }
 0x4e5   : > { %3399 = vrot.lane.b32.xlu1 %v3316_v11, %s7797_s1 }
 0x4e6   : > { %3401 = vrot.lane.b32.xlu2 %v3317_v8, %s7797_s1 }
 0x4e7   : > { %3397 = vrot.lane.b32.xlu0 %v3315_v17, %s7797_s1  ;;  %v3124_v5 = vpop.permute.xlu1 %3123  ;;  %v3955_v36 = vld [vmem:[#allocation3 + $0x90] sm:$0xff] }
 0x4e8   : > { %v3144_v40 = vpop.permute.xlu2 %3143  ;;  %3210 = vst.msk [vmem:[#allocation3 + $0xd8] sm:$0xff] %vm1156_vm4, %v3124_v5  ;;  %4187 = vmatmul.f32.gmra.mxu3 %v3943_v31  ;;  %v4053_v17 = vld [vmem:[#allocation11 + $0xa0] sm:$0xff] }
 0x4e9   : > { %v3122_v43 = vpop.permute.xlu0 %3121  ;;  %3220 = vst.msk [vmem:[#allocation3 + $0x1c8] sm:$0xff] %vm1156_vm4, %v3144_v40  ;;  %v3952_v46 = vld [vmem:[#allocation3 + $0x78] sm:$0xff]  ;;  %4289 = vmatpush.msrb.mxu2 %v4053_v17  ;;  %v3496_v5 = vld [vmem:[#allocation2 + $0x80] sm:$0xff] }
 0x4ea   : > { %3209 = vst.msk [vmem:[#allocation3 + $0xc0] sm:$0xff] %vm1156_vm4, %v3122_v43  ;;  %v12454_v40 = vld [vmem:[#allocation64_spill] sm:$0xff] }
 0x4eb   : > { %v3322_v31 = vld [vmem:[#allocation2 + $0x142] sm:$0xff] }
 0x4ed   : > { %3745 = vrot.lane.b32.xlu1 %v12447_v42, %s7799_s25 }
 0x4ee   : > { %3403 = vrot.lane.b32.xlu2 %v3318_v50, %s7797_s1 }
 0x4ef   : > { %3553 = vrot.lane.b32.xlu0 %v3489_v32, %s7798_s13  ;;  %v3130_v26 = vpop.permute.xlu1 %3129  ;;  %v3964_v50 = vld [vmem:[#allocation3 + $0xd8] sm:$0xff]  ;;  %v4052_v32 = vld [vmem:[#allocation11 + $0x98] sm:$0xff] }
 0x4f0   : > { %v3150_v52 = vpop.permute.xlu2 %3149  ;;  %3213 = vst.msk [vmem:[#allocation3 + $0x120] sm:$0xff] %vm1156_vm4, %v3130_v26  ;;  %4190 = vmatmul.f32.gmra.mxu3 %v3946_v19  ;;  %4290 = vmatpush.msrb.mxu2 %v4052_v32  ;;  %v3323_v26 = vld [vmem:[#allocation2 + $0x152] sm:$0xff] }
 0x4f1   : > { %v3128_v16 = vpop.permute.xlu0 %3127  ;;  %3223 = vst.msk [vmem:[#allocation3 + $0x210] sm:$0xff] %vm1156_vm4, %v3150_v52  ;;  %v3961_v11 = vld [vmem:[#allocation3 + $0xc0] sm:$0xff]  ;;  %v12455_v52 = vld [vmem:[#allocation65_spill] sm:$0xff] }
 0x4f2   : > { %3212 = vst.msk [vmem:[#allocation3 + $0x108] sm:$0xff] %vm1156_vm4, %v3128_v16  ;;  %v3497_v19 = vld [vmem:[#allocation2 + $0x90] sm:$0xff] }
 0x4f5   : > { %3747 = vrot.lane.b32.xlu1 %v12448_v34, %s7799_s25 }
 0x4f6   : > { %3557 = vrot.lane.b32.xlu2 %v3491_v45, %s7798_s13  ;;  %v3967_v45 = vld [vmem:[#allocation3 + $0xf0] sm:$0xff] }
 0x4f7   : > { %3555 = vrot.lane.b32.xlu0 %v3490_v41, %s7798_s13  ;;  %v3136_v53 = vpop.permute.xlu1 %3135  ;;  %v4051_v41 = vld [vmem:[#allocation11 + $0x90] sm:$0xff] }
 0x4f8   : > { %v3156_v23 = vpop.permute.xlu2 %3155  ;;  %3216 = vst.msk [vmem:[#allocation3 + $0x168] sm:$0xff] %vm1156_vm4, %v3136_v53  ;;  %4193 = vmatmul.f32.gmra.mxu3 %v3949_v38  ;;  %4291 = vmatpush.msrb.mxu2 %v4051_v41  ;;  %v3324_v53 = vld [vmem:[#allocation2 + $0x15a] sm:$0xff]  ;;  %v3507_v41 = vld [vmem:[#allocation2 + $0x108] sm:$0xff] }
 0x4f9   : > { %v3134_v39 = vpop.permute.xlu0 %3133  ;;  %3226 = vst.msk [vmem:[#allocation3 + $0x258] sm:$0xff] %vm1156_vm4, %v3156_v23  ;;  %v12456_v23 = vld [vmem:[#allocation66_spill] sm:$0xff]  ;;  %v3498_v38 = vld [vmem:[#allocation2 + $0x98] sm:$0xff] }
 0x4fa   : > { %3215 = vst.msk [vmem:[#allocation3 + $0x150] sm:$0xff] %vm1156_vm4, %v3134_v39 }
 0x4fd   : > { %3405 = vrot.lane.b32.xlu1 %v3319_v30, %s7797_s1  ;;  %v3970_v30 = vld [vmem:[#allocation3 + $0x108] sm:$0xff] }
 0x4fe   : > { %3559 = vrot.lane.b32.xlu2 %v3492_v12, %s7798_s13 }
 0x4ff   : > { %3749 = vrot.lane.b32.xlu0 %v12449_v15, %s7799_s25  ;;  %v3142_v56 = vpop.permute.xlu1 %3141  ;;  %v3500_v15 = vld [vmem:[#allocation2 + $0xb0] sm:$0xff]  ;;  %v3982_v17 = vld [vmem:[#allocation3 + $0x168] sm:$0xff] }
 0x500   : > { %v3162_v55 = vpop.permute.xlu2 %3161  ;;  %3219 = vst.msk [vmem:[#allocation3 + $0x1b0] sm:$0xff] %vm1156_vm4, %v3142_v56  ;;  %4196 = vmatmul.f32.gmra.mxu3 %v3952_v46  ;;  %v12457_v56 = vld [vmem:[#allocation67_spill] sm:$0xff]  ;;  %v4050_v46 = vld [vmem:[#allocation11 + $0x88] sm:$0xff] }
 0x501   : > { %v3140_v18 = vpop.permute.xlu0 %3139  ;;  %3229 = vst.msk [vmem:[#allocation3 + $0x2a0] sm:$0xff] %vm1156_vm4, %v3162_v55  ;;  %v3499_v55 = vld [vmem:[#allocation2 + $0xa8] sm:$0xff]  ;;  %4292 = vmatpush.msrb.mxu2 %v4050_v46 }
 0x502   : > { %3218 = vst.msk [vmem:[#allocation3 + $0x198] sm:$0xff] %vm1156_vm4, %v3140_v18 }
 0x505   : > { %3407 = vrot.lane.b32.xlu1 %v3320_v14, %s7797_s1 }
 0x506   : > { %3561 = vrot.lane.b32.xlu2 %v3493_v47, %s7798_s13  ;;  %v3973_v47 = vld [vmem:[#allocation3 + $0x120] sm:$0xff] }
 0x507   : > { %3751 = vrot.lane.b32.xlu0 %v12450_v1, %s7799_s25  ;;  %v3148_v61 = vpop.permute.xlu1 %3147 }
 0x508   : > { %v3168_v62 = vpop.permute.xlu2 %3167  ;;  %3222 = vst.msk [vmem:[#allocation3 + $0x1f8] sm:$0xff] %vm1156_vm4, %v3148_v61  ;;  %4199 = vmatmul.f32.gmra.mxu3 %v3955_v36  ;;  %v3501_v61 = vld [vmem:[#allocation2 + $0xc0] sm:$0xff] }
 0x509   : > { %v3146_v49 = vpop.permute.xlu0 %3145  ;;  %3232 = vst.msk [vmem:[#allocation3 + $0x2e8] sm:$0xff] %vm1156_vm4, %v3168_v62  ;;  %v12458_v62 = vld [vmem:[#allocation68_spill] sm:$0xff] }
 0x50a   : > { %3221 = vst.msk [vmem:[#allocation3 + $0x1e0] sm:$0xff] %vm1156_vm4, %v3146_v49 }
 0x50d   : > { %3563 = vrot.lane.b32.xlu1 %v3494_v28, %s7798_s13  ;;  %v3976_v28 = vld [vmem:[#allocation3 + $0x138] sm:$0xff] }
 0x50e   : > { %3755 = vrot.lane.b32.xlu2 %v12451_v3, %s7799_s25 }
 0x50f   : > { %3753 = vrot.lane.b32.xlu0 %v12452_v27, %s7799_s25  ;;  %v3154_v2 = vpop.permute.xlu1 %3153  ;;  %v4049_v27 = vld [vmem:[#allocation11 + $0x80] sm:$0xff] }
 0x510   : > { %v3366_v24 = vpop.permute.xlu2 %3365  ;;  %3225 = vst.msk [vmem:[#allocation3 + $0x240] sm:$0xff] %vm1156_vm4, %v3154_v2  ;;  %4202 = vmatmul.f32.gmra.mxu3 %v3958_v35  ;;  %4293 = vmatpush.msrb.mxu2 %v4049_v27  ;;  %v3326_v2 = vld [vmem:[#allocation2 + $0x172] sm:$0xff]  ;;  %v12459_v35 = vld [vmem:[#allocation69_spill] sm:$0xff] }
 0x511   : > { %v3152_v60 = vpop.permute.xlu0 %3151  ;;  %3459 = vst.msk [vmem:[#allocation3 + $0x38] sm:$0xff] %vm770_vm2, %v3366_v24  ;;  %v3502_v24 = vld [vmem:[#allocation2 + $0xc8] sm:$0xff] }
 0x512   : > { %3224 = vst.msk [vmem:[#allocation3 + $0x228] sm:$0xff] %vm1156_vm4, %v3152_v60 }
 0x515   : > { %3565 = vrot.lane.b32.xlu1 %v3495_v22, %s7798_s13  ;;  %v3979_v22 = vld [vmem:[#allocation3 + $0x150] sm:$0xff] }
 0x516   : > { %3757 = vrot.lane.b32.xlu2 %v12453_v58, %s7799_s25 }
 0x517   : > { %3409 = vrot.lane.b32.xlu0 %v3321_v13, %s7797_s1  ;;  %v3160_v48 = vpop.permute.xlu1 %3159  ;;  %v3503_v13 = vld [vmem:[#allocation2 + $0xd8] sm:$0xff] }
 0x518   : > { %v3372_v20 = vpop.permute.xlu2 %3371  ;;  %3228 = vst.msk [vmem:[#allocation3 + $0x288] sm:$0xff] %vm1156_vm4, %v3160_v48  ;;  %4205 = vmatmul.f32.gmra.mxu3 %v3961_v11  ;;  %v12460_v48 = vld [vmem:[#allocation71_spill] sm:$0xff] }
 0x519   : > { %v3158_v8 = vpop.permute.xlu0 %3157  ;;  %3462 = vst.msk [vmem:[#allocation3 + $0x80] sm:$0xff] %vm770_vm2, %v3372_v20  ;;  %v12461_v20 = vld [vmem:[#allocation70_spill] sm:$0xff] }
 0x51a   : > { %3227 = vst.msk [vmem:[#allocation3 + $0x270] sm:$0xff] %vm1156_vm4, %v3158_v8 }
 0x51d   : > { %3567 = vrot.lane.b32.xlu1 %v3496_v5, %s7798_s13 }
 0x51e   : > { %3759 = vrot.lane.b32.xlu2 %v12454_v40, %s7799_s25  ;;  %v3504_v40 = vld [vmem:[#allocation2 + $0xe0] sm:$0xff] }
 0x51f   : > { %3411 = vrot.lane.b32.xlu0 %v3322_v31, %s7797_s1  ;;  %v3166_v43 = vpop.permute.xlu1 %3165  ;;  %v12462_v31 = vld [vmem:[#allocation72_spill] sm:$0xff] }
 0x520   : > { %v3378_v37 = vpop.permute.xlu2 %3377  ;;  %3231 = vst.msk [vmem:[#allocation3 + $0x2d0] sm:$0xff] %vm1156_vm4, %v3166_v43  ;;  %4208 = vmatmul.f32.gmra.mxu3 %v3964_v50  ;;  %v3327_v43 = vld [vmem:[#allocation2 + $0x182] sm:$0xff] }
 0x521   : > { %v3164_v42 = vpop.permute.xlu0 %3163  ;;  %3465 = vst.msk [vmem:[#allocation3 + $0xc8] sm:$0xff] %vm770_vm2, %v3378_v37 }
 0x522   : > { %3230 = vst.msk [vmem:[#allocation3 + $0x2b8] sm:$0xff] %vm1156_vm4, %v3164_v42  ;;  %v3985_v42 = vld [vmem:[#allocation3 + $0x180] sm:$0xff] }
 0x525   : > { %3761 = vrot.lane.b32.xlu1 %v12455_v52, %s7799_s25  ;;  %v12463_v52 = vld [vmem:[#allocation73_spill] sm:$0xff] }
 0x526   : > { %3413 = vrot.lane.b32.xlu2 %v3323_v26, %s7797_s1  ;;  %v3505_v26 = vld [vmem:[#allocation2 + $0xf0] sm:$0xff] }
 0x527   : > { %3569 = vrot.lane.b32.xlu0 %v3497_v19, %s7798_s13  ;;  %v3364_v16 = vpop.permute.xlu1 %3363  ;;  %v3328_v19 = vld [vmem:[#allocation2 + $0x18a] sm:$0xff] }
 0x528   : > { %v3384_v44 = vpop.permute.xlu2 %3383  ;;  %3458 = vst.msk [vmem:[#allocation3 + $0x20] sm:$0xff] %vm770_vm2, %v3364_v16  ;;  %4211 = vmatmul.f32.gmra.mxu3 %v3967_v45  ;;  %v3988_v45 = vld [vmem:[#allocation3 + $0x198] sm:$0xff] }
 0x529   : > { %v3362_v34 = vpop.permute.xlu0 %3361  ;;  %3468 = vst.msk [vmem:[#allocation3 + $0x110] sm:$0xff] %vm770_vm2, %v3384_v44 }
 0x52a   : > { %3457 = vst.msk [vmem:[#allocation3 + $0x8] sm:$0xff] %vm770_vm2, %v3362_v34 }
 0x52d   : > { %3763 = vrot.lane.b32.xlu1 %v12456_v23, %s7799_s25  ;;  %v3506_v23 = vld [vmem:[#allocation2 + $0xf8] sm:$0xff] }
 0x52e   : > { %3415 = vrot.lane.b32.xlu2 %v3324_v53, %s7797_s1  ;;  %v12464_v53 = vld [vmem:[#allocation74_spill] sm:$0xff] }
 0x52f   : > { %3571 = vrot.lane.b32.xlu0 %v3498_v38, %s7798_s13  ;;  %v3370_v39 = vpop.permute.xlu1 %3369 }
 0x530   : > { %v3390_v10 = vpop.permute.xlu2 %3389  ;;  %3461 = vst.msk [vmem:[#allocation3 + $0x68] sm:$0xff] %vm770_vm2, %v3370_v39  ;;  %4214 = vmatmul.f32.gmra.mxu3 %v3970_v30 }
 0x531   : > { %v3368_v12 = vpop.permute.xlu0 %3367  ;;  %3471 = vst.msk [vmem:[#allocation3 + $0x158] sm:$0xff] %vm770_vm2, %v3390_v10  ;;  %v3991_v10 = vld [vmem:[#allocation3 + $0x1b0] sm:$0xff] }
 0x532   : > { %3460 = vst.msk [vmem:[#allocation3 + $0x50] sm:$0xff] %vm770_vm2, %v3368_v12 }
 0x535   : > { %3765 = vrot.lane.b32.xlu1 %v12457_v56, %s7799_s25  ;;  %v3509_v56 = vld [vmem:[#allocation2 + $0x120] sm:$0xff] }
 0x536   : > { %3575 = vrot.lane.b32.xlu2 %v3500_v15, %s7798_s13  ;;  %v3508_v15 = vld [vmem:[#allocation2 + $0x110] sm:$0xff] }
 0x537   : > { %3573 = vrot.lane.b32.xlu0 %v3499_v55, %s7798_s13  ;;  %v3376_v18 = vpop.permute.xlu1 %3375  ;;  %v12465_v55 = vld [vmem:[#allocation76_spill] sm:$0xff] }
 0x538   : > { %v3396_v14 = vpop.permute.xlu2 %3395  ;;  %3464 = vst.msk [vmem:[#allocation3 + $0xb0] sm:$0xff] %vm770_vm2, %v3376_v18  ;;  %4217 = vmatmul.f32.gmra.mxu3 %v3973_v47 }
 0x539   : > { %v3374_v1 = vpop.permute.xlu0 %3373  ;;  %3474 = vst.msk [vmem:[#allocation3 + $0x1a0] sm:$0xff] %vm770_vm2, %v3396_v14  ;;  %v3994_v14 = vld [vmem:[#allocation3 + $0x1c8] sm:$0xff] }
 0x53a   : > { %3463 = vst.msk [vmem:[#allocation3 + $0x98] sm:$0xff] %vm770_vm2, %v3374_v1 }
 0x53d   : > { %3417 = vrot.lane.b32.xlu1 %v3325_v29, %s7797_s1  ;;  %v3510_v29 = vld [vmem:[#allocation2 + $0x128] sm:$0xff] }
 0x53e   : > { %3577 = vrot.lane.b32.xlu2 %v3501_v61, %s7798_s13  ;;  %v3511_v61 = vld [vmem:[#allocation2 + $0x138] sm:$0xff] }
 0x53f   : > { %3767 = vrot.lane.b32.xlu0 %v12458_v62, %s7799_s25  ;;  %v3382_v36 = vpop.permute.xlu1 %3381  ;;  %v12466_v62 = vld [vmem:[#allocation77_spill] sm:$0xff] }
 0x540   : > { %v3402_v49 = vpop.permute.xlu2 %3401  ;;  %3467 = vst.msk [vmem:[#allocation3 + $0xf8] sm:$0xff] %vm770_vm2, %v3382_v36  ;;  %4220 = vmatmul.f32.gmra.mxu3 %v3976_v28  ;;  %v3997_v28 = vld [vmem:[#allocation3 + $0x1e0] sm:$0xff] }
 0x541   : > { %v3380_v3 = vpop.permute.xlu0 %3379  ;;  %3477 = vst.msk [vmem:[#allocation3 + $0x1e8] sm:$0xff] %vm770_vm2, %v3402_v49 }
 0x542   : > { %3466 = vst.msk [vmem:[#allocation3 + $0xe0] sm:$0xff] %vm770_vm2, %v3380_v3 }
 0x545   : > { %3419 = vrot.lane.b32.xlu1 %v3326_v2, %s7797_s1  ;;  %v3512_v2 = vld [vmem:[#allocation2 + $0x140] sm:$0xff] }
 0x546   : > { %3579 = vrot.lane.b32.xlu2 %v3502_v24, %s7798_s13  ;;  %v12467_v24 = vld [vmem:[#allocation81_spill] sm:$0xff] }
 0x547   : > { %3769 = vrot.lane.b32.xlu0 %v12459_v35, %s7799_s25  ;;  %v3388_v60 = vpop.permute.xlu1 %3387  ;;  %v12468_v35 = vld [vmem:[#allocation79_spill] sm:$0xff] }
 0x548   : > { %v3404_v59 = vpop.permute.xlu2 %3403  ;;  %3470 = vst.msk [vmem:[#allocation3 + $0x140] sm:$0xff] %vm770_vm2, %v3388_v60  ;;  %4223 = vmatmul.f32.gmra.mxu3 %v3979_v22  ;;  %v4000_v22 = vld [vmem:[#allocation3 + $0x1f8] sm:$0xff] }
 0x549   : > { %v3386_v58 = vpop.permute.xlu0 %3385  ;;  %3478 = vst.msk [vmem:[#allocation3 + $0x200] sm:$0xff] %vm770_vm2, %v3404_v59 }
 0x54a   : > { %3469 = vst.msk [vmem:[#allocation3 + $0x128] sm:$0xff] %vm770_vm2, %v3386_v58 }
 0x54d   : > { %3581 = vrot.lane.b32.xlu1 %v3503_v13, %s7798_s13 }
 0x54e   : > { %3773 = vrot.lane.b32.xlu2 %v12460_v48, %s7799_s25  ;;  %v3514_v48 = vld [vmem:[#allocation2 + $0x158] sm:$0xff] }
 0x54f   : > { %3771 = vrot.lane.b32.xlu0 %v12461_v20, %s7799_s25  ;;  %v3394_v11 = vpop.permute.xlu1 %3393  ;;  %v3513_v20 = vld [vmem:[#allocation2 + $0x150] sm:$0xff] }
 0x550   : > { %v3558_v8 = vpop.permute.xlu2 %3557  ;;  %3473 = vst.msk [vmem:[#allocation3 + $0x188] sm:$0xff] %vm770_vm2, %v3394_v11  ;;  %4226 = vmatmul.f32.gmra.mxu3 %v3982_v17  ;;  %v4003_v17 = vld [vmem:[#allocation3 + $0x210] sm:$0xff] }
 0x551   : > { %v3392_v5 = vpop.permute.xlu0 %3391  ;;  %3651 = vst.msk [vmem:[#allocation3 + $0x38] sm:$0xff] %vm963_vm3, %v3558_v8 }
 0x552   : > { %3472 = vst.msk [vmem:[#allocation3 + $0x170] sm:$0xff] %vm770_vm2, %v3392_v5 }
 0x555   : > { %3583 = vrot.lane.b32.xlu1 %v3504_v40, %s7798_s13 }
 0x556   : > { %3775 = vrot.lane.b32.xlu2 %v12462_v31, %s7799_s25 }
 0x557   : > { %3421 = vrot.lane.b32.xlu0 %v3327_v43, %s7797_s1  ;;  %v3400_v37 = vpop.permute.xlu1 %3399  ;;  %v12469_v43 = vld [vmem:[#allocation84_spill] sm:$0xff] }
 0x558   : > { %v3560_v50 = vpop.permute.xlu2 %3559  ;;  %3476 = vst.msk [vmem:[#allocation3 + $0x1d0] sm:$0xff] %vm770_vm2, %v3400_v37  ;;  %4229 = vmatmul.f32.gmra.mxu3 %v3985_v42  ;;  %v3515_v37 = vld [vmem:[#allocation2 + $0x168] sm:$0xff] }
 0x559   : > { %v3398_v32 = vpop.permute.xlu0 %3397  ;;  %3652 = vst.msk [vmem:[#allocation3 + $0x50] sm:$0xff] %vm963_vm3, %v3560_v50 }
 0x55a   : > { %3475 = vst.msk [vmem:[#allocation3 + $0x1b8] sm:$0xff] %vm770_vm2, %v3398_v32  ;;  %v4006_v32 = vld [vmem:[#allocation3 + $0x228] sm:$0xff] }
 0x55b   : > { %v10194_v40 = vpop.f32.mrf.mxu3 }
 0x55d   : > { %3585 = vrot.lane.b32.xlu1 %v3505_v26, %s7798_s13 }
 0x55e   : > { %3777 = vrot.lane.b32.xlu2 %v12463_v52, %s7799_s25 }
 0x55f   : > { %3423 = vrot.lane.b32.xlu0 %v3328_v19, %s7797_s1  ;;  %v3746_v16 = vpop.permute.xlu1 %3745  ;;  %s7805_s1 = smov 124  }
 0x560   : > { %v3562_v44 = vpop.permute.xlu2 %3561  ;;  %4232 = vmatmul.f32.gmra.mxu3 %v3988_v45 }
 0x561   : > { %3653 = vst.msk [vmem:[#allocation3 + $0x68] sm:$0xff] %vm963_vm3, %v3562_v44  ;;  %v3554_v34 = vpop.permute.xlu0 %3553  ;;  %v3517_v44 = vld [vmem:[#allocation2 + $0x180] sm:$0xff] }
 0x562   : > { %3649 = vst.msk [vmem:[#allocation3 + $0x8] sm:$0xff] %vm963_vm3, %v3554_v34 }
 0x563   : > { %3841 = vst.msk [vmem:[#allocation3 + $0x8] sm:$0xff] %vm1156_vm4, %v3746_v16  ;;  %v10206_v19 = vpop.f32.mrf.mxu3  ;;  %v3518_v16 = vld [vmem:[#allocation2 + $0x188] sm:$0xff] }
 0x565   : > { %3779 = vrot.lane.b32.xlu1 %v12464_v53, %s7799_s25 }
 0x566   : > { %3589 = vrot.lane.b32.xlu2 %v3507_v41, %s7798_s13  ;;  %v4009_v41 = vld [vmem:[#allocation3 + $0x240] sm:$0xff] }
 0x567   : > { %3587 = vrot.lane.b32.xlu0 %v3506_v23, %s7798_s13  ;;  %v3748_v38 = vpop.permute.xlu1 %3747 }
 0x568   : > { %v3756_v39 = vpop.permute.xlu2 %3755  ;;  %4235 = vmatmul.f32.gmra.mxu3 %v3991_v10 }
 0x569   : > { %v3556_v30 = vpop.permute.xlu0 %3555 }
 0x56a   : > { %3650 = vst.msk [vmem:[#allocation3 + $0x20] sm:$0xff] %vm963_vm3, %v3556_v30  ;;  %v3938_v12 = vld [vmem:[#allocation3 + $0x8] sm:$0xff] }
 0x56b   : > { %3842 = vst.msk [vmem:[#allocation3 + $0x20] sm:$0xff] %vm1156_vm4, %v3748_v38  ;;  %4294 = vmatmul.f32.vlgmr.msrb.gmra.mxu2 %v3938_v12  ;;  %v3520_v38 = vld [vmem:[#allocation2 + $0x1a0] sm:$0xff]  ;;  %v4012_v12 = vld [vmem:[#allocation3 + $0x258] sm:$0xff] }
 0x56d   : > { %3591 = vrot.lane.b32.xlu1 %v3508_v15, %s7798_s13 }
 0x56e   : > { %3593 = vrot.lane.b32.xlu2 %v3509_v56, %s7798_s13 }
 0x56f   : > { %3781 = vrot.lane.b32.xlu0 %v12465_v55, %s7799_s25  ;;  %v3406_v46 = vpop.permute.xlu1 %3405 }
 0x570   : > { %v3758_v18 = vpop.permute.xlu2 %3757  ;;  %3479 = vst.msk [vmem:[#allocation3 + $0x218] sm:$0xff] %vm770_vm2, %v3406_v46  ;;  %4238 = vmatmul.f32.gmra.mxu3 %v3994_v14  ;;  %v4015_v46 = vld [vmem:[#allocation3 + $0x270] sm:$0xff] }
 0x571   : > { %v3750_v47 = vpop.permute.xlu0 %3749 }
 0x572   : > { %3843 = vst.msk [vmem:[#allocation3 + $0x38] sm:$0xff] %vm1156_vm4, %v3750_v47  ;;  %v3941_v1 = vld [vmem:[#allocation3 + $0x20] sm:$0xff] }
 0x573   : > { %4297 = vmatmul.f32.gmra.mxu2 %v3941_v1  ;;  %v4018_v1 = vld [vmem:[#allocation3 + $0x288] sm:$0xff] }
 0x575   : > { %3595 = vrot.lane.b32.xlu1 %v3510_v29, %s7798_s13 }
 0x576   : > { %3597 = vrot.lane.b32.xlu2 %v3511_v61, %s7798_s13 }
 0x577   : > { %3783 = vrot.lane.b32.xlu0 %v12466_v62, %s7799_s25  ;;  %v3408_v36 = vpop.permute.xlu1 %3407 }
 0x578   : > { %v3760_v49 = vpop.permute.xlu2 %3759  ;;  %3480 = vst.msk [vmem:[#allocation3 + $0x230] sm:$0xff] %vm770_vm2, %v3408_v36  ;;  %4241 = vmatmul.f32.gmra.mxu3 %v3997_v28 }
 0x579   : > { %v3752_v3 = vpop.permute.xlu0 %3751  ;;  %v3944_v27 = vld [vmem:[#allocation3 + $0x38] sm:$0xff] }
 0x57a   : > { %3844 = vst.msk [vmem:[#allocation3 + $0x50] sm:$0xff] %vm1156_vm4, %v3752_v3  ;;  %v3711_v3 = vld [vmem:[#allocation2 + $0x199] sm:$0xff] }
 0x57b   : > { %4300 = vmatmul.f32.gmra.mxu2 %v3944_v27 }
 0x57d   : > { %3599 = vrot.lane.b32.xlu1 %v3512_v2, %s7798_s13 }
 0x57e   : > { %3787 = vrot.lane.b32.xlu2 %v12467_v24, %s7799_s25 }
 0x57f   : > { %3785 = vrot.lane.b32.xlu0 %v12468_v35, %s7799_s25  ;;  %v3564_v60 = vpop.permute.xlu1 %3563  ;;  %v4024_v35 = vld [vmem:[#allocation3 + $0x2b8] sm:$0xff] }
 0x580   : > { %v3414_v59 = vpop.permute.xlu2 %3413  ;;  %3654 = vst.msk [vmem:[#allocation3 + $0x80] sm:$0xff] %vm963_vm3, %v3564_v60  ;;  %4244 = vmatmul.f32.gmra.mxu3 %v4000_v22 }
 0x581   : > { %v3754_v58 = vpop.permute.xlu0 %3753  ;;  %v3947_v13 = vld [vmem:[#allocation3 + $0x50] sm:$0xff]  ;;  %3846 = vst.msk [vmem:[#allocation3 + $0x80] sm:$0xff] %vm1156_vm4, %v3756_v39  ;;  %v10218_v39 = vpop.f32.mrf.mxu3 }
 0x582   : > { %3483 = vst.msk [vmem:[#allocation3 + $0x278] sm:$0xff] %vm770_vm2, %v3414_v59 }
 0x583   : > { %4303 = vmatmul.f32.gmra.mxu2 %v3947_v13  ;;  %3845 = vst.msk [vmem:[#allocation3 + $0x68] sm:$0xff] %vm1156_vm4, %v3754_v58 }
 0x585   : > { %3603 = vrot.lane.b32.xlu1 %v3514_v48, %s7798_s13  ;;  %v4027_v48 = vld [vmem:[#allocation3 + $0x2d0] sm:$0xff] }
 0x586   : > { %3789 = vrot.lane.b32.xlu2 %v9714_v6, %s7799_s25  ;;  %v3516_v6 = vld [vmem:[#allocation2 + $0x170] sm:$0xff] }
 0x587   : > { %3601 = vrot.lane.b32.xlu0 %v3513_v20, %s7798_s13  ;;  %v3566_v11 = vpop.permute.xlu1 %3565 }
 0x588   : > { %v3416_v8 = vpop.permute.xlu2 %3415  ;;  %3655 = vst.msk [vmem:[#allocation3 + $0x98] sm:$0xff] %vm963_vm3, %v3566_v11  ;;  %4247 = vmatmul.f32.gmra.mxu3 %v4003_v17  ;;  %v3953_v52 = vld [vmem:[#allocation3 + $0x80] sm:$0xff] }
 0x589   : > { %v3410_v5 = vpop.permute.xlu0 %3409  ;;  %3847 = vst.msk [vmem:[#allocation3 + $0x98] sm:$0xff] %vm1156_vm4, %v3758_v18  ;;  %v10230_v18 = vpop.f32.mrf.mxu3 }
 0x58a   : > { %3484 = vst.msk [vmem:[#allocation3 + $0x290] sm:$0xff] %vm770_vm2, %v3416_v8  ;;  %v3950_v31 = vld [vmem:[#allocation3 + $0x68] sm:$0xff] }
 0x58b   : > { %3481 = vst.msk [vmem:[#allocation3 + $0x248] sm:$0xff] %vm770_vm2, %v3410_v5  ;;  %4306 = vmatmul.f32.gmra.mxu2 %v3950_v31  ;;  %v4030_v5 = vld [vmem:[#allocation3 + $0x2e8] sm:$0xff] }
 0x58d   : > { %3607 = vrot.lane.b32.xlu1 %v3516_v6, %s7798_s13 }
 0x58e   : > { %3791 = vrot.lane.b32.xlu2 %v12469_v43, %s7799_s25 }
 0x58f   : > { %3605 = vrot.lane.b32.xlu0 %v3515_v37, %s7798_s13  ;;  %v3568_v50 = vpop.permute.xlu1 %3567 }
 0x590   : > { %v3576_v42 = vpop.permute.xlu2 %3575  ;;  %3656 = vst.msk [vmem:[#allocation3 + $0xb0] sm:$0xff] %vm963_vm3, %v3568_v50  ;;  %4250 = vmatmul.f32.gmra.mxu3 %v4006_v32  ;;  %v3956_v23 = vld [vmem:[#allocation3 + $0x98] sm:$0xff] }
 0x591   : > { %v3412_v26 = vpop.permute.xlu0 %3411  ;;  %3848 = vst.msk [vmem:[#allocation3 + $0xb0] sm:$0xff] %vm1156_vm4, %v3760_v49  ;;  %v10238_v29 = vpop.f32.mrf.mxu3  ;;  %v4021_v49 = vld [vmem:[#allocation3 + $0x2a0] sm:$0xff] }
 0x592   : > { %3660 = vst.msk [vmem:[#allocation3 + $0x110] sm:$0xff] %vm963_vm3, %v3576_v42 }
 0x593   : > { %3482 = vst.msk [vmem:[#allocation3 + $0x260] sm:$0xff] %vm770_vm2, %v3412_v26  ;;  %4309 = vmatmul.f32.gmra.mxu2 %v3953_v52 }
 0x595   : > { %3793 = vrot.lane.b32.xlu1 %v9756_v7, %s7799_s25  ;;  %v3519_v7 = vld [vmem:[#allocation2 + $0x198] sm:$0xff] }
 0x596   : > { %3611 = vrot.lane.b32.xlu2 %v3518_v16, %s7798_s13 }
 0x597   : > { %3609 = vrot.lane.b32.xlu0 %v3517_v44, %s7798_s13  ;;  %v3762_v45 = vpop.permute.xlu1 %3761 }
 0x598   : > { %v3578_v34 = vpop.permute.xlu2 %3577  ;;  %4253 = vmatmul.f32.gmra.mxu3 %v4009_v41  ;;  %v3959_v56 = vld [vmem:[#allocation3 + $0xb0] sm:$0xff] }
 0x599   : > { %3661 = vst.msk [vmem:[#allocation3 + $0x128] sm:$0xff] %vm963_vm3, %v3578_v34  ;;  %v3570_v53 = vpop.permute.xlu0 %3569  ;;  %v10242_v27 = vpop.f32.mrf.mxu3 }
 0x59a   : > { %3657 = vst.msk [vmem:[#allocation3 + $0xc8] sm:$0xff] %vm963_vm3, %v3570_v53 }
 0x59b   : > { %3849 = vst.msk [vmem:[#allocation3 + $0xc8] sm:$0xff] %vm1156_vm4, %v3762_v45  ;;  %4312 = vmatmul.f32.gmra.mxu2 %v3956_v23  ;;  %v3712_v45 = vld [vmem:[#allocation2 + $0x1a1] sm:$0xff] }
 0x59d   : > { %3795 = vrot.lane.b32.xlu1 %v9793_v33, %s7799_s25 }
 0x59e   : > { %3615 = vrot.lane.b32.xlu2 %v3520_v38, %s7798_s13 }
 0x59f   : > { %3613 = vrot.lane.b32.xlu0 %v3519_v7, %s7798_s13  ;;  %v3764_v10 = vpop.permute.xlu1 %3763  ;;  %s11164_s13 = sld [smem:[#allocation15 + $0x10]] }
 0x5a0   : > { %v3580_v30 = vpop.permute.xlu2 %3579  ;;  %4256 = vmatmul.f32.gmra.mxu3 %v4012_v12 }
 0x5a1   : > { %3662 = vst.msk [vmem:[#allocation3 + $0x140] sm:$0xff] %vm963_vm3, %v3580_v30  ;;  %v3572_v15 = vpop.permute.xlu0 %3571  ;;  %v10249_v22 = vpop.f32.mrf.mxu3 }
 0x5a2   : > { %3658 = vst.msk [vmem:[#allocation3 + $0xe0] sm:$0xff] %vm963_vm3, %v3572_v15  ;;  %v3962_v47 = vld [vmem:[#allocation3 + $0xc8] sm:$0xff]  ;;  %v10272_v30 = vpop.f32.mrf.mxu0 }
 0x5a3   : > { %3850 = vst.msk [vmem:[#allocation3 + $0xe0] sm:$0xff] %vm1156_vm4, %v3764_v10  ;;  %4315 = vmatmul.f32.gmra.mxu2 %v3959_v56 }
 0x5a5   : > { %3799 = vrot.lane.b32.xlu1 %v9841_v54, %s7799_s25 }
 0x5a6   : > { %3801 = vrot.lane.b32.xlu2 %v9851_v21, %s7799_s25 }
 0x5a7   : > { %3797 = vrot.lane.b32.xlu0 %v9809_v9, %s7799_s25  ;;  %v3766_v33 = vpop.permute.xlu1 %3765 }
 0x5a8   : > { %v3774_v55 = vpop.permute.xlu2 %3773  ;;  %4259 = vmatmul.f32.gmra.mxu3 %v4015_v46 }
 0x5a9   : > { %v3574_v14 = vpop.permute.xlu0 %3573  ;;  %v10255_v31 = vpop.f32.mrf.mxu3 }
 0x5aa   : > { %3659 = vst.msk [vmem:[#allocation3 + $0xf8] sm:$0xff] %vm963_vm3, %v3574_v14  ;;  %v3965_v61 = vld [vmem:[#allocation3 + $0xe0] sm:$0xff] }
 0x5ab   : > { %3851 = vst.msk [vmem:[#allocation3 + $0xf8] sm:$0xff] %vm1156_vm4, %v3766_v33  ;;  %4318 = vmatmul.f32.gmra.mxu2 %v3962_v47  ;;  %v10284_v47 = vpop.f32.mrf.mxu0 }
 0x5ad   : > { %3805 = vrot.lane.b32.xlu1 %v3711_v3, %s7799_s25 }
 0x5ae   : > { %3807 = vrot.lane.b32.xlu2 %v3712_v45, %s7799_s25 }
 0x5af   : > { %3803 = vrot.lane.b32.xlu0 %v9875_v0, %s7799_s25  ;;  %v3418_v54 = vpop.permute.xlu1 %3417  ;;  %s7806_s25 = smov 122  }
 0x5b0   : > { %v3776_v21 = vpop.permute.xlu2 %3775  ;;  %3485 = vst.msk [vmem:[#allocation3 + $0x2a8] sm:$0xff] %vm770_vm2, %v3418_v54  ;;  %4262 = vmatmul.f32.gmra.mxu3 %v4018_v1 }
 0x5b1   : > { %v3768_v9 = vpop.permute.xlu0 %3767  ;;  %v10280_v33 = vpop.f32.mrf.mxu3 }
 0x5b2   : > { %3852 = vst.msk [vmem:[#allocation3 + $0x110] sm:$0xff] %vm1156_vm4, %v3768_v9  ;;  %v3968_v0 = vld [vmem:[#allocation3 + $0xf8] sm:$0xff] }
 0x5b3   : > { %4321 = vmatmul.f32.gmra.mxu2 %v3965_v61 }
 0x5b7   : > { %v3420_v62 = vpop.permute.xlu1 %3419 }
 0x5b8   : > { %v3778_v36 = vpop.permute.xlu2 %3777  ;;  %3486 = vst.msk [vmem:[#allocation3 + $0x2c0] sm:$0xff] %vm770_vm2, %v3420_v62  ;;  %4265 = vmatmul.f32.gmra.mxu3 %v4021_v49 }
 0x5b9   : > { %v3770_v28 = vpop.permute.xlu0 %3769  ;;  %v3971_v59 = vld [vmem:[#allocation3 + $0x110] sm:$0xff]  ;;  %v10290_v61 = vpop.f32.mrf.mxu3 }
 0x5ba   : > { %3853 = vst.msk [vmem:[#allocation3 + $0x128] sm:$0xff] %vm1156_vm4, %v3770_v28 }
 0x5bb   : > { %4324 = vmatmul.f32.gmra.mxu2 %v3968_v0 }
 0x5bf   : > { %v3582_v2 = vpop.permute.xlu1 %3581 }
 0x5c0   : > { %v3590_v24 = vpop.permute.xlu2 %3589  ;;  %3663 = vst.msk [vmem:[#allocation3 + $0x158] sm:$0xff] %vm963_vm3, %v3582_v2  ;;  %4268 = vmatmul.f32.gmra.mxu3 %v4024_v35 }
 0x5c1   : > { %v3772_v60 = vpop.permute.xlu0 %3771  ;;  %3855 = vst.msk [vmem:[#allocation3 + $0x158] sm:$0xff] %vm1156_vm4, %v3774_v55  ;;  %v3974_v11 = vld [vmem:[#allocation3 + $0x128] sm:$0xff] }
 0x5c2   : > { %3667 = vst.msk [vmem:[#allocation3 + $0x1b8] sm:$0xff] %vm963_vm3, %v3590_v24  ;;  %v10300_v24 = vpop.f32.mrf.mxu3 }
 0x5c3   : > { %3854 = vst.msk [vmem:[#allocation3 + $0x140] sm:$0xff] %vm1156_vm4, %v3772_v60  ;;  %4327 = vmatmul.f32.gmra.mxu2 %v3971_v59 }
 0x5c7   : > { %v3584_v58 = vpop.permute.xlu1 %3583 }
 0x5c8   : > { %v3594_v13 = vpop.permute.xlu2 %3593  ;;  %3664 = vst.msk [vmem:[#allocation3 + $0x170] sm:$0xff] %vm963_vm3, %v3584_v58  ;;  %4271 = vmatmul.f32.gmra.mxu3 %v4027_v48  ;;  %v3980_v32 = vld [vmem:[#allocation3 + $0x158] sm:$0xff] }
 0x5c9   : > { %v3422_v20 = vpop.permute.xlu0 %3421  ;;  %3856 = vst.msk [vmem:[#allocation3 + $0x170] sm:$0xff] %vm1156_vm4, %v3776_v21 }
 0x5ca   : > { %3669 = vst.msk [vmem:[#allocation3 + $0x1e8] sm:$0xff] %vm963_vm3, %v3594_v13  ;;  %v3977_v43 = vld [vmem:[#allocation3 + $0x140] sm:$0xff]  ;;  %v10308_v48 = vpop.f32.mrf.mxu3 }
 0x5cb   : > { %3487 = vst.msk [vmem:[#allocation3 + $0x2d8] sm:$0xff] %vm770_vm2, %v3422_v20  ;;  %4330 = vmatmul.f32.gmra.mxu2 %v3974_v11 }
 0x5cf   : > { %v3586_v8 = vpop.permute.xlu1 %3585 }
 0x5d0   : > { %v3598_v17 = vpop.permute.xlu2 %3597  ;;  %3665 = vst.msk [vmem:[#allocation3 + $0x188] sm:$0xff] %vm963_vm3, %v3586_v8  ;;  %4274 = vmatmul.f32.gmra.mxu3 %v4030_v5  ;;  %v3983_v44 = vld [vmem:[#allocation3 + $0x170] sm:$0xff] }
 0x5d1   : > { %v3424_v6 = vpop.permute.xlu0 %3423  ;;  %3857 = vst.msk [vmem:[#allocation3 + $0x188] sm:$0xff] %vm1156_vm4, %v3778_v36  ;;  %v10293_v36 = vpop.f32.mrf.mxu0 }
 0x5d2   : > { %3671 = vst.msk [vmem:[#allocation3 + $0x218] sm:$0xff] %vm963_vm3, %v3598_v17 }
 0x5d3   : > { %3488 = vst.msk [vmem:[#allocation3 + $0x2f0] sm:$0xff] %vm770_vm2, %v3424_v6  ;;  %4333 = vmatmul.f32.gmra.mxu2 %v3977_v43  ;;  %v10318_v43 = vpop.f32.mrf.mxu3  ;;  %vm5061_vm2 = vcmask 1044484  }
 0x5d7   : > { %v3780_v37 = vpop.permute.xlu1 %3779 }
 0x5d8   : > { %v3788_v50 = vpop.permute.xlu2 %3787  ;;  %v3986_v23 = vld [vmem:[#allocation3 + $0x188] sm:$0xff] }
 0x5d9   : > { %v3588_v42 = vpop.permute.xlu0 %3587  ;;  %v10302_v35 = vpop.f32.mrf.mxu0 }
 0x5da   : > { %3666 = vst.msk [vmem:[#allocation3 + $0x1a0] sm:$0xff] %vm963_vm3, %v3588_v42 }
 0x5db   : > { %3858 = vst.msk [vmem:[#allocation3 + $0x1a0] sm:$0xff] %vm1156_vm4, %v3780_v37  ;;  %4336 = vmatmul.f32.gmra.mxu2 %v3980_v32 }
 0x5df   : > { %v3592_v26 = vpop.permute.xlu1 %3591 }
 0x5e0   : > { %v3790_v52 = vpop.permute.xlu2 %3789  ;;  %3668 = vst.msk [vmem:[#allocation3 + $0x1d0] sm:$0xff] %vm963_vm3, %v3592_v26  ;;  %v10325_v26 = vpop.f32.mrf.mxu3 }
 0x5e1   : > { %v3782_v16 = vpop.permute.xlu0 %3781  ;;  %3863 = vst.msk [vmem:[#allocation3 + $0x218] sm:$0xff] %vm1156_vm4, %v3790_v52  ;;  %v10312_v8 = vpop.f32.mrf.mxu0 }
 0x5e2   : > { %3859 = vst.msk [vmem:[#allocation3 + $0x1b8] sm:$0xff] %vm1156_vm4, %v3782_v16  ;;  %v3989_v15 = vld [vmem:[#allocation3 + $0x1a0] sm:$0xff] }
 0x5e3   : > { %4339 = vmatmul.f32.gmra.mxu2 %v3983_v44 }
 0x5e7   : > { %v3596_v34 = vpop.permute.xlu1 %3595 }
 0x5e8   : > { %v3792_v41 = vpop.permute.xlu2 %3791  ;;  %3670 = vst.msk [vmem:[#allocation3 + $0x200] sm:$0xff] %vm963_vm3, %v3596_v34  ;;  %v4004_v5 = vld [vmem:[#allocation3 + $0x218] sm:$0xff]  ;;  %v10331_v34 = vpop.f32.mrf.mxu3 }
 0x5e9   : > { %v3784_v53 = vpop.permute.xlu0 %3783  ;;  %3862 = vst.msk [vmem:[#allocation3 + $0x200] sm:$0xff] %vm1156_vm4, %v3788_v50  ;;  %v3992_v54 = vld [vmem:[#allocation3 + $0x1b8] sm:$0xff]  ;;  %v10321_v50 = vpop.f32.mrf.mxu0 }
 0x5ea   : > { %3860 = vst.msk [vmem:[#allocation3 + $0x1d0] sm:$0xff] %vm1156_vm4, %v3784_v53 }
 0x5eb   : > { %4342 = vmatmul.f32.gmra.mxu2 %v3986_v23 }
 0x5ee   : > { %v10270_v38 = vpop.f32.mrf.mxu2 }
 0x5ef   : > { %v3600_v7 = vpop.permute.xlu1 %3599 }
 0x5f0   : > { %v3612_v10 = vpop.permute.xlu2 %3611  ;;  %3672 = vst.msk [vmem:[#allocation3 + $0x230] sm:$0xff] %vm963_vm3, %v3600_v7  ;;  %v4001_v13 = vld [vmem:[#allocation3 + $0x200] sm:$0xff] }
 0x5f1   : > { %v3786_v12 = vpop.permute.xlu0 %3785  ;;  %3864 = vst.msk [vmem:[#allocation3 + $0x230] sm:$0xff] %vm1156_vm4, %v3792_v41  ;;  %v3995_v62 = vld [vmem:[#allocation3 + $0x1d0] sm:$0xff]  ;;  %v10327_v16 = vpop.f32.mrf.mxu0 }
 0x5f2   : > { %3678 = vst.msk [vmem:[#allocation3 + $0x2c0] sm:$0xff] %vm963_vm3, %v3612_v10  ;;  %v10338_v10 = vpop.f32.mrf.mxu3 }
 0x5f3   : > { %3861 = vst.msk [vmem:[#allocation3 + $0x1e8] sm:$0xff] %vm1156_vm4, %v3786_v12  ;;  %4345 = vmatmul.f32.gmra.mxu2 %v3989_v15 }
 0x5f6   : > { %v10278_v56 = vpop.f32.mrf.mxu2 }
 0x5f7   : > { %v3604_v55 = vpop.permute.xlu1 %3603 }
 0x5f8   : > { %3674 = vst.msk [vmem:[#allocation3 + $0x260] sm:$0xff] %vm963_vm3, %v3604_v55  ;;  %v3616_v46 = vpop.permute.xlu2 %3615  ;;  %v4007_v42 = vld [vmem:[#allocation3 + $0x230] sm:$0xff] }
 0x5f9   : > { %v3602_v14 = vpop.permute.xlu0 %3601  ;;  %3680 = vst.msk [vmem:[#allocation3 + $0x2f0] sm:$0xff] %vm963_vm3, %v3616_v46  ;;  %v10333_v41 = vpop.f32.mrf.mxu0 }
 0x5fa   : > { %3673 = vst.msk [vmem:[#allocation3 + $0x248] sm:$0xff] %vm963_vm3, %v3602_v14  ;;  %v3998_v2 = vld [vmem:[#allocation3 + $0x1e8] sm:$0xff] }
 0x5fb   : > { %4348 = vmatmul.f32.gmra.mxu2 %v3992_v54  ;;  %v10347_v54 = vpop.f32.mrf.mxu3 }
 0x5fe   : > { %v10287_v21 = vpop.f32.mrf.mxu2 }
 0x5ff   : > { %v3608_v1 = vpop.permute.xlu1 %3607 }
 0x600   : > { %3676 = vst.msk [vmem:[#allocation3 + $0x290] sm:$0xff] %vm963_vm3, %v3608_v1  ;;  %v3802_v3 = vpop.permute.xlu2 %3801  ;;  %v4029_v1 = vld [vmem:[#allocation3 + $0x2e0] sm:$0xff] }
 0x601   : > { %v3606_v9 = vpop.permute.xlu0 %3605  ;;  %v10342_v55 = vpop.f32.mrf.mxu0  ;;  %7219 = vmatmul.msk.f32.gmra.mxu0 %vm417_vm0, %v4029_v1  ;;  %v10380_v1 = vld [vmem:[%s12266_s5] sm:$0x3] }
 0x602   : > { %3675 = vst.msk [vmem:[#allocation3 + $0x278] sm:$0xff] %vm963_vm3, %v3606_v9  ;;  %v4032_v9 = vld [vmem:[#allocation3 + $0x2f8] sm:$0xff]  ;;  %7223 = vmatpush.msk.msra.mxu1 %vm4775_vm5, %v10380_v1 }
 0x603   : > { %4351 = vmatmul.f32.gmra.mxu2 %v3995_v62  ;;  %7220 = vmatmul.msk.f32.vlgmr.msra.gmra.mxu3 %vm417_vm0, %v4032_v9  ;;  %12476 = vst [vmem:[#allocation58_spill] sm:$0xff] %v10380_v1 }
 0x606   : > { %v10295_v49 = vpop.f32.mrf.mxu2 }
 0x607   : > { %v3794_v28 = vpop.permute.xlu1 %3793 }
 0x608   : > { %3865 = vst.msk [vmem:[#allocation3 + $0x248] sm:$0xff] %vm1156_vm4, %v3794_v28  ;;  %v3808_v15 = vpop.permute.xlu2 %3807 }
 0x609   : > { %v3610_v0 = vpop.permute.xlu0 %3609  ;;  %3872 = vst.msk [vmem:[#allocation3 + $0x2f0] sm:$0xff] %vm1156_vm4, %v3808_v15  ;;  %v10351_v62 = vpop.f32.mrf.mxu0 }
 0x60a   : > { %3677 = vst.msk [vmem:[#allocation3 + $0x2a8] sm:$0xff] %vm963_vm3, %v3610_v0 }
 0x60b   : > { %3869 = vst.msk [vmem:[#allocation3 + $0x2a8] sm:$0xff] %vm1156_vm4, %v3802_v3  ;;  %4354 = vmatmul.f32.gmra.mxu2 %v3998_v2  ;;  %v10355_v3 = vpop.f32.mrf.mxu3 }
 0x60e   : > { %v10304_v60 = vpop.f32.mrf.mxu2 }
 0x60f   : > { %v3796_v59 = vpop.permute.xlu1 %3795  ;;  %v4010_v52 = vld [vmem:[#allocation3 + $0x248] sm:$0xff] }
 0x610   : > { %3866 = vst.msk [vmem:[#allocation3 + $0x260] sm:$0xff] %vm1156_vm4, %v3796_v59 }
 0x611   : > { %v3614_v58 = vpop.permute.xlu0 %3613  ;;  %v10357_v59 = vpop.f32.mrf.mxu0 }
 0x612   : > { %3679 = vst.msk [vmem:[#allocation3 + $0x2d8] sm:$0xff] %vm963_vm3, %v3614_v58  ;;  %v4022_v28 = vld [vmem:[#allocation3 + $0x2a8] sm:$0xff]  ;;  %vm5063_vm3 = vcmask 1045509  }
 0x613   : > { %4357 = vmatmul.f32.gmra.mxu2 %v4001_v13  ;;  %12470 = vst [vmem:[#allocation78_spill] sm:$0xff] %v10357_v59 }
 0x616   : > { %v10310_v20 = vpop.f32.mrf.mxu2 }
 0x617   : > { %v3800_v11 = vpop.permute.xlu1 %3799  ;;  %v4013_v45 = vld [vmem:[#allocation3 + $0x260] sm:$0xff] }
 0x618   : > { %3868 = vst.msk [vmem:[#allocation3 + $0x290] sm:$0xff] %vm1156_vm4, %v3800_v11  ;;  %v10361_v11 = vpop.f32.mrf.mxu3 }
 0x619   : > { %v3798_v17 = vpop.permute.xlu0 %3797  ;;  %12471 = vst [vmem:[#allocation75_spill] sm:$0xff] %v10361_v11 }
 0x61a   : > { %3867 = vst.msk [vmem:[#allocation3 + $0x278] sm:$0xff] %vm1156_vm4, %v3798_v17  ;;  %v10363_v17 = vpop.f32.mrf.mxu0 }
 0x61b   : > { %4360 = vmatmul.f32.gmra.mxu2 %v4004_v5  ;;  %12472 = vst [vmem:[#allocation83_spill] sm:$0xff] %v10363_v17 }
 0x61e   : > { %v10316_v6 = vpop.f32.mrf.mxu2 }
 0x61f   : > { %v3806_v23 = vpop.permute.xlu1 %3805  ;;  %v4019_v46 = vld [vmem:[#allocation3 + $0x290] sm:$0xff] }
 0x620   : > { %3871 = vst.msk [vmem:[#allocation3 + $0x2d8] sm:$0xff] %vm1156_vm4, %v3806_v23 }
 0x621   : > { %v3804_v37 = vpop.permute.xlu0 %3803  ;;  %v4016_v7 = vld [vmem:[#allocation3 + $0x278] sm:$0xff] }
 0x622   : > { %3870 = vst.msk [vmem:[#allocation3 + $0x2c0] sm:$0xff] %vm1156_vm4, %v3804_v37  ;;  %v4031_v37 = vld [vmem:[#allocation3 + $0x2f0] sm:$0xff]  ;;  %vm5065_vm4 = vcmask 1046534  }
 0x623   : > { %4363 = vmatmul.f32.gmra.mxu2 %v4007_v42  ;;  %v4239_v42 = vpop.f32.mrf.mxu3 }
 0x626   : > { %v10323_v32 = vpop.f32.mrf.mxu2 }
 0x627   : > { %v4028_v13 = vld [vmem:[#allocation3 + $0x2d8] sm:$0xff] }
 0x629   : > { %v4025_v2 = vld [vmem:[#allocation3 + $0x2c0] sm:$0xff] }
 0x62b   : > { %4366 = vmatmul.f32.gmra.mxu2 %v4010_v52 }
 0x62e   : > { %v10329_v44 = vpop.f32.mrf.mxu2 }
 0x633   : > { %4369 = vmatmul.f32.gmra.mxu2 %v4013_v45  ;;  %v10369_v45 = vpop.f32.mrf.mxu0 }
 0x634   : > { %12473 = vst [vmem:[#allocation80_spill] sm:$0xff] %v10369_v45 }
 0x636   : > { %v10335_v53 = vpop.f32.mrf.mxu2 }
 0x63b   : > { %4372 = vmatmul.f32.gmra.mxu2 %v4016_v7  ;;  %v10373_v7 = vpop.f32.mrf.mxu3  ;;  %v4465_v15 = vpop.f32.mrf.mxu0 }
 0x63c   : > { %12474 = vst [vmem:[#allocation82_spill] sm:$0xff] %v10373_v7 }
 0x63e   : > { %v10340_v12 = vpop.f32.mrf.mxu2 }
 0x643   : > { %4375 = vmatmul.f32.gmra.mxu2 %v4019_v46  ;;  %v10382_v9 = vpop.f32.mrf.mxu3 }
 0x644   : > { %12477 = vst [vmem:[#allocation59_spill] sm:$0xff] %v10382_v9 }
 0x646   : > { %v10345_v14 = vpop.f32.mrf.mxu2 }
 0x64b   : > { %4378 = vmatmul.f32.gmra.mxu2 %v4022_v28  ;;  %v10386_v28 = vpop.f32.mrf.mxu0 }
 0x64c   : > { %12478 = vst [vmem:[#allocation60_spill] sm:$0xff] %v10386_v28 }
 0x64e   : > { %v10353_v0 = vpop.f32.mrf.mxu2 }
 0x653   : > { %4381 = vmatmul.f32.gmra.mxu2 %v4025_v2 }
 0x656   : > { %v10359_v58 = vpop.f32.mrf.mxu2 }
 0x65b   : > { %4384 = vmatmul.f32.gmra.mxu2 %v4028_v13  ;;  %v10390_v13 = vpop.f32.mrf.mxu3 }
 0x65e   : > { %v10365_v5 = vpop.f32.mrf.mxu2 }
 0x663   : > { %4387 = vmatmul.f32.gmra.mxu2 %v4031_v37  ;;  %v10392_v37 = vpop.f32.mrf.mxu0  ;;  %v10396_v11 = vpop.f32.mrf.mxu3 }
 0x664   : > { %12480 = vst [vmem:[#allocation61_spill] sm:$0xff] %v10392_v37  ;;  %v4299_v37 = vadd.f32 %v10278_v56, %v10206_v19  ;;  %v4308_v19 = vadd.f32 %v10304_v60, %v10238_v29  ;;  %v4314_v29 = vadd.f32 %v10316_v6, %v10249_v22 }
 0x665   : > { %12482 = vst [vmem:[#allocation64_spill] sm:$0xff] %v10396_v11 }
 0x666   : > { %v10367_v52 = vpop.f32.mrf.mxu2 }
 0x66b   : > { %v10400_v9 = vpop.f32.mrf.mxu0  ;;  %v10404_v1 = vpop.f32.mrf.mxu3 }
 0x66c   : > { %12483 = vst [vmem:[#allocation65_spill] sm:$0xff] %v10400_v9  ;;  %v4412_v9 = vadd.f32 %v9811_v63, %v4299_v37  ;;  %v4311_v63 = vadd.f32 %v10310_v20, %v10242_v27  ;;  %v4317_v20 = vadd.f32 %v10323_v32, %v10255_v31  ;;  %v4323_v31 = vadd.f32 %v10335_v53, %v10290_v61 }
 0x66d   : > { %12484 = vst [vmem:[#allocation66_spill] sm:$0xff] %v10404_v1  ;;  %v12486_v1 = vld [vmem:[#allocation85_spill] sm:$0xff]  ;;  %v4326_v53 = vadd.f32 %v10340_v12, %v10300_v24 }
 0x66e   : > { %v10371_v23 = vpop.f32.mrf.mxu2  ;;  %v4424_v27 = vadd.f32 %v9894_v25, %v4311_v63  ;;  %v4320_v25 = vadd.f32 %v10329_v44, %v10280_v33 }
 0x670   : > { %v4433_v44 = vadd.f32 %v10293_v36, %v4320_v25  ;;  %v4335_v25 = vadd.f32 %v10359_v58, %v10325_v26 }
 0x673   : > { %v10406_v28 = vpop.f32.mrf.mxu0 }
 0x674   : > { %12485 = vst [vmem:[#allocation67_spill] sm:$0xff] %v10406_v28  ;;  %v4305_v28 = vadd.f32 %v10295_v49, %v10230_v18  ;;  %v4421_v49 = vadd.f32 %v9880_v57, %v4308_v19 }
 0x676   : > { %v10375_v46 = vpop.f32.mrf.mxu2 }
 0x677   : > { %12475 = vst [vmem:[#allocation57_spill] sm:$0xff] %v10375_v46 }
 0x67e   : > { %v10388_v2 = vpop.f32.mrf.mxu2 }
 0x67f   : > { %12479 = vst [vmem:[#allocation62_spill] sm:$0xff] %v10388_v2 }
 0x686   : > { %v4352_v7 = vpop.f32.mrf.mxu2 }
 0x687   : > { %v4353_v45 = vadd.f32 %v4352_v7, %v4239_v42  ;;  %v10412_v42 = vpop.f32.mrf.mxu3  ;;  %v4302_v7 = vadd.f32 %v10287_v21, %v10218_v39  ;;  %v10436_v21 = vld [vmem:[#allocation12 + $0x3] ss:$0 sm:$0xff] }
 0x689   : > { %v10394_v17 = vadd.f32 %v4465_v15, %v4353_v45  ;;  %v4296_v45 = vadd.f32 %v10270_v38, %v10194_v40  ;;  %v10418_v15 = vpop.f32.mrf.mxu0  ;;  %v4415_v40 = vadd.f32 %v9843_v51, %v4302_v7  ;;  %v4418_v38 = vadd.f32 %v9864_v4, %v4305_v28 }
 0x68a   : > { %v4427_v28 = vadd.f32 %v10272_v30, %v4314_v29  ;;  %v4430_v7 = vadd.f32 %v10284_v47, %v4317_v20  ;;  %v4439_v29 = vadd.f32 %v10312_v8, %v4326_v53 }
 0x68b   : > { %12481 = vst [vmem:[#allocation63_spill] sm:$0xff] %v10394_v17  ;;  %v4409_v11 = vadd.f32 %v12486_v1, %v4296_v45  ;;  %v10424_v17 = vld [vmem:[#allocation12 + $0x2] ss:$0 sm:$0xff] }
 0x68c   : > { %v4507_v39 = vmul.f32 %v10424_v17, %v4412_v9  ;;  %v4508_v1 = vmul.f32 %v10424_v17, %v4415_v40  ;;  %v4509_v4 = vmul.f32 %v10424_v17, %v4418_v38  ;;  %v4510_v9 = vmul.f32 %v10424_v17, %v4421_v49 }
 0x68d   : > { %v4506_v18 = vmul.f32 %v10424_v17, %v4409_v11  ;;  %v4511_v45 = vmul.f32 %v10424_v17, %v4424_v27  ;;  %v4512_v61 = vmul.f32 %v10424_v17, %v4427_v28  ;;  %v4513_v63 = vmul.f32 %v10424_v17, %v4430_v7 }
 0x68e   : > { %v10398_v59 = vpop.f32.mrf.mxu2  ;;  %v10445_v51 = vadd.f32 %v10436_v21, %v4507_v39  ;;  %v10460_v6 = vadd.f32 %v10436_v21, %v4508_v1  ;;  %v10470_v37 = vadd.f32 %v10436_v21, %v4509_v4  ;;  %v10477_v30 = vadd.f32 %v10436_v21, %v4510_v9 }
 0x68f   : > { %v10442_v60 = vpop.f32.mrf.mxu3  ;;  %v10454_v57 = vadd.f32 %v10436_v21, %v4506_v18  ;;  %v4436_v39 = vadd.f32 %v10302_v35, %v4323_v31  ;;  %v10489_v38 = vadd.f32 %v10436_v21, %v4511_v45  ;;  %v4329_v49 = vadd.f32 %v10345_v14, %v10308_v48 }
 0x690   : > { %v4573_v32 = vsel %vm417_vm0, %v10445_v51, 0.0  ;;  %v4575_v33 = vsel %vm417_vm0, %v10460_v6, 0.0  ;;  %v4577_v47 = vsel %vm417_vm0, %v10470_v37, 0.0  ;;  %v4579_v24 = vsel %vm417_vm0, %v10477_v30, 0.0 }
 0x691   : > { %v10451_v11 = vpop.f32.mrf.mxu0  ;;  %v4572_v19 = vsel %vm417_vm0, %v10454_v57, 0.0  ;;  %v10501_v35 = vadd.f32 %v10436_v21, %v4512_v61  ;;  %v4514_v1 = vmul.f32 %v10424_v17, %v4433_v44  ;;  %v4332_v4 = vadd.f32 %v10353_v0, %v10318_v43 }
 0x692   : > { %v4574_v40 = vadd.f32 %v4573_v32, %v4572_v19  ;;  %v4515_v48 = vmul.f32 %v10424_v17, %v4436_v39  ;;  %v4581_v14 = vsel %vm417_vm0, %v10489_v38, 0.0  ;;  %v10513_v9 = vadd.f32 %v10436_v21, %v4513_v63  ;;  %v12487_v63 = vld [vmem:[#allocation57_spill] sm:$0xff] }
 0x693   : > { %v4442_v28 = vadd.f32 %v10321_v50, %v4329_v49  ;;  %v4338_v43 = vadd.f32 %v10365_v5, %v10331_v34  ;;  %v4583_v0 = vsel %vm417_vm0, %v10501_v35, 0.0  ;;  %v10523_v31 = vadd.f32 %v10436_v21, %v4514_v1 }
 0x694   : > { %v4576_v36 = vadd.f32 %v4575_v33, %v4574_v40  ;;  %v4516_v32 = vmul.f32 %v10424_v17, %v4439_v29  ;;  %v4445_v45 = vadd.f32 %v10327_v16, %v4332_v4  ;;  %v10528_v50 = vadd.f32 %v10436_v21, %v4515_v48  ;;  %v12488_v29 = vld [vmem:[#allocation78_spill] sm:$0xff] }
 0x695   : > { %v4585_v26 = vsel %vm417_vm0, %v10513_v9, 0.0  ;;  %v4517_v58 = vmul.f32 %v10424_v17, %v4442_v28  ;;  %v4448_v34 = vadd.f32 %v10333_v41, %v4335_v25  ;;  %v4341_v5 = vadd.f32 %v10367_v52, %v10338_v10  ;;  %v12490_v48 = vld [vmem:[#allocation62_spill] sm:$0xff] }
 0x696   : > { %v10402_v46 = vpop.f32.mrf.mxu2  ;;  %v4578_v20 = vadd.f32 %v4577_v47, %v4576_v36  ;;  %v4451_v33 = vadd.f32 %v10342_v55, %v4338_v43  ;;  %v4587_v16 = vsel %vm417_vm0, %v10523_v31, 0.0  ;;  %v10544_v53 = vadd.f32 %v10436_v21, %v4516_v32 }
 0x697   : > { %v10492_v18 = vpop.f32.mrf.mxu3  ;;  %v4518_v40 = vmul.f32 %v10424_v17, %v4445_v45  ;;  %v4344_v41 = vadd.f32 %v10371_v23, %v10347_v54  ;;  %v4589_v10 = vsel %vm417_vm0, %v10528_v50, 0.0  ;;  %v10552_v55 = vadd.f32 %v10436_v21, %v4517_v58  ;;  %v12492_v58 = vld [vmem:[#allocation80_spill] sm:$0xff] }
 0x698   : > { %v4580_v8 = vadd.f32 %v4579_v24, %v4578_v20  ;;  %v4519_v52 = vmul.f32 %v10424_v17, %v4448_v34  ;;  %v4454_v47 = vadd.f32 %v10351_v62, %v4341_v5  ;;  %v4347_v49 = vadd.f32 %v12487_v63, %v10355_v3  ;;  %v12489_v20 = vld [vmem:[#allocation75_spill] sm:$0xff]  ;;  %v12493_v5 = vld [vmem:[#allocation82_spill] sm:$0xff] }
 0x699   : > { %v10507_v27 = vpop.f32.mrf.mxu0  ;;  %v4520_v1 = vmul.f32 %v10424_v17, %v4451_v33  ;;  %v4591_v54 = vsel %vm417_vm0, %v10544_v53, 0.0  ;;  %v10564_v23 = vadd.f32 %v10436_v21, %v4518_v40  ;;  %v4457_v4 = vadd.f32 %v12488_v29, %v4344_v41 }
 0x69a   : > { %v4582_v7 = vadd.f32 %v4581_v14, %v4580_v8  ;;  %v4350_v14 = vadd.f32 %v12490_v48, %v12489_v20  ;;  %v4593_v3 = vsel %vm417_vm0, %v10552_v55, 0.0  ;;  %v10572_v28 = vadd.f32 %v10436_v21, %v4519_v52  ;;  %v12491_v8 = vld [vmem:[#allocation83_spill] sm:$0xff] }
 0x69b   : > { %v4521_v25 = vmul.f32 %v10424_v17, %v4454_v47  ;;  %v4460_v43 = vadd.f32 %v12491_v8, %v4347_v49  ;;  %v10577_v32 = vadd.f32 %v10436_v21, %v4520_v1  ;;  %v10597_v47 = vsel %vm417_vm0, %v10454_v57, -inf  ;;  %v12498_v8 = vld [vmem:[#allocation64_spill] sm:$0xff] }
 0x69c   : > { %v4584_v19 = vadd.f32 %v4583_v0, %v4582_v7  ;;  %v4595_v7 = vsel %vm417_vm0, %v10564_v23, 0.0  ;;  %v4463_v34 = vadd.f32 %v12492_v58, %v4350_v14  ;;  %v10616_v20 = vsel %vm417_vm0, %v10460_v6, -inf  ;;  %v12496_v14 = vld [vmem:[#allocation61_spill] sm:$0xff]  ;;  %v12499_v58 = vld [vmem:[#allocation66_spill] sm:$0xff] }
 0x69d   : > { %v4523_v52 = vmul.f32 %v10424_v17, %v4460_v43 }
 0x69e   : > { %v10408_v2 = vpop.f32.mrf.mxu2  ;;  %v4586_v39 = vadd.f32 %v4585_v26, %v4584_v19  ;;  %v4522_v26 = vmul.f32 %v10424_v17, %v4457_v4  ;;  %v4356_v19 = vadd.f32 %v10398_v59, %v12493_v5  ;;  %v4599_v59 = vsel %vm417_vm0, %v10577_v32, 0.0 }
 0x69f   : > { %v10541_v44 = vpop.f32.mrf.mxu3  ;;  %v4524_v49 = vmul.f32 %v10424_v17, %v4463_v34  ;;  %v10612_v4 = vsel %vm417_vm0, %v10445_v51, -inf }
 0x6a0   : > { %v4588_v24 = vadd.f32 %v4587_v16, %v4586_v39  ;;  %v12494_v16 = vld [vmem:[#allocation59_spill] sm:$0xff]  ;;  %v4597_v39 = vsel %vm417_vm0, %v10572_v28, 0.0 }
 0x6a1   : > { %v10558_v36 = vpop.f32.mrf.mxu0  ;;  %v4359_v40 = vadd.f32 %v10402_v46, %v12494_v16  ;;  %v10602_v46 = vadd.f32 %v10436_v21, %v4522_v26  ;;  %v12500_v16 = vld [vmem:[#allocation65_spill] sm:$0xff] }
 0x6a2   : > { %v4590_v62 = vadd.f32 %v4589_v10, %v4588_v24  ;;  %v10592_v10 = vadd.f32 %v10436_v21, %v4521_v25  ;;  %v12495_v24 = vld [vmem:[#allocation60_spill] sm:$0xff]  ;;  %v10622_v25 = vadd.f32 %v10436_v21, %v4523_v52  ;;  %v4657_v52 = vsel %vm417_vm0, %v10501_v35, -inf }
 0x6a3   : > { %v4469_v1 = vadd.f32 %v12495_v24, %v4356_v19  ;;  %v4603_v19 = vsel %vm417_vm0, %v10602_v46, 0.0 }
 0x6a4   : > { %v4592_v0 = vadd.f32 %v4591_v54, %v4590_v62  ;;  %v4362_v54 = vadd.f32 %v10408_v2, %v10390_v13  ;;  %v4472_v62 = vadd.f32 %v12496_v14, %v4359_v40  ;;  %v12497_v2 = vld [vmem:[#allocation63_spill] sm:$0xff]  ;;  %v4659_v14 = vsel %vm417_vm0, %v10513_v9, -inf }
 0x6a5   : > { %v4525_v13 = vmul.f32 %v10424_v17, %v12497_v2 }
 0x6a6   : > { %v10428_v56 = vpop.f32.mrf.mxu2  ;;  %v4594_v33 = vadd.f32 %v4593_v3, %v4592_v0  ;;  %v4601_v3 = vsel %vm417_vm0, %v10592_v10, 0.0  ;;  %v10630_v0 = vsel %vm417_vm0, %v10470_v37, -inf  ;;  %v4475_v40 = vadd.f32 %v12500_v16, %v4362_v54 }
 0x6a7   : > { %v10587_v41 = vpop.f32.mrf.mxu3  ;;  %v4365_v43 = vadd.f32 %v10428_v56, %v12498_v8  ;;  %v4526_v56 = vmul.f32 %v10424_v17, %v4469_v1  ;;  %v10651_v24 = vadd.f32 %v10436_v21, %v4525_v13 }
 0x6a8   : > { %v4596_v63 = vadd.f32 %v4595_v7, %v4594_v33  ;;  %v4653_v7 = vsel %vm417_vm0, %v10477_v30, -inf  ;;  %v10639_v33 = vadd.f32 %v10436_v21, %v4524_v49  ;;  %v12501_v49 = vld [vmem:[#allocation67_spill] sm:$0xff] }
 0x6a9   : > { %v10608_v29 = vpop.f32.mrf.mxu0  ;;  %v4654_v54 = vmax.f32 %v10597_v47, %v4653_v7  ;;  %v10663_v13 = vadd.f32 %v10436_v21, %v4526_v56  ;;  %v4658_v47 = vmax.f32 %v10616_v20, %v4657_v52 }
 0x6aa   : > { %v4598_v48 = vadd.f32 %v4597_v39, %v4596_v63  ;;  %v4655_v39 = vsel %vm417_vm0, %v10489_v38, -inf  ;;  %v4607_v8 = vsel %vm417_vm0, %v10639_v33, 0.0 }
 0x6ac   : > { %v4600_v26 = vadd.f32 %v4599_v59, %v4598_v48  ;;  %v4605_v59 = vsel %vm417_vm0, %v10622_v25, 0.0  ;;  %v4478_v48 = vadd.f32 %v12501_v49, %v4365_v43  ;;  %v4528_v43 = vmul.f32 %v10424_v17, %v4475_v40 }
 0x6ad   : > { %v4611_v40 = vsel %vm417_vm0, %v10663_v13, 0.0 }
 0x6ae   : > { %v10457_v22 = vpop.f32.mrf.mxu2  ;;  %v4602_v63 = vadd.f32 %v4601_v3, %v4600_v26 }
 0x6af   : > { %v4368_v34 = vadd.f32 %v10457_v22, %v12499_v58  ;;  %v4527_v22 = vmul.f32 %v10424_v17, %v4472_v62  ;;  %v4272_v62 = vpop.f32.mrf.mxu3  ;;  %v4529_v58 = vmul.f32 %v10424_v17, %v4478_v48 }
 0x6b0   : > { %v4604_v2 = vadd.f32 %v4603_v19, %v4602_v63 }
 0x6b1   : > { %v4481_v3 = vadd.f32 %v10418_v15, %v4368_v34  ;;  %v10671_v26 = vadd.f32 %v10436_v21, %v4527_v22  ;;  %v4609_v15 = vsel %vm417_vm0, %v10651_v24, 0.0  ;;  %v4495_v56 = vpop.f32.mrf.mxu0  ;;  %v10696_v22 = vadd.f32 %v10436_v21, %v4529_v58 }
 0x6b2   : > { %v4606_v7 = vadd.f32 %v4605_v59, %v4604_v2 }
 0x6b3   : > { %v4530_v20 = vmul.f32 %v10424_v17, %v4481_v3  ;;  %v4613_v63 = vsel %vm417_vm0, %v10671_v26, 0.0  ;;  %v4617_v58 = vsel %vm417_vm0, %v10696_v22, 0.0 }
 0x6b6   : > { %v10498_v12 = vpop.f32.mrf.mxu2 }
 0x6b7   : > { %v4371_v1 = vadd.f32 %v10498_v12, %v10412_v42  ;;  %v4656_v12 = vmax.f32 %v10612_v4, %v4655_v39  ;;  %v4608_v4 = vadd.f32 %v4607_v8, %v4606_v7  ;;  %v10685_v39 = vadd.f32 %v10436_v21, %v4528_v43  ;;  %v4720_v7 = vld [vmem:[#allocation14 + $0x10] sm:$0xff] }
 0x6b9   : > { %v4484_v34 = vadd.f32 %v10451_v11, %v4371_v1  ;;  %v4610_v52 = vadd.f32 %v4609_v15, %v4608_v4  ;;  %v10704_v1 = vadd.f32 %v10436_v21, %v4530_v20  ;;  %v4615_v2 = vsel %vm417_vm0, %v10685_v39, 0.0  ;;  %v4275_v15 = vpop.f32.mrf.mxu3 }
 0x6bb   : > { %v4531_v59 = vmul.f32 %v10424_v17, %v4484_v34  ;;  %v4612_v48 = vadd.f32 %v4611_v40, %v4610_v52  ;;  %v4619_v4 = vsel %vm417_vm0, %v10704_v1, 0.0  ;;  %v4719_v40 = vld [vmem:[#allocation14 + $0x8] sm:$0xff] }
 0x6bd   : > { %v4614_v43 = vadd.f32 %v4613_v63, %v4612_v48  ;;  %v10717_v34 = vadd.f32 %v10436_v21, %v4531_v59  ;;  %v4718_v63 = vld [vmem:[#allocation14] sm:$0xff] }
 0x6be   : > { %v10537_v61 = vpop.f32.mrf.mxu2 }
 0x6bf   : > { %v4374_v42 = vadd.f32 %v10537_v61, %v10442_v60  ;;  %v4660_v60 = vmax.f32 %v10630_v0, %v4659_v14  ;;  %v4661_v61 = vsel %vm417_vm0, %v10523_v31, -inf  ;;  %v4665_v0 = vsel %vm417_vm0, %v10544_v53, -inf }
 0x6c0   : > { %v4669_v14 = vsel %vm417_vm0, %v10564_v23, -inf  ;;  %v4621_v59 = vsel %vm417_vm0, %v10717_v34, 0.0 }
 0x6c1   : > { %v4487_v11 = vadd.f32 %v10507_v27, %v4374_v42  ;;  %v4721_v42 = vld [vmem:[#allocation14 + $0x18] sm:$0xff] }
 0x6c2   : > { %4737 = vmatpush.msrb.mxu3 %v4721_v42 }
 0x6c3   : > { %v4532_v3 = vmul.f32 %v10424_v17, %v4487_v11 }
 0x6c4   : > { %4738 = vmatpush.msrb.mxu3 %v4720_v7 }
 0x6c5   : > { %v10723_v11 = vadd.f32 %v10436_v21, %v4532_v3 }
 0x6c6   : > { %v4376_v45 = vpop.f32.mrf.mxu2  ;;  %4739 = vmatpush.msrb.mxu3 %v4719_v40 }
 0x6c7   : > { %v4377_v19 = vadd.f32 %v4376_v45, %v10492_v18  ;;  %v4663_v45 = vsel %vm417_vm0, %v10528_v50, -inf  ;;  %v4623_v3 = vsel %vm417_vm0, %v10723_v11, 0.0 }
 0x6c8   : > { %v4664_v8 = vmax.f32 %v4656_v12, %v4663_v45  ;;  %4740 = vmatpush.msrb.mxu3 %v4718_v63 }
 0x6c9   : > { %v4490_v49 = vadd.f32 %v10558_v36, %v4377_v19 }
 0x6ca   : > { %4762 = vmatpush.msra.mxu3 %v4721_v42 }
 0x6cb   : > { %v4533_v19 = vmul.f32 %v10424_v17, %v4490_v49 }
 0x6cc   : > { %4763 = vmatpush.msra.mxu3 %v4720_v7  ;;  %v4695_v7 = vsel %vm417_vm0, %v10717_v34, -inf }
 0x6cd   : > { %v10733_v49 = vadd.f32 %v10436_v21, %v4533_v19 }
 0x6ce   : > { %v4379_v5 = vpop.f32.mrf.mxu2  ;;  %4764 = vmatpush.msra.mxu3 %v4719_v40 }
 0x6cf   : > { %v4380_v18 = vadd.f32 %v4379_v5, %v10541_v44  ;;  %v4662_v44 = vmax.f32 %v4654_v54, %v4661_v61  ;;  %v4667_v5 = vsel %vm417_vm0, %v10552_v55, -inf  ;;  %v4671_v54 = vsel %vm417_vm0, %v10572_v28, -inf }
 0x6d0   : > { %4765 = vmatpush.msra.mxu3 %v4718_v63 }
 0x6d1   : > { %v4493_v36 = vadd.f32 %v10608_v29, %v4380_v18  ;;  %v4668_v29 = vmax.f32 %v4660_v60, %v4667_v5  ;;  %v4670_v12 = vmax.f32 %v4662_v44, %v4669_v14  ;;  %v4675_v60 = vsel %vm417_vm0, %v10592_v10, -inf }
 0x6d2   : > { %v4679_v5 = vsel %vm417_vm0, %v10622_v25, -inf  ;;  %v7800_v14 = vmov 256.0  }
 0x6d3   : > { %v4534_v18 = vmul.f32 %v10424_v17, %v4493_v36  ;;  %7502 = vrcp.f32 %v7800_v14 }
 0x6d5   : > { %v10745_v36 = vadd.f32 %v10436_v21, %v4534_v18 }
 0x6d6   : > { %v4382_v16 = vpop.f32.mrf.mxu2 }
 0x6d7   : > { %v4383_v27 = vadd.f32 %v4382_v16, %v10587_v41  ;;  %v4666_v41 = vmax.f32 %v4658_v47, %v4665_v0  ;;  %v4616_v47 = vadd.f32 %v4615_v2, %v4614_v43  ;;  %v4498_v16 = vpop.f32.mrf.mxu0  ;;  %v4672_v0 = vmax.f32 %v4664_v8, %v4671_v54 }
 0x6d8   : > { %v4681_v2 = vsel %vm417_vm0, %v10639_v33, -inf  ;;  %v4676_v43 = vmax.f32 %v4668_v29, %v4675_v60  ;;  %v4627_v60 = vsel %vm417_vm0, %v10745_v36, 0.0 }
 0x6d9   : > { %v4496_v61 = vadd.f32 %v4495_v56, %v4383_v27  ;;  %v4673_v56 = vsel %vm417_vm0, %v10577_v32, -inf  ;;  %v4618_v52 = vadd.f32 %v4617_v58, %v4616_v47  ;;  %v4683_v58 = vsel %vm417_vm0, %v10651_v24, -inf }
 0x6da   : > { %v4674_v54 = vmax.f32 %v4666_v41, %v4673_v56  ;;  %v4687_v47 = vsel %vm417_vm0, %v10671_v26, -inf  ;;  %v4680_v41 = vmax.f32 %v4672_v0, %v4679_v5  ;;  %v4501_v56 = vpop.f32.mrf.mxu3  ;;  %v4684_v42 = vmax.f32 %v4676_v43, %v4683_v58 }
 0x6db   : > { %v4535_v27 = vmul.f32 %v10424_v17, %v4496_v61  ;;  %v4620_v48 = vadd.f32 %v4619_v4, %v4618_v52  ;;  %v4685_v61 = vsel %vm417_vm0, %v10663_v13, -inf  ;;  %v4625_v4 = vsel %vm417_vm0, %v10733_v49, 0.0 }
 0x6dc   : > { %v4682_v29 = vmax.f32 %v4674_v54, %v4681_v2  ;;  %v4688_v14 = vmax.f32 %v4680_v41, %v4687_v47  ;;  %v4697_v2 = vsel %vm417_vm0, %v10723_v11, -inf  ;;  %v4701_v41 = vsel %vm417_vm0, %v10745_v36, -inf }
 0x6dd   : > { %v4622_v19 = vadd.f32 %v4621_v59, %v4620_v48 }
 0x6de   : > { %v4385_v20 = vpop.f32.mrf.mxu2  ;;  %v4696_v47 = vmax.f32 %v4688_v14, %v4695_v7 }
 0x6df   : > { %v4386_v45 = vadd.f32 %v4385_v20, %v4272_v62  ;;  %v4677_v62 = vsel %vm417_vm0, %v10602_v46, -inf  ;;  %v10757_v20 = vadd.f32 %v10436_v21, %v4535_v27  ;;  %v4624_v18 = vadd.f32 %v4623_v3, %v4622_v19 }
 0x6e0   : > { %v4691_v27 = vsel %vm417_vm0, %v10696_v22, -inf  ;;  %v4699_v3 = vsel %vm417_vm0, %v10733_v49, -inf }
 0x6e1   : > { %v4499_v44 = vadd.f32 %v4498_v16, %v4386_v45  ;;  %v4678_v16 = vmax.f32 %v4670_v12, %v4677_v62  ;;  %v4689_v12 = vsel %vm417_vm0, %v10685_v39, -inf  ;;  %v4626_v0 = vadd.f32 %v4625_v4, %v4624_v18 }
 0x6e2   : > { %v4629_v62 = vsel %vm417_vm0, %v10757_v20, 0.0  ;;  %v4690_v19 = vmax.f32 %v4682_v29, %v4689_v12 }
 0x6e3   : > { %v4536_v8 = vmul.f32 %v10424_v17, %v4499_v44  ;;  %v7503_v44 = vpop.eup %7502  ;;  %v4686_v48 = vmax.f32 %v4678_v16, %v4685_v61  ;;  %v4628_v40 = vadd.f32 %v4627_v60, %v4626_v0  ;;  %v4692_v61 = vmax.f32 %v4684_v42, %v4691_v27 }
 0x6e4   : > { %v4642_v58 = vmul.f32 256.0, %v7503_v44  ;;  %v4698_v60 = vmax.f32 %v4690_v19, %v4697_v2  ;;  %vm4646_vm6 = vweird.f32 %v7503_v44 }
 0x6e5   : > { %v10762_v52 = vadd.f32 %v10436_v21, %v4536_v8  ;;  %v4703_v8 = vsel %vm417_vm0, %v10757_v20, -inf  ;;  %v4630_v4 = vadd.f32 %v4629_v62, %v4628_v40 }
 0x6e6   : > { %v4388_v45 = vpop.f32.mrf.mxu2  ;;  %v4643_v42 = vsub.f32 1.0, %v4642_v58 }
 0x6e7   : > { %v4389_v59 = vadd.f32 %v4388_v45, %v4275_v15  ;;  %v4693_v15 = vsel %vm417_vm0, %v10704_v1, -inf  ;;  %v4631_v54 = vsel %vm417_vm0, %v10762_v52, 0.0  ;;  %v4705_v63 = vsel %vm417_vm0, %v10762_v52, -inf }
 0x6e8   : > { %v4694_v16 = vmax.f32 %v4686_v48, %v4693_v15  ;;  %v4704_v45 = vmax.f32 %v4696_v47, %v4703_v8  ;;  %v4706_v14 = vmax.f32 %v4698_v60, %v4705_v63 }
 0x6e9   : > { %v4502_v5 = vadd.f32 %v4501_v56, %v4389_v59  ;;  %v4632_v56 = vadd.f32 %v4631_v54, %v4630_v4  ;;  %v4700_v59 = vmax.f32 %v4692_v61, %v4699_v3 }
 0x6ea   : > { %v4702_v48 = vmax.f32 %v4694_v16, %v4701_v41  ;;  %v12502_v16 = vld [vmem:[#allocation58_spill] sm:$0xff] }
 0x6eb   : > { %v4537_v43 = vmul.f32 %v10424_v17, %v4502_v5 }
 0x6ec   : > { %v4709_v27 = vmax.f32 %v4702_v48, %v4704_v45 }
 0x6ed   : > { %v10788_v18 = vadd.f32 %v10436_v21, %v4537_v43  ;;  %v4644_v21 = vmul.f32 %v7503_v44, %v4643_v42 }
 0x6ef   : > { %v4633_v17 = vsel %vm417_vm0, %v10788_v18, 0.0  ;;  %v4707_v29 = vsel %vm417_vm0, %v10788_v18, -inf  ;;  %v4645_v3 = vadd.f32 %v7503_v44, %v4644_v21 }
 0x6f0   : > { %v4634_v12 = vadd.f32 %v4633_v17, %v4632_v56  ;;  %v4708_v0 = vmax.f32 %v4700_v59, %v4707_v29 }
 0x6f1   : > { %v4647_v61 = vsel %vm4646_vm6, %v7503_v44, %v4645_v3  ;;  %vm5078_vm6 = vcmask 154648  }
 0x6f2   : > { %v4635_v7 = vrot.slane %v4634_v12, 4  ;;  %v4710_v62 = vmax.f32 %v4706_v14, %v4708_v0 }
 0x6f4   : > { %v4636_v5 = vadd.f32 %v4635_v7, %v4634_v12  ;;  %v4711_v15 = vmax.f32 %v4709_v27, %v4710_v62 }
 0x6f6   : > { %v4637_v40 = vrot.slane %v4636_v5, 2  ;;  %v4712_v2 = vrot.slane %v4711_v15, 4 }
 0x6f8   : > { %v4638_v8 = vadd.f32 %v4637_v40, %v4636_v5  ;;  %v4713_v54 = vmax.f32 %v4711_v15, %v4712_v2 }
 0x6fa   : > { %v4639_v43 = vrot.slane %v4638_v8, 1  ;;  %v4714_v19 = vrot.slane %v4713_v54, 2 }
 0x6fc   : > { %v4640_v58 = vadd.f32 %v4639_v43, %v4638_v8  ;;  %v4715_v47 = vmax.f32 %v4713_v54, %v4714_v19 }
 0x6fe   : > { %v4648_v4 = vmul.f32 %v4647_v61, %v4640_v58  ;;  %v4716_v41 = vrot.slane %v4715_v47, 1 }
 0x700   : > { %7221 = vmatmul.msk.f32.vlgmr.msrb.gmra.mxu3 %vm417_vm0, %v4648_v4  ;;  %v4717_v63 = vmax.f32 %v4715_v47, %v4716_v41 }
 0x701   : > { %7225 = vmatpush.msk.msrb.mxu3 %vm4775_vm5, %v12502_v16  ;;  %vm5067_vm5 = vcmask 1047559  }
 0x708   : > { %7222 = vmatmul.msk.f32.vlgmr.msra.gmra.mxu3 %vm417_vm0, %v4717_v63 }
 0x783   : > { %v4742_v45 = vpop.f32.mrf.mxu3 }
 0x784   : > { %v4745_v56 = vmax.f32 %v4742_v45, 0.0 }
 0x786   : > { %7226 = vmatmul.msk.f32.vlgmr.msrb.gmra.mxu3 %vm4771_vm7, %v4745_v56 }
 0x78b   : > { %v4767_v60 = vpop.f32.mrf.mxu3 }
 0x78c   : > { %v4770_v59 = vmax.f32 %v4767_v60, 0.0 }
 0x78e   : > { %7224 = vmatmul.msk.f32.vlgmr.msra.gmra.mxu1 %vm4771_vm7, %v4770_v59  ;;  %vm476_vm7 = vcmask 177152  }
 0x809   : > { %v4819_v44 = vpop.f32.mrf.mxu3 }
 0x80b   : > { %v4796_v17 = vpop.f32.mrf.mxu1 }
 0x80c   : > { %v4820_v29 = vadd.f32 %v4819_v44, %v4796_v17 }
 0x80e   : > { %v7227_v42 = vmul.f32 -1.442695, %v4820_v29 }
 0x810   : > { %7504 = vpow2.f32 %v7227_v42 }
 0x816   : > { %v7505_v48 = vpop.eup %7504 }
 0x817   : > { %v4825_v14 = vadd.f32 1.0, %v7505_v48 }
 0x819   : > { %7506 = vrcp.f32 %v4825_v14  ;;  %v4837_v7 = vand.u32 2147483648, %v4825_v14  ;;  %v4835_v21 = vand.u32 2147483647, %v4825_v14  ;;  %vm4831_vm9 = vweird.f32 %v4825_v14 }
 0x81b   : > { %v4838_v15 = vor.u32 1.1754944e-38, %v4837_v7  ;;  %vm4836_vm11 = vcmp.eq.f32.partialorder %v4835_v21, 8.507059e+37 }
 0x81f   : > { %v7507_v12 = vpop.eup %7506 }
 0x820   : > { %v4827_v0 = vmul.f32 %v7507_v12, %v4825_v14  ;;  %vm4832_vm8 = vweird.f32 %v7507_v12 }
 0x821   : > { %vm4833_vm10 = vmor %vm4831_vm9, %vm4832_vm8 }
 0x822   : > { %v4828_v27 = vsub.f32 1.0, %v4827_v0 }
 0x824   : > { %v4829_v62 = vmul.f32 %v7507_v12, %v4828_v27 }
 0x826   : > { %v4830_v5 = vadd.f32 %v7507_v12, %v4829_v62 }
 0x828   : > { %v4834_v40 = vsel %vm4833_vm10, %v7507_v12, %v4830_v5 }
 0x829   : > { %v4839_v2 = vsel %vm4836_vm11, %v4838_v15, %v4834_v40 }
 0x82a   : > { %v10798_v3 = vperm.slane %v4839_v2, 0 }
 0x82c   : > { %v10802_v8 = vmul.f32 %v10798_v3, %v10460_v6  ;;  %v10806_v54 = vmul.f32 %v10798_v3, %v10445_v51  ;;  %v10810_v43 = vmul.f32 %v10798_v3, %v10454_v57  ;;  %v10820_v51 = vmul.f32 %v10798_v3, %v10470_v37 }
 0x82d   : > { %v10824_v57 = vmul.f32 %v10798_v3, %v10489_v38  ;;  %v10828_v6 = vmul.f32 %v10798_v3, %v10477_v30  ;;  %v10838_v38 = vmul.f32 %v10798_v3, %v10501_v35  ;;  %v10842_v30 = vmul.f32 %v10798_v3, %v10523_v31 }
 0x82e   : > { %v4880_v19 = vsel %vm417_vm0, %v10802_v8, -inf  ;;  %v4877_v61 = vsel %vm417_vm0, %v10806_v54, -inf  ;;  %v4874_v58 = vsel %vm417_vm0, %v10810_v43, -inf  ;;  %v4883_v47 = vsel %vm417_vm0, %v10820_v51, -inf }
 0x82f   : > { %4881 = vmax.xlane.f32.xlu2 %v4880_v19  ;;  %4878 = vmax.xlane.f32.xlu1 %v4877_v61  ;;  %12503 = vst [vmem:[#allocation68_spill] sm:$0xff] %v10828_v6  ;;  %v4889_v4 = vsel %vm417_vm0, %v10824_v57, -inf  ;;  %v4886_v37 = vsel %vm417_vm0, %v10828_v6, -inf  ;;  %v10846_v16 = vmul.f32 %v10798_v3, %v10513_v9  ;;  %v4892_v41 = vsel %vm417_vm0, %v10838_v38, -inf }
 0x830   : > { %4875 = vmax.xlane.f32.xlu0 %v4874_v58  ;;  %12504 = vst [vmem:[#allocation69_spill] sm:$0xff] %v10838_v38  ;;  %v4898_v63 = vsel %vm417_vm0, %v10842_v30, -inf  ;;  %v10856_v31 = vmul.f32 %v10798_v3, %v10528_v50  ;;  %v10860_v9 = vmul.f32 %v10798_v3, %v10552_v55  ;;  %v10864_v45 = vmul.f32 %v10798_v3, %v10544_v53 }
 0x831   : > { %12505 = vst [vmem:[#allocation71_spill] sm:$0xff] %v10842_v30  ;;  %v4895_v35 = vsel %vm417_vm0, %v10846_v16, -inf  ;;  %v10874_v55 = vmul.f32 %v10798_v3, %v10564_v23  ;;  %v10878_v53 = vmul.f32 %v10798_v3, %v10577_v32  ;;  %v10882_v59 = vmul.f32 %v10798_v3, %v10572_v28 }
 0x832   : > { %12506 = vst [vmem:[#allocation70_spill] sm:$0xff] %v10846_v16  ;;  %v4901_v56 = vsel %vm417_vm0, %v10856_v31, -inf  ;;  %v4907_v60 = vsel %vm417_vm0, %v10860_v9, -inf  ;;  %v4904_v50 = vsel %vm417_vm0, %v10864_v45, -inf  ;;  %v10892_v32 = vmul.f32 %v10798_v3, %v10592_v10 }
 0x833   : > { %12507 = vst [vmem:[#allocation72_spill] sm:$0xff] %v10856_v31  ;;  %v4910_v44 = vsel %vm417_vm0, %v10874_v55, -inf  ;;  %v4916_v17 = vsel %vm417_vm0, %v10878_v53, -inf  ;;  %v4913_v23 = vsel %vm417_vm0, %v10882_v59, -inf  ;;  %v10896_v28 = vmul.f32 %v10798_v3, %v10622_v25 }
 0x834   : > { %12508 = vst [vmem:[#allocation73_spill] sm:$0xff] %v10860_v9  ;;  %v10900_v29 = vmul.f32 %v10798_v3, %v10602_v46  ;;  %v4919_v42 = vsel %vm417_vm0, %v10892_v32, -inf  ;;  %v10910_v25 = vmul.f32 %v10798_v3, %v10639_v33  ;;  %v10914_v46 = vmul.f32 %v10798_v3, %v10663_v13 }
 0x835   : > { %12509 = vst [vmem:[#allocation74_spill] sm:$0xff] %v10864_v45  ;;  %v4925_v48 = vsel %vm417_vm0, %v10896_v28, -inf  ;;  %v10918_v14 = vmul.f32 %v10798_v3, %v10651_v24  ;;  %v10928_v13 = vmul.f32 %v10798_v3, %v10671_v26  ;;  %v10932_v24 = vmul.f32 %v10798_v3, %v10696_v22 }
 0x836   : > { %12510 = vst [vmem:[#allocation76_spill] sm:$0xff] %v10874_v55  ;;  %v4922_v10 = vsel %vm417_vm0, %v10900_v29, -inf  ;;  %v4928_v12 = vsel %vm417_vm0, %v10910_v25, -inf  ;;  %v4934_v0 = vsel %vm417_vm0, %v10914_v46, -inf  ;;  %v10936_v27 = vmul.f32 %v10798_v3, %v10685_v39 }
 0x837   : > { %4884 = vmax.xlane.f32.xlu2 %v4883_v47  ;;  %4890 = vmax.xlane.f32.xlu1 %v4889_v4  ;;  %12511 = vst [vmem:[#allocation77_spill] sm:$0xff] %v10878_v53  ;;  %v4931_v33 = vsel %vm417_vm0, %v10918_v14, -inf  ;;  %v4937_v7 = vsel %vm417_vm0, %v10928_v13, -inf  ;;  %v4943_v62 = vsel %vm417_vm0, %v10932_v24, -inf  ;;  %v10946_v22 = vmul.f32 %v10798_v3, %v10704_v1 }
 0x838   : > { %4887 = vmax.xlane.f32.xlu0 %v4886_v37  ;;  %12512 = vst [vmem:[#allocation81_spill] sm:$0xff] %v10882_v59  ;;  %v4940_v26 = vsel %vm417_vm0, %v10936_v27, -inf  ;;  %v10950_v39 = vmul.f32 %v10798_v3, %v10723_v11  ;;  %v10954_v21 = vmul.f32 %v10798_v3, %v10717_v34  ;;  %v10964_v11 = vmul.f32 %v10798_v3, %v10733_v49 }
 0x839   : > { %12513 = vst [vmem:[#allocation79_spill] sm:$0xff] %v10892_v32  ;;  %v4946_v5 = vsel %vm417_vm0, %v10946_v22, -inf  ;;  %v10968_v34 = vmul.f32 %v10798_v3, %v10757_v20  ;;  %v10972_v40 = vmul.f32 %v10798_v3, %v10745_v36  ;;  %v10982_v20 = vmul.f32 %v10798_v3, %v10762_v52 }
 0x83a   : > { %12514 = vst [vmem:[#allocation84_spill] sm:$0xff] %v10896_v28  ;;  %v4952_v15 = vsel %vm417_vm0, %v10950_v39, -inf  ;;  %v4949_v1 = vsel %vm417_vm0, %v10954_v21, -inf  ;;  %v4955_v2 = vsel %vm417_vm0, %v10964_v11, -inf  ;;  %v10986_v36 = vmul.f32 %v10798_v3, %v10788_v18 }
 0x83b   : > { %12515 = vst [vmem:[#allocation85_spill] sm:$0xff] %v10900_v29  ;;  %v4961_v19 = vsel %vm417_vm0, %v10968_v34, -inf  ;;  %v4958_v49 = vsel %vm417_vm0, %v10972_v40, -inf  ;;  %v4964_v61 = vsel %vm417_vm0, %v10982_v20, -inf  ;;  %v5081_v58 = vsel %vm417_vm0, %v10810_v43, 0.0 }
 0x83c   : > { %12516 = vst [vmem:[#allocation57_spill] sm:$0xff] %v10910_v25  ;;  %v4967_v47 = vsel %vm417_vm0, %v10986_v36, -inf  ;;  %v5084_v52 = vsel %vm417_vm0, %v10806_v54, 0.0  ;;  %v5090_v4 = vsel %vm417_vm0, %v10820_v51, 0.0  ;;  %v5087_v18 = vsel %vm417_vm0, %v10802_v8, 0.0 }
 0x83d   : > { %12517 = vst [vmem:[#allocation78_spill] sm:$0xff] %v10914_v46  ;;  %v5093_v3 = vsel %vm417_vm0, %v10828_v6, 0.0  ;;  %v5099_v37 = vsel %vm417_vm0, %v10838_v38, 0.0 }
 0x83e   : > { %12518 = vst [vmem:[#allocation75_spill] sm:$0xff] %v10918_v14 }
 0x83f   : > { %4893 = vmax.xlane.f32.xlu2 %v4892_v41  ;;  %4899 = vmax.xlane.f32.xlu1 %v4898_v63  ;;  %12519 = vst [vmem:[#allocation62_spill] sm:$0xff] %v10928_v13  ;;  %v5096_v41 = vsel %vm417_vm0, %v10824_v57, 0.0  ;;  %v5102_v63 = vsel %vm417_vm0, %v10846_v16, 0.0 }
 0x840   : > { %4896 = vmax.xlane.f32.xlu0 %v4895_v35  ;;  %12520 = vst [vmem:[#allocation83_spill] sm:$0xff] %v10932_v24  ;;  %v5108_v35 = vsel %vm417_vm0, %v10856_v31, 0.0 }
 0x841   : > { %12521 = vst [vmem:[#allocation80_spill] sm:$0xff] %v10936_v27 }
 0x842   : > { %12522 = vst [vmem:[#allocation82_spill] sm:$0xff] %v10946_v22 }
 0x843   : > { %12523 = vst [vmem:[#allocation59_spill] sm:$0xff] %v10950_v39 }
 0x844   : > { %12524 = vst [vmem:[#allocation60_spill] sm:$0xff] %v10954_v21 }
 0x845   : > { %12525 = vst [vmem:[#allocation61_spill] sm:$0xff] %v10964_v11 }
 0x846   : > { %12526 = vst [vmem:[#allocation63_spill] sm:$0xff] %v10968_v34 }
 0x847   : > { %4902 = vmax.xlane.f32.xlu2 %v4901_v56  ;;  %4908 = vmax.xlane.f32.xlu1 %v4907_v60  ;;  %12527 = vst [vmem:[#allocation64_spill] sm:$0xff] %v10972_v40  ;;  %v5105_v56 = vsel %vm417_vm0, %v10842_v30, 0.0  ;;  %v5111_v60 = vsel %vm417_vm0, %v10864_v45, 0.0 }
 0x848   : > { %4905 = vmax.xlane.f32.xlu0 %v4904_v50  ;;  %12528 = vst [vmem:[#allocation66_spill] sm:$0xff] %v10982_v20  ;;  %v5117_v50 = vsel %vm417_vm0, %v10874_v55, 0.0 }
 0x849   : > { %12529 = vst [vmem:[#allocation65_spill] sm:$0xff] %v10986_v36 }
 0x84f   : > { %4911 = vmax.xlane.f32.xlu2 %v4910_v44  ;;  %4917 = vmax.xlane.f32.xlu1 %v4916_v17  ;;  %v5114_v44 = vsel %vm417_vm0, %v10860_v9, 0.0 }
 0x850   : > { %4914 = vmax.xlane.f32.xlu0 %v4913_v23 }
 0x857   : > { %4920 = vmax.xlane.f32.xlu2 %v4919_v42  ;;  %4926 = vmax.xlane.f32.xlu1 %v4925_v48  ;;  %v5120_v48 = vsel %vm417_vm0, %v10882_v59, 0.0 }
 0x858   : > { %4923 = vmax.xlane.f32.xlu0 %v4922_v10  ;;  %v5126_v10 = vsel %vm417_vm0, %v10892_v32, 0.0 }
 0x85f   : > { %4929 = vmax.xlane.f32.xlu2 %v4928_v12  ;;  %4935 = vmax.xlane.f32.xlu1 %v4934_v0  ;;  %v5123_v12 = vsel %vm417_vm0, %v10878_v53, 0.0  ;;  %v12530_v0 = vmov 0.0  }
 0x860   : > { %4932 = vmax.xlane.f32.xlu0 %v4931_v33  ;;  %474 = vst.msk [vmem:[#allocation4] sm:$0xff] %vm473_vm12, %v12530_v0 }
 0x861   : > { %475 = vst.msk [vmem:[#allocation4 + $0x8] sm:$0xff] %vm473_vm12, %v12530_v0 }
 0x862   : > { %478 = vst.msk [vmem:[#allocation4 + $0x18] sm:$0xff] %vm473_vm12, %v12530_v0 }
 0x863   : > { %479 = vst.msk [vmem:[#allocation4 + $0x20] sm:$0xff] %vm473_vm12, %v12530_v0 }
 0x864   : > { %477 = vst.msk [vmem:[#allocation4 + $0x10] sm:$0x3f] %vm476_vm7, %v12530_v0 }
 0x865   : > { %480 = vst.msk [vmem:[#allocation4 + $0x28] sm:$0x3f] %vm476_vm7, %v12530_v0 }
 0x867   : > { %4938 = vmax.xlane.f32.xlu2 %v4937_v7  ;;  %4944 = vmax.xlane.f32.xlu1 %v4943_v62 }
 0x868   : > { %4941 = vmax.xlane.f32.xlu0 %v4940_v26  ;;  %v5129_v26 = vsel %vm417_vm0, %v10900_v29, 0.0 }
 0x86f   : > { %4947 = vmax.xlane.f32.xlu2 %v4946_v5  ;;  %4953 = vmax.xlane.f32.xlu1 %v4952_v15  ;;  %v5135_v5 = vsel %vm417_vm0, %v10910_v25, 0.0  ;;  %v5132_v15 = vsel %vm417_vm0, %v10896_v28, 0.0 }
 0x870   : > { %4950 = vmax.xlane.f32.xlu0 %v4949_v1 }
 0x877   : > { %4956 = vmax.xlane.f32.xlu2 %v4955_v2  ;;  %4962 = vmax.xlane.f32.xlu1 %v4961_v19  ;;  %v12335_v19 = vlaneseq }
 0x878   : > { %4959 = vmax.xlane.f32.xlu0 %v4958_v49 }
 0x87f   : > { %4965 = vmax.xlane.f32.xlu2 %v4964_v61  ;;  %5082 = vadd.xlane.f32.xlu1 %v5081_v58  ;;  %v5138_v61 = vsel %vm417_vm0, %v10918_v14, 0.0  ;;  %v5144_v58 = vsel %vm417_vm0, %v10928_v13, 0.0 }
 0x880   : > { %4968 = vmax.xlane.f32.xlu0 %v4967_v47  ;;  %v5003_v47 = vand.u32 127, %v12335_v19 }
 0x887   : > { %5085 = vadd.xlane.f32.xlu2 %v5084_v52  ;;  %5091 = vadd.xlane.f32.xlu1 %v5090_v4  ;;  %v5141_v52 = vsel %vm417_vm0, %v10914_v46, 0.0 }
 0x888   : > { %5088 = vadd.xlane.f32.xlu0 %v5087_v18 }
 0x88f   : > { %5094 = vadd.xlane.f32.xlu2 %v5093_v3  ;;  %5100 = vadd.xlane.f32.xlu1 %v5099_v37  ;;  %v11041_v3 = vadd.s32 4294967293, %v5003_v47  ;;  %v11043_v37 = vadd.s32 4294967285, %v5003_v47 }
 0x890   : > { %5097 = vadd.xlane.f32.xlu0 %v5096_v41 }
 0x897   : > { %5103 = vadd.xlane.f32.xlu2 %v5102_v63  ;;  %5109 = vadd.xlane.f32.xlu1 %v5108_v35  ;;  %v5147_v35 = vsel %vm417_vm0, %v10936_v27, 0.0 }
 0x898   : > { %5106 = vadd.xlane.f32.xlu0 %v5105_v56  ;;  %v5153_v56 = vsel %vm417_vm0, %v10946_v22, 0.0 }
 0x89f   : > { %5112 = vadd.xlane.f32.xlu2 %v5111_v60  ;;  %5118 = vadd.xlane.f32.xlu1 %v5117_v50 }
 0x8a0   : > { %5115 = vadd.xlane.f32.xlu0 %v5114_v44 }
 0x8a2   : > { %v4882_v17 = vpop.xlane.xlu2 %4881  ;;  %v4879_v23 = vpop.xlane.xlu1 %4878 }
 0x8a3   : > { %v4876_v42 = vpop.xlane.xlu0 %4875  ;;  %v5010_v60 = vperm.slane %v4882_v17, %v11041_v3  ;;  %v5007_v50 = vperm.slane %v4879_v23, %v11043_v37 }
 0x8a4   : > { %v5005_v44 = vperm.slane %v4876_v42, %v11041_v3 }
 0x8a7   : > { %5121 = vadd.xlane.f32.xlu2 %v5120_v48  ;;  %5127 = vadd.xlane.f32.xlu1 %v5126_v10  ;;  %v5150_v48 = vsel %vm417_vm0, %v10932_v24, 0.0 }
 0x8a8   : > { %5124 = vadd.xlane.f32.xlu0 %v5123_v12 }
 0x8aa   : > { %v4885_v33 = vpop.xlane.xlu2 %4884  ;;  %v4891_v7 = vpop.xlane.xlu1 %4890 }
 0x8ab   : > { %v4888_v62 = vpop.xlane.xlu0 %4887  ;;  %v5011_v63 = vperm.slane %v4885_v33, %v11043_v37  ;;  %v5014_v10 = vperm.slane %v4891_v7, %v11043_v37  ;;  %v5156_v7 = vsel %vm417_vm0, %v10954_v21, 0.0 }
 0x8ac   : > { %v5013_v12 = vperm.slane %v4888_v62, %v11041_v3  ;;  %v5162_v62 = vsel %vm417_vm0, %v10964_v11, 0.0 }
 0x8ad   : > { %v5012_v33 = vsel %vm5008_vm13, %v5011_v63, %v5010_v60 }
 0x8af   : > { %5130 = vadd.xlane.f32.xlu2 %v5129_v26  ;;  %5136 = vadd.xlane.f32.xlu1 %v5135_v5 }
 0x8b0   : > { %5133 = vadd.xlane.f32.xlu0 %v5132_v15  ;;  %v5009_v15 = vsel %vm5008_vm13, %v5007_v50, %v5005_v44 }
 0x8b2   : > { %v4894_v1 = vpop.xlane.xlu2 %4893  ;;  %v4900_v2 = vpop.xlane.xlu1 %4899 }
 0x8b3   : > { %v4897_v49 = vpop.xlane.xlu0 %4896  ;;  %v5016_v17 = vperm.slane %v4894_v1, %v11041_v3  ;;  %v5015_v1 = vsel %vm5008_vm13, %v5014_v10, %v5013_v12 }
 0x8b4   : > { %v5017_v23 = vperm.slane %v4897_v49, %v11043_v37  ;;  %v5019_v49 = vperm.slane %v4900_v2, %v11041_v3  ;;  %v5159_v2 = vsel %vm417_vm0, %v10950_v39, 0.0 }
 0x8b6   : > { %v5018_v47 = vsel %vm5008_vm13, %v5017_v23, %v5016_v17 }
 0x8b7   : > { %5139 = vadd.xlane.f32.xlu2 %v5138_v61  ;;  %5145 = vadd.xlane.f32.xlu1 %v5144_v58  ;;  %v5056_v58 = vsel %vm5055_vm14, %v5012_v33, %v5009_v15 }
 0x8b8   : > { %5142 = vadd.xlane.f32.xlu0 %v5141_v52  ;;  %v5058_v60 = vsel %vm5057_vm15, %v5015_v1, %v5056_v58 }
 0x8b9   : > { %v5060_v50 = vsel %vm5059_vm1, %v5018_v47, %v5058_v60 }
 0x8ba   : > { %v4903_v4 = vpop.xlane.xlu2 %4902  ;;  %v4909_v18 = vpop.xlane.xlu1 %4908 }
 0x8bb   : > { %v4906_v41 = vpop.xlane.xlu0 %4905  ;;  %v5020_v42 = vperm.slane %v4903_v4, %v11043_v37  ;;  %v5023_v52 = vperm.slane %v4909_v18, %v11043_v37 }
 0x8bc   : > { %v5022_v4 = vperm.slane %v4906_v41, %v11041_v3 }
 0x8bd   : > { %v5021_v63 = vsel %vm5008_vm13, %v5020_v42, %v5019_v49  ;;  %v5174_v49 = vsel %vm417_vm0, %v10986_v36, 0.0 }
 0x8be   : > { %v5062_v18 = vsel %vm5061_vm2, %v5021_v63, %v5060_v50  ;;  %v5024_v41 = vsel %vm5008_vm13, %v5023_v52, %v5022_v4 }
 0x8bf   : > { %5148 = vadd.xlane.f32.xlu2 %v5147_v35  ;;  %5154 = vadd.xlane.f32.xlu1 %v5153_v56  ;;  %v5064_v23 = vsel %vm5063_vm3, %v5024_v41, %v5062_v18 }
 0x8c0   : > { %5151 = vadd.xlane.f32.xlu0 %v5150_v48 }
 0x8c2   : > { %v4912_v26 = vpop.xlane.xlu2 %4911  ;;  %v4918_v5 = vpop.xlane.xlu1 %4917 }
 0x8c3   : > { %v4915_v61 = vpop.xlane.xlu0 %4914  ;;  %v5025_v35 = vperm.slane %v4912_v26, %v11041_v3  ;;  %v5028_v12 = vperm.slane %v4918_v5, %v11041_v3  ;;  %v5168_v5 = vsel %vm417_vm0, %v10968_v34, 0.0 }
 0x8c4   : > { %v5026_v56 = vperm.slane %v4915_v61, %v11043_v37  ;;  %v5165_v61 = vsel %vm417_vm0, %v10972_v40, 0.0 }
 0x8c6   : > { %v5027_v44 = vsel %vm5008_vm13, %v5026_v56, %v5025_v35  ;;  %v5332_v35 = vstv %s11098_s16  ;;  %s11208_s16 = sld [smem:[#allocation15 + $0x12]] }
 0x8c7   : > { %5157 = vadd.xlane.f32.xlu2 %v5156_v7  ;;  %5163 = vadd.xlane.f32.xlu1 %v5162_v62  ;;  %v5066_v42 = vsel %vm5065_vm4, %v5027_v44, %v5064_v23  ;;  %v5171_v7 = vsel %vm417_vm0, %v10982_v20, 0.0 }
 0x8c8   : > { %5160 = vadd.xlane.f32.xlu0 %v5159_v2 }
 0x8ca   : > { %v4921_v48 = vpop.xlane.xlu2 %4920  ;;  %v4927_v10 = vpop.xlane.xlu1 %4926 }
 0x8cb   : > { %v5029_v33 = vperm.slane %v4921_v48, %v11043_v37  ;;  %v4924_v17 = vpop.xlane.xlu0 %4923  ;;  %v5032_v44 = vperm.slane %v4927_v10, %v11043_v37 }
 0x8cc   : > { %v5031_v48 = vperm.slane %v4924_v17, %v11041_v3 }
 0x8cd   : > { %v5030_v26 = vsel %vm5008_vm13, %v5029_v33, %v5028_v12 }
 0x8ce   : > { %v5068_v15 = vsel %vm5067_vm5, %v5030_v26, %v5066_v42  ;;  %v5033_v10 = vsel %vm5008_vm13, %v5032_v44, %v5031_v48 }
 0x8cf   : > { %5079 = vst.msk [vmem:[#allocation4 + $0x3] sm:$0xff] %vm5078_vm6, %v5068_v15  ;;  %5166 = vadd.xlane.f32.xlu2 %v5165_v61  ;;  %5172 = vadd.xlane.f32.xlu1 %v5171_v7 }
 0x8d0   : > { %5169 = vadd.xlane.f32.xlu0 %v5168_v5 }
 0x8d2   : > { %v4930_v62 = vpop.xlane.xlu2 %4929  ;;  %v4936_v58 = vpop.xlane.xlu1 %4935 }
 0x8d3   : > { %v4933_v1 = vpop.xlane.xlu0 %4932  ;;  %v5034_v18 = vperm.slane %v4930_v62, %v11041_v3  ;;  %v5037_v12 = vperm.slane %v4936_v58, %v11041_v3 }
 0x8d4   : > { %v5035_v41 = vperm.slane %v4933_v1, %v11043_v37 }
 0x8d6   : > { %v11101_v63 = vld [vmem:[#allocation4] sm:$0xff]  ;;  %v5036_v33 = vsel %vm5008_vm13, %v5035_v41, %v5034_v18 }
 0x8d7   : > { %5175 = vadd.xlane.f32.xlu2 %v5174_v49  ;;  %v5333_v2 = vmul.f32 %v5332_v35, %v11101_v63  ;;  %v5069_v58 = vsel %vm5055_vm14, %v5036_v33, %v5033_v10  ;;  %v11532_v32 = vld [vmem:[#allocation4 + $0x3] sm:$0xff] }
 0x8da   : > { %v4939_v47 = vpop.xlane.xlu2 %4938  ;;  %v4945_v52 = vpop.xlane.xlu1 %4944 }
 0x8db   : > { %v4942_v4 = vpop.xlane.xlu0 %4941  ;;  %v5038_v0 = vperm.slane %v4939_v47, %v11043_v37  ;;  %v5041_v23 = vperm.slane %v4945_v52, %v11043_v37 }
 0x8dc   : > { %v5040_v42 = vperm.slane %v4942_v4, %v11041_v3 }
 0x8dd   : > { %v5039_v61 = vsel %vm5008_vm13, %v5038_v0, %v5037_v12  ;;  %v7802_v12 = vmov 32.0  }
 0x8de   : > { %v5070_v1 = vsel %vm5057_vm15, %v5039_v61, %v5069_v58  ;;  %v5042_v49 = vsel %vm5008_vm13, %v5041_v23, %v5040_v42  ;;  %7508 = vrcp.f32 %v7802_v12  ;;  %v5388_v58 = vstv %s11136_s9  ;;  %s11232_s9 = sld [smem:[#allocation15 + $0x16]] }
 0x8e2   : > { %v4948_v56 = vpop.xlane.xlu2 %4947  ;;  %v4954_v60 = vpop.xlane.xlu1 %4953 }
 0x8e3   : > { %v4951_v50 = vpop.xlane.xlu0 %4950  ;;  %v5043_v7 = vperm.slane %v4948_v56, %v11041_v3  ;;  %v5046_v47 = vperm.slane %v4954_v60, %v11041_v3 }
 0x8e4   : > { %5337 = vrot.lane.b32.xlu0 %v5333_v2, %s7801_s24  ;;  %v5044_v5 = vperm.slane %v4951_v50, %v11043_v37  ;;  %v5071_v50 = vsel %vm5059_vm1, %v5042_v49, %v5070_v1  ;;  %v7509_v61 = vpop.eup %7508  ;;  %v5360_v1 = vstv %s11139_s10  ;;  %s11236_s10 = sld [smem:[#allocation15]] }
 0x8e5   : > { %v5178_v10 = vmul.f32 32.0, %v7509_v61  ;;  %vm5182_vm8 = vweird.f32 %v7509_v61 }
 0x8e6   : > { %v5045_v52 = vsel %vm5008_vm13, %v5044_v5, %v5043_v7 }
 0x8e7   : > { %v5072_v18 = vsel %vm5061_vm2, %v5045_v52, %v5071_v50  ;;  %v5179_v49 = vsub.f32 1.0, %v5178_v10 }
 0x8ea   : > { %v4957_v26 = vpop.xlane.xlu2 %4956  ;;  %v4963_v15 = vpop.xlane.xlu1 %4962 }
 0x8eb   : > { %v4960_v62 = vpop.xlane.xlu0 %4959  ;;  %v5047_v17 = vperm.slane %v4957_v26, %v11043_v37  ;;  %v5050_v4 = vperm.slane %v4963_v15, %v11043_v37 }
 0x8ec   : > { %v5049_v56 = vperm.slane %v4960_v62, %v11041_v3 }
 0x8ed   : > { %v5048_v2 = vsel %vm5008_vm13, %v5047_v17, %v5046_v47 }
 0x8ee   : > { %v5073_v44 = vsel %vm5063_vm3, %v5048_v2, %v5072_v18  ;;  %v5051_v48 = vsel %vm5008_vm13, %v5050_v4, %v5049_v56  ;;  %v5180_v18 = vmul.f32 %v7509_v61, %v5179_v49  ;;  %v5472_v49 = vstv %s11155_s3  ;;  %s11255_s3 = sld [smem:[#allocation15 + $0x1a]] }
 0x8ef   : > { %v5074_v42 = vsel %vm5065_vm4, %v5051_v48, %v5073_v44  ;;  %v5389_v48 = vmul.f32 %v5388_v58, %v11101_v63 }
 0x8f0   : > { %v5181_v44 = vadd.f32 %v7509_v61, %v5180_v18 }
 0x8f2   : > { %v4966_v41 = vpop.xlane.xlu2 %4965  ;;  %v5083_v0 = vpop.xlane.xlu1 %5082 }
 0x8f3   : > { %v5052_v60 = vperm.slane %v4966_v41, %v11041_v3  ;;  %v4969_v33 = vpop.xlane.xlu0 %4968  ;;  %v5416_v41 = vstv %s11142_s18  ;;  %s11242_s18 = sld [smem:[#allocation15 + $0x1]] }
 0x8f4   : > { %v5053_v23 = vperm.slane %v4969_v33, %v11043_v37 }
 0x8f6   : > { %v5054_v26 = vsel %vm5008_vm13, %v5053_v23, %v5052_v60  ;;  %v5361_v60 = vmul.f32 %v5360_v1, %v11101_v63 }
 0x8f7   : > { %v5075_v15 = vsel %vm5067_vm5, %v5054_v26, %v5074_v42  ;;  %v11167_v42 = vsel %vm5182_vm8, %v7509_v61, %v5181_v44 }
 0x8f8   : > { %5080 = vst.msk [vmem:[#allocation4 + $0xb] sm:$0xff] %vm5078_vm6, %v5075_v15 }
 0x8fa   : > { %v5086_v7 = vpop.xlane.xlu2 %5085  ;;  %v5092_v5 = vpop.xlane.xlu1 %5091 }
 0x8fb   : > { %v5089_v62 = vpop.xlane.xlu0 %5088  ;;  %v5185_v26 = vmul.f32 %v11167_v42, %v5086_v7  ;;  %v5187_v15 = vmul.f32 %v11167_v42, %v5092_v5 }
 0x8fc   : > { %v5186_v10 = vmul.f32 %v11167_v42, %v5089_v62 }
 0x8fd   : > { %v5249_v7 = vperm.slane %v5185_v26, %v11043_v37  ;;  %v5252_v62 = vperm.slane %v5187_v15, %v11043_v37 }
 0x8ff   : > { %v11144_v17 = vld [vmem:[#allocation4 + $0x8] sm:$0xff] }
 0x900   : > { %v5390_v47 = vmul.f32 %v5388_v58, %v11144_v17  ;;  %v5362_v52 = vmul.f32 %v5360_v1, %v11144_v17  ;;  %v5334_v4 = vmul.f32 %v5332_v35, %v11144_v17  ;;  %v5417_v35 = vmul.f32 %v5416_v41, %v11101_v63  ;;  %v11554_v31 = vld [vmem:[#allocation4 + $0xb] sm:$0xff] }
 0x901   : > { %v5474_v61 = vmul.f32 %v5472_v49, %v11144_v17  ;;  %v5418_v5 = vmul.f32 %v5416_v41, %v11144_v17 }
 0x902   : > { %5395 = vrot.lane.b32.xlu2 %v5390_v47, %s7803_s20  ;;  %5367 = vrot.lane.b32.xlu0 %v5362_v52, %s7804_s14  ;;  %v5095_v56 = vpop.xlane.xlu2 %5094  ;;  %v5101_v2 = vpop.xlane.xlu1 %5100  ;;  %v5444_v47 = vstv %s11157_s23  ;;  %v5184_v52 = vmul.f32 %v11167_v42, %v5083_v0  ;;  %s11257_s23 = sld [smem:[#allocation15 + $0x18]] }
 0x903   : > { %5339 = vrot.lane.b32.xlu1 %v5334_v4, %s7801_s24  ;;  %v5098_v50 = vpop.xlane.xlu0 %5097  ;;  %v5188_v58 = vmul.f32 %v11167_v42, %v5095_v56  ;;  %v5446_v18 = vmul.f32 %v5444_v47, %v11144_v17  ;;  %v5251_v56 = vperm.slane %v5186_v10, %v11041_v3 }
 0x904   : > { %v5189_v1 = vmul.f32 %v11167_v42, %v5098_v50  ;;  %v5190_v50 = vmul.f32 %v11167_v42, %v5101_v2  ;;  %v5248_v26 = vperm.slane %v5184_v52, %v11041_v3 }
 0x90a   : > { %5421 = vrot.lane.b32.xlu2 %v5417_v35, %s7805_s1  ;;  %5393 = vrot.lane.b32.xlu0 %v5389_v48, %s7803_s20  ;;  %v5104_v12 = vpop.xlane.xlu2 %5103  ;;  %v5110_v33 = vpop.xlane.xlu1 %5109  ;;  %v5516_v35 = vstv %s11164_s13  ;;  %v5254_v48 = vperm.slane %v5188_v58, %v11041_v3  ;;  %v5250_v58 = vsel %vm5008_vm13, %v5249_v7, %v5248_v26  ;;  %s11277_s13 = sld [smem:[#allocation15 + $0x1e]] }
 0x90b   : > { %5365 = vrot.lane.b32.xlu1 %v5361_v60, %s7804_s14  ;;  %v5107_v23 = vpop.xlane.xlu0 %5106  ;;  %v5191_v4 = vmul.f32 %v11167_v42, %v5104_v12  ;;  %v5255_v60 = vperm.slane %v5189_v1, %v11043_v37  ;;  %v5193_v41 = vmul.f32 %v11167_v42, %v5110_v33  ;;  %v5253_v1 = vsel %vm5008_vm13, %v5252_v62, %v5251_v56 }
 0x90c   : > { %v5192_v12 = vmul.f32 %v11167_v42, %v5107_v23  ;;  %v5257_v33 = vperm.slane %v5190_v50, %v11041_v3  ;;  %v5473_v56 = vmul.f32 %v5472_v49, %v11101_v63  ;;  %v5296_v50 = vsel %vm5055_vm14, %v5253_v1, %v5250_v58 }
 0x90d   : > { %v5258_v15 = vperm.slane %v5191_v4, %v11043_v37  ;;  %v5256_v23 = vsel %vm5008_vm13, %v5255_v60, %v5254_v48  ;;  %v5261_v52 = vperm.slane %v5193_v41, %v11043_v37  ;;  %v5445_v60 = vmul.f32 %v5444_v47, %v11101_v63 }
 0x90e   : > { %v5260_v4 = vperm.slane %v5192_v12, %v11041_v3  ;;  %v5297_v41 = vsel %vm5057_vm15, %v5256_v23, %v5296_v50  ;;  %v11230_v23 = vld [vmem:[#allocation4 + $0x9] sm:$0xff] }
 0x912   : > { %5479 = vrot.lane.b32.xlu2 %v5474_v61, %s7806_s25  ;;  %5451 = vrot.lane.b32.xlu0 %v5446_v18, %s7807_s26  ;;  %v5113_v0 = vpop.xlane.xlu2 %5112  ;;  %v5119_v44 = vpop.xlane.xlu1 %5118  ;;  %v11197_v18 = vld [vmem:[#allocation4 + $0x1] sm:$0xff] }
 0x913   : > { %5423 = vrot.lane.b32.xlu1 %v5418_v5, %s7805_s1  ;;  %v5116_v2 = vpop.xlane.xlu0 %5115  ;;  %v5194_v10 = vmul.f32 %v11167_v42, %v5113_v0  ;;  %v5517_v5 = vmul.f32 %v5516_v35, %v11197_v18  ;;  %v5259_v0 = vsel %vm5008_vm13, %v5258_v15, %v5257_v33  ;;  %v5196_v48 = vmul.f32 %v11167_v42, %v5119_v44 }
 0x914   : > { %v5195_v61 = vmul.f32 %v11167_v42, %v5116_v2  ;;  %v5298_v26 = vsel %vm5059_vm1, %v5259_v0, %v5297_v41  ;;  %v5262_v15 = vsel %vm5008_vm13, %v5261_v52, %v5260_v4 }
 0x915   : > { %v5263_v7 = vperm.slane %v5194_v10, %v11041_v3  ;;  %v5266_v58 = vperm.slane %v5196_v48, %v11041_v3  ;;  %v5299_v52 = vsel %vm5061_vm2, %v5262_v15, %v5298_v26 }
 0x916   : > { %v5264_v62 = vperm.slane %v5195_v61, %v11043_v37 }
 0x918   : > { %v5265_v10 = vsel %vm5008_vm13, %v5264_v62, %v5263_v7  ;;  %v5572_v7 = vstv %s11202_s19  ;;  %v5544_v62 = vstv %s11208_s16  ;;  %s11290_s19 = sld [smem:[#allocation15 + $0x3]] }
 0x919   : > { %v5574_v48 = vmul.f32 %v5572_v7, %v11230_v23  ;;  %s11292_s16 = sld [smem:[#allocation15 + $0x20]] }
 0x91a   : > { %5521 = vrot.lane.b32.xlu2 %v5517_v5, %s7801_s24  ;;  %5477 = vrot.lane.b32.xlu0 %v5473_v56, %s7806_s25  ;;  %v5122_v12 = vpop.xlane.xlu2 %5121  ;;  %v5128_v2 = vpop.xlane.xlu1 %5127  ;;  %v5300_v5 = vsel %vm5063_vm3, %v5265_v10, %v5299_v52  ;;  %v5573_v10 = vmul.f32 %v5572_v7, %v11197_v18  ;;  %v5656_v7 = vstv %s11255_s3  ;;  %s11366_s3 = sld [smem:[#allocation15 + $0x9]] }
 0x91b   : > { %5449 = vrot.lane.b32.xlu1 %v5445_v60, %s7807_s26  ;;  %v5197_v49 = vmul.f32 %v11167_v42, %v5122_v12  ;;  %v5199_v47 = vmul.f32 %v11167_v42, %v5128_v2  ;;  %v5125_v44 = vpop.xlane.xlu0 %5124  ;;  %v5546_v60 = vmul.f32 %v5544_v62, %v11230_v23  ;;  %v5518_v12 = vmul.f32 %v5516_v35, %v11230_v23 }
 0x91c   : > { %v5198_v61 = vmul.f32 %v11167_v42, %v5125_v44  ;;  %v12336_v35 = vstv %s11242_s18 }
 0x91d   : > { %v5267_v1 = vperm.slane %v5197_v49, %v11043_v37  ;;  %v5270_v33 = vperm.slane %v5199_v47, %v11043_v37  ;;  %v5600_v49 = vstv %s11232_s9  ;;  %v12337_v47 = vstv %s11236_s10  ;;  %s11308_s9 = sld [smem:[#allocation15 + $0x5]] }
 0x91e   : > { %v5269_v4 = vperm.slane %v5198_v61, %v11041_v3  ;;  %v5601_v44 = vmul.f32 %v5600_v49, %v11197_v18  ;;  %v5545_v61 = vmul.f32 %v5544_v62, %v11197_v18  ;;  %v5319_v52 = vmul.f32 %v12337_v47, %v11101_v63 }
 0x91f   : > { %v5268_v0 = vsel %vm5008_vm13, %v5267_v1, %v5266_v58  ;;  %v5628_v62 = vstv %s11257_s23  ;;  %v5728_v47 = vstv %s11292_s16  ;;  %s7238_s23 = sld [smem:[#allocation15 + $0xb]] }
 0x920   : > { %v5301_v56 = vsel %vm5065_vm4, %v5268_v0, %v5300_v5  ;;  %v5271_v50 = vsel %vm5008_vm13, %v5270_v33, %v5269_v4  ;;  %s11384_s16 = sld [smem:[#allocation15 + $0x11]] }
 0x921   : > { %v5302_v41 = vsel %vm5067_vm5, %v5271_v50, %v5301_v56  ;;  %v5658_v56 = vmul.f32 %v5656_v7, %v11230_v23  ;;  %v5630_v50 = vmul.f32 %v5628_v62, %v11230_v23 }
 0x922   : > { %5313 = vst.msk [vmem:[#allocation4 + $0x1b] sm:$0xff] %vm5078_vm6, %v5302_v41  ;;  %5579 = vrot.lane.b32.xlu2 %v5574_v48, %s7803_s20  ;;  %5551 = vrot.lane.b32.xlu0 %v5546_v60, %s7804_s14  ;;  %v5131_v2 = vpop.xlane.xlu2 %5130  ;;  %v5137_v26 = vpop.xlane.xlu1 %5136  ;;  %v5602_v48 = vmul.f32 %v5600_v49, %v11230_v23  ;;  %v5657_v49 = vmul.f32 %v5656_v7, %v11197_v18 }
 0x923   : > { %5523 = vrot.lane.b32.xlu1 %v5518_v12, %s7801_s24  ;;  %v5134_v15 = vpop.xlane.xlu0 %5133  ;;  %v11287_v12 = vld [vmem:[#allocation4 + $0x2] sm:$0xff]  ;;  %v5200_v19 = vmul.f32 %v11167_v42, %v5131_v2 }
 0x924   : > { %v5201_v7 = vmul.f32 %v11167_v42, %v5134_v15 }
 0x925   : > { %v5272_v34 = vperm.slane %v5200_v19, %v11041_v3 }
 0x929   : > { %v11264_v58 = vld [vmem:[#allocation4 + $0x18] sm:$0xff] }
 0x92a   : > { %5605 = vrot.lane.b32.xlu2 %v5601_v44, %s7805_s1  ;;  %5577 = vrot.lane.b32.xlu0 %v5573_v10, %s7803_s20  ;;  %v5140_v1 = vpop.xlane.xlu2 %5139  ;;  %v5146_v33 = vpop.xlane.xlu1 %5145  ;;  %v5327_v4 = vmul.f32 %v12336_v35, %v11264_v58  ;;  %v5700_v44 = vstv %s11277_s13  ;;  %s7234_s13 = sld [smem:[#allocation15 + $0x7]]  ;;  %v11572_v6 = vld [vmem:[#allocation4 + $0x1b] sm:$0xff] }
 0x92b   : > { %5549 = vrot.lane.b32.xlu1 %v5545_v61, %s7804_s14  ;;  %v5143_v5 = vpop.xlane.xlu0 %5142  ;;  %v5701_v10 = vmul.f32 %v5700_v44, %v11287_v12  ;;  %v5629_v61 = vmul.f32 %v5628_v62, %v11197_v18  ;;  %v5205_v62 = vmul.f32 %v11167_v42, %v5146_v33 }
 0x92c   : > { %v11275_v0 = vadd.f32 %v5327_v4, %v5319_v52  ;;  %v5203_v52 = vmul.f32 %v11167_v42, %v5140_v1  ;;  %v11305_v1 = vld [vmem:[#allocation4 + $0xa] sm:$0xff] }
 0x92d   : > { %v5730_v33 = vmul.f32 %v5728_v47, %v11305_v1 }
 0x932   : > { %5663 = vrot.lane.b32.xlu2 %v5658_v56, %s7806_s25  ;;  %5635 = vrot.lane.b32.xlu0 %v5630_v50, %s7807_s26  ;;  %v5149_v63 = vpop.xlane.xlu2 %5148  ;;  %v5155_v60 = vpop.xlane.xlu1 %5154  ;;  %v5202_v50 = vmul.f32 %v11167_v42, %v5137_v26 }
 0x933   : > { %5607 = vrot.lane.b32.xlu1 %v5602_v48, %s7805_s1  ;;  %v5152_v41 = vpop.xlane.xlu0 %5151  ;;  %v5206_v35 = vmul.f32 %v11167_v42, %v5149_v63  ;;  %v5702_v63 = vmul.f32 %v5700_v44, %v11305_v1 }
 0x934   : > { %v5207_v26 = vmul.f32 %v11167_v42, %v5152_v41  ;;  %v5275_v2 = vperm.slane %v5202_v50, %v11041_v3 }
 0x935   : > { %v5281_v19 = vperm.slane %v5206_v35, %v11041_v3 }
 0x93a   : > { %5705 = vrot.lane.b32.xlu2 %v5701_v10, %s7801_s24  ;;  %5661 = vrot.lane.b32.xlu0 %v5657_v49, %s7806_s25  ;;  %v5158_v4 = vpop.xlane.xlu2 %5157  ;;  %v5164_v48 = vpop.xlane.xlu1 %5163  ;;  %v12340_v10 = vstv %s11290_s19  ;;  %v5276_v49 = vperm.slane %v5203_v52, %v11043_v37  ;;  %v5273_v52 = vperm.slane %v5201_v7, %v11043_v37  ;;  %v5282_v7 = vperm.slane %v5207_v26, %v11043_v37 }
 0x93b   : > { %5633 = vrot.lane.b32.xlu1 %v5629_v61, %s7807_s26  ;;  %v5161_v56 = vpop.xlane.xlu0 %5160  ;;  %v5204_v61 = vmul.f32 %v11167_v42, %v5143_v5  ;;  %v5209_v15 = vmul.f32 %v11167_v42, %v5158_v4  ;;  %v5347_v36 = vmul.f32 %v12340_v10, %v11264_v58  ;;  %v5279_v5 = vperm.slane %v5205_v62, %v11043_v37 }
 0x93c   : > { %v5277_v41 = vsel %vm5008_vm13, %v5276_v49, %v5275_v2  ;;  %v5208_v4 = vmul.f32 %v11167_v42, %v5155_v60  ;;  %v5211_v62 = vmul.f32 %v11167_v42, %v5164_v48  ;;  %v5210_v44 = vmul.f32 %v11167_v42, %v5161_v56 }
 0x93d   : > { %v5278_v50 = vperm.slane %v5204_v61, %v11041_v3  ;;  %v5285_v61 = vperm.slane %v5209_v15, %v11043_v37  ;;  %v5283_v56 = vsel %vm5008_vm13, %v5282_v7, %v5281_v19 }
 0x93e   : > { %v5284_v48 = vperm.slane %v5208_v4, %v11041_v3  ;;  %v5287_v15 = vperm.slane %v5210_v44, %v11041_v3 }
 0x93f   : > { %v5280_v26 = vsel %vm5008_vm13, %v5279_v5, %v5278_v50  ;;  %v5729_v50 = vmul.f32 %v5728_v47, %v11287_v12 }
 0x942   : > { %5735 = vrot.lane.b32.xlu0 %v5730_v33, %s7804_s14  ;;  %5351 = vrot.lane.b32.xlu2 %v5347_v36, %s7801_s24  ;;  %v5167_v10 = vpop.xlane.xlu2 %5166  ;;  %v5274_v36 = vsel %vm5008_vm13, %v5273_v52, %v5272_v34  ;;  %v5374_v33 = vstv %s11308_s9  ;;  %v5173_v20 = vpop.xlane.xlu1 %5172  ;;  %s7252_s9 = sld [smem:[#allocation15 + $0x19]] }
 0x943   : > { %5707 = vrot.lane.b32.xlu1 %v5702_v63, %s7801_s24  ;;  %v5170_v49 = vpop.xlane.xlu0 %5169  ;;  %v5212_v60 = vmul.f32 %v11167_v42, %v5167_v10  ;;  %v5303_v35 = vsel %vm5055_vm14, %v5277_v41, %v5274_v36  ;;  %v5288_v63 = vperm.slane %v5211_v62, %v11043_v37  ;;  %v5286_v10 = vsel %vm5008_vm13, %v5285_v61, %v5284_v48 }
 0x944   : > { %v5213_v2 = vmul.f32 %v11167_v42, %v5170_v49  ;;  %v5375_v52 = vmul.f32 %v5374_v33, %v11264_v58  ;;  %v5304_v41 = vsel %vm5057_vm15, %v5280_v26, %v5303_v35  ;;  %v5214_v5 = vmul.f32 %v11167_v42, %v5173_v20 }
 0x945   : > { %v5290_v49 = vperm.slane %v5212_v60, %v11041_v3  ;;  %v5305_v4 = vsel %vm5059_vm1, %v5283_v56, %v5304_v41  ;;  %v5289_v62 = vsel %vm5008_vm13, %v5288_v63, %v5287_v15  ;;  %v12532_v63 = vstv %s11236_s10  ;;  %s7246_s10 = sld [smem:[#allocation15 + $0x13]] }
 0x946   : > { %v5291_v34 = vperm.slane %v5213_v2, %v11043_v37  ;;  %v5306_v7 = vsel %vm5061_vm2, %v5286_v10, %v5305_v4  ;;  %v5293_v20 = vperm.slane %v5214_v5, %v11041_v3  ;;  %v5430_v3 = vstv %s11366_s3  ;;  %s7248_s3 = sld [smem:[#allocation15 + $0x15]] }
 0x947   : > { %v5307_v60 = vsel %vm5063_vm3, %v5289_v62, %v5306_v7  ;;  %v5320_v15 = vmul.f32 %v12532_v63, %v11144_v17  ;;  %v12533_v10 = vstv %s11242_s18  ;;  %v5458_v41 = vstv %s7238_s23  ;;  %s7240_s18 = sld [smem:[#allocation15 + $0xd]] }
 0x948   : > { %v5292_v61 = vsel %vm5008_vm13, %v5291_v34, %v5290_v49  ;;  %v5402_v5 = vstv %s7234_s13  ;;  %v5530_v7 = vstv %s11384_s16  ;;  %s11433_s23 = sld [smem:[#allocation15 + $0x1f]] }
 0x949   : > { %v5308_v2 = vsel %vm5065_vm4, %v5292_v61, %v5307_v60  ;;  %v5403_v17 = vmul.f32 %v5402_v5, %v11264_v58  ;;  %v5431_v61 = vmul.f32 %v5430_v3, %v11264_v58  ;;  %v11405_v60 = vld [vmem:[#allocation4 + $0x19] sm:$0xff]  ;;  %s7260_s13 = sld [smem:[#allocation15 + $0x21]] }
 0x94a   : > { %5379 = vrot.lane.b32.xlu2 %v5375_v52, %s7804_s14  ;;  %v5176_v19 = vpop.xlane.xlu2 %5175  ;;  %s7254_s16 = sld [smem:[#allocation15 + $0x1b]] }
 0x94b   : > { %5733 = vrot.lane.b32.xlu1 %v5729_v50, %s7804_s14  ;;  %v5215_v44 = vmul.f32 %v11167_v42, %v5176_v19 }
 0x94d   : > { %v5294_v47 = vperm.slane %v5215_v44, %v11043_v37  ;;  %v12531_v37 = vstv %s11290_s19  ;;  %s11407_s19 = sld [smem:[#allocation15 + $0x17]] }
 0x94f   : > { %v5295_v36 = vsel %vm5008_vm13, %v5294_v47, %v5293_v20 }
 0x950   : > { %v5309_v35 = vsel %vm5067_vm5, %v5295_v36, %v5308_v2  ;;  %v5558_v2 = vstv %s7246_s10  ;;  %v5486_v36 = vstv %s7240_s18  ;;  %s7261_s10 = sld [smem:[#allocation15 + $0x22]] }
 0x951   : > { %5314 = vst.msk [vmem:[#allocation4 + $0x23] sm:$0xff] %vm5078_vm6, %v5309_v35  ;;  %v5559_v35 = vmul.f32 %v5558_v2, %v11405_v60  ;;  %s7263_s18 = sld [smem:[#allocation15 + $0x24]] }
 0x953   : > { %v5614_v63 = vstv %s11407_s19  ;;  %s7262_s19 = sld [smem:[#allocation15 + $0x23]] }
 0x956   : > { %v11403_v47 = vpop.permute.xlu0 %5337 }
 0x957   : > { %v5343_v16 = vadd.f32 %v11403_v47, %v11275_v0 }
 0x958   : > { %v5324_v42 = vld [vmem:[#allocation4 + $0x20] sm:$0xff] }
 0x959   : > { %v5432_v26 = vmul.f32 %v5430_v3, %v5324_v42  ;;  %v5376_v48 = vmul.f32 %v5374_v33, %v5324_v42  ;;  %v5348_v56 = vmul.f32 %v12531_v37, %v5324_v42  ;;  %v5328_v49 = vmul.f32 %v12533_v10, %v5324_v42  ;;  %v11393_v19 = vld [vmem:[#allocation4 + $0x21] sm:$0xff] }
 0x95a   : > { %v5459_v33 = vmul.f32 %v5458_v41, %v11264_v58  ;;  %v5404_v50 = vmul.f32 %v5402_v5, %v5324_v42  ;;  %v5532_v62 = vmul.f32 %v5530_v7, %v11393_v19  ;;  %v5460_v44 = vmul.f32 %v5458_v41, %v5324_v42  ;;  %v11552_v28 = vld [vmem:[#allocation4 + $0x23] sm:$0xff] }
 0x95b   : > { %5437 = vrot.lane.b32.xlu2 %v5432_v26, %s7805_s1  ;;  %5381 = vrot.lane.b32.xlu1 %v5376_v48, %s7804_s14  ;;  %v11382_v52 = vadd.f32 %v5328_v49, %v5320_v15  ;;  %v5487_v3 = vmul.f32 %v5486_v36, %v11264_v58  ;;  %v5488_v26 = vmul.f32 %v5486_v36, %v5324_v42  ;;  %v5642_v41 = vstv %s7252_s9  ;;  %s7264_s9 = sld [smem:[#allocation15 + $0x25]] }
 0x95c   : > { %v11379_v34 = vpop.permute.xlu2 %5395  ;;  %5353 = vrot.lane.b32.xlu0 %v5348_v56, %s7801_s24  ;;  %v5616_v15 = vmul.f32 %v5614_v63, %v11393_v19  ;;  %v5560_v58 = vmul.f32 %v5558_v2, %v11393_v19  ;;  %v5531_v42 = vmul.f32 %v5530_v7, %v11405_v60  ;;  %v5586_v5 = vstv %s7248_s3  ;;  %s7265_s3 = sld [smem:[#allocation15 + $0x26]] }
 0x95d   : > { %v5588_v7 = vmul.f32 %v5586_v5, %v11393_v19  ;;  %v5714_v2 = vstv %s11433_s23  ;;  %v5770_v22 = vstv %s7262_s19  ;;  %s7266_s23 = sld [smem:[#allocation15 + $0x27]] }
 0x95e   : > { %s11548_s19 = sld [smem:[#allocation15 + $0x2e]] }
 0x963   : > { %5463 = vrot.lane.b32.xlu2 %v5459_v33, %s7807_s26  ;;  %5407 = vrot.lane.b32.xlu1 %v5403_v17, %s7803_s20  ;;  %v5643_v17 = vmul.f32 %v5642_v41, %v11405_v60 }
 0x964   : > { %v11390_v4 = vpop.permute.xlu2 %5421  ;;  %5409 = vrot.lane.b32.xlu0 %v5404_v50, %s7803_s20  ;;  %v5587_v50 = vmul.f32 %v5586_v5, %v11405_v60  ;;  %v5670_v5 = vstv %s7254_s16  ;;  %s11516_s16 = sld [smem:[#allocation15 + $0x2c]]  ;;  %v5912_v55 = vstv %s11548_s19 }
 0x965   : > { %s11630_s19 = sld [smem:[#allocation15 + $0x34]] }
 0x96a   : > { %v5884_v11 = vstv %s11516_s16  ;;  %s11604_s16 = sld [smem:[#allocation15 + $0xe]] }
 0x96b   : > { %5537 = vrot.lane.b32.xlu2 %v5532_v62, %s7801_s24  ;;  %5465 = vrot.lane.b32.xlu1 %v5460_v44, %s7807_s26 }
 0x96c   : > { %v11400_v20 = vpop.permute.xlu2 %5479  ;;  %5435 = vrot.lane.b32.xlu0 %v5431_v61, %s7805_s1  ;;  %v11445_v61 = vld [vmem:[#allocation4 + $0x22] sm:$0xff] }
 0x96d   : > { %v5716_v36 = vmul.f32 %v5714_v2, %v11445_v61 }
 0x973   : > { %5563 = vrot.lane.b32.xlu2 %v5559_v35, %s7804_s14  ;;  %5491 = vrot.lane.b32.xlu1 %v5487_v3, %s7806_s25  ;;  %v5644_v35 = vmul.f32 %v5642_v41, %v11393_v19 }
 0x974   : > { %v11413_v48 = vpop.permute.xlu2 %5521  ;;  %5493 = vrot.lane.b32.xlu0 %v5488_v26, %s7806_s25  ;;  %v11418_v56 = vpop.permute.xlu0 %5367  ;;  %v5615_v26 = vmul.f32 %v5614_v63, %v11405_v60  ;;  %v5672_v63 = vmul.f32 %v5670_v5, %v11393_v19 }
 0x975   : > { %v11416_v37 = vpop.permute.xlu1 %5339 }
 0x976   : > { %v5344_v45 = vadd.f32 %v11416_v37, %v11382_v52 }
 0x97b   : > { %5621 = vrot.lane.b32.xlu2 %v5616_v15, %s7805_s1  ;;  %5565 = vrot.lane.b32.xlu1 %v5560_v58, %s7804_s14  ;;  %v11458_v58 = vld [vmem:[#allocation4 + $0x1a] sm:$0xff] }
 0x97c   : > { %v11426_v10 = vpop.permute.xlu2 %5579  ;;  %5535 = vrot.lane.b32.xlu0 %v5531_v42, %s7801_s24  ;;  %v11431_v33 = vpop.permute.xlu0 %5393  ;;  %v5742_v42 = vstv %s7260_s13  ;;  %v5771_v13 = vmul.f32 %v5770_v22, %v11458_v58  ;;  %s7267_s13 = sld [smem:[#allocation15 + $0x28]] }
 0x97d   : > { %v11429_v49 = vpop.permute.xlu1 %5365  ;;  %v5743_v41 = vmul.f32 %v5742_v42, %v11458_v58  ;;  %v5744_v40 = vmul.f32 %v5742_v42, %v11445_v61 }
 0x983   : > { %5647 = vrot.lane.b32.xlu2 %v5643_v17, %s7807_s26  ;;  %5591 = vrot.lane.b32.xlu1 %v5587_v50, %s7803_s20  ;;  %v5671_v50 = vmul.f32 %v5670_v5, %v11405_v60  ;;  %v5715_v5 = vmul.f32 %v5714_v2, %v11458_v58 }
 0x984   : > { %5593 = vrot.lane.b32.xlu0 %v5588_v7, %s7803_s20  ;;  %v11441_v62 = vpop.permute.xlu2 %5605  ;;  %v11450_v3 = vpop.permute.xlu0 %5451 }
 0x985   : > { %v11443_v44 = vpop.permute.xlu1 %5423 }
 0x98b   : > { %5721 = vrot.lane.b32.xlu2 %v5716_v36, %s7801_s24  ;;  %5649 = vrot.lane.b32.xlu1 %v5644_v35, %s7807_s26  ;;  %v5756_v35 = vstv %s7261_s10  ;;  %s11518_s10 = sld [smem:[#allocation15 + $0x29]] }
 0x98c   : > { %5619 = vrot.lane.b32.xlu0 %v5615_v26, %s7805_s1  ;;  %v11460_v17 = vpop.permute.xlu2 %5663  ;;  %v11467_v7 = vpop.permute.xlu0 %5477  ;;  %v5758_v39 = vmul.f32 %v5756_v35, %v11305_v1  ;;  %v5757_v42 = vmul.f32 %v5756_v35, %v11287_v12  ;;  %v5772_v35 = vmul.f32 %v5770_v22, %v11445_v61 }
 0x98d   : > { %v11456_v15 = vpop.permute.xlu1 %5449 }
 0x991   : > { %v5854_v9 = vstv %s11518_s10  ;;  %s11610_s10 = sld [smem:[#allocation15 + $0xf]] }
 0x993   : > { %5747 = vrot.lane.b32.xlu2 %v5743_v41, %s7804_s14  ;;  %5675 = vrot.lane.b32.xlu1 %v5671_v50, %s7806_s25 }
 0x994   : > { %5677 = vrot.lane.b32.xlu0 %v5672_v63, %s7806_s25  ;;  %v11472_v26 = vpop.permute.xlu2 %5705  ;;  %v11482_v50 = vpop.permute.xlu0 %5551  ;;  %v5784_v63 = vstv %s7263_s18  ;;  %s11536_s18 = sld [smem:[#allocation15 + $0x2d]] }
 0x995   : > { %v11470_v36 = vpop.permute.xlu1 %5523  ;;  %v5785_v21 = vmul.f32 %v5784_v63, %v11287_v12  ;;  %v5786_v14 = vmul.f32 %v5784_v63, %v11305_v1 }
 0x99b   : > { %5763 = vrot.lane.b32.xlu2 %v5758_v39, %s7803_s20  ;;  %5749 = vrot.lane.b32.xlu1 %v5744_v40, %s7804_s14 }
 0x99c   : > { %5719 = vrot.lane.b32.xlu0 %v5715_v5, %s7801_s24  ;;  %v11487_v2 = vpop.permute.xlu2 %5351  ;;  %v11494_v40 = vpop.permute.xlu0 %5577  ;;  %v5798_v5 = vstv %s7264_s9  ;;  %s11556_s9 = sld [smem:[#allocation15 + $0x2f]] }
 0x99d   : > { %v11480_v41 = vpop.permute.xlu1 %5549  ;;  %v5800_v24 = vmul.f32 %v5798_v5, %v11445_v61  ;;  %v5799_v22 = vmul.f32 %v5798_v5, %v11458_v58  ;;  %v5357_v38 = vadd.f32 %v11487_v2, %v5343_v16  ;;  %v5913_v16 = vmul.f32 %v5912_v55, %v11532_v32 }
 0x99f   : > { %v5371_v47 = vadd.f32 %v11429_v49, %v5357_v38 }
 0x9a3   : > { %5789 = vrot.lane.b32.xlu2 %v5785_v21, %s7805_s1  ;;  %5775 = vrot.lane.b32.xlu1 %v5771_v13, %s7803_s20  ;;  %v5826_v21 = vstv %s7266_s23  ;;  %s11590_s23 = sld [smem:[#allocation15 + $0x32]] }
 0x9a4   : > { %5761 = vrot.lane.b32.xlu0 %v5757_v42, %s7803_s20  ;;  %v11502_v13 = vpop.permute.xlu2 %5379  ;;  %v5812_v42 = vstv %s7265_s3  ;;  %v5827_v29 = vmul.f32 %v5826_v21, %v11458_v58  ;;  %v11508_v63 = vpop.permute.xlu0 %5635  ;;  %v5828_v53 = vmul.f32 %v5826_v21, %v11445_v61  ;;  %v5885_v21 = vmul.f32 %v5884_v11, %v11532_v32  ;;  %s11576_s3 = sld [smem:[#allocation15 + $0x30]] }
 0x9a5   : > { %v11492_v39 = vpop.permute.xlu1 %5607  ;;  %v5813_v25 = vmul.f32 %v5812_v42, %v11287_v12  ;;  %v5814_v5 = vmul.f32 %v5812_v42, %v11305_v1  ;;  %v5855_v42 = vmul.f32 %v5854_v9, %v11458_v58  ;;  %v5385_v37 = vadd.f32 %v11502_v13, %v5371_v47 }
 0x9ab   : > { %5805 = vrot.lane.b32.xlu2 %v5800_v24, %s7805_s1  ;;  %5791 = vrot.lane.b32.xlu1 %v5786_v14, %s7805_s1  ;;  %v5840_v24 = vstv %s7267_s13  ;;  %s11592_s13 = sld [smem:[#allocation15 + $0x31]] }
 0x9ac   : > { %5777 = vrot.lane.b32.xlu0 %v5772_v35, %s7803_s20  ;;  %v5842_v35 = vmul.f32 %v5840_v24, %v11305_v1 }
 0x9ad   : > { %v11504_v46 = vpop.permute.xlu1 %5633 }
 0x9b3   : > { %5831 = vrot.lane.b32.xlu2 %v5827_v29, %s7807_s26  ;;  %5817 = vrot.lane.b32.xlu1 %v5813_v25, %s7807_s26  ;;  %v11527_v25 = vpop.permute.xlu0 %5661 }
 0x9b4   : > { %5803 = vrot.lane.b32.xlu0 %v5799_v22, %s7805_s1 }
 0x9b5   : > { %v11514_v14 = vpop.permute.xlu2 %5437  ;;  %v11523_v29 = vpop.permute.xlu1 %5707 }
 0x9bb   : > { %5847 = vrot.lane.b32.xlu2 %v5842_v35, %s7806_s25  ;;  %5833 = vrot.lane.b32.xlu1 %v5828_v53, %s7807_s26  ;;  %v5841_v35 = vmul.f32 %v5840_v24, %v11287_v12  ;;  %v11550_v59 = vpop.permute.xlu0 %5735  ;;  %v5898_v24 = vstv %s11536_s18  ;;  %s11614_s18 = sld [smem:[#allocation15 + $0x33]] }
 0x9bc   : > { %5819 = vrot.lane.b32.xlu0 %v5814_v5, %s7807_s26  ;;  %v5899_v52 = vmul.f32 %v5898_v24, %v11572_v6 }
 0x9bd   : > { %v11530_v22 = vpop.permute.xlu2 %5463  ;;  %v11544_v53 = vpop.permute.xlu1 %5733 }
 0x9c3   : > { %5889 = vrot.lane.b32.xlu2 %v5885_v21, %s7801_s24  ;;  %5859 = vrot.lane.b32.xlu1 %v5855_v42, %s7806_s25  ;;  %v5900_v21 = vmul.f32 %v5898_v24, %v11552_v28  ;;  %v5886_v42 = vmul.f32 %v5884_v11, %v11554_v31  ;;  %v5399_v24 = vadd.f32 %v11431_v33, %v5385_v37 }
 0x9c4   : > { %5845 = vrot.lane.b32.xlu0 %v5841_v35, %s7806_s25  ;;  %v5856_v35 = vmul.f32 %v5854_v9, %v11445_v61  ;;  %v5926_v9 = vstv %s11556_s9  ;;  %s11632_s9 = sld [smem:[#allocation15 + $0x35]] }
 0x9c5   : > { %v11546_v5 = vpop.permute.xlu2 %5537  ;;  %v5928_v47 = vmul.f32 %v5926_v9, %v11552_v28 }
 0x9cb   : > { %5905 = vrot.lane.b32.xlu2 %v5900_v21, %s7801_s24  ;;  %5891 = vrot.lane.b32.xlu1 %v5886_v42, %s7801_s24  ;;  %v5927_v42 = vmul.f32 %v5926_v9, %v11572_v6  ;;  %v5968_v9 = vstv %s11590_s23  ;;  %s11667_s23 = sld [smem:[#allocation15 + $0x3a]] }
 0x9cc   : > { %5861 = vrot.lane.b32.xlu0 %v5856_v35, %s7806_s25  ;;  %v5940_v35 = vstv %s11576_s3  ;;  %s11652_s3 = sld [smem:[#allocation15 + $0x36]] }
 0x9cd   : > { %v11570_v30 = vpop.permute.xlu2 %5563  ;;  %v5382_v27 = vpop.permute.xlu1 %5381 }
 0x9ce   : > { %v5354_v11 = vpop.permute.xlu0 %5353 }
 0x9cf   : > { %v5358_v0 = vadd.f32 %v5354_v11, %v5344_v45 }
 0x9d1   : > { %v5372_v21 = vadd.f32 %v11418_v56, %v5358_v0  ;;  %v5942_v0 = vmul.f32 %v5940_v35, %v11554_v31 }
 0x9d3   : > { %5931 = vrot.lane.b32.xlu2 %v5927_v42, %s7804_s14  ;;  %5917 = vrot.lane.b32.xlu1 %v5913_v16, %s7804_s14  ;;  %v5386_v45 = vadd.f32 %v5382_v27, %v5372_v21 }
 0x9d4   : > { %5903 = vrot.lane.b32.xlu0 %v5899_v52, %s7801_s24  ;;  %v5954_v52 = vstv %s11592_s13  ;;  %s11669_s13 = sld [smem:[#allocation15 + $0x37]] }
 0x9d5   : > { %v11587_v2 = vpop.permute.xlu2 %5621  ;;  %v5408_v38 = vpop.permute.xlu1 %5407  ;;  %v5400_v56 = vadd.f32 %v11379_v34, %v5386_v45  ;;  %v5914_v34 = vmul.f32 %v5912_v55, %v11554_v31 }
 0x9d6   : > { %v5410_v49 = vpop.permute.xlu0 %5409  ;;  %v5413_v11 = vadd.f32 %v5408_v38, %v5399_v24  ;;  %v5969_v38 = vmul.f32 %v5968_v9, %v11532_v32 }
 0x9d7   : > { %v5414_v13 = vadd.f32 %v5410_v49, %v5400_v56  ;;  %v5955_v56 = vmul.f32 %v5954_v52, %v11572_v6  ;;  %v5502_v49 = vstv %s11604_s16  ;;  %s11680_s16 = sld [smem:[#allocation15 + $0x1c]] }
 0x9d8   : > { %v5427_v16 = vadd.f32 %v11390_v4, %v5413_v11 }
 0x9d9   : > { %v5428_v27 = vadd.f32 %v11443_v44, %v5414_v13 }
 0x9db   : > { %5947 = vrot.lane.b32.xlu2 %v5942_v0, %s7803_s20  ;;  %5933 = vrot.lane.b32.xlu1 %v5928_v47, %s7804_s14  ;;  %v5442_v21 = vadd.f32 %v11514_v14, %v5428_v27  ;;  %v5510_v27 = vstv %s11610_s10  ;;  %v5503_v0 = vmul.f32 %v5502_v49, %v11197_v18  ;;  %s11686_s10 = sld [smem:[#allocation15 + $0x1d]] }
 0x9dc   : > { %5919 = vrot.lane.b32.xlu0 %v5914_v34, %s7804_s14 }
 0x9dd   : > { %v11606_v33 = vpop.permute.xlu2 %5647  ;;  %v5466_v44 = vpop.permute.xlu1 %5465  ;;  %v5456_v42 = vadd.f32 %v11450_v3, %v5442_v21  ;;  %v5941_v3 = vmul.f32 %v5940_v35, %v11532_v32  ;;  %v5982_v21 = vstv %s11614_s18  ;;  %s11692_s18 = sld [smem:[#allocation15 + $0x3b]] }
 0x9de   : > { %v5436_v55 = vpop.permute.xlu0 %5435 }
 0x9df   : > { %v5441_v37 = vadd.f32 %v5436_v55, %v5427_v16  ;;  %v5470_v14 = vadd.f32 %v5466_v44, %v5456_v42  ;;  %v5970_v44 = vmul.f32 %v5968_v9, %v11554_v31  ;;  %v5511_v42 = vmul.f32 %v5510_v27, %v11405_v60 }
 0x9e0   : > { %v5984_v55 = vmul.f32 %v5982_v21, %v11552_v28 }
 0x9e1   : > { %v5455_v45 = vadd.f32 %v11456_v15, %v5441_v37  ;;  %v5484_v11 = vadd.f32 %v11400_v20, %v5470_v14  ;;  %v5512_v20 = vmul.f32 %v5510_v27, %v11393_v19  ;;  %v5956_v37 = vmul.f32 %v5954_v52, %v11552_v28 }
 0x9e3   : > { %5973 = vrot.lane.b32.xlu2 %v5969_v38, %s7805_s1  ;;  %5959 = vrot.lane.b32.xlu1 %v5955_v56, %s7803_s20  ;;  %v5469_v4 = vadd.f32 %v11530_v22, %v5455_v45  ;;  %v5504_v22 = vmul.f32 %v5502_v49, %v11230_v23  ;;  %v6010_v38 = vstv %s11632_s9  ;;  %v5996_v56 = vstv %s11630_s19  ;;  %s11710_s19 = sld [smem:[#allocation15 + $0x3c]] }
 0x9e4   : > { %5945 = vrot.lane.b32.xlu0 %v5941_v3, %s7803_s20  ;;  %s11715_s9 = sld [smem:[#allocation15 + $0x3d]] }
 0x9e5   : > { %v11625_v24 = vpop.permute.xlu2 %5721  ;;  %v5492_v13 = vpop.permute.xlu1 %5491  ;;  %v5483_v15 = vadd.f32 %v11467_v7, %v5469_v4 }
 0x9e6   : > { %v5494_v35 = vpop.permute.xlu0 %5493 }
 0x9e7   : > { %v5497_v47 = vadd.f32 %v5492_v13, %v5483_v15  ;;  %v5498_v34 = vadd.f32 %v5494_v35, %v5484_v11  ;;  %v6011_v13 = vmul.f32 %v6010_v38, %v11572_v6  ;;  %v5997_v15 = vmul.f32 %v5996_v56, %v11532_v32 }
 0x9e9   : > { %v5505_v7 = vadd.f32 %v5503_v0, %v5497_v47  ;;  %v5506_v16 = vadd.f32 %v5504_v22, %v5498_v34 }
 0x9eb   : > { %v5514_v18 = vadd.f32 %v5512_v20, %v5506_v16  ;;  %5989 = vrot.lane.b32.xlu2 %v5984_v55, %s7805_s1  ;;  %5975 = vrot.lane.b32.xlu1 %v5970_v44, %s7805_s1  ;;  %v5513_v23 = vadd.f32 %v5511_v42, %v5505_v7  ;;  %v6068_v16 = vstv %s11667_s23  ;;  %v6038_v55 = vstv %s11669_s13  ;;  %s11749_s23 = sld [smem:[#allocation15 + $0x40]] }
 0x9ec   : > { %5961 = vrot.lane.b32.xlu0 %v5956_v37, %s7803_s20  ;;  %s11752_s13 = sld [smem:[#allocation15 + $0x3f]] }
 0x9ed   : > { %v11645_v9 = vpop.permute.xlu2 %5747  ;;  %v5566_v60 = vpop.permute.xlu1 %5565  ;;  %v5528_v14 = vadd.f32 %v11470_v36, %v5514_v18  ;;  %v5527_v19 = vadd.f32 %v11413_v48, %v5513_v23  ;;  %v5983_v36 = vmul.f32 %v5982_v21, %v11572_v6  ;;  %v6012_v21 = vmul.f32 %v6010_v38, %v11552_v28 }
 0x9ee   : > { %v5536_v45 = vpop.permute.xlu0 %5535 }
 0x9ef   : > { %v5542_v52 = vadd.f32 %v11546_v5, %v5528_v14  ;;  %v5541_v3 = vadd.f32 %v5536_v45, %v5527_v19  ;;  %v5686_v19 = vstv %s11680_s16  ;;  %s11766_s16 = sld [smem:[#allocation15 + $0x41]] }
 0x9f1   : > { %v5556_v4 = vadd.f32 %v11482_v50, %v5542_v52  ;;  %v5555_v49 = vadd.f32 %v11480_v41, %v5541_v3  ;;  %v5694_v52 = vstv %s11686_s10  ;;  %v11708_v3 = vld [vmem:[#allocation4 + $0xc] sm:$0xff]  ;;  %s11777_s10 = sld [smem:[#allocation15 + $0x42]] }
 0x9f3   : > { %v5570_v48 = vadd.f32 %v5566_v60, %v5556_v4  ;;  %v5569_v11 = vadd.f32 %v11570_v30, %v5555_v49  ;;  %6015 = vrot.lane.b32.xlu2 %v6011_v13, %s7807_s26  ;;  %6001 = vrot.lane.b32.xlu1 %v5997_v15, %s7807_s26  ;;  %v6024_v30 = vstv %s11652_s3  ;;  %v11712_v4 = vld [vmem:[#allocation4 + $0x24] sm:$0xff]  ;;  %v6082_v49 = vstv %s11692_s18  ;;  %s11735_s3 = sld [smem:[#allocation15 + $0x3e]] }
 0x9f4   : > { %5987 = vrot.lane.b32.xlu0 %v5983_v36, %s7805_s1  ;;  %v6026_v34 = vmul.f32 %v6024_v30, %v11554_v31  ;;  %v5687_v13 = vmul.f32 %v5686_v19, %v11287_v12  ;;  %v5688_v36 = vmul.f32 %v5686_v19, %v11305_v1  ;;  %s11780_s18 = sld [smem:[#allocation15 + $0x43]] }
 0x9f5   : > { %v11663_v5 = vpop.permute.xlu2 %5763  ;;  %v5592_v50 = vpop.permute.xlu1 %5591  ;;  %v5583_v41 = vadd.f32 %v11494_v40, %v5569_v11  ;;  %v5584_v27 = vadd.f32 %v11426_v10, %v5570_v48  ;;  %v5998_v40 = vmul.f32 %v5996_v56, %v11554_v31 }
 0x9f6   : > { %v5594_v35 = vpop.permute.xlu0 %5593 }
 0x9f7   : > { %v5598_v0 = vadd.f32 %v5594_v35, %v5584_v27  ;;  %v5597_v47 = vadd.f32 %v5592_v50, %v5583_v41  ;;  %v5696_v50 = vmul.f32 %v5694_v52, %v11445_v61  ;;  %v6084_v27 = vmul.f32 %v6082_v49, %v11712_v4 }
 0x9f8   : > { %v6040_v35 = vmul.f32 %v6038_v55, %v11552_v28 }
 0x9f9   : > { %v5612_v22 = vadd.f32 %v11492_v39, %v5598_v0  ;;  %v5611_v7 = vadd.f32 %v11441_v62, %v5597_v47  ;;  %v6025_v62 = vmul.f32 %v6024_v30, %v11532_v32 }
 0x9fb   : > { %v5626_v10 = vadd.f32 %v11587_v2, %v5612_v22  ;;  %6031 = vrot.lane.b32.xlu2 %v6026_v34, %s7806_s25  ;;  %6017 = vrot.lane.b32.xlu1 %v6012_v21, %s7807_s26  ;;  %v11688_v2 = vld [vmem:[#allocation4 + $0x4] sm:$0xff]  ;;  %v11731_v22 = vld [vmem:[#allocation4 + $0x1c] sm:$0xff]  ;;  %v6110_v34 = vstv %s11715_s9  ;;  %v6096_v21 = vstv %s11710_s19  ;;  %s11791_s19 = sld [smem:[#allocation15 + $0x2a]] }
 0x9fc   : > { %6003 = vrot.lane.b32.xlu0 %v5998_v40, %s7807_s26  ;;  %v6069_v60 = vmul.f32 %v6068_v16, %v11688_v2  ;;  %s11795_s9 = sld [smem:[#allocation15 + $0x44]] }
 0x9fd   : > { %v11682_v44 = vpop.permute.xlu2 %5789  ;;  %v5650_v39 = vpop.permute.xlu1 %5649  ;;  %v5640_v42 = vadd.f32 %v11508_v63, %v5626_v10  ;;  %v6039_v63 = vmul.f32 %v6038_v55, %v11572_v6  ;;  %v6124_v55 = vstv %s11735_s3  ;;  %s11797_s3 = sld [smem:[#allocation15 + $0x2b]] }
 0x9fe   : > { %v5620_v20 = vpop.permute.xlu0 %5619 }
 0x9ff   : > { %v5625_v37 = vadd.f32 %v5620_v20, %v5611_v7  ;;  %v5654_v18 = vadd.f32 %v5650_v39, %v5640_v42  ;;  %v6097_v42 = vmul.f32 %v6096_v21, %v11688_v2  ;;  %v6083_v7 = vmul.f32 %v6082_v49, %v11731_v22 }
 0xa01   : > { %v5639_v23 = vadd.f32 %v11504_v46, %v5625_v37  ;;  %v5668_v56 = vadd.f32 %v11460_v17, %v5654_v18  ;;  %v5695_v17 = vmul.f32 %v5694_v52, %v11458_v58 }
 0xa03   : > { %v5653_v14 = vadd.f32 %v11606_v33, %v5639_v23  ;;  %6073 = vrot.lane.b32.xlu2 %v6069_v60, %s7801_s24  ;;  %6043 = vrot.lane.b32.xlu1 %v6039_v63, %s7806_s25  ;;  %v6126_v60 = vmul.f32 %v6124_v55, %v11708_v3  ;;  %v6098_v63 = vmul.f32 %v6096_v21, %v11708_v3 }
 0xa04   : > { %6029 = vrot.lane.b32.xlu0 %v6025_v62, %s7806_s25 }
 0xa05   : > { %v11703_v45 = vpop.permute.xlu2 %5805  ;;  %v5676_v38 = vpop.permute.xlu1 %5675  ;;  %v5667_v46 = vadd.f32 %v11527_v25, %v5653_v14  ;;  %v6070_v25 = vmul.f32 %v6068_v16, %v11708_v3 }
 0xa06   : > { %v5678_v33 = vpop.permute.xlu0 %5677 }
 0xa07   : > { %v5681_v15 = vadd.f32 %v5676_v38, %v5667_v46  ;;  %v5682_v48 = vadd.f32 %v5678_v33, %v5668_v56  ;;  %v6152_v46 = vstv %s11749_s23  ;;  %v6138_v56 = vstv %s11752_s13  ;;  %s11808_s23 = sld [smem:[#allocation15 + $0x48]] }
 0xa08   : > { %v6153_v49 = vmul.f32 %v6152_v46, %v11688_v2  ;;  %s11812_s13 = sld [smem:[#allocation15 + $0x45]] }
 0xa09   : > { %v5689_v11 = vadd.f32 %v5687_v13, %v5681_v15  ;;  %v5690_v41 = vadd.f32 %v5688_v36, %v5682_v48  ;;  %v6139_v13 = vmul.f32 %v6138_v56, %v11731_v22 }
 0xa0b   : > { %v5698_v0 = vadd.f32 %v5696_v50, %v5690_v41  ;;  %6089 = vrot.lane.b32.xlu2 %v6084_v27, %s7801_s24  ;;  %6075 = vrot.lane.b32.xlu1 %v6070_v25, %s7801_s24  ;;  %v5697_v12 = vadd.f32 %v5695_v17, %v5689_v11  ;;  %v6166_v25 = vstv %s11766_s16  ;;  %v6154_v41 = vmul.f32 %v6152_v46, %v11708_v3  ;;  %s11829_s16 = sld [smem:[#allocation15 + $0x49]] }
 0xa0c   : > { %6045 = vrot.lane.b32.xlu0 %v6040_v35, %s7806_s25  ;;  %v6168_v50 = vmul.f32 %v6166_v25, %v11712_v4  ;;  %v6167_v21 = vmul.f32 %v6166_v25, %v11731_v22  ;;  %v11847_v25 = vld [vmem:[#allocation4 + $0xd] sm:$0xff] }
 0xa0d   : > { %v5712_v1 = vadd.f32 %v11523_v29, %v5698_v0  ;;  %v11728_v58 = vpop.permute.xlu2 %5831  ;;  %v5750_v30 = vpop.permute.xlu1 %5749  ;;  %v5711_v61 = vadd.f32 %v11472_v26, %v5697_v12  ;;  %v6111_v29 = vmul.f32 %v6110_v34, %v11731_v22 }
 0xa0e   : > { %v5720_v47 = vpop.permute.xlu0 %5719 }
 0xa0f   : > { %v5725_v40 = vadd.f32 %v5720_v47, %v5711_v61  ;;  %v5726_v10 = vadd.f32 %v11625_v24, %v5712_v1  ;;  %v6194_v1 = vstv %s11780_s18  ;;  %s11849_s18 = sld [smem:[#allocation15 + $0x4b]] }
 0xa11   : > { %v5739_v39 = vadd.f32 %v11544_v53, %v5725_v40  ;;  %v5740_v26 = vadd.f32 %v11550_v59, %v5726_v10  ;;  %v6112_v59 = vmul.f32 %v6110_v34, %v11712_v4 }
 0xa13   : > { %6115 = vrot.lane.b32.xlu2 %v6111_v29, %s7804_s14  ;;  %6101 = vrot.lane.b32.xlu1 %v6097_v42, %s7804_s14  ;;  %v5753_v24 = vadd.f32 %v11645_v9, %v5739_v39  ;;  %v5754_v18 = vadd.f32 %v5750_v30, %v5740_v26  ;;  %v6180_v30 = vstv %s11777_s10  ;;  %v5870_v29 = vstv %s11791_s19  ;;  %s11842_s10 = sld [smem:[#allocation15 + $0x4a]] }
 0xa14   : > { %6087 = vrot.lane.b32.xlu0 %v6083_v7, %s7801_s24  ;;  %v6181_v34 = vmul.f32 %v6180_v30, %v11688_v2  ;;  %v6208_v7 = vstv %s11795_s9  ;;  %s11863_s19 = sld [smem:[#allocation15 + $0x4c]] }
 0xa15   : > { %v11746_v20 = vpop.permute.xlu2 %5847  ;;  %v5776_v16 = vpop.permute.xlu1 %5775  ;;  %v5768_v19 = vadd.f32 %v11663_v5, %v5754_v18  ;;  %s11872_s9 = sld [smem:[#allocation15 + $0x4e]] }
 0xa16   : > { %v5762_v53 = vpop.permute.xlu0 %5761 }
 0xa17   : > { %v5767_v37 = vadd.f32 %v5762_v53, %v5753_v24  ;;  %v5871_v24 = vmul.f32 %v5870_v29, %v11532_v32 }
 0xa19   : > { %v5781_v23 = vadd.f32 %v5776_v16, %v5767_v37  ;;  %v5878_v16 = vstv %s11797_s3  ;;  %v6182_v37 = vmul.f32 %v6180_v30, %v11708_v3  ;;  %s11875_s3 = sld [smem:[#allocation15 + $0x4d]] }
 0xa1b   : > { %6131 = vrot.lane.b32.xlu2 %v6126_v60, %s7803_s20  ;;  %6117 = vrot.lane.b32.xlu1 %v6112_v59, %s7804_s14  ;;  %v5795_v9 = vadd.f32 %v11682_v44, %v5781_v23  ;;  %v6125_v44 = vmul.f32 %v6124_v55, %v11688_v2  ;;  %v6196_v55 = vmul.f32 %v6194_v1, %v11712_v4 }
 0xa1c   : > { %6103 = vrot.lane.b32.xlu0 %v6098_v63, %s7804_s14  ;;  %v5879_v23 = vmul.f32 %v5878_v16, %v11572_v6  ;;  %v5880_v6 = vmul.f32 %v5878_v16, %v11552_v28 }
 0xa1d   : > { %v11761_v62 = vpop.permute.xlu2 %5889  ;;  %v5792_v14 = vpop.permute.xlu1 %5791 }
 0xa1e   : > { %v5778_v38 = vpop.permute.xlu0 %5777 }
 0xa1f   : > { %v5782_v52 = vadd.f32 %v5778_v38, %v5768_v19  ;;  %v6222_v19 = vstv %s11812_s13  ;;  %v5872_v38 = vmul.f32 %v5870_v29, %v11554_v31  ;;  %s11899_s13 = sld [smem:[#allocation15 + $0x50]] }
 0xa21   : > { %v5796_v33 = vadd.f32 %v5792_v14, %v5782_v52  ;;  %v6252_v14 = vstv %s11808_s23  ;;  %s11888_s23 = sld [smem:[#allocation15 + $0x4f]] }
 0xa23   : > { %6157 = vrot.lane.b32.xlu2 %v6153_v49, %s7805_s1  ;;  %6143 = vrot.lane.b32.xlu1 %v6139_v13, %s7803_s20  ;;  %v5810_v5 = vadd.f32 %v11703_v45, %v5796_v33  ;;  %v6140_v45 = vmul.f32 %v6138_v56, %v11712_v4  ;;  %v6223_v49 = vmul.f32 %v6222_v19, %v11731_v22 }
 0xa24   : > { %6129 = vrot.lane.b32.xlu0 %v6125_v44, %s7803_s20  ;;  %v6209_v13 = vmul.f32 %v6208_v7, %v11688_v2 }
 0xa25   : > { %v11775_v15 = vpop.permute.xlu2 %5905  ;;  %v5818_v36 = vpop.permute.xlu1 %5817 }
 0xa26   : > { %v5804_v48 = vpop.permute.xlu0 %5803 }
 0xa27   : > { %v5809_v17 = vadd.f32 %v5804_v48, %v5795_v9  ;;  %v11825_v9 = vld [vmem:[#allocation4 + $0x5] sm:$0xff]  ;;  %v6266_v48 = vstv %s11829_s16  ;;  %s11902_s16 = sld [smem:[#allocation15 + $0x51]] }
 0xa28   : > { %v6253_v33 = vmul.f32 %v6252_v14, %v11825_v9 }
 0xa29   : > { %v5823_v11 = vadd.f32 %v5818_v36, %v5809_v17  ;;  %v11844_v36 = vld [vmem:[#allocation4 + $0x25] sm:$0xff] }
 0xa2b   : > { %6173 = vrot.lane.b32.xlu2 %v6168_v50, %s7805_s1  ;;  %6159 = vrot.lane.b32.xlu1 %v6154_v41, %s7805_s1  ;;  %v5837_v27 = vadd.f32 %v11728_v58, %v5823_v11  ;;  %v6195_v58 = vmul.f32 %v6194_v1, %v11731_v22  ;;  %v6268_v41 = vmul.f32 %v6266_v48, %v11844_v36 }
 0xa2c   : > { %6145 = vrot.lane.b32.xlu0 %v6140_v45, %s7803_s20  ;;  %v6254_v45 = vmul.f32 %v6252_v14, %v11847_v25 }
 0xa2d   : > { %v11789_v35 = vpop.permute.xlu2 %5931  ;;  %v5834_v0 = vpop.permute.xlu1 %5833 }
 0xa2e   : > { %v5820_v12 = vpop.permute.xlu0 %5819 }
 0xa2f   : > { %v5824_v61 = vadd.f32 %v5820_v12, %v5810_v5 }
 0xa31   : > { %v5838_v47 = vadd.f32 %v5834_v0, %v5824_v61  ;;  %v11859_v61 = vld [vmem:[#allocation4 + $0x1d] sm:$0xff] }
 0xa33   : > { %6199 = vrot.lane.b32.xlu2 %v6195_v58, %s7807_s26  ;;  %6185 = vrot.lane.b32.xlu1 %v6181_v34, %s7807_s26  ;;  %v5852_v40 = vadd.f32 %v11746_v20, %v5838_v47  ;;  %v6210_v20 = vmul.f32 %v6208_v7, %v11708_v3  ;;  %v6280_v47 = vstv %s11842_s10  ;;  %s11912_s10 = sld [smem:[#allocation15 + $0x38]] }
 0xa34   : > { %6171 = vrot.lane.b32.xlu0 %v6167_v21, %s7805_s1 }
 0xa35   : > { %v11806_v10 = vpop.permute.xlu2 %5947  ;;  %v5860_v39 = vpop.permute.xlu1 %5859 }
 0xa36   : > { %v5846_v42 = vpop.permute.xlu0 %5845 }
 0xa37   : > { %v5851_v26 = vadd.f32 %v5846_v42, %v5837_v27  ;;  %v6224_v27 = vmul.f32 %v6222_v19, %v11712_v4 }
 0xa39   : > { %v5865_v53 = vadd.f32 %v5860_v39, %v5851_v26  ;;  %v6308_v26 = vstv %s11863_s19  ;;  %s11918_s19 = sld [smem:[#allocation15 + $0x39]] }
 0xa3b   : > { %v5873_v18 = vadd.f32 %v5871_v24, %v5865_v53  ;;  %6215 = vrot.lane.b32.xlu2 %v6210_v20, %s7806_s25  ;;  %6201 = vrot.lane.b32.xlu1 %v6196_v55, %s7807_s26  ;;  %v6310_v53 = vmul.f32 %v6308_v26, %v11847_v25 }
 0xa3c   : > { %6187 = vrot.lane.b32.xlu0 %v6182_v37, %s7807_s26 }
 0xa3d   : > { %v11823_v60 = vpop.permute.xlu2 %5973  ;;  %v5892_v32 = vpop.permute.xlu1 %5891  ;;  %v5881_v59 = vadd.f32 %v5879_v23, %v5873_v18 }
 0xa3e   : > { %v5862_v63 = vpop.permute.xlu0 %5861 }
 0xa3f   : > { %v5866_v46 = vadd.f32 %v5862_v63, %v5852_v40  ;;  %v5895_v56 = vadd.f32 %v11761_v62, %v5881_v59  ;;  %v6281_v40 = vmul.f32 %v6280_v47, %v11825_v9  ;;  %v6322_v59 = vstv %s11875_s3  ;;  %s11932_s3 = sld [smem:[#allocation15 + $0x53]] }
 0xa41   : > { %v5874_v52 = vadd.f32 %v5872_v38, %v5866_v46  ;;  %v6323_v38 = vmul.f32 %v6322_v59, %v11859_v61  ;;  %v6309_v46 = vmul.f32 %v6308_v26, %v11825_v9 }
 0xa43   : > { %v5882_v44 = vadd.f32 %v5880_v6, %v5874_v52  ;;  %6257 = vrot.lane.b32.xlu2 %v6253_v33, %s7801_s24  ;;  %6227 = vrot.lane.b32.xlu1 %v6223_v49, %s7806_s25  ;;  %v6350_v33 = vstv %s11888_s23  ;;  %s11949_s23 = sld [smem:[#allocation15 + $0x57]] }
 0xa44   : > { %6213 = vrot.lane.b32.xlu0 %v6209_v13, %s7806_s25 }
 0xa45   : > { %v11840_v31 = vpop.permute.xlu2 %5989  ;;  %v5918_v62 = vpop.permute.xlu1 %5917  ;;  %v5896_v5 = vadd.f32 %v5892_v32, %v5882_v44  ;;  %v6336_v32 = vstv %s11872_s9  ;;  %v6352_v44 = vmul.f32 %v6350_v33, %v11844_v36  ;;  %s11928_s9 = sld [smem:[#allocation15 + $0x56]] }
 0xa46   : > { %v5904_v28 = vpop.permute.xlu0 %5903  ;;  %v6337_v19 = vmul.f32 %v6336_v32, %v11825_v9 }
 0xa47   : > { %v5909_v17 = vadd.f32 %v5904_v28, %v5895_v56  ;;  %v5910_v11 = vadd.f32 %v11775_v15, %v5896_v5  ;;  %v6294_v15 = vstv %s11849_s18  ;;  %s11916_s18 = sld [smem:[#allocation15 + $0x52]] }
 0xa48   : > { %v6295_v21 = vmul.f32 %v6294_v15, %v11859_v61  ;;  %v6296_v20 = vmul.f32 %v6294_v15, %v11844_v36 }
 0xa49   : > { %v5923_v50 = vadd.f32 %v5918_v62, %v5909_v17  ;;  %v6338_v62 = vmul.f32 %v6336_v32, %v11847_v25 }
 0xa4b   : > { %6273 = vrot.lane.b32.xlu2 %v6268_v41, %s7801_s24  ;;  %6259 = vrot.lane.b32.xlu1 %v6254_v45, %s7801_s24  ;;  %v5937_v0 = vadd.f32 %v11789_v35, %v5923_v50  ;;  %v6267_v35 = vmul.f32 %v6266_v48, %v11859_v61  ;;  %v6364_v50 = vstv %s11899_s13  ;;  %s11960_s13 = sld [smem:[#allocation15 + $0x58]] }
 0xa4c   : > { %6229 = vrot.lane.b32.xlu0 %v6224_v27, %s7806_s25 }
 0xa4d   : > { %v6016_v12 = vpop.permute.xlu2 %6015  ;;  %v5934_v1 = vpop.permute.xlu1 %5933 }
 0xa4e   : > { %v5920_v30 = vpop.permute.xlu0 %5919 }
 0xa4f   : > { %v5924_v58 = vadd.f32 %v5920_v30, %v5910_v11  ;;  %v6378_v11 = vstv %s11902_s16  ;;  %s11967_s16 = sld [smem:[#allocation15 + $0x59]] }
 0xa50   : > { %v6379_v27 = vmul.f32 %v6378_v11, %v11859_v61 }
 0xa51   : > { %v5938_v34 = vadd.f32 %v5934_v1, %v5924_v58 }
 0xa53   : > { %6299 = vrot.lane.b32.xlu2 %v6295_v21, %s7804_s14  ;;  %6285 = vrot.lane.b32.xlu1 %v6281_v40, %s7804_s14  ;;  %v5952_v39 = vadd.f32 %v11806_v10, %v5938_v34  ;;  %v6282_v10 = vmul.f32 %v6280_v47, %v11847_v25  ;;  %v6054_v47 = vstv %s11912_s10  ;;  %v6392_v34 = vstv %s11916_s18  ;;  %s11981_s10 = sld [smem:[#allocation15 + $0x5a]] }
 0xa54   : > { %6271 = vrot.lane.b32.xlu0 %v6267_v35, %s7801_s24  ;;  %v6062_v40 = vstv %s11918_s19  ;;  %v6055_v35 = vmul.f32 %v6054_v47, %v11688_v2  ;;  %s11990_s18 = sld [smem:[#allocation15 + $0x5c]] }
 0xa55   : > { %v6032_v29 = vpop.permute.xlu2 %6031  ;;  %v5960_v42 = vpop.permute.xlu1 %5959  ;;  %s11993_s19 = sld [smem:[#allocation15 + $0x5b]] }
 0xa56   : > { %v5946_v7 = vpop.permute.xlu0 %5945 }
 0xa57   : > { %v5951_v16 = vadd.f32 %v5946_v7, %v5937_v0  ;;  %v6365_v0 = vmul.f32 %v6364_v50, %v11825_v9  ;;  %v6366_v7 = vmul.f32 %v6364_v50, %v11847_v25  ;;  %v11977_v50 = vld [vmem:[#allocation4 + $0x1e] sm:$0xff] }
 0xa59   : > { %v5965_v24 = vadd.f32 %v5960_v42, %v5951_v16  ;;  %v6380_v42 = vmul.f32 %v6378_v11, %v11844_v36  ;;  %v6063_v16 = vmul.f32 %v6062_v40, %v11731_v22  ;;  %v6064_v22 = vmul.f32 %v6062_v40, %v11712_v4  ;;  %v11962_v4 = vld [vmem:[#allocation4 + $0x26] sm:$0xff] }
 0xa5b   : > { %6315 = vrot.lane.b32.xlu2 %v6310_v53, %s7803_s20  ;;  %6301 = vrot.lane.b32.xlu1 %v6296_v20, %s7804_s14  ;;  %v5979_v55 = vadd.f32 %v11823_v60, %v5965_v24 }
 0xa5c   : > { %6287 = vrot.lane.b32.xlu0 %v6282_v10, %s7804_s14  ;;  %v11945_v10 = vld [vmem:[#allocation4 + $0x6] sm:$0xff] }
 0xa5d   : > { %v11884_v37 = vpop.permute.xlu2 %6073  ;;  %v5976_v18 = vpop.permute.xlu1 %5975 }
 0xa5e   : > { %v5962_v23 = vpop.permute.xlu0 %5961 }
 0xa5f   : > { %v5966_v63 = vadd.f32 %v5962_v23, %v5952_v39  ;;  %v6056_v23 = vmul.f32 %v6054_v47, %v11708_v3 }
 0xa61   : > { %v5980_v14 = vadd.f32 %v5976_v18, %v5966_v63  ;;  %v6406_v18 = vstv %s11932_s3  ;;  %s12023_s3 = sld [smem:[#allocation15 + $0x46]] }
 0xa63   : > { %6341 = vrot.lane.b32.xlu2 %v6337_v19, %s7805_s1  ;;  %6327 = vrot.lane.b32.xlu1 %v6323_v38, %s7803_s20  ;;  %v5994_v60 = vadd.f32 %v11840_v31, %v5980_v14  ;;  %v6324_v31 = vmul.f32 %v6322_v59, %v11844_v36  ;;  %v6407_v19 = vmul.f32 %v6406_v18, %v11859_v61 }
 0xa64   : > { %6313 = vrot.lane.b32.xlu0 %v6309_v46, %s7803_s20  ;;  %v6393_v38 = vmul.f32 %v6392_v34, %v11825_v9 }
 0xa65   : > { %v11897_v56 = vpop.permute.xlu2 %6089  ;;  %v6002_v6 = vpop.permute.xlu1 %6001 }
 0xa66   : > { %v5988_v52 = vpop.permute.xlu0 %5987 }
 0xa67   : > { %v5993_v49 = vadd.f32 %v5988_v52, %v5979_v55  ;;  %v6436_v55 = vstv %s11928_s9  ;;  %v11965_v52 = vld [vmem:[#allocation4 + $0xe] sm:$0xff]  ;;  %s12015_s9 = sld [smem:[#allocation15 + $0x5f]] }
 0xa68   : > { %v6437_v14 = vmul.f32 %v6436_v55, %v11945_v10 }
 0xa69   : > { %v6007_v13 = vadd.f32 %v6002_v6, %v5993_v49  ;;  %v6450_v6 = vstv %s11949_s23  ;;  %s12027_s23 = sld [smem:[#allocation15 + $0x60]] }
 0xa6b   : > { %6357 = vrot.lane.b32.xlu2 %v6352_v44, %s7805_s1  ;;  %6343 = vrot.lane.b32.xlu1 %v6338_v62, %s7805_s1  ;;  %v6021_v5 = vadd.f32 %v6016_v12, %v6007_v13  ;;  %v6351_v12 = vmul.f32 %v6350_v33, %v11859_v61  ;;  %v6452_v62 = vmul.f32 %v6450_v6, %v11962_v4 }
 0xa6c   : > { %6329 = vrot.lane.b32.xlu0 %v6324_v31, %s7803_s20  ;;  %v6438_v31 = vmul.f32 %v6436_v55, %v11965_v52 }
 0xa6d   : > { %v11910_v28 = vpop.permute.xlu2 %6115  ;;  %v6018_v48 = vpop.permute.xlu1 %6017 }
 0xa6e   : > { %v6004_v17 = vpop.permute.xlu0 %6003 }
 0xa6f   : > { %v6008_v41 = vadd.f32 %v6004_v17, %v5994_v60 }
 0xa71   : > { %v6022_v45 = vadd.f32 %v6018_v48, %v6008_v41  ;;  %v6464_v41 = vstv %s11960_s13  ;;  %s12029_s13 = sld [smem:[#allocation15 + $0x47]] }
 0xa73   : > { %6383 = vrot.lane.b32.xlu2 %v6379_v27, %s7807_s26  ;;  %6369 = vrot.lane.b32.xlu1 %v6365_v0, %s7807_s26  ;;  %v6036_v1 = vadd.f32 %v6032_v29, %v6022_v45  ;;  %v6394_v29 = vmul.f32 %v6392_v34, %v11847_v25  ;;  %v6492_v34 = vstv %s11981_s10  ;;  %s12092_s10 = scalar_lea.vmem [#allocation18], %s7149_s2  ;;  %s7334_s2 = sshll.u32 %s7879_s12, 8 }
 0xa74   : > { %6355 = vrot.lane.b32.xlu0 %v6351_v12, %s7805_s1  ;;  %v6465_v12 = vmul.f32 %v6464_v41, %v11945_v10  ;;  %s6988_s12 = scalar_lea.sflag [#allocation7], %s7995_s11 }
 0xa75   : > { %v11926_v30 = vpop.permute.xlu2 %6131  ;;  %v6044_v15 = vpop.permute.xlu1 %6043 }
 0xa76   : > { %v6030_v58 = vpop.permute.xlu0 %6029 }
 0xa77   : > { %v6035_v21 = vadd.f32 %v6030_v58, %v6021_v5  ;;  %v6408_v5 = vmul.f32 %v6406_v18, %v11844_v36 }
 0xa79   : > { %v6049_v39 = vadd.f32 %v6044_v15, %v6035_v21 }
 0xa7b   : > { %v6057_v26 = vadd.f32 %v6055_v35, %v6049_v39  ;;  %6399 = vrot.lane.b32.xlu2 %v6394_v29, %s7806_s25  ;;  %6385 = vrot.lane.b32.xlu1 %v6380_v42, %s7807_s26  ;;  %v6494_v35 = vmul.f32 %v6492_v34, %v11965_v52  ;;  %v6466_v29 = vmul.f32 %v6464_v41, %v11965_v52 }
 0xa7c   : > { %6371 = vrot.lane.b32.xlu0 %v6366_v7, %s7807_s26 }
 0xa7d   : > { %v6076_v24 = vpop.permute.xlu1 %6075  ;;  %v6065_v53 = vadd.f32 %v6063_v16, %v6057_v26  ;;  %v11943_v2 = vpop.permute.xlu2 %6157  ;;  %v6520_v16 = vstv %s11990_s18 }
 0xa7e   : > { %v6046_v20 = vpop.permute.xlu0 %6045  ;;  %v6521_v55 = vmul.f32 %v6520_v16, %v11945_v10 }
 0xa7f   : > { %v6050_v32 = vadd.f32 %v6046_v20, %v6036_v1  ;;  %v6079_v59 = vadd.f32 %v11884_v37, %v6065_v53 }
 0xa81   : > { %v6058_v63 = vadd.f32 %v6056_v23, %v6050_v32  ;;  %v6493_v23 = vmul.f32 %v6492_v34, %v11945_v10 }
 0xa83   : > { %v6066_v46 = vadd.f32 %v6064_v22, %v6058_v63  ;;  %6441 = vrot.lane.b32.xlu2 %v6437_v14, %s7801_s24  ;;  %6411 = vrot.lane.b32.xlu1 %v6407_v19, %s7806_s25 }
 0xa84   : > { %6397 = vrot.lane.b32.xlu0 %v6393_v38, %s7806_s25 }
 0xa85   : > { %v6102_v3 = vpop.permute.xlu1 %6101  ;;  %v6080_v60 = vadd.f32 %v6076_v24, %v6066_v46  ;;  %v6174_v13 = vpop.permute.xlu2 %6173  ;;  %v6506_v24 = vstv %s11993_s19  ;;  %v6522_v46 = vmul.f32 %v6520_v16, %v11965_v52 }
 0xa86   : > { %v6088_v37 = vpop.permute.xlu0 %6087  ;;  %v6507_v18 = vmul.f32 %v6506_v24, %v11977_v50 }
 0xa87   : > { %v6093_v33 = vadd.f32 %v6088_v37, %v6079_v59  ;;  %v6094_v49 = vadd.f32 %v11897_v56, %v6080_v60  ;;  %v6478_v56 = vstv %s11967_s16  ;;  %s7325_s16 = sld [smem:[#allocation16 + $0x1]] }
 0xa88   : > { %v6479_v0 = vmul.f32 %v6478_v56, %v11977_v50  ;;  %v6480_v39 = vmul.f32 %v6478_v56, %v11962_v4  ;;  %v6238_v56 = vstv %s12023_s3 }
 0xa89   : > { %v6107_v44 = vadd.f32 %v6102_v3, %v6093_v33  ;;  %v6508_v3 = vmul.f32 %v6506_v24, %v11962_v4  ;;  %v6562_v33 = vstv %s12015_s9 }
 0xa8b   : > { %6457 = vrot.lane.b32.xlu2 %v6452_v62, %s7801_s24  ;;  %6443 = vrot.lane.b32.xlu1 %v6438_v31, %s7801_s24  ;;  %v6121_v48 = vadd.f32 %v11910_v28, %v6107_v44  ;;  %v6451_v28 = vmul.f32 %v6450_v6, %v11977_v50  ;;  %v6563_v31 = vmul.f32 %v6562_v33, %v11977_v50 }
 0xa8c   : > { %6413 = vrot.lane.b32.xlu0 %v6408_v5, %s7806_s25 }
 0xa8d   : > { %v6118_v17 = vpop.permute.xlu1 %6117  ;;  %v6200_v1 = vpop.permute.xlu2 %6199 }
 0xa8e   : > { %v6104_v11 = vpop.permute.xlu0 %6103 }
 0xa8f   : > { %v6108_v45 = vadd.f32 %v6104_v11, %v6094_v49 }
 0xa91   : > { %v6122_v27 = vadd.f32 %v6118_v17, %v6108_v45  ;;  %v6576_v45 = vstv %s12027_s23 }
 0xa92   : > { %v6577_v24 = vmul.f32 %v6576_v45, %v11945_v10 }
 0xa93   : > { %6483 = vrot.lane.b32.xlu2 %v6479_v0, %s7804_s14  ;;  %6469 = vrot.lane.b32.xlu1 %v6465_v12, %s7804_s14  ;;  %v6136_v15 = vadd.f32 %v11926_v30, %v6122_v27  ;;  %v6246_v0 = vstv %s12029_s13  ;;  %v6239_v12 = vmul.f32 %v6238_v56, %v11825_v9 }
 0xa94   : > { %6455 = vrot.lane.b32.xlu0 %v6451_v28, %s7801_s24  ;;  %s12004_s24 = sld [smem:[#allocation15 + $0x5d]]  ;;  %v6578_v28 = vmul.f32 %v6576_v45, %v11965_v52 }
 0xa95   : > { %v6144_v47 = vpop.permute.xlu1 %6143  ;;  %v6216_v42 = vpop.permute.xlu2 %6215 }
 0xa96   : > { %v6130_v58 = vpop.permute.xlu0 %6129 }
 0xa97   : > { %v6135_v21 = vadd.f32 %v6130_v58, %v6121_v48 }
 0xa99   : > { %v6149_v40 = vadd.f32 %v6144_v47, %v6135_v21  ;;  %v6247_v21 = vmul.f32 %v6246_v0, %v11859_v61 }
 0xa9a   : > { %v6534_v63 = vstv %s12004_s24  ;;  %s6999_s24 = scalar_lea.hbm %s12269_s8, %s7334_s2 }
 0xa9b   : > { %6499 = vrot.lane.b32.xlu2 %v6494_v35, %s7803_s20  ;;  %6485 = vrot.lane.b32.xlu1 %v6480_v39, %s7804_s14  ;;  %v6163_v30 = vadd.f32 %v11943_v2, %v6149_v40  ;;  %v6536_v38 = vmul.f32 %v6534_v63, %v11962_v4  ;;  %v6535_v48 = vmul.f32 %v6534_v63, %v11977_v50  ;;  %s7002_s9 = sshll.u32 %s6999_s24, 4  ;;  %s7003_s9 = int_to_ptr.hbm [resolvable:$true] %s7002_s9 }
 0xa9c   : > { %6471 = vrot.lane.b32.xlu0 %v6466_v29, %s7804_s14  ;;  %s12012_s14 = sld [smem:[#allocation15 + $0x5e]]  ;;  %v6240_v29 = vmul.f32 %v6238_v56, %v11847_v25  ;;  %s7718_s3 = sshra.s32 %s7003_s9, 4  ;;  %s7719_s3 = int_to_ptr.hbm [resolvable:$true] %s7718_s3 }
 0xa9d   : > { %v6160_v7 = vpop.permute.xlu1 %6159  ;;  %v6258_v59 = vpop.permute.xlu2 %6257  ;;  %s7720_s23 = scalar_lea.hbm %s7719_s3, 256  ;;  %p7725_p12 = scmp.lt.s32.totalorder %s7719_s3, %s12269_s8 }
 0xa9e   : > { %v6146_v26 = vpop.permute.xlu0 %6145  ;;  %p7721_p1 = scmp.ne.s32.totalorder %s7719_s3, %s7720_s23 }
 0xa9f   : > { %v6150_v53 = vadd.f32 %v6146_v26, %v6136_v15  ;;  %v6564_v15 = vmul.f32 %v6562_v33, %v11962_v4 }
 0xaa0   : > { %p7722_p3 = pnand %p7721_p1, %p7961_p4 }
 0xaa1   : > { %v6164_v20 = vadd.f32 %v6160_v7, %v6150_v53  ;;  %v6248_v7 = vmul.f32 %v6246_v0, %v11844_v36 }
 0xaa2   : > { %v6548_v49 = vstv %s12012_s14  ;;  %s7000_s14 = sshll.u32 %s12092_s10, 4  ;;  %p7723_p5 = pneg %p7722_p3  ;;  %s7001_s14 = int_to_ptr.vmem [resolvable:$true] %s7000_s14 }
 0xaa3   : > { %6525 = vrot.lane.b32.xlu2 %v6521_v55, %s7805_s1  ;;  %6511 = vrot.lane.b32.xlu1 %v6507_v18, %s7803_s20  ;;  %v6178_v2 = vadd.f32 %v6174_v13, %v6164_v20  ;;  %v6549_v5 = vmul.f32 %v6548_v49, %v11945_v10  ;;  %v6550_v58 = vmul.f32 %v6548_v49, %v11965_v52 }
 0xaa4   : > { %6497 = vrot.lane.b32.xlu0 %v6493_v23, %s7803_s20 }
 0xaa5   : > { %v6186_v32 = vpop.permute.xlu1 %6185  ;;  %v6274_v44 = vpop.permute.xlu2 %6273 }
 0xaa6   : > { %v6172_v22 = vpop.permute.xlu0 %6171 }
 0xaa7   : > { %v6177_v14 = vadd.f32 %v6172_v22, %v6163_v30 }
 0xaa9   : > { %v6191_v19 = vadd.f32 %v6186_v32, %v6177_v14 }
 0xaab   : > { %6541 = vrot.lane.b32.xlu2 %v6536_v38, %s7805_s1  ;;  %6527 = vrot.lane.b32.xlu1 %v6522_v46, %s7805_s1  ;;  %v6205_v60 = vadd.f32 %v6200_v1, %v6191_v19 }
 0xaac   : > { %6513 = vrot.lane.b32.xlu0 %v6508_v3, %s7803_s20  ;;  %s12039_s20 = sld [smem:[#allocation15 + $0x61]] }
 0xaad   : > { %v6202_v37 = vpop.permute.xlu1 %6201  ;;  %v6300_v47 = vpop.permute.xlu2 %6299 }
 0xaae   : > { %v6188_v6 = vpop.permute.xlu0 %6187 }
 0xaaf   : > { %v6192_v13 = vadd.f32 %v6188_v6, %v6178_v2 }
 0xab1   : > { %v6206_v62 = vadd.f32 %v6202_v37, %v6192_v13 }
 0xab2   : > { %v6590_v39 = vstv %s12039_s20 }
 0xab3   : > { %6567 = vrot.lane.b32.xlu2 %v6563_v31, %s7807_s26  ;;  %6553 = vrot.lane.b32.xlu1 %v6549_v5, %s7807_s26  ;;  %v6220_v17 = vadd.f32 %v6216_v42, %v6206_v62  ;;  %v6591_v16 = vmul.f32 %v6590_v39, %v11977_v50  ;;  %v6592_v32 = vmul.f32 %v6590_v39, %v11962_v4 }
 0xab4   : > { %6539 = vrot.lane.b32.xlu0 %v6535_v48, %s7805_s1  ;;  %s7311_s1 = sld [smem:[#allocation15 + $0x54]] }
 0xab5   : > { %v6228_v11 = vpop.permute.xlu1 %6227  ;;  %v6316_v61 = vpop.permute.xlu2 %6315 }
 0xab6   : > { %v6214_v41 = vpop.permute.xlu0 %6213 }
 0xab7   : > { %v6219_v27 = vadd.f32 %v6214_v41, %v6205_v60 }
 0xab9   : > { %v6233_v1 = vadd.f32 %v6228_v11, %v6219_v27 }
 0xabb   : > { %v6241_v34 = vadd.f32 %v6239_v12, %v6233_v1  ;;  %6583 = vrot.lane.b32.xlu2 %v6578_v28, %s7806_s25  ;;  %6569 = vrot.lane.b32.xlu1 %v6564_v15, %s7807_s26  ;;  %v6422_v15 = vstv %s7311_s1  ;;  %s7724_s1 = scalar_lea.hbm %s12269_s8, 512 }
 0xabc   : > { %6555 = vrot.lane.b32.xlu0 %v6550_v58, %s7807_s26  ;;  %s6603_s26 = sld [smem:[#allocation16]]  ;;  %p7726_p7 = scmp.lt.s32.totalorder %s7724_s1, %s7720_s23 }
 0xabd   : > { %v6260_v40 = vpop.permute.xlu1 %6259  ;;  %v6249_v35 = vadd.f32 %v6247_v21, %v6241_v34 }
 0xabe   : > { %v6230_v9 = vpop.permute.xlu0 %6229  ;;  %p7727_p8 = por %p7726_p7, %p7725_p12 }
 0xabf   : > { %v6234_v30 = vadd.f32 %v6230_v9, %v6220_v17  ;;  %v6263_v42 = vadd.f32 %v6258_v59, %v6249_v35  ;;  %v6342_v59 = vpop.permute.xlu2 %6341 }
 0xac0   : > { %p7728_p9 = pnand %p7727_p8, %p7723_p5 }
 0xac1   : > { %v6242_v26 = vadd.f32 %v6240_v29, %v6234_v30 }
 0xac3   : > { %v6250_v53 = vadd.f32 %v6248_v7, %v6242_v26  ;;  %6595 = vrot.lane.b32.xlu1 %v6591_v16, %s7806_s25  ;;  %v6424_v26 = vmul.f32 %v6422_v15, %v11965_v52 }
 0xac4   : > { %6581 = vrot.lane.b32.xlu0 %v6577_v24, %s7806_s25 }
 0xac5   : > { %v6286_v20 = vpop.permute.xlu1 %6285  ;;  %v6264_v55 = vadd.f32 %v6260_v40, %v6250_v53  ;;  %v6423_v40 = vmul.f32 %v6422_v15, %v11945_v10 }
 0xac6   : > { %v6272_v18 = vpop.permute.xlu0 %6271 }
 0xac7   : > { %v6277_v23 = vadd.f32 %v6272_v18, %v6263_v42  ;;  %v6278_v25 = vadd.f32 %v6274_v44, %v6264_v55  ;;  %v6358_v3 = vpop.permute.xlu2 %6357 }
 0xac9   : > { %v6291_v2 = vadd.f32 %v6286_v20, %v6277_v23 }
 0xacb   : > { %v6305_v33 = vadd.f32 %v6300_v47, %v6291_v2 }
 0xacc   : > { %6597 = vrot.lane.b32.xlu0 %v6592_v32, %s7806_s25  ;;  %s7312_s25 = sld [smem:[#allocation15 + $0x55]] }
 0xacd   : > { %v6302_v36 = vpop.permute.xlu1 %6301 }
 0xace   : > { %v6288_v22 = vpop.permute.xlu0 %6287 }
 0xacf   : > { %v6292_v63 = vadd.f32 %v6288_v22, %v6278_v25  ;;  %v6384_v13 = vpop.permute.xlu2 %6383 }
 0xad1   : > { %v6306_v14 = vadd.f32 %v6302_v36, %v6292_v63 }
 0xad2   : > { %v6430_v34 = vstv %s7312_s25 }
 0xad3   : > { %v6320_v19 = vadd.f32 %v6316_v61, %v6306_v14  ;;  %v6431_v39 = vmul.f32 %v6430_v34, %v11977_v50  ;;  %v6432_v53 = vmul.f32 %v6430_v34, %v11962_v4 }
 0xad5   : > { %v6328_v38 = vpop.permute.xlu1 %6327 }
 0xad6   : > { %v6314_v46 = vpop.permute.xlu0 %6313 }
 0xad7   : > { %v6319_v44 = vadd.f32 %v6314_v46, %v6305_v33  ;;  %v6400_v17 = vpop.permute.xlu2 %6399 }
 0xad9   : > { %v6333_v5 = vadd.f32 %v6328_v38, %v6319_v44 }
 0xadb   : > { %v6347_v48 = vadd.f32 %v6342_v59, %v6333_v5 }
 0xadd   : > { %v6344_v60 = vpop.permute.xlu1 %6343 }
 0xade   : > { %v6330_v37 = vpop.permute.xlu0 %6329 }
 0xadf   : > { %v6334_v6 = vadd.f32 %v6330_v37, %v6320_v19  ;;  %v6442_v28 = vpop.permute.xlu2 %6441 }
 0xae1   : > { %v6348_v49 = vadd.f32 %v6344_v60, %v6334_v6 }
 0xae3   : > { %v6362_v27 = vadd.f32 %v6358_v3, %v6348_v49 }
 0xae5   : > { %v6370_v62 = vpop.permute.xlu1 %6369 }
 0xae6   : > { %v6356_v31 = vpop.permute.xlu0 %6355 }
 0xae7   : > { %v6361_v11 = vadd.f32 %v6356_v31, %v6347_v48  ;;  %v6458_v24 = vpop.permute.xlu2 %6457 }
 0xae9   : > { %v6375_v45 = vadd.f32 %v6370_v62, %v6361_v11 }
 0xaeb   : > { %v6389_v1 = vadd.f32 %v6384_v13, %v6375_v45 }
 0xaed   : > { %v6386_v56 = vpop.permute.xlu1 %6385 }
 0xaee   : > { %v6372_v41 = vpop.permute.xlu0 %6371 }
 0xaef   : > { %v6376_v0 = vadd.f32 %v6372_v41, %v6362_v27  ;;  %v6484_v23 = vpop.permute.xlu2 %6483 }
 0xaf1   : > { %v6390_v21 = vadd.f32 %v6386_v56, %v6376_v0 }
 0xaf3   : > { %v6404_v30 = vadd.f32 %v6400_v17, %v6390_v21 }
 0xaf5   : > { %v6412_v12 = vpop.permute.xlu1 %6411 }
 0xaf6   : > { %v6398_v47 = vpop.permute.xlu0 %6397 }
 0xaf7   : > { %v6403_v58 = vadd.f32 %v6398_v47, %v6389_v1  ;;  %v6500_v2 = vpop.permute.xlu2 %6499 }
 0xaf9   : > { %v6417_v35 = vadd.f32 %v6412_v12, %v6403_v58  ;;  %v6608_v58 = vstv %s7325_s16 }
 0xafb   : > { %v6425_v9 = vadd.f32 %v6423_v40, %v6417_v35 }
 0xafd   : > { %v6444_v29 = vpop.permute.xlu1 %6443  ;;  %v6433_v42 = vadd.f32 %v6431_v39, %v6425_v9 }
 0xafe   : > { %v6414_v7 = vpop.permute.xlu0 %6413 }
 0xaff   : > { %v6418_v16 = vadd.f32 %v6414_v7, %v6404_v30  ;;  %v6447_v36 = vadd.f32 %v6442_v28, %v6433_v42  ;;  %v6526_v52 = vpop.permute.xlu2 %6525  ;;  %v6604_v28 = vstv %s6603_s26  ;;  %v12534_v7 = vlaneseq }
 0xb01   : > { %v6426_v61 = vadd.f32 %v6424_v26, %v6418_v16  ;;  %v12064_v26 = vshrl.u32 %v12534_v7, 7 }
 0xb03   : > { %v6434_v20 = vadd.f32 %v6432_v53, %v6426_v61  ;;  %7484 = vset.pattern.permute.xlu0 %v12064_v26  ;;  %7482 = vset.pattern.permute.xlu2 %v12064_v26 }
 0xb05   : > { %v6470_v55 = vpop.permute.xlu1 %6469  ;;  %v6448_v22 = vadd.f32 %v6444_v29, %v6434_v20 }
 0xb06   : > { %v6456_v18 = vpop.permute.xlu0 %6455 }
 0xb07   : > { %v6461_v59 = vadd.f32 %v6456_v18, %v6447_v36  ;;  %v6462_v38 = vadd.f32 %v6458_v24, %v6448_v22  ;;  %v6542_v49 = vpop.permute.xlu2 %6541  ;;  %v12069_v24 = vadd.s32 8, %v12064_v26 }
 0xb09   : > { %v6475_v63 = vadd.f32 %v6470_v55, %v6461_v59  ;;  %7483 = vset.pattern.permute.xlu1 %v12069_v24 }
 0xb0b   : > { %v6489_v4 = vadd.f32 %v6484_v23, %v6475_v63 }
 0xb0d   : > { %v6486_v10 = vpop.permute.xlu1 %6485 }
 0xb0e   : > { %v6472_v25 = vpop.permute.xlu0 %6471 }
 0xb0f   : > { %v6476_v46 = vadd.f32 %v6472_v25, %v6462_v38  ;;  %v6568_v56 = vpop.permute.xlu2 %6567 }
 0xb11   : > { %v6490_v60 = vadd.f32 %v6486_v10, %v6476_v46 }
 0xb13   : > { %v6504_v13 = vadd.f32 %v6500_v2, %v6490_v60 }
 0xb15   : > { %v6512_v32 = vpop.permute.xlu1 %6511 }
 0xb16   : > { %v6498_v50 = vpop.permute.xlu0 %6497 }
 0xb17   : > { %v6503_v3 = vadd.f32 %v6498_v50, %v6489_v4  ;;  %v6584_v21 = vpop.permute.xlu2 %6583 }
 0xb19   : > { %v6517_v33 = vadd.f32 %v6512_v32, %v6503_v3 }
 0xb1b   : > { %v6531_v62 = vadd.f32 %v6526_v52, %v6517_v33 }
 0xb1d   : > { %v6528_v14 = vpop.permute.xlu1 %6527 }
 0xb1e   : > { %v6514_v19 = vpop.permute.xlu0 %6513 }
 0xb1f   : > { %v6518_v44 = vadd.f32 %v6514_v19, %v6504_v13 }
 0xb21   : > { %v6532_v17 = vadd.f32 %v6528_v14, %v6518_v44 }
 0xb23   : > { %v6546_v41 = vadd.f32 %v6542_v49, %v6532_v17 }
 0xb25   : > { %v6554_v37 = vpop.permute.xlu1 %6553 }
 0xb26   : > { %v6540_v6 = vpop.permute.xlu0 %6539 }
 0xb27   : > { %v6545_v31 = vadd.f32 %v6540_v6, %v6531_v62 }
 0xb29   : > { %v6559_v11 = vadd.f32 %v6554_v37, %v6545_v31 }
 0xb2b   : > { %v6573_v27 = vadd.f32 %v6568_v56, %v6559_v11 }
 0xb2d   : > { %v6570_v5 = vpop.permute.xlu1 %6569 }
 0xb2e   : > { %v6556_v48 = vpop.permute.xlu0 %6555 }
 0xb2f   : > { %v6560_v45 = vadd.f32 %v6556_v48, %v6546_v41 }
 0xb31   : > { %v6574_v15 = vadd.f32 %v6570_v5, %v6560_v45 }
 0xb33   : > { %v6588_v40 = vadd.f32 %v6584_v21, %v6574_v15 }
 0xb35   : > { %v6596_v1 = vpop.permute.xlu1 %6595 }
 0xb36   : > { %v6582_v0 = vpop.permute.xlu0 %6581 }
 0xb37   : > { %v6587_v12 = vadd.f32 %v6582_v0, %v6573_v27 }
 0xb39   : > { %v6601_v47 = vadd.f32 %v6596_v1, %v6587_v12  ;;  %v12535_v12 = vld [vmem:[#allocation25_spill] sm:$0xff] }
 0xb3b   : > { %v6605_v34 = vmul.f32 %v6604_v28, %v6601_v47 }
 0xb3d   : > { %v6609_v35 = vadd.f32 %v6608_v58, %v6605_v34 }
 0xb3e   : > { %v6598_v9 = vpop.permute.xlu0 %6597 }
 0xb3f   : > { %v6611_v39 = vmax.f32 %v6609_v35, 0.0  ;;  %v6602_v29 = vadd.f32 %v6598_v9, %v6588_v40 }
 0xb41   : > { %v7326_v30 = vmul.f32 -1.442695, %v6611_v39  ;;  %v6606_v42 = vmul.f32 %v6604_v28, %v6602_v29 }
 0xb43   : > { %7510 = vpow2.f32 %v7326_v30  ;;  %v6610_v16 = vadd.f32 %v6608_v58, %v6606_v42  ;;  %v12536_v58 = vld [vmem:[#allocation35_spill] sm:$0xff]  ;;  %v12537_v42 = vld [vmem:[#allocation26_spill] sm:$0xff] }
 0xb45   : > { %v6612_v53 = vmax.f32 %v6610_v16, 0.0  ;;  %v12538_v16 = vld [vmem:[#allocation32_spill] sm:$0xff] }
 0xb47   : > { %v7327_v61 = vmul.f32 -1.442695, %v6612_v53 }
 0xb49   : > { %v7511_v20 = vpop.eup %7510  ;;  %7512 = vpow2.f32 %v7327_v61  ;;  %v12539_v61 = vld [vmem:[#allocation28_spill] sm:$0xff] }
 0xb4a   : > { %v6619_v55 = vadd.f32 1.0, %v7511_v20 }
 0xb4c   : > { %7514 = vrcp.f32 %v6619_v55  ;;  %v6632_v32 = vand.u32 2147483648, %v6619_v55  ;;  %v6630_v36 = vand.u32 2147483647, %v6619_v55  ;;  %vm6626_vm10 = vweird.f32 %v6619_v55 }
 0xb4e   : > { %v6633_v14 = vor.u32 1.1754944e-38, %v6632_v32  ;;  %vm6631_vm12 = vcmp.eq.f32.partialorder %v6630_v36, 8.507059e+37  ;;  %v12542_v36 = vld [vmem:[#allocation68_spill] sm:$0xff] }
 0xb4f   : > { %v7513_v18 = vpop.eup %7512 }
 0xb50   : > { %v6620_v23 = vadd.f32 1.0, %v7513_v18 }
 0xb52   : > { %v7515_v10 = vpop.eup %7514  ;;  %7516 = vrcp.f32 %v6620_v23  ;;  %v6647_v37 = vand.u32 2147483648, %v6620_v23  ;;  %vm6641_vm14 = vweird.f32 %v6620_v23  ;;  %v6645_v6 = vand.u32 2147483647, %v6620_v23 }
 0xb53   : > { %v6622_v25 = vmul.f32 %v7515_v10, %v6619_v55  ;;  %vm6627_vm9 = vweird.f32 %v7515_v10 }
 0xb54   : > { %vm6628_vm11 = vmor %vm6626_vm10, %vm6627_vm9  ;;  %v6648_v13 = vor.u32 1.1754944e-38, %v6647_v37  ;;  %vm6646_vm1 = vcmp.eq.f32.partialorder %v6645_v6, 8.507059e+37 }
 0xb55   : > { %v6623_v2 = vsub.f32 1.0, %v6622_v25 }
 0xb57   : > { %v6624_v50 = vmul.f32 %v7515_v10, %v6623_v2 }
 0xb58   : > { %v7517_v59 = vpop.eup %7516 }
 0xb59   : > { %v6625_v22 = vadd.f32 %v7515_v10, %v6624_v50  ;;  %v6637_v63 = vmul.f32 %v7517_v59, %v6620_v23  ;;  %vm6642_vm13 = vweird.f32 %v7517_v59 }
 0xb5a   : > { %vm6643_vm15 = vmor %vm6641_vm14, %vm6642_vm13 }
 0xb5b   : > { %v6629_v52 = vsel %vm6628_vm11, %v7515_v10, %v6625_v22  ;;  %v6638_v19 = vsub.f32 1.0, %v6637_v63  ;;  %v12541_v10 = vld [vmem:[#allocation44_spill] sm:$0xff] }
 0xb5c   : > { %v6634_v38 = vsel %vm6631_vm12, %v6633_v14, %v6629_v52  ;;  %v12543_v63 = vld [vmem:[#allocation80_spill] sm:$0xff]  ;;  %v12544_v52 = vld [vmem:[#allocation71_spill] sm:$0xff] }
 0xb5d   : > { %v6664_v46 = vperm.slane %v6634_v38, 1  ;;  %v6651_v4 = vperm.slane %v6634_v38, 0  ;;  %v6639_v3 = vmul.f32 %v7517_v59, %v6638_v19  ;;  %v6729_v33 = vperm.slane %v6634_v38, 6 }
 0xb5e   : > { %v6677_v62 = vperm.slane %v6634_v38, 2  ;;  %v6690_v5 = vperm.slane %v6634_v38, 3  ;;  %v6703_v48 = vperm.slane %v6634_v38, 4  ;;  %v6716_v11 = vperm.slane %v6634_v38, 5 }
 0xb5f   : > { %6669 = vperm.xlu0 %7484, %v6664_v46   ;;  %6662 = vperm.xlu1 %7483, %v6651_v4   ;;  %v6640_v60 = vadd.f32 %v7517_v59, %v6639_v3  ;;  %v6742_v41 = vperm.slane %v6634_v38, 7  ;;  %v12545_v38 = vld [vmem:[#allocation27_spill] sm:$0xff]  ;;  %v12547_v3 = vld [vmem:[#allocation30_spill] sm:$0xff] }
 0xb60   : > { %6656 = vperm.xlu2 %7482, %v6651_v4   ;;  %v12546_v4 = vld [vmem:[#allocation43_spill] sm:$0xff] }
 0xb61   : > { %v6644_v49 = vsel %vm6643_vm15, %v7517_v59, %v6640_v60 }
 0xb62   : > { %v12074_v44 = vsel %vm6646_vm1, %v6648_v13, %v6644_v49  ;;  %v12548_v13 = vld [vmem:[#allocation69_spill] sm:$0xff] }
 0xb63   : > { %v6794_v31 = vperm.slane %v12074_v44, 3  ;;  %v6755_v17 = vperm.slane %v12074_v44, 0  ;;  %v6820_v56 = vperm.slane %v12074_v44, 5  ;;  %v6768_v45 = vperm.slane %v12074_v44, 1 }
 0xb64   : > { %v6781_v28 = vperm.slane %v12074_v44, 2  ;;  %v6807_v21 = vperm.slane %v12074_v44, 4  ;;  %v6833_v37 = vperm.slane %v12074_v44, 6 }
 0xb67   : > { %6734 = vperm.xlu0 %7484, %v6729_v33   ;;  %7486 = vset.pattern.permute.xlu1 %v12064_v26 }
 0xb68   : > { %7485 = vset.pattern.permute.xlu2 %v12069_v24 }
 0xb6f   : > { %6682 = vperm.xlu1 %7486, %v6677_v62   ;;  %6799 = vperm.xlu0 %7484, %v6794_v31  }
 0xb70   : > { %6675 = vperm.xlu2 %7485, %v6664_v46  }
 0xb77   : > { %6695 = vperm.xlu1 %7486, %v6690_v5   ;;  %7493 = vset.pattern.permute.xlu0 %v12069_v24 }
 0xb78   : > { %6688 = vperm.xlu2 %7485, %v6677_v62  }
 0xb7f   : > { %7488 = vset.pattern.permute.xlu1 %v12069_v24  ;;  %6701 = vperm.xlu0 %7493, %v6690_v5   ;;  %v12549_v5 = vld [vmem:[#allocation74_spill] sm:$0xff] }
 0xb80   : > { %7487 = vset.pattern.permute.xlu2 %v12064_v26 }
 0xb87   : > { %6714 = vperm.xlu1 %7488, %v6703_v48   ;;  %6766 = vperm.xlu0 %7493, %v6755_v17  }
 0xb88   : > { %6708 = vperm.xlu2 %7487, %v6703_v48  }
 0xb8f   : > { %6727 = vperm.xlu1 %7488, %v6716_v11   ;;  %6831 = vperm.xlu0 %7493, %v6820_v56  }
 0xb90   : > { %6721 = vperm.xlu2 %7487, %v6716_v11  }
 0xb97   : > { %7490 = vset.pattern.permute.xlu1 %v12064_v26 }
 0xb98   : > { %7489 = vset.pattern.permute.xlu2 %v12069_v24 }
 0xb9f   : > { %6747 = vperm.xlu1 %7490, %v6742_v41  }
 0xba0   : > { %6740 = vperm.xlu2 %7489, %v6729_v33  }
 0xba7   : > { %6760 = vperm.xlu1 %7490, %v6755_v17   ;;  %v12550_v17 = vld [vmem:[#allocation38_spill] sm:$0xff] }
 0xba8   : > { %6753 = vperm.xlu2 %7489, %v6742_v41  }
 0xbaf   : > { %7492 = vset.pattern.permute.xlu1 %v12069_v24 }
 0xbb0   : > { %7491 = vset.pattern.permute.xlu2 %v12064_v26 }
 0xbb7   : > { %6779 = vperm.xlu1 %7492, %v6768_v45  }
 0xbb8   : > { %6773 = vperm.xlu2 %7491, %v6768_v45   ;;  %v6846_v45 = vperm.slane %v12074_v44, 7 }
 0xbba   : > { %v6657_v27 = vpop.permute.xlu2 %6656 }
 0xbbb   : > { %v6859_v0 = vmul.f32 %v6657_v27, %v10810_v43 }
 0xbbd   : > { %v6891_v1 = vadd.f32 %v6859_v0, %v12535_v12 }
 0xbbf   : > { %v6923_v15 = vmax.f32 %v6891_v1, 0.0  ;;  %6792 = vperm.xlu1 %7492, %v6781_v28   ;;  %v12552_v1 = vld [vmem:[#allocation70_spill] sm:$0xff] }
 0xbc0   : > { %6786 = vperm.xlu2 %7491, %v6781_v28  }
 0xbc1   : > { %6955 = vst.msk [vmem:[%s12092_s10] sm:$0xff] %vm417_vm0, %v6923_v15  ;;  %v12553_v15 = vld [vmem:[#allocation29_spill] sm:$0xff] }
 0xbc7   : > { %7495 = vset.pattern.permute.xlu1 %v12064_v26 }
 0xbc8   : > { %7494 = vset.pattern.permute.xlu2 %v12069_v24 }
 0xbca   : > { %v6676_v47 = vpop.permute.xlu2 %6675 }
 0xbcb   : > { %v6862_v43 = vmul.f32 %v6676_v47, %v10820_v51 }
 0xbcd   : > { %v6894_v34 = vadd.f32 %v6862_v43, %v12536_v58 }
 0xbcf   : > { %v6926_v40 = vmax.f32 %v6894_v34, 0.0  ;;  %6812 = vperm.xlu1 %7495, %v6807_v21   ;;  %v12554_v34 = vld [vmem:[#allocation72_spill] sm:$0xff] }
 0xbd0   : > { %6805 = vperm.xlu2 %7494, %v6794_v31  }
 0xbd1   : > { %6958 = vst.msk [vmem:[%s12092_s10 + $0x18] sm:$0xff] %vm417_vm0, %v6926_v40  ;;  %v6663_v35 = vpop.permute.xlu1 %6662  ;;  %v6670_v9 = vpop.permute.xlu0 %6669 }
 0xbd2   : > { %v6860_v39 = vmul.f32 %v6663_v35, %v10806_v54  ;;  %v6689_v29 = vpop.permute.xlu2 %6688  ;;  %v6861_v30 = vmul.f32 %v6670_v9, %v10802_v8  ;;  %v12540_v8 = vld [vmem:[#allocation76_spill] sm:$0xff] }
 0xbd3   : > { %v6864_v51 = vmul.f32 %v6689_v29, %v10824_v57  ;;  %v12555_v35 = vld [vmem:[#allocation84_spill] sm:$0xff] }
 0xbd4   : > { %v6892_v7 = vadd.f32 %v6860_v39, %v12537_v42  ;;  %v6893_v53 = vadd.f32 %v6861_v30, %v12538_v16  ;;  %v12556_v39 = vld [vmem:[#allocation81_spill] sm:$0xff]  ;;  %v12558_v42 = vld [vmem:[#allocation39_spill] sm:$0xff]  ;;  %v12559_v16 = vld [vmem:[#allocation34_spill] sm:$0xff] }
 0xbd5   : > { %v6896_v20 = vadd.f32 %v6864_v51, %v12539_v61  ;;  %v12557_v30 = vld [vmem:[#allocation41_spill] sm:$0xff] }
 0xbd6   : > { %v6924_v55 = vmax.f32 %v6892_v7, 0.0  ;;  %v6925_v18 = vmax.f32 %v6893_v53, 0.0 }
 0xbd7   : > { %v6928_v23 = vmax.f32 %v6896_v20, 0.0  ;;  %6825 = vperm.xlu1 %7495, %v6820_v56   ;;  %v12551_v56 = vld [vmem:[#allocation31_spill] sm:$0xff] }
 0xbd8   : > { %6956 = vst.msk [vmem:[%s12092_s10 + $0x8] sm:$0xff] %vm417_vm0, %v6924_v55  ;;  %6818 = vperm.xlu2 %7494, %v6807_v21  }
 0xbd9   : > { %6960 = vst.msk [vmem:[%s12092_s10 + $0x28] sm:$0xff] %vm417_vm0, %v6928_v23  ;;  %v6735_v54 = vpop.permute.xlu0 %6734 }
 0xbda   : > { %6957 = vst.msk [vmem:[%s12092_s10 + $0x10] sm:$0xff] %vm417_vm0, %v6925_v18  ;;  %v6871_v57 = vmul.f32 %v6735_v54, %v12540_v8  ;;  %v12560_v54 = vld [vmem:[#allocation73_spill] sm:$0xff] }
 0xbdc   : > { %v6903_v25 = vadd.f32 %v6871_v57, %v12541_v10  ;;  %v12561_v10 = vld [vmem:[#allocation61_spill] sm:$0xff] }
 0xbde   : > { %v6935_v2 = vmax.f32 %v6903_v25, 0.0 }
 0xbdf   : > { %7497 = vset.pattern.permute.xlu1 %v12069_v24 }
 0xbe0   : > { %6967 = vst.msk [vmem:[%s12092_s10 + $0x60] sm:$0xff] %vm417_vm0, %v6935_v2  ;;  %7496 = vset.pattern.permute.xlu2 %v12064_v26  ;;  %v12562_v2 = vld [vmem:[#allocation79_spill] sm:$0xff] }
 0xbe1   : > { %v6683_v32 = vpop.permute.xlu1 %6682  ;;  %v6800_v50 = vpop.permute.xlu0 %6799 }
 0xbe2   : > { %v6863_v59 = vmul.f32 %v6683_v32, %v12542_v36  ;;  %v6709_v22 = vpop.permute.xlu2 %6708  ;;  %v6881_v14 = vmul.f32 %v6800_v50, %v12543_v63  ;;  %v12563_v50 = vld [vmem:[#allocation33_spill] sm:$0xff]  ;;  %v12565_v63 = vld [vmem:[#allocation47_spill] sm:$0xff] }
 0xbe3   : > { %v6867_v19 = vmul.f32 %v6709_v22, %v12544_v52 }
 0xbe4   : > { %v6895_v46 = vadd.f32 %v6863_v59, %v12545_v38  ;;  %v6913_v24 = vadd.f32 %v6881_v14, %v12546_v4  ;;  %v12564_v59 = vld [vmem:[#allocation54_spill] sm:$0xff]  ;;  %v12566_v4 = vld [vmem:[#allocation77_spill] sm:$0xff] }
 0xbe5   : > { %v6899_v60 = vadd.f32 %v6867_v19, %v12547_v3 }
 0xbe6   : > { %v6927_v26 = vmax.f32 %v6895_v46, 0.0  ;;  %v6945_v6 = vmax.f32 %v6913_v24, 0.0 }
 0xbe7   : > { %v6931_v33 = vmax.f32 %v6899_v60, 0.0  ;;  %6844 = vperm.xlu1 %7497, %v6833_v37   ;;  %v12567_v60 = vld [vmem:[#allocation57_spill] sm:$0xff] }
 0xbe8   : > { %6959 = vst.msk [vmem:[%s12092_s10 + $0x20] sm:$0xff] %vm417_vm0, %v6927_v26  ;;  %6838 = vperm.xlu2 %7496, %v6833_v37   ;;  %v12568_v26 = vld [vmem:[#allocation36_spill] sm:$0xff] }
 0xbe9   : > { %6963 = vst.msk [vmem:[%s12092_s10 + $0x40] sm:$0xff] %vm417_vm0, %v6931_v33  ;;  %v6696_v49 = vpop.permute.xlu1 %6695  ;;  %v12569_v33 = vld [vmem:[#allocation50_spill] sm:$0xff] }
 0xbea   : > { %6977 = vst.msk [vmem:[%s12092_s10 + $0xb0] sm:$0xff] %vm417_vm0, %v6945_v6  ;;  %v6865_v62 = vmul.f32 %v6696_v49, %v12548_v13  ;;  %v6722_v31 = vpop.permute.xlu2 %6721 }
 0xbeb   : > { %v6869_v48 = vmul.f32 %v6722_v31, %v12549_v5 }
 0xbec   : > { %v6897_v11 = vadd.f32 %v6865_v62, %v12550_v17 }
 0xbed   : > { %v6901_v41 = vadd.f32 %v6869_v48, %v12551_v56  ;;  %v12570_v48 = vld [vmem:[#allocation85_spill] sm:$0xff] }
 0xbee   : > { %v6929_v27 = vmax.f32 %v6897_v11, 0.0  ;;  %v12571_v11 = vld [vmem:[#allocation78_spill] sm:$0xff] }
 0xbef   : > { %v6933_v0 = vmax.f32 %v6901_v41, 0.0  ;;  %6857 = vperm.xlu1 %7497, %v6846_v45   ;;  %v12572_v41 = vld [vmem:[#allocation37_spill] sm:$0xff] }
 0xbf0   : > { %6961 = vst.msk [vmem:[%s12092_s10 + $0x30] sm:$0xff] %vm417_vm0, %v6929_v27  ;;  %6851 = vperm.xlu2 %7496, %v6846_v45   ;;  %v12573_v27 = vld [vmem:[#allocation42_spill] sm:$0xff] }
 0xbf1   : > { %6965 = vst.msk [vmem:[%s12092_s10 + $0x50] sm:$0xff] %vm417_vm0, %v6933_v0  ;;  %v6702_v12 = vpop.permute.xlu0 %6701 }
 0xbf2   : > { %v6866_v28 = vmul.f32 %v6702_v12, %v12552_v1 }
 0xbf4   : > { %v6898_v47 = vadd.f32 %v6866_v28, %v12553_v15 }
 0xbf6   : > { %v6930_v43 = vmax.f32 %v6898_v47, 0.0  ;;  %v12574_v47 = vld [vmem:[#allocation75_spill] sm:$0xff] }
 0xbf8   : > { %6962 = vst.msk [vmem:[%s12092_s10 + $0x38] sm:$0xff] %vm417_vm0, %v6930_v43 }
 0xbf9   : > { %v6715_v58 = vpop.permute.xlu1 %6714  ;;  %v6767_v44 = vpop.permute.xlu0 %6766 }
 0xbfa   : > { %v6868_v21 = vmul.f32 %v6715_v58, %v12554_v34  ;;  %v6741_v40 = vpop.permute.xlu2 %6740  ;;  %v6876_v9 = vmul.f32 %v6767_v44, %v12555_v35  ;;  %v12575_v58 = vld [vmem:[#allocation83_spill] sm:$0xff]  ;;  %v12576_v34 = vld [vmem:[#allocation40_spill] sm:$0xff] }
 0xbfb   : > { %v6872_v29 = vmul.f32 %v6741_v40, %v12556_v39  ;;  %v12577_v40 = vld [vmem:[#allocation45_spill] sm:$0xff] }
 0xbfc   : > { %v6900_v51 = vadd.f32 %v6868_v21, %v12557_v30  ;;  %v6908_v7 = vadd.f32 %v6876_v9, %v12558_v42 }
 0xbfd   : > { %v6904_v53 = vadd.f32 %v6872_v29, %v12559_v16 }
 0xbfe   : > { %v6932_v61 = vmax.f32 %v6900_v51, 0.0  ;;  %v6940_v20 = vmax.f32 %v6908_v7, 0.0  ;;  %v12578_v51 = vld [vmem:[#allocation62_spill] sm:$0xff]  ;;  %v12579_v7 = vld [vmem:[#allocation60_spill] sm:$0xff] }
 0xbff   : > { %v6936_v55 = vmax.f32 %v6904_v53, 0.0  ;;  %v12580_v53 = vld [vmem:[#allocation52_spill] sm:$0xff] }
 0xc00   : > { %6964 = vst.msk [vmem:[%s12092_s10 + $0x48] sm:$0xff] %vm417_vm0, %v6932_v61 }
 0xc01   : > { %6968 = vst.msk [vmem:[%s12092_s10 + $0x68] sm:$0xff] %vm417_vm0, %v6936_v55  ;;  %v6728_v18 = vpop.permute.xlu1 %6727  ;;  %v6832_v23 = vpop.permute.xlu0 %6831 }
 0xc02   : > { %6972 = vst.msk [vmem:[%s12092_s10 + $0x88] sm:$0xff] %vm417_vm0, %v6940_v20  ;;  %v6870_v8 = vmul.f32 %v6728_v18, %v12560_v54  ;;  %v6754_v57 = vpop.permute.xlu2 %6753  ;;  %v6886_v25 = vmul.f32 %v6832_v23, %v12561_v10  ;;  %v12581_v20 = vld [vmem:[#allocation46_spill] sm:$0xff] }
 0xc03   : > { %v6874_v32 = vmul.f32 %v6754_v57, %v12562_v2  ;;  %v12582_v57 = vld [vmem:[#allocation82_spill] sm:$0xff] }
 0xc04   : > { %v6902_v36 = vadd.f32 %v6870_v8, %v12563_v50  ;;  %v6918_v22 = vadd.f32 %v6886_v25, %v12564_v59  ;;  %v12583_v25 = vld [vmem:[#allocation64_spill] sm:$0xff] }
 0xc05   : > { %v6906_v14 = vadd.f32 %v6874_v32, %v12565_v63  ;;  %v12584_v32 = vld [vmem:[#allocation53_spill] sm:$0xff] }
 0xc06   : > { %v6934_v52 = vmax.f32 %v6902_v36, 0.0  ;;  %v6950_v19 = vmax.f32 %v6918_v22, 0.0  ;;  %v12585_v36 = vld [vmem:[#allocation49_spill] sm:$0xff] }
 0xc07   : > { %v6938_v38 = vmax.f32 %v6906_v14, 0.0 }
 0xc08   : > { %6966 = vst.msk [vmem:[%s12092_s10 + $0x58] sm:$0xff] %vm417_vm0, %v6934_v52 }
 0xc09   : > { %6970 = vst.msk [vmem:[%s12092_s10 + $0x78] sm:$0xff] %vm417_vm0, %v6938_v38 }
 0xc0a   : > { %6982 = vst.msk [vmem:[%s12092_s10 + $0xd8] sm:$0xff] %vm417_vm0, %v6950_v19  ;;  %v12586_v19 = vld [vmem:[#allocation59_spill] sm:$0xff] }
 0xc11   : > { %v6748_v46 = vpop.permute.xlu1 %6747 }
 0xc12   : > { %v6873_v24 = vmul.f32 %v6748_v46, %v12566_v4  ;;  %v6774_v3 = vpop.permute.xlu2 %6773  ;;  %v12587_v46 = vld [vmem:[#allocation66_spill] sm:$0xff] }
 0xc13   : > { %v6877_v37 = vmul.f32 %v6774_v3, %v12567_v60  ;;  %v12589_v60 = vld [vmem:[#allocation55_spill] sm:$0xff] }
 0xc14   : > { %v6905_v6 = vadd.f32 %v6873_v24, %v12568_v26  ;;  %v12588_v24 = vld [vmem:[#allocation48_spill] sm:$0xff] }
 0xc15   : > { %v6909_v49 = vadd.f32 %v6877_v37, %v12569_v33 }
 0xc16   : > { %v6937_v13 = vmax.f32 %v6905_v6, 0.0 }
 0xc17   : > { %v6941_v62 = vmax.f32 %v6909_v49, 0.0  ;;  %v12590_v49 = vld [vmem:[#allocation63_spill] sm:$0xff] }
 0xc18   : > { %6969 = vst.msk [vmem:[%s12092_s10 + $0x70] sm:$0xff] %vm417_vm0, %v6937_v13 }
 0xc19   : > { %6973 = vst.msk [vmem:[%s12092_s10 + $0x90] sm:$0xff] %vm417_vm0, %v6941_v62  ;;  %v6761_v31 = vpop.permute.xlu1 %6760  ;;  %v12591_v62 = vld [vmem:[#allocation51_spill] sm:$0xff] }
 0xc1a   : > { %v6787_v5 = vpop.permute.xlu2 %6786  ;;  %v6875_v17 = vmul.f32 %v6761_v31, %v12570_v48 }
 0xc1b   : > { %v6879_v56 = vmul.f32 %v6787_v5, %v12571_v11 }
 0xc1c   : > { %v6907_v45 = vadd.f32 %v6875_v17, %v12572_v41  ;;  %v12592_v17 = vld [vmem:[#allocation65_spill] sm:$0xff] }
 0xc1d   : > { %v6911_v0 = vadd.f32 %v6879_v56, %v12573_v27  ;;  %v12593_v56 = vld [vmem:[#allocation56_spill] sm:$0xff] }
 0xc1e   : > { %v6939_v12 = vmax.f32 %v6907_v45, 0.0 }
 0xc1f   : > { %v6943_v1 = vmax.f32 %v6911_v0, 0.0 }
 0xc20   : > { %6971 = vst.msk [vmem:[%s12092_s10 + $0x80] sm:$0xff] %vm417_vm0, %v6939_v12 }
 0xc21   : > { %6975 = vst.msk [vmem:[%s12092_s10 + $0xa0] sm:$0xff] %vm417_vm0, %v6943_v1 }
 0xc29   : > { %v6780_v28 = vpop.permute.xlu1 %6779 }
 0xc2a   : > { %v6806_v15 = vpop.permute.xlu2 %6805  ;;  %v6878_v43 = vmul.f32 %v6780_v28, %v12574_v47 }
 0xc2b   : > { %v6882_v44 = vmul.f32 %v6806_v15, %v12575_v58 }
 0xc2c   : > { %v6910_v21 = vadd.f32 %v6878_v43, %v12576_v34 }
 0xc2d   : > { %v6914_v35 = vadd.f32 %v6882_v44, %v12577_v40 }
 0xc2e   : > { %v6942_v9 = vmax.f32 %v6910_v21, 0.0 }
 0xc2f   : > { %v6946_v39 = vmax.f32 %v6914_v35, 0.0 }
 0xc30   : > { %6974 = vst.msk [vmem:[%s12092_s10 + $0x98] sm:$0xff] %vm417_vm0, %v6942_v9 }
 0xc31   : > { %6978 = vst.msk [vmem:[%s12092_s10 + $0xb8] sm:$0xff] %vm417_vm0, %v6946_v39  ;;  %v6793_v29 = vpop.permute.xlu1 %6792 }
 0xc32   : > { %v6819_v30 = vpop.permute.xlu2 %6818  ;;  %v6880_v42 = vmul.f32 %v6793_v29, %v12578_v51 }
 0xc33   : > { %v6884_v16 = vmul.f32 %v6819_v30, %v12579_v7 }
 0xc34   : > { %v6912_v61 = vadd.f32 %v6880_v42, %v12580_v53 }
 0xc35   : > { %v6916_v55 = vadd.f32 %v6884_v16, %v12581_v20 }
 0xc36   : > { %v6944_v18 = vmax.f32 %v6912_v61, 0.0 }
 0xc37   : > { %v6948_v23 = vmax.f32 %v6916_v55, 0.0 }
 0xc38   : > { %6976 = vst.msk [vmem:[%s12092_s10 + $0xa8] sm:$0xff] %vm417_vm0, %v6944_v18 }
 0xc39   : > { %6980 = vst.msk [vmem:[%s12092_s10 + $0xc8] sm:$0xff] %vm417_vm0, %v6948_v23 }
 0xc41   : > { %v6813_v54 = vpop.permute.xlu1 %6812 }
 0xc42   : > { %v6839_v8 = vpop.permute.xlu2 %6838  ;;  %v6883_v10 = vmul.f32 %v6813_v54, %v12582_v57 }
 0xc43   : > { %v6887_v2 = vmul.f32 %v6839_v8, %v12583_v25 }
 0xc44   : > { %v6915_v50 = vadd.f32 %v6883_v10, %v12584_v32 }
 0xc45   : > { %v6919_v59 = vadd.f32 %v6887_v2, %v12585_v36 }
 0xc46   : > { %v6947_v22 = vmax.f32 %v6915_v50, 0.0 }
 0xc47   : > { %v6951_v63 = vmax.f32 %v6919_v59, 0.0 }
 0xc48   : > { %6979 = vst.msk [vmem:[%s12092_s10 + $0xc0] sm:$0xff] %vm417_vm0, %v6947_v22 }
 0xc49   : > { %6983 = vst.msk [vmem:[%s12092_s10 + $0xe0] sm:$0xff] %vm417_vm0, %v6951_v63  ;;  %v6826_v14 = vpop.permute.xlu1 %6825 }
 0xc4a   : > { %v6852_v52 = vpop.permute.xlu2 %6851  ;;  %v6885_v38 = vmul.f32 %v6826_v14, %v12586_v19 }
 0xc4b   : > { %v6889_v4 = vmul.f32 %v6852_v52, %v12587_v46 }
 0xc4c   : > { %v6917_v3 = vadd.f32 %v6885_v38, %v12588_v24 }
 0xc4d   : > { %v6921_v37 = vadd.f32 %v6889_v4, %v12589_v60 }
 0xc4e   : > { %v6949_v26 = vmax.f32 %v6917_v3, 0.0 }
 0xc4f   : > { %v6953_v6 = vmax.f32 %v6921_v37, 0.0 }
 0xc50   : > { %6981 = vst.msk [vmem:[%s12092_s10 + $0xd0] sm:$0xff] %vm417_vm0, %v6949_v26 }
 0xc51   : > { %6985 = vst.msk [vmem:[%s12092_s10 + $0xf0] sm:$0xff] %vm417_vm0, %v6953_v6 }
 0xc59   : > { %v6845_v33 = vpop.permute.xlu1 %6844 }
 0xc5a   : > { %v6888_v13 = vmul.f32 %v6845_v33, %v12590_v49 }
 0xc5c   : > { %v6920_v31 = vadd.f32 %v6888_v13, %v12591_v62 }
 0xc5e   : > { %v6952_v5 = vmax.f32 %v6920_v31, 0.0 }
 0xc60   : > { %6984 = vst.msk [vmem:[%s12092_s10 + $0xe8] sm:$0xff] %vm417_vm0, %v6952_v5 }
 0xc61   : > { %v6858_v48 = vpop.permute.xlu1 %6857 }
 0xc62   : > { %v6890_v11 = vmul.f32 %v6858_v48, %v12592_v17 }
 0xc64   : > { %v6922_v41 = vadd.f32 %v6890_v11, %v12593_v56 }
 0xc66   : > { %v6954_v45 = vmax.f32 %v6922_v41, 0.0 }
 0xc68   : > { %6986 = vst.msk [vmem:[%s12092_s10 + $0xf8] sm:$0xff] %vm417_vm0, %v6954_v45 }
 0xc69   : > { %7731 = shalt.err (!%p7728_p9)
}
 0xc6a   : > { %s7808_s11 = smov 128   ;;  %s7809_s16 = smov 8  }
 0xc6b   : > { %7385 = dma.vmem_to_hbm [thread:$0]  (%p7961_p4), %s7001_s14, 4096, %s7003_s9, %s6988_s12, %s7808_s11, %s7808_s11, %s7809_s16  }
 0xc6c PF: > { %s7017_s10 = sand.u32 1, %s7774_s27   ;;  %p12594_p10 = scmp.ge.s32.totalorder %s7786_s30, 2 }
 0xc6d   : > { %s7018_s2 = scalar_lea.sflag [#allocation7], %s7017_s10 }
 0xc6e   : > { %p7411_p13 = pnand %p12594_p10, %p7965_p6 }
 0xc70   : > { %p7412_p11 = pneg %p7411_p13 }
 0xc72   : > { %7769 = dma.done.wait (%p7412_p11), %s7018_s2, 4096  }
 0xc73   : > { %7771 = vsyncadd (%p7412_p11), %s7018_s2, 4294963200  ;;  %p25_p0 = scmp.ge.s32.totalorder %s7935_s17, 4   ;;  %s12595_s27 = smov %s7778_s28 }
 0xc74   : > { %s12596_s28 = smov %s7782_s29  ;;  %s12597_s29 = smov %s7946_s15 }
 0xc75   : > { %s12598_s30 = smov %s7935_s17  ;;  %27 = sbr.rel (!%p25_p0) target bundleno = 13 (0xd), region = 125 }
 0xc7a   :  { %7024 = vsyncpa [#allocation6], 1 }
 0xc7b   :  { %7026 = vsyncpa [#allocation6 + $0x1], 1 }
 0xc7c   :  { %7027 = vsyncpa [#allocation10], 1 }
 0xc7d   :  { %7028 = vsyncpa [#allocation13], 1 }
 0xc7e   :  { %7029 = vsyncpa [#allocation7], 1 }
 0xc7f   :  { %7031 = vsyncpa [#allocation7 + $0x1], 1 }
 0xc80   :  { %7032 = vsyncpa [#allocation8], 1 }
 0xc81   :  { %7034 = vsyncpa [#allocation8 + $0x1], 1 }
 0xc82   :  { %7035 = vsyncpa [#allocation17], 1 }

</bundles_post_ra>
